<compile_context>
chip_gen: v7x
topology: tpu7x:2x2x1
jax: 0.10.0
libtpu: 0.0.40
codegen_flags: <defaults>
</compile_context>

<pallas_src>
import jax
import jax.numpy as jnp
from jax import lax
from jax.experimental import pallas as pl
from jax.experimental.pallas import tpu as pltpu

C, F, S = 4, 2, 300          # channels, linear in_features, spatial extent
N = C * S                    # 1200 (channel, spatial) rows seen by the kernel


def _linear_gelu_kernel(w_ref, b_ref, x_ref, o_ref):
    # w_ref: SMEM (1, 2); b_ref: SMEM (1,)
    # x_ref: VMEM (N, 2)  -- row n = one (channel, spatial) position, 2 features
    # o_ref: VMEM (N, 1)
    w0 = w_ref[0, 0]
    w1 = w_ref[0, 1]
    b = b_ref[0]

    # Linear(2, 1): contract the 2-wide feature axis via static ref slices.
    z = x_ref[:, 0:1] * w0 + x_ref[:, 1:2] * w1 + b          # (N, 1) f32

    # Exact erf-GELU: 0.5 * z * (erf(z / sqrt(2)) + 1).
    # erf via Abramowitz-Stegun 7.1.26 (max abs error 1.5e-7): EUP exp + VPU.
    u = z * 0.7071067811865476
    au = jnp.abs(u)
    t = 1.0 / (1.0 + 0.3275911 * au)
    poly = t * (0.254829592 + t * (-0.284496736 + t * (1.421413741
                + t * (-1.453152027 + t * 1.061405429))))
    erf_abs = 1.0 - poly * jnp.exp(-(au * au))
    erf_u = jnp.where(u >= 0.0, erf_abs, -erf_abs)

    o_ref[...] = (z * 0.5) * (erf_u + 1.0)


def _fused_linear_gelu(weight, bias, x2d):
    return pl.pallas_call(
        _linear_gelu_kernel,
        out_shape=jax.ShapeDtypeStruct((N, 1), jnp.float32),
        in_specs=[
            pl.BlockSpec(memory_space=pltpu.MemorySpace.SMEM),   # weight (1, 2)
            pl.BlockSpec(memory_space=pltpu.MemorySpace.SMEM),   # bias   (1,)
            pl.BlockSpec(memory_space=pltpu.MemorySpace.VMEM),   # x      (N, 2)
        ],
        out_specs=pl.BlockSpec(memory_space=pltpu.MemorySpace.VMEM),
    )(weight, bias, x2d)


@jax.jit
def model_forward(x1, weight, bias):
    """x1: (1, 4, 300, 2) f32; weight: (1, 2) f32; bias: (1,) f32 -> (1, 4, 300, 1)."""
    # (1, 4, 300, 2) -> (1200, 2): contiguous row-major reshape (bitcast, no copy).
    x2d = x1.reshape(N, F)
    y = _fused_linear_gelu(weight, bias, x2d)                 # (N, 1)
    # (1200, 1) -> (1, 4, 300, 1): contiguous reshape (bitcast, no copy).
    return y.reshape(1, C, S, 1)


if __name__ == "__main__":
    key = jax.random.PRNGKey(0)
    k_x, k_w, k_b = jax.random.split(key, 3)

    # Input matching the module: (1, 4, 300, 2)
    x1 = jax.random.normal(k_x, (1, C, S, F), dtype=jnp.float32)

    # Deterministic Linear(2, 1) params (PyTorch-style U(-1/sqrt(in), 1/sqrt(in)))
    bound = 1.0 / jnp.sqrt(2.0)
    weight = jax.random.uniform(k_w, (1, 2), jnp.float32, -bound, bound)
    bias = jax.random.uniform(k_b, (1,), jnp.float32, -bound, bound)

    y = jax.block_until_ready(model_forward(x1, weight, bias))

    # Pure-JAX reference of the module's math: Linear(2,1) over the size-2
    # feature axis + exact erf-GELU, shaped (1, 4, 300, 1).
    z = x1 @ weight.T + bias
    ref = (z * 0.5) * (lax.erf(z * 0.7071067811865476) + 1.0)
    assert y.shape == (1, C, S, 1)
    err = float(jnp.max(jnp.abs(y - ref)))
    assert jnp.allclose(y, ref, atol=1e-5, rtol=1e-5), err

    print("KERNEL_OK")
</pallas_src>

<mosaic_0001>
module attributes {stable_mosaic.version = 11 : i64} {
  func.func @_linear_gelu_kernel(%arg0: memref<1x2xf32, #tpu.memory_space<smem>>, %arg1: memref<1xf32, #tpu.memory_space<smem>>, %arg2: memref<1200x2xf32, #tpu.memory_space<vmem>>, %arg3: memref<1200x1xf32, #tpu.memory_space<vmem>>) attributes {dimension_semantics = [], scalar_prefetch = 0 : i64, scratch_operands = 0 : i64, tpu.core_type = #tpu.core_type<tc>} {
    %c0 = arith.constant 0 : index
    %c0_0 = arith.constant 0 : index
    %0 = memref.load %arg0[%c0, %c0_0] : memref<1x2xf32, #tpu.memory_space<smem>>
    %c0_1 = arith.constant 0 : index
    %c1 = arith.constant 1 : index
    %1 = memref.load %arg0[%c0_1, %c1] : memref<1x2xf32, #tpu.memory_space<smem>>
    %c0_2 = arith.constant 0 : index
    %2 = memref.load %arg1[%c0_2] : memref<1xf32, #tpu.memory_space<smem>>
    %c0_3 = arith.constant 0 : index
    %c0_4 = arith.constant 0 : index
    %3 = vector.load %arg2[%c0_3, %c0_4] : memref<1200x2xf32, #tpu.memory_space<vmem>>, vector<1200x1xf32>
    %4 = vector.broadcast %0 : f32 to vector<1200x1xf32>
    %5 = arith.mulf %3, %4 : vector<1200x1xf32>
    %c0_5 = arith.constant 0 : index
    %c1_6 = arith.constant 1 : index
    %6 = vector.load %arg2[%c0_5, %c1_6] : memref<1200x2xf32, #tpu.memory_space<vmem>>, vector<1200x1xf32>
    %7 = vector.broadcast %1 : f32 to vector<1200x1xf32>
    %8 = arith.mulf %6, %7 : vector<1200x1xf32>
    %9 = arith.addf %5, %8 : vector<1200x1xf32>
    %10 = vector.broadcast %2 : f32 to vector<1200x1xf32>
    %11 = arith.addf %9, %10 : vector<1200x1xf32>
    %cst = arith.constant 0.707106769 : f32
    %12 = vector.broadcast %cst : f32 to vector<1200x1xf32>
    %13 = arith.mulf %11, %12 : vector<1200x1xf32>
    %14 = math.absf %13 : vector<1200x1xf32>
    %cst_7 = arith.constant 0.327591091 : f32
    %15 = vector.broadcast %cst_7 : f32 to vector<1200x1xf32>
    %16 = arith.mulf %15, %14 : vector<1200x1xf32>
    %cst_8 = arith.constant 1.000000e+00 : f32
    %17 = vector.broadcast %cst_8 : f32 to vector<1200x1xf32>
    %18 = arith.addf %17, %16 : vector<1200x1xf32>
    %cst_9 = arith.constant 1.000000e+00 : f32
    %19 = vector.broadcast %cst_9 : f32 to vector<1200x1xf32>
    %20 = arith.divf %19, %18 : vector<1200x1xf32>
    %cst_10 = arith.constant 1.06140542 : f32
    %21 = vector.broadcast %cst_10 : f32 to vector<1200x1xf32>
    %22 = arith.mulf %20, %21 : vector<1200x1xf32>
    %cst_11 = arith.constant -1.45315206 : f32
    %23 = vector.broadcast %cst_11 : f32 to vector<1200x1xf32>
    %24 = arith.addf %23, %22 : vector<1200x1xf32>
    %25 = arith.mulf %20, %24 : vector<1200x1xf32>
    %cst_12 = arith.constant 1.42141378 : f32
    %26 = vector.broadcast %cst_12 : f32 to vector<1200x1xf32>
    %27 = arith.addf %26, %25 : vector<1200x1xf32>
    %28 = arith.mulf %20, %27 : vector<1200x1xf32>
    %cst_13 = arith.constant -0.284496725 : f32
    %29 = vector.broadcast %cst_13 : f32 to vector<1200x1xf32>
    %30 = arith.addf %29, %28 : vector<1200x1xf32>
    %31 = arith.mulf %20, %30 : vector<1200x1xf32>
    %cst_14 = arith.constant 0.254829586 : f32
    %32 = vector.broadcast %cst_14 : f32 to vector<1200x1xf32>
    %33 = arith.addf %32, %31 : vector<1200x1xf32>
    %34 = arith.mulf %20, %33 : vector<1200x1xf32>
    %35 = arith.mulf %14, %14 : vector<1200x1xf32>
    %cst_15 = arith.constant 0.000000e+00 : f32
    %36 = vector.broadcast %cst_15 : f32 to vector<1200x1xf32>
    %37 = arith.subf %36, %35 : vector<1200x1xf32>
    %38 = math.exp %37 : vector<1200x1xf32>
    %39 = arith.mulf %34, %38 : vector<1200x1xf32>
    %cst_16 = arith.constant 1.000000e+00 : f32
    %40 = vector.broadcast %cst_16 : f32 to vector<1200x1xf32>
    %41 = arith.subf %40, %39 : vector<1200x1xf32>
    %cst_17 = arith.constant 0.000000e+00 : f32
    %42 = vector.broadcast %cst_17 : f32 to vector<1200x1xf32>
    %43 = arith.cmpf oge, %13, %42 : vector<1200x1xf32>
    %cst_18 = arith.constant 0.000000e+00 : f32
    %44 = vector.broadcast %cst_18 : f32 to vector<1200x1xf32>
    %45 = arith.subf %44, %41 : vector<1200x1xf32>
    %46 = arith.select %43, %41, %45 : vector<1200x1xi1>, vector<1200x1xf32>
    %cst_19 = arith.constant 5.000000e-01 : f32
    %47 = vector.broadcast %cst_19 : f32 to vector<1200x1xf32>
    %48 = arith.mulf %11, %47 : vector<1200x1xf32>
    %cst_20 = arith.constant 1.000000e+00 : f32
    %49 = vector.broadcast %cst_20 : f32 to vector<1200x1xf32>
    %50 = arith.addf %46, %49 : vector<1200x1xf32>
    %51 = arith.mulf %48, %50 : vector<1200x1xf32>
    %c0_21 = arith.constant 0 : index
    %c0_22 = arith.constant 0 : index
    %52 = vector.load %arg3[%c0_21, %c0_22] : memref<1200x1xf32, #tpu.memory_space<vmem>>, vector<1200x1xf32>
    tpu.vector_store %arg3[%c0_21, %c0_22], %51 {strides = array<i32>} : memref<1200x1xf32, #tpu.memory_space<vmem>>, vector<1200x1xf32>,
    return
  }
}

</mosaic_0001>

<bundles_post_ra>
// kernel: model_forward.1
= control target key start
LH: loop header
LB: loop body
LE: loop exit
PB: predicated region body
PF: predicated region fallthrough
CT: control target
= control target key end

     0   :  { %9 = vsyncpa [#allocation4], 0  ;;  %s11231_s0 = inlined_call_operand.vmem [shape: f32[1,2], index: 0, kind: input, shape index: {}]   ;;  %s11232_s1 = inlined_call_operand.<no memory space> [shape: f32[1], index: 1, kind: input, shape index: {}]   ;;  %s11233_s2 = inlined_call_operand.vmem [shape: f32[1200,2], index: 2, kind: input, shape index: {}]   ;;  %s11234_s3 = inlined_call_operand.vmem [shape: f32[1200,1], index: 3, kind: output, shape index: {}]  }
   0x1   :  { %s16_s14 = sshll.u32 %s11231_s0, 4  ;;  %s17_s14 = int_to_ptr.vmem [resolvable:$true] %s16_s14 }
   0x2   :  { %s6322_s15 = scalar_lea.vmem %s17_s14, 16  ;;  %p6327_p1 = scmp.lt.s32.totalorder %s17_s14, %s17_s14 }
   0x3   :  { %p6323_p0 = scmp.ne.s32.totalorder %s17_s14, %s6322_s15  ;;  %p6328_p2 = scmp.lt.s32.totalorder %s6322_s15, %s6322_s15 }
   0x5   :  { %p6329_p3 = por %p6328_p2, %p6327_p1 }
   0x7   :  { %p6330_p4 = pnand %p6329_p3, %p6323_p0 }
   0x9   :  { %6333 = shalt.err (!%p6330_p4)
}
   0xa   :  { %s6336_s16 = smov [#allocation3]  }
   0xb   :  { %19 = dma.vmem_to_smem %s17_s14, 16, %s6336_s16, [#allocation4]  }
   0xc   :  { %6334 = dma.done.wait [#allocation4], 16  }
   0xd   :  { %6335 = vsyncadd [#allocation4], 4294967280 }
   0xe   :  { %27 = sfence }
   0xf   :  { %s5590_s17 = sld [smem:[#allocation3 + $0x1]]  ;;  %v6364_v0 = vld [vmem:[%s11233_s2 + $0x10] sm:$0xff]  ;;  %v6369_v1 = vld [vmem:[%s11233_s2] sm:$0xff]  ;;  %v6376_v3 = vld [vmem:[%s11233_s2 + $0x18] sm:$0xff]  ;;  %s6337_s25 = smov 127   ;;  %vm5434_vm2 = vcmask 7168  }
  0x10   :  { %v6381_v4 = vld [vmem:[%s11233_s2 + $0x8] sm:$0xff]  ;;  %v6401_v10 = vld [vmem:[%s11233_s2 + $0x20] sm:$0xff]  ;;  %v6412_v13 = vld [vmem:[%s11233_s2 + $0x38] sm:$0xff]  ;;  %s28_s18 = sld [smem:[#allocation3]] }
  0x11   :  { %v6396_v9 = vld [vmem:[%s11233_s2 + $0x28] sm:$0xff]  ;;  %v6417_v14 = vld [vmem:[%s11233_s2 + $0x30] sm:$0xff]  ;;  %v6433_v18 = vld [vmem:[%s11233_s2 + $0x40] sm:$0xff] }
  0x12   :  { %v6428_v17 = vld [vmem:[%s11233_s2 + $0x48] sm:$0xff]  ;;  %v6444_v21 = vld [vmem:[%s11233_s2 + $0x58] sm:$0xff]  ;;  %v6449_v22 = vld [vmem:[%s11233_s2 + $0x50] sm:$0xff] }
  0x13   :  { %v6460_v25 = vld [vmem:[%s11233_s2 + $0x68] sm:$0xff]  ;;  %v6465_v26 = vld [vmem:[%s11233_s2 + $0x60] sm:$0xff]  ;;  %v6476_v29 = vld [vmem:[%s11233_s2 + $0x78] sm:$0xff] }
  0x14   :  { %v6481_v30 = vld [vmem:[%s11233_s2 + $0x70] sm:$0xff]  ;;  %v6492_v33 = vld [vmem:[%s11233_s2 + $0x88] sm:$0xff]  ;;  %v6497_v34 = vld [vmem:[%s11233_s2 + $0x80] sm:$0xff] }
  0x15   :  { %v6371_v2 = vstv %s5590_s17  ;;  %v6508_v37 = vld [vmem:[%s11233_s2 + $0x98] sm:$0xff]  ;;  %v6513_v38 = vld [vmem:[%s11233_s2 + $0x90] sm:$0xff]  ;;  %v6524_v41 = vld [vmem:[%s11233_s2 + $0xa8] sm:$0xff] }
  0x16   :  { %11237 = vst [vmem:[#allocation6_spill] sm:$0xff] %v6371_v2  ;;  %v335_v5 = vmul.f32 %v6371_v2, %v6364_v0  ;;  %v333_v6 = vmul.f32 %v6371_v2, %v6369_v1  ;;  %v336_v7 = vmul.f32 %v6371_v2, %v6376_v3  ;;  %v334_v8 = vmul.f32 %v6371_v2, %v6381_v4  ;;  %v51_v42 = vld [vmem:[%s11233_s2 + $0xa0] sm:$0xff]  ;;  %v54_v45 = vld [vmem:[%s11233_s2 + $0xb8] sm:$0xff]  ;;  %v53_v46 = vld [vmem:[%s11233_s2 + $0xb0] sm:$0xff] }
  0x17   :  { %v338_v11 = vmul.f32 %v6371_v2, %v6396_v9  ;;  %v337_v12 = vmul.f32 %v6371_v2, %v6401_v10  ;;  %v340_v15 = vmul.f32 %v6371_v2, %v6412_v13  ;;  %v339_v16 = vmul.f32 %v6371_v2, %v6417_v14  ;;  %v56_v49 = vld [vmem:[%s11233_s2 + $0xc8] sm:$0xff]  ;;  %v55_v50 = vld [vmem:[%s11233_s2 + $0xc0] sm:$0xff]  ;;  %v58_v53 = vld [vmem:[%s11233_s2 + $0xd8] sm:$0xff] }
  0x18   :  { %637 = vrot.lane.b32.xlu1 %v335_v5, %s6337_s25  ;;  %633 = vrot.lane.b32.xlu0 %v333_v6, %s6337_s25  ;;  %v342_v19 = vmul.f32 %v6371_v2, %v6428_v17  ;;  %v341_v20 = vmul.f32 %v6371_v2, %v6433_v18  ;;  %v344_v23 = vmul.f32 %v6371_v2, %v6444_v21  ;;  %v57_v54 = vld [vmem:[%s11233_s2 + $0xd0] sm:$0xff]  ;;  %v60_v57 = vld [vmem:[%s11233_s2 + $0xe8] sm:$0xff] }
  0x19   :  { %v343_v24 = vmul.f32 %v6371_v2, %v6449_v22  ;;  %v346_v27 = vmul.f32 %v6371_v2, %v6460_v25  ;;  %v345_v28 = vmul.f32 %v6371_v2, %v6465_v26  ;;  %v348_v31 = vmul.f32 %v6371_v2, %v6476_v29  ;;  %v59_v58 = vld [vmem:[%s11233_s2 + $0xe0] sm:$0xff]  ;;  %v62_v61 = vld [vmem:[%s11233_s2 + $0xf8] sm:$0xff]  ;;  %v61_v62 = vld [vmem:[%s11233_s2 + $0xf0] sm:$0xff] }
  0x1a   :  { %v347_v32 = vmul.f32 %v6371_v2, %v6481_v30  ;;  %v350_v35 = vmul.f32 %v6371_v2, %v6492_v33  ;;  %v349_v36 = vmul.f32 %v6371_v2, %v6497_v34  ;;  %v352_v39 = vmul.f32 %v6371_v2, %v6508_v37  ;;  %v64_v6 = vld [vmem:[%s11233_s2 + $0x108] sm:$0xff] }
  0x1b   :  { %v351_v40 = vmul.f32 %v6371_v2, %v6513_v38  ;;  %v354_v43 = vmul.f32 %v6371_v2, %v6524_v41  ;;  %v353_v44 = vmul.f32 %v6371_v2, %v51_v42  ;;  %v356_v47 = vmul.f32 %v6371_v2, %v54_v45 }
  0x1c   :  { %639 = vrot.lane.b32.xlu1 %v336_v7, %s6337_s25  ;;  %635 = vrot.lane.b32.xlu0 %v334_v8, %s6337_s25  ;;  %v355_v48 = vmul.f32 %v6371_v2, %v53_v46  ;;  %v358_v51 = vmul.f32 %v6371_v2, %v56_v49  ;;  %v357_v52 = vmul.f32 %v6371_v2, %v55_v50  ;;  %v63_v7 = vld [vmem:[%s11233_s2 + $0x100] sm:$0xff] }
  0x1d   :  { %v360_v55 = vmul.f32 %v6371_v2, %v58_v53  ;;  %v359_v56 = vmul.f32 %v6371_v2, %v57_v54  ;;  %v362_v59 = vmul.f32 %v6371_v2, %v60_v57  ;;  %v361_v60 = vmul.f32 %v6371_v2, %v59_v58 }
  0x1e   :  { %v364_v63 = vmul.f32 %v6371_v2, %v62_v61  ;;  %v363_v5 = vmul.f32 %v6371_v2, %v61_v62  ;;  %v366_v8 = vmul.f32 %v6371_v2, %v64_v6 }
  0x20   :  { %643 = vrot.lane.b32.xlu1 %v338_v11, %s6337_s25  ;;  %641 = vrot.lane.b32.xlu0 %v337_v12, %s6337_s25  ;;  %v365_v11 = vmul.f32 %v6371_v2, %v63_v7  ;;  %v66_v12 = vld [vmem:[%s11233_s2 + $0x118] sm:$0xff] }
  0x24   :  { %647 = vrot.lane.b32.xlu1 %v340_v15, %s6337_s25  ;;  %645 = vrot.lane.b32.xlu0 %v339_v16, %s6337_s25  ;;  %v65_v15 = vld [vmem:[%s11233_s2 + $0x110] sm:$0xff]  ;;  %v368_v16 = vmul.f32 %v6371_v2, %v66_v12 }
  0x28   :  { %651 = vrot.lane.b32.xlu1 %v342_v19, %s6337_s25  ;;  %649 = vrot.lane.b32.xlu0 %v341_v20, %s6337_s25  ;;  %v367_v19 = vmul.f32 %v6371_v2, %v65_v15  ;;  %v68_v20 = vld [vmem:[%s11233_s2 + $0x128] sm:$0xff] }
  0x2c   :  { %655 = vrot.lane.b32.xlu1 %v344_v23, %s6337_s25  ;;  %653 = vrot.lane.b32.xlu0 %v343_v24, %s6337_s25  ;;  %v67_v23 = vld [vmem:[%s11233_s2 + $0x120] sm:$0xff]  ;;  %v370_v24 = vmul.f32 %v6371_v2, %v68_v20  ;;  %v6710_v20 = vstv %s28_s18 }
  0x30   :  { %659 = vrot.lane.b32.xlu1 %v346_v27, %s6337_s25  ;;  %657 = vrot.lane.b32.xlu0 %v345_v28, %s6337_s25  ;;  %v369_v27 = vmul.f32 %v6371_v2, %v67_v23  ;;  %v70_v28 = vld [vmem:[%s11233_s2 + $0x138] sm:$0xff] }
  0x34   :  { %663 = vrot.lane.b32.xlu1 %v348_v31, %s6337_s25  ;;  %661 = vrot.lane.b32.xlu0 %v347_v32, %s6337_s25  ;;  %v69_v31 = vld [vmem:[%s11233_s2 + $0x130] sm:$0xff]  ;;  %v372_v32 = vmul.f32 %v6371_v2, %v70_v28 }
  0x35   :  { %v89_v28 = vld [vmem:[%s11233_s2 + $0x1d0] sm:$0xff] }
  0x38   :  { %667 = vrot.lane.b32.xlu1 %v350_v35, %s6337_s25  ;;  %665 = vrot.lane.b32.xlu0 %v349_v36, %s6337_s25  ;;  %v371_v35 = vmul.f32 %v6371_v2, %v69_v31  ;;  %v72_v36 = vld [vmem:[%s11233_s2 + $0x148] sm:$0xff]  ;;  %v184_v31 = vmul.f32 %v6710_v20, %v6364_v0  ;;  %v94_v0 = vld [vmem:[%s11233_s2 + $0x1f8] sm:$0xff] }
  0x3c   :  { %671 = vrot.lane.b32.xlu1 %v352_v39, %s6337_s25  ;;  %669 = vrot.lane.b32.xlu0 %v351_v40, %s6337_s25  ;;  %v71_v39 = vld [vmem:[%s11233_s2 + $0x140] sm:$0xff]  ;;  %v374_v40 = vmul.f32 %v6371_v2, %v72_v36 }
  0x3d   :  { %v373_v42 = vmul.f32 %v6371_v2, %v71_v39  ;;  %v91_v36 = vld [vmem:[%s11233_s2 + $0x1e0] sm:$0xff] }
  0x40   :  { %675 = vrot.lane.b32.xlu1 %v354_v43, %s6337_s25  ;;  %673 = vrot.lane.b32.xlu0 %v353_v44, %s6337_s25  ;;  %v74_v43 = vld [vmem:[%s11233_s2 + $0x158] sm:$0xff]  ;;  %v73_v44 = vld [vmem:[%s11233_s2 + $0x150] sm:$0xff] }
  0x41   :  { %v376_v45 = vmul.f32 %v6371_v2, %v74_v43  ;;  %v375_v46 = vmul.f32 %v6371_v2, %v73_v44  ;;  %v93_v43 = vld [vmem:[%s11233_s2 + $0x1f0] sm:$0xff] }
  0x44   :  { %679 = vrot.lane.b32.xlu1 %v356_v47, %s6337_s25  ;;  %677 = vrot.lane.b32.xlu0 %v355_v48, %s6337_s25  ;;  %v76_v47 = vld [vmem:[%s11233_s2 + $0x168] sm:$0xff]  ;;  %v75_v48 = vld [vmem:[%s11233_s2 + $0x160] sm:$0xff] }
  0x45   :  { %v378_v49 = vmul.f32 %v6371_v2, %v76_v47  ;;  %v377_v50 = vmul.f32 %v6371_v2, %v75_v48  ;;  %v393_v48 = vmul.f32 %v6371_v2, %v91_v36 }
  0x48   :  { %683 = vrot.lane.b32.xlu1 %v358_v51, %s6337_s25  ;;  %681 = vrot.lane.b32.xlu0 %v357_v52, %s6337_s25  ;;  %v78_v51 = vld [vmem:[%s11233_s2 + $0x178] sm:$0xff]  ;;  %v77_v52 = vld [vmem:[%s11233_s2 + $0x170] sm:$0xff] }
  0x49   :  { %v380_v53 = vmul.f32 %v6371_v2, %v78_v51  ;;  %v379_v54 = vmul.f32 %v6371_v2, %v77_v52 }
  0x4c   :  { %687 = vrot.lane.b32.xlu1 %v360_v55, %s6337_s25  ;;  %685 = vrot.lane.b32.xlu0 %v359_v56, %s6337_s25  ;;  %v80_v55 = vld [vmem:[%s11233_s2 + $0x188] sm:$0xff]  ;;  %v79_v56 = vld [vmem:[%s11233_s2 + $0x180] sm:$0xff] }
  0x4d   :  { %v382_v57 = vmul.f32 %v6371_v2, %v80_v55  ;;  %v381_v58 = vmul.f32 %v6371_v2, %v79_v56  ;;  %v395_v55 = vmul.f32 %v6371_v2, %v93_v43  ;;  %v6783_v56 = vmul.f32 %v6710_v20, %v6417_v14 }
  0x4e   :  { %v6798_v14 = vmul.f32 %v6710_v20, %v6428_v17 }
  0x50   :  { %691 = vrot.lane.b32.xlu1 %v362_v59, %s6337_s25  ;;  %689 = vrot.lane.b32.xlu0 %v361_v60, %s6337_s25  ;;  %v82_v59 = vld [vmem:[%s11233_s2 + $0x198] sm:$0xff]  ;;  %v81_v60 = vld [vmem:[%s11233_s2 + $0x190] sm:$0xff] }
  0x51   :  { %v384_v61 = vmul.f32 %v6371_v2, %v82_v59  ;;  %v383_v62 = vmul.f32 %v6371_v2, %v81_v60 }
  0x54   :  { %695 = vrot.lane.b32.xlu1 %v364_v63, %s6337_s25  ;;  %693 = vrot.lane.b32.xlu0 %v363_v5, %s6337_s25  ;;  %v84_v63 = vld [vmem:[%s11233_s2 + $0x1a8] sm:$0xff]  ;;  %v83_v5 = vld [vmem:[%s11233_s2 + $0x1a0] sm:$0xff] }
  0x55   :  { %v386_v6 = vmul.f32 %v6371_v2, %v84_v63  ;;  %v385_v7 = vmul.f32 %v6371_v2, %v83_v5  ;;  %v6802_v63 = vmul.f32 %v6710_v20, %v6433_v18  ;;  %v6821_v18 = vmul.f32 %v6710_v20, %v6444_v21 }
  0x58   :  { %699 = vrot.lane.b32.xlu1 %v366_v8, %s6337_s25  ;;  %697 = vrot.lane.b32.xlu0 %v365_v11, %s6337_s25  ;;  %v86_v8 = vld [vmem:[%s11233_s2 + $0x1b8] sm:$0xff]  ;;  %v85_v11 = vld [vmem:[%s11233_s2 + $0x1b0] sm:$0xff] }
  0x59   :  { %v388_v12 = vmul.f32 %v6371_v2, %v86_v8  ;;  %v387_v15 = vmul.f32 %v6371_v2, %v85_v11  ;;  %v6825_v11 = vmul.f32 %v6710_v20, %v6449_v22 }
  0x5c   :  { %703 = vrot.lane.b32.xlu1 %v368_v16, %s6337_s25  ;;  %701 = vrot.lane.b32.xlu0 %v367_v19, %s6337_s25  ;;  %v88_v16 = vld [vmem:[%s11233_s2 + $0x1c8] sm:$0xff]  ;;  %v87_v19 = vld [vmem:[%s11233_s2 + $0x1c0] sm:$0xff] }
  0x5d   :  { %v390_v23 = vmul.f32 %v6371_v2, %v88_v16 }
  0x60   :  { %707 = vrot.lane.b32.xlu1 %v370_v24, %s6337_s25  ;;  %705 = vrot.lane.b32.xlu0 %v369_v27, %s6337_s25  ;;  %v389_v24 = vmul.f32 %v6371_v2, %v87_v19  ;;  %v90_v27 = vld [vmem:[%s11233_s2 + $0x1d8] sm:$0xff] }
  0x61   :  { %v392_v39 = vmul.f32 %v6371_v2, %v90_v27  ;;  %v101_v27 = vld [vmem:[%s11233_s2 + $0x230] sm:$0xff] }
  0x64   :  { %711 = vrot.lane.b32.xlu1 %v372_v32, %s6337_s25  ;;  %709 = vrot.lane.b32.xlu0 %v371_v35, %s6337_s25  ;;  %v182_v32 = vmul.f32 %v6710_v20, %v6369_v1  ;;  %v92_v35 = vld [vmem:[%s11233_s2 + $0x1e8] sm:$0xff]  ;;  %v6742_v1 = vstv %s11232_s1 }
  0x65   :  { %v394_v47 = vmul.f32 %v6371_v2, %v92_v35 }
  0x68   :  { %715 = vrot.lane.b32.xlu1 %v374_v40, %s6337_s25  ;;  %713 = vrot.lane.b32.xlu0 %v373_v42, %s6337_s25  ;;  %v391_v40 = vmul.f32 %v6371_v2, %v89_v28  ;;  %v185_v42 = vmul.f32 %v6710_v20, %v6376_v3  ;;  %v96_v3 = vld [vmem:[%s11233_s2 + $0x208] sm:$0xff] }
  0x69   :  { %v398_v59 = vmul.f32 %v6371_v2, %v96_v3 }
  0x6c   :  { %719 = vrot.lane.b32.xlu1 %v376_v45, %s6337_s25  ;;  %717 = vrot.lane.b32.xlu0 %v375_v46, %s6337_s25  ;;  %v183_v46 = vmul.f32 %v6710_v20, %v6381_v4  ;;  %v6765_v4 = vmul.f32 %v6710_v20, %v6401_v10  ;;  %v6779_v10 = vmul.f32 %v6710_v20, %v6412_v13 }
  0x70   :  { %723 = vrot.lane.b32.xlu1 %v378_v49, %s6337_s25  ;;  %721 = vrot.lane.b32.xlu0 %v377_v50, %s6337_s25  ;;  %v6755_v49 = vmul.f32 %v6710_v20, %v6396_v9  ;;  %v95_v50 = vld [vmem:[%s11233_s2 + $0x200] sm:$0xff]  ;;  %v98_v9 = vld [vmem:[%s11233_s2 + $0x218] sm:$0xff] }
  0x71   :  { %v397_v60 = vmul.f32 %v6371_v2, %v95_v50  ;;  %v6805_v5 = vmul.f32 %v6371_v2, %v98_v9 }
  0x74   :  { %727 = vrot.lane.b32.xlu1 %v380_v53, %s6337_s25  ;;  %725 = vrot.lane.b32.xlu0 %v379_v54, %s6337_s25  ;;  %v396_v53 = vmul.f32 %v6371_v2, %v94_v0  ;;  %v97_v54 = vld [vmem:[%s11233_s2 + $0x210] sm:$0xff] }
  0x78   :  { %731 = vrot.lane.b32.xlu1 %v382_v57, %s6337_s25  ;;  %729 = vrot.lane.b32.xlu0 %v381_v58, %s6337_s25 }
  0x7c   :  { %735 = vrot.lane.b32.xlu1 %v384_v61, %s6337_s25  ;;  %733 = vrot.lane.b32.xlu0 %v383_v62, %s6337_s25  ;;  %v100_v61 = vld [vmem:[%s11233_s2 + $0x228] sm:$0xff] }
  0x7d   :  { %v6833_v19 = vmul.f32 %v6371_v2, %v100_v61 }
  0x80   :  { %739 = vrot.lane.b32.xlu1 %v386_v6, %s6337_s25  ;;  %737 = vrot.lane.b32.xlu0 %v385_v7, %s6337_s25  ;;  %v6808_v6 = vmul.f32 %v6371_v2, %v97_v54  ;;  %v99_v7 = vld [vmem:[%s11233_s2 + $0x220] sm:$0xff] }
  0x81   :  { %v6838_v22 = vmul.f32 %v6371_v2, %v99_v7 }
  0x84   :  { %743 = vrot.lane.b32.xlu1 %v388_v12, %s6337_s25  ;;  %741 = vrot.lane.b32.xlu0 %v387_v15, %s6337_s25  ;;  %v102_v12 = vld [vmem:[%s11233_s2 + $0x238] sm:$0xff] }
  0x85   :  { %v6858_v35 = vmul.f32 %v6371_v2, %v102_v12 }
  0x88   :  { %747 = vrot.lane.b32.xlu1 %v390_v23, %s6337_s25  ;;  %745 = vrot.lane.b32.xlu0 %v389_v24, %s6337_s25  ;;  %v6842_v24 = vmul.f32 %v6710_v20, %v6460_v25  ;;  %v104_v25 = vld [vmem:[%s11233_s2 + $0x248] sm:$0xff] }
  0x8a   :  { %v638_v44 = vpop.permute.xlu1 %637  ;;  %v634_v45 = vpop.permute.xlu0 %633 }
  0x8b   :  { %v1085_v51 = vadd.f32 %v638_v44, %v184_v31  ;;  %v1083_v52 = vadd.f32 %v634_v45, %v182_v32  ;;  %v6855_v32 = vmul.f32 %v6710_v20, %v6465_v26  ;;  %v103_v44 = vld [vmem:[%s11233_s2 + $0x240] sm:$0xff]  ;;  %v106_v26 = vld [vmem:[%s11233_s2 + $0x258] sm:$0xff] }
  0x8c   :  { %751 = vrot.lane.b32.xlu1 %v392_v39, %s6337_s25  ;;  %749 = vrot.lane.b32.xlu0 %v391_v40, %s6337_s25  ;;  %v6894_v54 = vmul.f32 %v6371_v2, %v103_v44 }
  0x8d   :  { %v6786_v57 = vadd.f32 %v6742_v1, %v1085_v51  ;;  %v6789_v58 = vadd.f32 %v6742_v1, %v1083_v52  ;;  %v6886_v51 = vmul.f32 %v6710_v20, %v6481_v30  ;;  %v6889_v52 = vmul.f32 %v6371_v2, %v104_v25 }
  0x8e   :  { %v640_v13 = vpop.permute.xlu1 %639  ;;  %v636_v62 = vpop.permute.xlu0 %635 }
  0x8f   :  { %v6814_v8 = vmul.f32 0.70710677, %v6786_v57  ;;  %v6817_v17 = vmul.f32 0.70710677, %v6789_v58  ;;  %v1086_v15 = vadd.f32 %v640_v13, %v185_v42  ;;  %v1084_v16 = vadd.f32 %v636_v62, %v183_v46  ;;  %11238 = vst [vmem:[#allocation7_spill] sm:$0xff] %v6886_v51  ;;  %v108_v62 = vld [vmem:[%s11233_s2 + $0x268] sm:$0xff] }
  0x90   :  { %755 = vrot.lane.b32.xlu1 %v394_v47, %s6337_s25  ;;  %753 = vrot.lane.b32.xlu0 %v393_v48, %s6337_s25  ;;  %v6878_v47 = vmul.f32 %v6371_v2, %v101_v27  ;;  %v6882_v48 = vmul.f32 %v6710_v20, %v6476_v29  ;;  %v105_v29 = vld [vmem:[%s11233_s2 + $0x250] sm:$0xff] }
  0x91   :  { %v1536_v21 = vand.u32 2147483647, %v6814_v8  ;;  %v1534_v23 = vand.u32 2147483647, %v6817_v17  ;;  %v6848_v28 = vadd.f32 %v6742_v1, %v1086_v15  ;;  %v6851_v31 = vadd.f32 %v6742_v1, %v1084_v16 }
  0x92   :  { %v644_v42 = vpop.permute.xlu1 %643  ;;  %v642_v43 = vpop.permute.xlu0 %641  ;;  %v6913_v25 = vmul.f32 %v6371_v2, %v105_v29  ;;  %v6938_v29 = vmul.f32 0.5, %v6786_v57  ;;  %v109_v57 = vld [vmem:[%s11233_s2 + $0x270] sm:$0xff]  ;;  %vm4536_vm0 = vcmp.ge.f32.partialorder %v6814_v8, 0.0  ;;  %vm4534_vm1 = vcmp.ge.f32.partialorder %v6817_v17, 0.0 }
  0x93   :  { %v1686_v36 = vmul.f32 0.3275911, %v1536_v21  ;;  %v3636_v39 = vmul.f32 %v1536_v21, %v1536_v21  ;;  %v1684_v40 = vmul.f32 0.3275911, %v1534_v23  ;;  %v3634_v0 = vmul.f32 %v1534_v23, %v1534_v23 }
  0x94   :  { %v6870_v45 = vmul.f32 0.70710677, %v6848_v28  ;;  %v6873_v46 = vmul.f32 0.70710677, %v6851_v31  ;;  %759 = vrot.lane.b32.xlu1 %v396_v53, %s6337_s25  ;;  %757 = vrot.lane.b32.xlu0 %v395_v55, %s6337_s25  ;;  %v6897_v55 = vmul.f32 %v6371_v2, %v106_v26  ;;  %v1088_v13 = vadd.f32 %v644_v42, %v6755_v49 }
  0x95   :  { %v1836_v3 = vadd.f32 1.0, %v1686_v36  ;;  %v1834_v50 = vadd.f32 1.0, %v1684_v40  ;;  %v3786_v30 = vsub.f32 0.0, %v3636_v39  ;;  %v3784_v61 = vsub.f32 0.0, %v3634_v0 }
  0x96   :  { %v1537_v53 = vand.u32 2147483647, %v6870_v45  ;;  %v1535_v9 = vand.u32 2147483647, %v6873_v46  ;;  %v6909_v21 = vadd.f32 %v6742_v1, %v1088_v13  ;;  %v1087_v23 = vadd.f32 %v642_v43, %v6765_v4  ;;  %v648_v27 = vpop.permute.xlu1 %647  ;;  %v646_v49 = vpop.permute.xlu0 %645 }
  0x97   :  { %5593 = vrcp.f32 %v1836_v3  ;;  %v6916_v0 = vmul.f32 %v6371_v2, %v108_v62  ;;  %v3934_v42 = vmul.f32 1.442695, %v3784_v61  ;;  %v1090_v26 = vadd.f32 %v648_v27, %v6779_v10 }
  0x98   :  { %5595 = vrcp.f32 %v1834_v50  ;;  %v1687_v7 = vmul.f32 0.3275911, %v1537_v53  ;;  %v3637_v12 = vmul.f32 %v1537_v53, %v1537_v53  ;;  %v1685_v15 = vmul.f32 0.3275911, %v1535_v9  ;;  %763 = vrot.lane.b32.xlu1 %v398_v59, %s6337_s25  ;;  %761 = vrot.lane.b32.xlu0 %v397_v60, %s6337_s25  ;;  %v107_v59 = vld [vmem:[%s11233_s2 + $0x260] sm:$0xff] }
  0x99   :  { %v3635_v16 = vmul.f32 %v1535_v9, %v1535_v9  ;;  %v3938_v60 = vmul.f32 1.442695, %v3786_v30  ;;  %v6922_v44 = vmul.f32 0.70710677, %v6909_v21  ;;  %v6925_v4 = vadd.f32 %v6742_v1, %v1087_v23 }
  0x9a   :  { %v1837_v36 = vadd.f32 1.0, %v1687_v7  ;;  %v3787_v39 = vsub.f32 0.0, %v3637_v12  ;;  %v1835_v40 = vadd.f32 1.0, %v1685_v15  ;;  %v1089_v3 = vadd.f32 %v646_v49, %v6783_v56  ;;  %v652_v51 = vpop.permute.xlu1 %651 }
  0x9b   :  { %v3785_v43 = vsub.f32 0.0, %v3635_v16  ;;  %v1539_v53 = vand.u32 2147483647, %v6922_v44  ;;  %v6935_v9 = vmul.f32 %v6371_v2, %v107_v59  ;;  %v6941_v10 = vmul.f32 0.5, %v6789_v58 }
  0x9c   :  { %5597 = vrcp.f32 %v1837_v36  ;;  %767 = vrot.lane.b32.xlu1 %v6805_v5, %s6337_s25  ;;  %765 = vrot.lane.b32.xlu0 %v6808_v6, %s6337_s25  ;;  %v3940_v50 = vmul.f32 1.442695, %v3787_v39  ;;  %v6944_v56 = vmul.f32 0.70710677, %v6925_v4  ;;  %v6947_v5 = vadd.f32 %v6742_v1, %v1090_v26  ;;  %v110_v6 = vld [vmem:[%s11233_s2 + $0x278] sm:$0xff] }
  0x9d   :  { %5599 = vrcp.f32 %v1835_v40  ;;  %v1689_v30 = vmul.f32 0.3275911, %v1539_v53  ;;  %v3639_v61 = vmul.f32 %v1539_v53, %v1539_v53  ;;  %v6953_v13 = vadd.f32 %v6742_v1, %v1089_v3 }
  0x9e   :  { %5601 = vpow2.f32 %v3938_v60  ;;  %v3936_v58 = vmul.f32 1.442695, %v3785_v43  ;;  %v1538_v62 = vand.u32 2147483647, %v6944_v56  ;;  %v6960_v7 = vmul.f32 0.70710677, %v6947_v5 }
  0x9f   :  { %5603 = vpow2.f32 %v3934_v42  ;;  %v1839_v15 = vadd.f32 1.0, %v1689_v30  ;;  %v6969_v16 = vmul.f32 0.70710677, %v6953_v13  ;;  %v6972_v23 = vmul.f32 %v6371_v2, %v110_v6 }
  0xa0   :  { %771 = vrot.lane.b32.xlu1 %v6833_v19, %s6337_s25  ;;  %769 = vrot.lane.b32.xlu0 %v6838_v22, %s6337_s25  ;;  %5605 = vpow2.f32 %v3940_v50  ;;  %v1688_v36 = vmul.f32 0.3275911, %v1538_v62  ;;  %v3638_v39 = vmul.f32 %v1538_v62, %v1538_v62  ;;  %v1541_v19 = vand.u32 2147483647, %v6960_v7 }
  0xa1   :  { %v6966_v12 = vpop.eup %5593  ;;  %5607 = vrcp.f32 %v1839_v15  ;;  %v3789_v40 = vsub.f32 0.0, %v3639_v61  ;;  %v6980_v59 = vmul.f32 %v6371_v2, %v109_v57  ;;  %v1540_v53 = vand.u32 2147483647, %v6969_v16 }
  0xa2   :  { %v6974_v27 = vpop.eup %5595  ;;  %v2286_v49 = vmul.f32 1.0614054, %v6966_v12  ;;  %5609 = vpow2.f32 %v3936_v58  ;;  %v1838_v42 = vadd.f32 1.0, %v1688_v36  ;;  %v1691_v43 = vmul.f32 0.3275911, %v1541_v19 }
  0xa3   :  { %v2284_v22 = vmul.f32 1.0614054, %v6974_v27  ;;  %v3788_v3 = vsub.f32 0.0, %v3638_v39  ;;  %v3641_v50 = vmul.f32 %v1541_v19, %v1541_v19  ;;  %v6991_v61 = vmul.f32 0.5, %v6848_v28 }
  0xa4   :  { %v2436_v60 = vadd.f32 -1.4531521, %v2286_v49  ;;  %775 = vrot.lane.b32.xlu1 %v6858_v35, %s6337_s25  ;;  %773 = vrot.lane.b32.xlu0 %v6878_v47, %s6337_s25  ;;  %5611 = vrcp.f32 %v1838_v42  ;;  %v1841_v57 = vadd.f32 1.0, %v1691_v43  ;;  %v3944_v62 = vmul.f32 1.442695, %v3789_v40 }
  0xa5   :  { %v2434_v26 = vadd.f32 -1.4531521, %v2284_v22  ;;  %v1690_v15 = vmul.f32 0.3275911, %v1540_v53  ;;  %v3791_v39 = vsub.f32 0.0, %v3641_v50  ;;  %v3640_v19 = vmul.f32 %v1540_v53, %v1540_v53 }
  0xa6   :  { %v6987_v6 = vpop.eup %5597  ;;  %v2586_v30 = vmul.f32 %v6966_v12, %v2436_v60  ;;  %v3942_v42 = vmul.f32 1.442695, %v3788_v3  ;;  %5613 = vrcp.f32 %v1841_v57  ;;  %vm4537_vm3 = vcmp.ge.f32.partialorder %v6870_v45, 0.0 }
  0xa7   :  { %v6993_v58 = vpop.eup %5599  ;;  %v2584_v35 = vmul.f32 %v6974_v27, %v2434_v26  ;;  %v2287_v47 = vmul.f32 1.0614054, %v6987_v6  ;;  %v3790_v2 = vsub.f32 0.0, %v3640_v19  ;;  %5615 = vpow2.f32 %v3944_v62 }
  0xa8   :  { %v2736_v49 = vadd.f32 1.4214138, %v2586_v30  ;;  %v2285_v36 = vmul.f32 1.0614054, %v6993_v58  ;;  %779 = vrot.lane.b32.xlu1 %v6889_v52, %s6337_s25  ;;  %777 = vrot.lane.b32.xlu0 %v6894_v54, %s6337_s25  ;;  %v5602_v28 = vpop.eup %5601  ;;  %v1840_v30 = vadd.f32 1.0, %v1690_v15  ;;  %v7008_v54 = vmul.f32 0.5, %v6851_v31 }
  0xa9   :  { %v2734_v22 = vadd.f32 1.4214138, %v2584_v35  ;;  %v2437_v60 = vadd.f32 -1.4531521, %v2287_v47  ;;  %v5604_v43 = vpop.eup %5603  ;;  %v3948_v57 = vmul.f32 1.442695, %v3791_v39  ;;  %v650_v47 = vpop.permute.xlu0 %649  ;;  %v1092_v31 = vadd.f32 %v652_v51, %v6798_v14 }
  0xaa   :  { %v2886_v40 = vmul.f32 %v6966_v12, %v2736_v49  ;;  %v2435_v26 = vadd.f32 -1.4531521, %v2285_v36  ;;  %v7003_v50 = vpop.eup %5605  ;;  %5617 = vrcp.f32 %v1840_v30  ;;  %v3946_v19 = vmul.f32 1.442695, %v3790_v2 }
  0xab   :  { %v2884_v53 = vmul.f32 %v6974_v27, %v2734_v22  ;;  %v2587_v52 = vmul.f32 %v6987_v6, %v2437_v60  ;;  %v7015_v15 = vpop.eup %5607  ;;  %5619 = vpow2.f32 %v3942_v42  ;;  %vm4535_vm4 = vcmp.ge.f32.partialorder %v6873_v46, 0.0 }
  0xac   :  { %v3036_v35 = vadd.f32 -0.28449672, %v2886_v40  ;;  %v2585_v3 = vmul.f32 %v6993_v58, %v2435_v26  ;;  %783 = vrot.lane.b32.xlu1 %v6897_v55, %s6337_s25  ;;  %781 = vrot.lane.b32.xlu0 %v6913_v25, %s6337_s25  ;;  %v7018_v62 = vpop.eup %5609  ;;  %v2289_v60 = vmul.f32 1.0614054, %v7015_v15  ;;  %v7025_v25 = vadd.f32 %v6742_v1, %v1092_v31 }
  0xad   :  { %v3034_v49 = vadd.f32 -0.28449672, %v2884_v53  ;;  %v2737_v36 = vadd.f32 1.4214138, %v2587_v52  ;;  %v1091_v26 = vadd.f32 %v650_v47, %v6802_v63  ;;  %5621 = vpow2.f32 %v3948_v57 }
  0xae   :  { %v3186_v22 = vmul.f32 %v6966_v12, %v3036_v35  ;;  %v2735_v39 = vadd.f32 1.4214138, %v2585_v3  ;;  %v7028_v2 = vpop.eup %5611  ;;  %v2439_v30 = vadd.f32 -1.4531521, %v2289_v60  ;;  %5623 = vpow2.f32 %v3946_v19 }
  0xaf   :  { %v3184_v55 = vmul.f32 %v6974_v27, %v3034_v49  ;;  %v2887_v40 = vmul.f32 %v6987_v6, %v2737_v36  ;;  %v2288_v52 = vmul.f32 1.0614054, %v7028_v2  ;;  %v7041_v57 = vmul.f32 0.70710677, %v7025_v25 }
  0xb0   :  { %v3336_v14 = vadd.f32 0.2548296, %v3186_v22  ;;  %v2885_v51 = vmul.f32 %v6993_v58, %v2735_v39  ;;  %787 = vrot.lane.b32.xlu1 %v6916_v0, %s6337_s25  ;;  %785 = vrot.lane.b32.xlu0 %v6935_v9, %s6337_s25  ;;  %v2589_v3 = vmul.f32 %v7015_v15, %v2439_v30  ;;  %v7043_v0 = vpop.eup %5613  ;;  %v7048_v36 = vadd.f32 %v6742_v1, %v1091_v26 }
  0xb1   :  { %v3334_v42 = vadd.f32 0.2548296, %v3184_v55  ;;  %v3037_v53 = vadd.f32 -0.28449672, %v2887_v40  ;;  %v2438_v49 = vadd.f32 -1.4531521, %v2288_v52 }
  0xb2   :  { %v3486_v63 = vmul.f32 %v6966_v12, %v3336_v14  ;;  %v3035_v35 = vadd.f32 -0.28449672, %v2885_v51  ;;  %v2739_v31 = vadd.f32 1.4214138, %v2589_v3  ;;  %v2291_v22 = vmul.f32 1.0614054, %v7043_v0 }
  0xb3   :  { %v3484_v9 = vmul.f32 %v6974_v27, %v3334_v42  ;;  %v3187_v47 = vmul.f32 %v6987_v6, %v3037_v53  ;;  %v5616_v27 = vpop.eup %5615  ;;  %v2588_v55 = vmul.f32 %v7028_v2, %v2438_v49  ;;  %v7058_v40 = vand.u32 2147483647, %v7041_v57 }
  0xb4   :  { %v4236_v12 = vmul.f32 %v5602_v28, %v3486_v63  ;;  %v3185_v19 = vmul.f32 %v6993_v58, %v3035_v35  ;;  %791 = vrot.lane.b32.xlu1 %v6972_v23, %s6337_s25  ;;  %789 = vrot.lane.b32.xlu0 %v6980_v59, %s6337_s25  ;;  %v7060_v28 = vpop.eup %5617  ;;  %v2889_v51 = vmul.f32 %v7015_v15, %v2739_v31  ;;  %v2441_v23 = vadd.f32 -1.4531521, %v2291_v22 }
  0xb5   :  { %v4234_v39 = vmul.f32 %v5604_v43, %v3484_v9  ;;  %v3337_v60 = vadd.f32 0.2548296, %v3187_v47  ;;  %v2738_v43 = vadd.f32 1.4214138, %v2588_v55  ;;  %v2290_v42 = vmul.f32 1.0614054, %v7060_v28  ;;  %v5620_v53 = vpop.eup %5619 }
  0xb6   :  { %v4386_v26 = vsub.f32 1.0, %v4236_v12  ;;  %v3335_v14 = vadd.f32 0.2548296, %v3185_v19  ;;  %v3039_v35 = vadd.f32 -0.28449672, %v2889_v51  ;;  %v2591_v3 = vmul.f32 %v7043_v0, %v2441_v23 }
  0xb7   :  { %v4384_v30 = vsub.f32 1.0, %v4234_v39  ;;  %v3487_v59 = vmul.f32 %v6987_v6, %v3337_v60  ;;  %v2888_v49 = vmul.f32 %v7028_v2, %v2738_v43  ;;  %v2440_v12 = vadd.f32 -1.4531521, %v2290_v42  ;;  %v5622_v19 = vpop.eup %5621 }
  0xb8   :  { %v4686_v52 = vsub.f32 0.0, %v4386_v26  ;;  %v3485_v63 = vmul.f32 %v6993_v58, %v3335_v14  ;;  %v3189_v22 = vmul.f32 %v7015_v15, %v3039_v35  ;;  %v2741_v39 = vadd.f32 1.4214138, %v2591_v3  ;;  %v7075_v60 = vpop.eup %5623 }
  0xb9   :  { %v4684_v9 = vsub.f32 0.0, %v4384_v30  ;;  %v4237_v47 = vmul.f32 %v7003_v50, %v3487_v59  ;;  %v3038_v50 = vadd.f32 -0.28449672, %v2888_v49  ;;  %v2590_v42 = vmul.f32 %v7060_v28, %v2440_v12 }
  0xba   :  { %v4836_v6 = vsel %vm4536_vm0, %v4386_v26, %v4686_v52  ;;  %v4235_v31 = vmul.f32 %v7018_v62, %v3485_v63  ;;  %v3339_v59 = vadd.f32 0.2548296, %v3189_v22  ;;  %v2891_v43 = vmul.f32 %v7043_v0, %v2741_v39 }
  0xbb   :  { %v5136_v58 = vadd.f32 1.0, %v4836_v6  ;;  %v4834_v55 = vsel %vm4534_vm1, %v4384_v30, %v4684_v9  ;;  %v4387_v14 = vsub.f32 1.0, %v4237_v47  ;;  %v3188_v62 = vmul.f32 %v7028_v2, %v3038_v50  ;;  %v656_v47 = vpop.permute.xlu1 %655 }
  0xbc   :  { %v5134_v51 = vadd.f32 1.0, %v4834_v55  ;;  %v4385_v23 = vsub.f32 1.0, %v4235_v31  ;;  %v3489_v17 = vmul.f32 %v7015_v15, %v3339_v59  ;;  %v3041_v30 = vadd.f32 -0.28449672, %v2891_v43 }
  0xbd   :  { %v5286_v8 = vmul.f32 %v5136_v58, %v6938_v29  ;;  %v4687_v26 = vsub.f32 0.0, %v4387_v14  ;;  %v3338_v29 = vadd.f32 0.2548296, %v3188_v62  ;;  %v2740_v3 = vadd.f32 1.4214138, %v2590_v42  ;;  %v654_v42 = vpop.permute.xlu0 %653 }
  0xbe   :  { %v5284_v52 = vmul.f32 %v5134_v51, %v6941_v10  ;;  %v4685_v63 = vsub.f32 0.0, %v4385_v23  ;;  %v1693_v9 = vmul.f32 0.3275911, %v7058_v40  ;;  %v4239_v49 = vmul.f32 %v5616_v27, %v3489_v17 }
  0xbf   :  { %5437 = vst.msk [vmem:[%s11234_s3 + $0x10] sm:$0xff] %vm5434_vm2, %v5286_v8  ;;  %v4837_v35 = vsel %vm4537_vm3, %v4387_v14, %v4687_v26  ;;  %v3191_v12 = vmul.f32 %v7043_v0, %v3041_v30  ;;  %v3488_v45 = vmul.f32 %v7028_v2, %v3338_v29  ;;  %v2890_v31 = vmul.f32 %v7060_v28, %v2740_v3 }
  0xc0   :  { %5435 = vst.msk [vmem:[%s11234_s3] sm:$0xff] %vm5434_vm2, %v5284_v52  ;;  %v5137_v10 = vadd.f32 1.0, %v4837_v35  ;;  %v4835_v15 = vsel %vm4535_vm4, %v4385_v23, %v4685_v63  ;;  %v1843_v22 = vadd.f32 1.0, %v1693_v9  ;;  %v4389_v58 = vsub.f32 1.0, %v4239_v49 }
  0xc1   :  { %v5135_v6 = vadd.f32 1.0, %v4835_v15  ;;  %v3341_v55 = vadd.f32 0.2548296, %v3191_v12  ;;  %v1094_v14 = vadd.f32 %v656_v47, %v6821_v18  ;;  %v4238_v51 = vmul.f32 %v5620_v53, %v3488_v45  ;;  %v660_v12 = vpop.permute.xlu1 %659 }
  0xc2   :  { %v5287_v39 = vmul.f32 %v5137_v10, %v6991_v61  ;;  %v3040_v46 = vadd.f32 -0.28449672, %v2890_v31  ;;  %5625 = vrcp.f32 %v1843_v22  ;;  %v4689_v2 = vsub.f32 0.0, %v4389_v58 }
  0xc3   :  { %v5285_v50 = vmul.f32 %v5135_v6, %v7008_v54  ;;  %v4989_v27 = vmul.f32 0.5, %v6909_v21  ;;  %v3491_v23 = vmul.f32 %v7043_v0, %v3341_v55  ;;  %v7112_v61 = vmul.f32 %v6710_v20, %v6492_v33 }
  0xc4   :  { %5438 = vst.msk [vmem:[%s11234_s3 + $0x18] sm:$0xff] %vm5434_vm2, %v5287_v39  ;;  %vm4539_vm5 = vcmp.ge.f32.partialorder %v6922_v44, 0.0  ;;  %v4388_v18 = vsub.f32 1.0, %v4238_v51  ;;  %v3190_v54 = vmul.f32 %v7060_v28, %v3040_v46  ;;  %v7121_v53 = vmul.f32 0.70710677, %v7048_v36  ;;  %v658_v51 = vpop.permute.xlu0 %657 }
  0xc5   :  { %5436 = vst.msk [vmem:[%s11234_s3 + $0x8] sm:$0xff] %vm5434_vm2, %v5285_v50  ;;  %v4839_v21 = vsel %vm4539_vm5, %v4389_v58, %v4689_v2  ;;  %v4988_v0 = vmul.f32 0.5, %v6925_v4  ;;  %v4241_v59 = vmul.f32 %v5622_v19, %v3491_v23  ;;  %v7125_v33 = vadd.f32 %v6742_v1, %v1094_v14 }
  0xc6   :  { %v5139_v43 = vadd.f32 1.0, %v4839_v21  ;;  %v4688_v8 = vsub.f32 0.0, %v4388_v18  ;;  %v3340_v26 = vadd.f32 0.2548296, %v3190_v54  ;;  %v1542_v62 = vand.u32 2147483647, %v7121_v53 }
  0xc7   :  { %vm4538_vm6 = vcmp.ge.f32.partialorder %v6944_v56, 0.0  ;;  %v4391_v44 = vsub.f32 1.0, %v4241_v59  ;;  %v3643_v52 = vmul.f32 %v7058_v40, %v7058_v40  ;;  %v7132_v63 = vmul.f32 0.70710677, %v7125_v33 }
  0xc8   :  { %v5289_v4 = vmul.f32 %v5139_v43, %v4989_v27  ;;  %v4838_v19 = vsel %vm4538_vm6, %v4388_v18, %v4688_v8  ;;  %v3490_v17 = vmul.f32 %v7060_v28, %v3340_v26  ;;  %v1692_v30 = vmul.f32 0.3275911, %v1542_v62 }
  0xc9   :  { %v5138_v35 = vadd.f32 1.0, %v4838_v19  ;;  %v4691_v29 = vsub.f32 0.0, %v4391_v44  ;;  %v1545_v3 = vand.u32 2147483647, %v7132_v63  ;;  %v1093_v9 = vadd.f32 %v654_v42, %v6825_v11 }
  0xca   :  { %5440 = vst.msk [vmem:[%s11234_s3 + $0x28] sm:$0xff] %vm5434_vm2, %v5289_v4  ;;  %vm4541_vm7 = vcmp.ge.f32.partialorder %v6960_v7, 0.0  ;;  %v4991_v56 = vmul.f32 0.5, %v6947_v5  ;;  %v4240_v40 = vmul.f32 %v7075_v60, %v3490_v17  ;;  %v1842_v47 = vadd.f32 1.0, %v1692_v30 }
  0xcb   :  { %v5288_v28 = vmul.f32 %v5138_v35, %v4988_v0  ;;  %v4841_v10 = vsel %vm4541_vm7, %v4391_v44, %v4691_v29  ;;  %v3793_v15 = vsub.f32 0.0, %v3643_v52  ;;  %v1695_v49 = vmul.f32 0.3275911, %v1545_v3  ;;  %v664_v0 = vpop.permute.xlu1 %663  ;;  %v6193_v29 = vld [vmem:[%s11233_s2 + $0xa0] sm:$0xff] }
  0xcc   :  { %v7144_v6 = vpop.eup %5625  ;;  %v5141_v11 = vadd.f32 1.0, %v4841_v10  ;;  %v4390_v45 = vsub.f32 1.0, %v4240_v40  ;;  %v4990_v31 = vmul.f32 0.5, %v6953_v13  ;;  %5627 = vrcp.f32 %v1842_v47 }
  0xcd   :  { %5439 = vst.msk [vmem:[%s11234_s3 + $0x20] sm:$0xff] %vm5434_vm2, %v5288_v28  ;;  %v2293_v5 = vmul.f32 1.0614054, %v7144_v6  ;;  %v3642_v7 = vmul.f32 %v1542_v62, %v1542_v62  ;;  %v1845_v60 = vadd.f32 1.0, %v1695_v49  ;;  %v7153_v22 = vadd.f32 %v6742_v1, %v1093_v9 }
  0xce   :  { %v5291_v39 = vmul.f32 %v5141_v11, %v4991_v56  ;;  %vm4540_vm8 = vcmp.ge.f32.partialorder %v6969_v16, 0.0  ;;  %v4690_v58 = vsub.f32 0.0, %v4390_v45  ;;  %v1096_v55 = vadd.f32 %v660_v12, %v6842_v24 }
  0xcf   :  { %v2443_v13 = vadd.f32 -1.4531521, %v2293_v5  ;;  %v3952_v14 = vmul.f32 1.442695, %v3793_v15  ;;  %v7158_v50 = vmul.f32 0.70710677, %v7153_v22  ;;  %v7162_v46 = vmul.f32 %v6710_v20, %v6497_v34 }
  0xd0   :  { %5442 = vst.msk [vmem:[%s11234_s3 + $0x38] sm:$0xff] %vm5434_vm2, %v5291_v39  ;;  %v4840_v2 = vsel %vm4540_vm8, %v4390_v45, %v4690_v58  ;;  %5629 = vrcp.f32 %v1845_v60  ;;  %v3645_v16 = vmul.f32 %v1545_v3, %v1545_v3  ;;  %v7169_v24 = vadd.f32 %v6742_v1, %v1096_v55 }
  0xd1   :  { %v5140_v27 = vadd.f32 1.0, %v4840_v2  ;;  %v2593_v23 = vmul.f32 %v7144_v6, %v2443_v13  ;;  %v3792_v18 = vsub.f32 0.0, %v3642_v7  ;;  %v1544_v54 = vand.u32 2147483647, %v7158_v50 }
  0xd2   :  { %v7174_v34 = vmul.f32 0.70710677, %v7169_v24  ;;  %v1095_v21 = vadd.f32 %v658_v51, %v6855_v32  ;;  %v7179_v59 = vmul.f32 %v6710_v20, %v6508_v37  ;;  %v7183_v43 = vmul.f32 %v6710_v20, %v6513_v38 }
  0xd3   :  { %v5290_v8 = vmul.f32 %v5140_v27, %v4990_v31  ;;  %v2743_v26 = vadd.f32 1.4214138, %v2593_v23  ;;  %v1694_v62 = vmul.f32 0.3275911, %v1544_v54  ;;  %v7187_v42 = vmul.f32 %v6710_v20, %v6524_v41  ;;  %v11239_v31 = vld [vmem:[#allocation7_spill] sm:$0xff] }
  0xd4   :  { %5631 = vpow2.f32 %v3952_v14  ;;  %v3795_v44 = vsub.f32 0.0, %v3645_v16  ;;  %v1547_v32 = vand.u32 2147483647, %v7174_v34  ;;  %v7191_v52 = vadd.f32 %v6742_v1, %v1095_v21 }
  0xd5   :  { %5441 = vst.msk [vmem:[%s11234_s3 + $0x30] sm:$0xff] %vm5434_vm2, %v5290_v8  ;;  %v2893_v37 = vmul.f32 %v7144_v6, %v2743_v26  ;;  %v3950_v38 = vmul.f32 1.442695, %v3792_v18  ;;  %v1844_v4 = vadd.f32 1.0, %v1694_v62  ;;  %v1098_v19 = vadd.f32 %v664_v0, %v6882_v48 }
  0xd6   :  { %v7199_v41 = vpop.eup %5627  ;;  %v7202_v17 = vmul.f32 0.5, %v7025_v25  ;;  %v1697_v30 = vmul.f32 0.3275911, %v1547_v32  ;;  %v7205_v35 = vmul.f32 0.70710677, %v7191_v52  ;;  %v7211_v3 = vmul.f32 %v6193_v29, %v6710_v20  ;;  %v662_v25 = vpop.permute.xlu0 %661 }
  0xd7   :  { %v3043_v9 = vadd.f32 -0.28449672, %v2893_v37  ;;  %v2292_v56 = vmul.f32 1.0614054, %v7199_v41  ;;  %v7215_v48 = vmul.f32 0.5, %v7048_v36  ;;  %5633 = vrcp.f32 %v1844_v4 }
  0xd8   :  { %v3956_v40 = vmul.f32 1.442695, %v3795_v44  ;;  %v3644_v47 = vmul.f32 %v1544_v54, %v1544_v54  ;;  %v1847_v28 = vadd.f32 1.0, %v1697_v30  ;;  %v1546_v10 = vand.u32 2147483647, %v7205_v35 }
  0xd9   :  { %v3193_v15 = vmul.f32 %v7144_v6, %v3043_v9  ;;  %v2442_v49 = vadd.f32 -1.4531521, %v2292_v56  ;;  %5635 = vpow2.f32 %v3950_v38  ;;  %v7220_v12 = vadd.f32 %v6742_v1, %v1098_v19 }
  0xda   :  { %v7222_v11 = vpop.eup %5629  ;;  %v7225_v45 = vmul.f32 0.5, %v7125_v33  ;;  %5637 = vrcp.f32 %v1847_v28  ;;  %v1696_v36 = vmul.f32 0.3275911, %v1546_v10  ;;  %v1097_v5 = vadd.f32 %v662_v25, %v11239_v31 }
  0xdb   :  { %v3343_v7 = vadd.f32 0.2548296, %v3193_v15  ;;  %v2592_v60 = vmul.f32 %v7199_v41, %v2442_v49  ;;  %v2295_v39 = vmul.f32 1.0614054, %v7222_v11  ;;  %v7231_v58 = vmul.f32 0.70710677, %v7220_v12 }
  0xdc   :  { %vm4543_vm9 = vcmp.ge.f32.partialorder %v7041_v57, 0.0  ;;  %5639 = vpow2.f32 %v3956_v40  ;;  %v3794_v55 = vsub.f32 0.0, %v3644_v47  ;;  %v3647_v13 = vmul.f32 %v1547_v32, %v1547_v32 }
  0xdd   :  { %v1846_v14 = vadd.f32 1.0, %v1696_v36  ;;  %v3493_v33 = vmul.f32 %v7144_v6, %v3343_v7  ;;  %v2742_v51 = vadd.f32 1.4214138, %v2592_v60  ;;  %v2445_v2 = vadd.f32 -1.4531521, %v2295_v39  ;;  %v668_v60 = vpop.permute.xlu1 %667 }
  0xde   :  { %v1549_v16 = vand.u32 2147483647, %v7231_v58  ;;  %v5632_v27 = vpop.eup %5631  ;;  %v7237_v23 = vmul.f32 0.5, %v7153_v22  ;;  %v3646_v18 = vmul.f32 %v1546_v10, %v1546_v10  ;;  %v7240_v54 = vadd.f32 %v6742_v1, %v1097_v5 }
  0xdf   :  { %5641 = vrcp.f32 %v1846_v14  ;;  %v4243_v21 = vmul.f32 %v5632_v27, %v3493_v33  ;;  %v2892_v0 = vmul.f32 %v7199_v41, %v2742_v51  ;;  %v2595_v8 = vmul.f32 %v7222_v11, %v2445_v2 }
  0xe0   :  { %v1699_v26 = vmul.f32 0.3275911, %v1549_v16  ;;  %v3954_v6 = vmul.f32 1.442695, %v3794_v55  ;;  %v3797_v62 = vsub.f32 0.0, %v3647_v13  ;;  %v7245_v44 = vmul.f32 0.5, %v7169_v24 }
  0xe1   :  { %v7248_v32 = vmul.f32 0.70710677, %v7240_v54  ;;  %v7250_v22 = vpop.eup %5633  ;;  %v4393_v37 = vsub.f32 1.0, %v4243_v21  ;;  %v3042_v38 = vadd.f32 -0.28449672, %v2892_v0  ;;  %v3796_v29 = vsub.f32 0.0, %v3646_v18 }
  0xe2   :  { %v2745_v4 = vadd.f32 1.4214138, %v2595_v8  ;;  %v1849_v19 = vadd.f32 1.0, %v1699_v26  ;;  %v2294_v30 = vmul.f32 1.0614054, %v7250_v22  ;;  %v3649_v9 = vmul.f32 %v1549_v16, %v1549_v16 }
  0xe3   :  { %v1548_v56 = vand.u32 2147483647, %v7248_v32  ;;  %v5636_v25 = vpop.eup %5635  ;;  %v4693_v40 = vsub.f32 0.0, %v4393_v37  ;;  %v3192_v24 = vmul.f32 %v7199_v41, %v3042_v38  ;;  %v3960_v15 = vmul.f32 1.442695, %v3797_v62 }
  0xe4   :  { %v2895_v47 = vmul.f32 %v7222_v11, %v2745_v4  ;;  %5643 = vrcp.f32 %v1849_v19  ;;  %v7256_v28 = vpop.eup %5637  ;;  %v2444_v10 = vadd.f32 -1.4531521, %v2294_v30  ;;  %vm4542_vm10 = vcmp.ge.f32.partialorder %v7121_v53, 0.0 }
  0xe5   :  { %5645 = vpow2.f32 %v3954_v6  ;;  %v1698_v49 = vmul.f32 0.3275911, %v1548_v56  ;;  %v4843_v36 = vsel %vm4543_vm9, %v4393_v37, %v4693_v40  ;;  %v3342_v31 = vadd.f32 0.2548296, %v3192_v24 }
  0xe6   :  { %v3045_v5 = vadd.f32 -0.28449672, %v2895_v47  ;;  %v2297_v7 = vmul.f32 1.0614054, %v7256_v28  ;;  %v5640_v39 = vpop.eup %5639  ;;  %v5143_v55 = vadd.f32 1.0, %v4843_v36  ;;  %v2594_v13 = vmul.f32 %v7250_v22, %v2444_v10 }
  0xe7   :  { %v3799_v14 = vsub.f32 0.0, %v3649_v9  ;;  %v1848_v33 = vadd.f32 1.0, %v1698_v49  ;;  %v3492_v51 = vmul.f32 %v7199_v41, %v3342_v31  ;;  %v3958_v57 = vmul.f32 1.442695, %v3796_v29 }
  0xe8   :  { %v3195_v2 = vmul.f32 %v7222_v11, %v3045_v5  ;;  %v2447_v16 = vadd.f32 -1.4531521, %v2297_v7  ;;  %v5293_v18 = vmul.f32 %v5143_v55, %v7202_v17  ;;  %v2744_v21 = vadd.f32 1.4214138, %v2594_v13 }
  0xe9   :  { %v7265_v27 = vpop.eup %5641  ;;  %5647 = vrcp.f32 %v1848_v33  ;;  %v1100_v0 = vadd.f32 %v668_v60, %v7112_v61  ;;  %v4242_v8 = vmul.f32 %v5636_v25, %v3492_v51  ;;  %vm4545_vm11 = vcmp.ge.f32.partialorder %v7132_v63, 0.0  ;;  %v666_v60 = vpop.permute.xlu0 %665 }
  0xea   :  { %v3345_v26 = vadd.f32 0.2548296, %v3195_v2  ;;  %v2597_v6 = vmul.f32 %v7256_v28, %v2447_v16  ;;  %v2296_v62 = vmul.f32 1.0614054, %v7265_v27  ;;  %5444 = vst.msk [vmem:[%s11234_s3 + $0x48] sm:$0xff] %vm5434_vm2, %v5293_v18  ;;  %v2894_v41 = vmul.f32 %v7250_v22, %v2744_v21 }
  0xeb   :  { %5649 = vpow2.f32 %v3960_v15  ;;  %v3964_v17 = vmul.f32 1.442695, %v3799_v14  ;;  %v7278_v37 = vadd.f32 %v6742_v1, %v1100_v0  ;;  %v4392_v61 = vsub.f32 1.0, %v4242_v8 }
  0xec   :  { %v3495_v38 = vmul.f32 %v7222_v11, %v3345_v26  ;;  %v2747_v4 = vadd.f32 1.4214138, %v2597_v6  ;;  %v2446_v19 = vadd.f32 -1.4531521, %v2296_v62  ;;  %v3044_v30 = vadd.f32 -0.28449672, %v2894_v41 }
  0xed   :  { %5651 = vpow2.f32 %v3958_v57  ;;  %v3648_v29 = vmul.f32 %v1548_v56, %v1548_v56  ;;  %v7282_v9 = vmul.f32 0.70710677, %v7278_v37  ;;  %v4692_v40 = vsub.f32 0.0, %v4392_v61 }
  0xee   :  { %v7284_v25 = vpop.eup %5643  ;;  %v4245_v24 = vmul.f32 %v5640_v39, %v3495_v38  ;;  %v2897_v47 = vmul.f32 %v7256_v28, %v2747_v4  ;;  %v2596_v10 = vmul.f32 %v7265_v27, %v2446_v19  ;;  %v3194_v49 = vmul.f32 %v7250_v22, %v3044_v30  ;;  %v672_v19 = vpop.permute.xlu1 %671 }
  0xef   :  { %v5646_v15 = vpop.eup %5645  ;;  %v2299_v11 = vmul.f32 1.0614054, %v7284_v25  ;;  %5653 = vpow2.f32 %v3964_v17  ;;  %v1551_v36 = vand.u32 2147483647, %v7282_v9  ;;  %v4842_v56 = vsel %vm4542_vm10, %v4392_v61, %v4692_v40 }
  0xf0   :  { %v4395_v31 = vsub.f32 1.0, %v4245_v24  ;;  %v3047_v5 = vadd.f32 -0.28449672, %v2897_v47  ;;  %v2746_v7 = vadd.f32 1.4214138, %v2596_v10  ;;  %v5142_v39 = vadd.f32 1.0, %v4842_v56 }
  0xf1   :  { %v3344_v55 = vadd.f32 0.2548296, %v3194_v49  ;;  %v2449_v13 = vadd.f32 -1.4531521, %v2299_v11  ;;  %v3798_v14 = vsub.f32 0.0, %v3648_v29  ;;  %vm4544_vm12 = vcmp.ge.f32.partialorder %v7158_v50, 0.0 }
  0xf2   :  { %v4695_v33 = vsub.f32 0.0, %v4395_v31  ;;  %v3197_v51 = vmul.f32 %v7256_v28, %v3047_v5  ;;  %v2896_v2 = vmul.f32 %v7265_v27, %v2746_v7  ;;  %v1701_v16 = vmul.f32 0.3275911, %v1551_v36 }
  0xf3   :  { %v7296_v57 = vpop.eup %5647  ;;  %v5292_v53 = vmul.f32 %v5142_v39, %v7215_v48  ;;  %v3494_v18 = vmul.f32 %v7250_v22, %v3344_v55  ;;  %v2599_v21 = vmul.f32 %v7284_v25, %v2449_v13  ;;  %v1099_v0 = vadd.f32 %v666_v60, %v7162_v46 }
  0xf4   :  { %v4845_v8 = vsel %vm4545_vm11, %v4395_v31, %v4695_v33  ;;  %v3347_v26 = vadd.f32 0.2548296, %v3197_v51  ;;  %v3046_v6 = vadd.f32 -0.28449672, %v2896_v2  ;;  %v2298_v62 = vmul.f32 1.0614054, %v7296_v57 }
  0xf5   :  { %v5650_v41 = vpop.eup %5649  ;;  %5443 = vst.msk [vmem:[%s11234_s3 + $0x40] sm:$0xff] %vm5434_vm2, %v5292_v53  ;;  %v5145_v48 = vadd.f32 1.0, %v4845_v8  ;;  %v4244_v17 = vmul.f32 %v5646_v15, %v3494_v18  ;;  %v2749_v22 = vadd.f32 1.4214138, %v2599_v21  ;;  %v1851_v61 = vadd.f32 1.0, %v1701_v16 }
  0xf6   :  { %v3497_v38 = vmul.f32 %v7256_v28, %v3347_v26  ;;  %v3196_v46 = vmul.f32 %v7265_v27, %v3046_v6  ;;  %v2448_v63 = vadd.f32 -1.4531521, %v2298_v62  ;;  %v3962_v4 = vmul.f32 1.442695, %v3798_v14 }
  0xf7   :  { %v5652_v30 = vpop.eup %5651  ;;  %v5295_v29 = vmul.f32 %v5145_v48, %v7225_v45  ;;  %v4394_v40 = vsub.f32 1.0, %v4244_v17  ;;  %v2899_v24 = vmul.f32 %v7284_v25, %v2749_v22  ;;  %5655 = vrcp.f32 %v1851_v61 }
  0xf8   :  { %v4247_v47 = vmul.f32 %v5650_v41, %v3497_v38  ;;  %vm4547_vm13 = vcmp.ge.f32.partialorder %v7174_v34, 0.0  ;;  %v3346_v10 = vadd.f32 0.2548296, %v3196_v46  ;;  %v2598_v15 = vmul.f32 %v7296_v57, %v2448_v63 }
  0xf9   :  { %v5654_v49 = vpop.eup %5653  ;;  %5446 = vst.msk [vmem:[%s11234_s3 + $0x58] sm:$0xff] %vm5434_vm2, %v5295_v29  ;;  %v4694_v28 = vsub.f32 0.0, %v4394_v40  ;;  %v3049_v11 = vadd.f32 -0.28449672, %v2899_v24  ;;  %v7320_v45 = vadd.f32 %v6742_v1, %v1099_v0  ;;  %v1102_v56 = vadd.f32 %v672_v19, %v7179_v59  ;;  %v670_v0 = vpop.permute.xlu0 %669 }
  0xfa   :  { %v4397_v31 = vsub.f32 1.0, %v4247_v47  ;;  %v3496_v5 = vmul.f32 %v7265_v27, %v3346_v10  ;;  %v2748_v7 = vadd.f32 1.4214138, %v2598_v15  ;;  %5657 = vpow2.f32 %v3962_v4  ;;  %v676_v47 = vpop.permute.xlu1 %675 }
  0xfb   :  { %v4844_v60 = vsel %vm4544_vm12, %v4394_v40, %v4694_v28  ;;  %v3199_v39 = vmul.f32 %v7284_v25, %v3049_v11  ;;  %v3651_v55 = vmul.f32 %v1551_v36, %v1551_v36  ;;  %v7328_v13 = vmul.f32 0.70710677, %v7320_v45 }
  0xfc   :  { %v5144_v14 = vadd.f32 1.0, %v4844_v60  ;;  %v4697_v33 = vsub.f32 0.0, %v4397_v31  ;;  %v4246_v51 = vmul.f32 %v5652_v30, %v3496_v5  ;;  %v2898_v2 = vmul.f32 %v7296_v57, %v2748_v7 }
  0xfd   :  { %v4996_v59 = vmul.f32 0.5, %v7191_v52  ;;  %v3349_v16 = vadd.f32 0.2548296, %v3199_v39  ;;  %v1550_v27 = vand.u32 2147483647, %v7328_v13  ;;  %v7334_v53 = vadd.f32 %v6742_v1, %v1102_v56  ;;  %v674_v10 = vpop.permute.xlu0 %673 }
  0xfe   :  { %v5294_v50 = vmul.f32 %v5144_v14, %v7237_v23  ;;  %v4847_v36 = vsel %vm4547_vm13, %v4397_v31, %v4697_v33  ;;  %v4396_v18 = vsub.f32 1.0, %v4246_v51  ;;  %v3048_v21 = vadd.f32 -0.28449672, %v2898_v2 }
  0xff   :  { %v5147_v8 = vadd.f32 1.0, %v4847_v36  ;;  %vm4546_vm14 = vcmp.ge.f32.partialorder %v7205_v35, 0.0  ;;  %v3499_v26 = vmul.f32 %v7284_v25, %v3349_v16  ;;  %v1700_v52 = vmul.f32 0.3275911, %v1550_v27 }
 0x100   :  { %5445 = vst.msk [vmem:[%s11234_s3 + $0x50] sm:$0xff] %vm5434_vm2, %v5294_v50  ;;  %v4696_v6 = vsub.f32 0.0, %v4396_v18  ;;  %v3198_v23 = vmul.f32 %v7296_v57, %v3048_v21  ;;  %v3801_v62 = vsub.f32 0.0, %v3651_v55  ;;  %v7347_v34 = vmul.f32 0.70710677, %v7334_v53 }
 0x101   :  { %v7349_v41 = vpop.eup %5655  ;;  %v5297_v48 = vmul.f32 %v5147_v8, %v7245_v44  ;;  %v4249_v35 = vmul.f32 %v5654_v49, %v3499_v26  ;;  %v1850_v17 = vadd.f32 1.0, %v1700_v52  ;;  %v3650_v25 = vmul.f32 %v1550_v27, %v1550_v27 }
 0x102   :  { %v4846_v22 = vsel %vm4546_vm14, %v4396_v18, %v4696_v6  ;;  %v3348_v61 = vadd.f32 0.2548296, %v3198_v23  ;;  %v2301_v38 = vmul.f32 1.0614054, %v7349_v41  ;;  %v1553_v46 = vand.u32 2147483647, %v7347_v34 }
 0x103   :  { %5448 = vst.msk [vmem:[%s11234_s3 + $0x68] sm:$0xff] %vm5434_vm2, %v5297_v48  ;;  %v5146_v63 = vadd.f32 1.0, %v4846_v22  ;;  %v4399_v4 = vsub.f32 1.0, %v4249_v35  ;;  %5659 = vrcp.f32 %v1850_v17  ;;  %v1101_v19 = vadd.f32 %v670_v0, %v7183_v43 }
 0x104   :  { %v5658_v44 = vpop.eup %5657  ;;  %v4999_v30 = vmul.f32 0.5, %v7220_v12  ;;  %v3498_v29 = vmul.f32 %v7296_v57, %v3348_v61  ;;  %v2451_v40 = vadd.f32 -1.4531521, %v2301_v38  ;;  %v1703_v24 = vmul.f32 0.3275911, %v1553_v46 }
 0x105   :  { %v5296_v15 = vmul.f32 %v5146_v63, %v4996_v59  ;;  %vm4549_vm15 = vcmp.ge.f32.partialorder %v7231_v58, 0.0  ;;  %v4699_v49 = vsub.f32 0.0, %v4399_v4  ;;  %v3968_v28 = vmul.f32 1.442695, %v3801_v62 }
 0x106   :  { %v4248_v11 = vmul.f32 %v5658_v44, %v3498_v29  ;;  %v2601_v56 = vmul.f32 %v7349_v41, %v2451_v40  ;;  %v3800_v31 = vsub.f32 0.0, %v3650_v25  ;;  %v1853_v5 = vadd.f32 1.0, %v1703_v24 }
 0x107   :  { %5447 = vst.msk [vmem:[%s11234_s3 + $0x60] sm:$0xff] %vm5434_vm2, %v5296_v15  ;;  %v4849_v43 = vsel %vm4549_vm15, %v4399_v4, %v4699_v49  ;;  %v7368_v12 = vadd.f32 %v6742_v1, %v1101_v19  ;;  %v1104_v57 = vadd.f32 %v676_v47, %v7187_v42  ;;  %v1103_v58 = vadd.f32 %v674_v10, %v7211_v3 }
 0x108   :  { %v5149_v7 = vadd.f32 1.0, %v4849_v43  ;;  %v4398_v60 = vsub.f32 1.0, %v4248_v11  ;;  %v2751_v39 = vadd.f32 1.4214138, %v2601_v56  ;;  %5661 = vrcp.f32 %v1853_v5  ;;  %v680_v11 = vpop.permute.xlu1 %679  ;;  %v111_v56 = vld [vmem:[%s11233_s2 + $0x280] sm:$0xff] }
 0x109   :  { %5663 = vpow2.f32 %v3968_v28  ;;  %v3653_v55 = vmul.f32 %v1553_v46, %v1553_v46  ;;  %v7373_v14 = vmul.f32 0.70710677, %v7368_v12  ;;  %v7376_v33 = vadd.f32 %v6742_v1, %v1104_v57  ;;  %v678_v57 = vpop.permute.xlu0 %677 }
 0x10a   :  { %v5299_v51 = vmul.f32 %v5149_v7, %v4999_v30  ;;  %v4698_v2 = vsub.f32 0.0, %v4398_v60  ;;  %v2901_v59 = vmul.f32 %v7349_v41, %v2751_v39  ;;  %v7380_v42 = vadd.f32 %v6742_v1, %v1103_v58 }
 0x10b   :  { %vm4548_vm0 = vcmp.ge.f32.partialorder %v7248_v32, 0.0  ;;  %v1552_v3 = vand.u32 2147483647, %v7373_v14  ;;  %v7385_v16 = vmul.f32 0.70710677, %v7376_v33  ;;  %v4998_v32 = vmul.f32 0.5, %v7240_v54 }
 0x10c   :  { %5450 = vst.msk [vmem:[%s11234_s3 + $0x78] sm:$0xff] %vm5434_vm2, %v5299_v51  ;;  %v4848_v27 = vsel %vm4548_vm0, %v4398_v60, %v4698_v2  ;;  %v3051_v50 = vadd.f32 -0.28449672, %v2901_v59  ;;  %v3966_v36 = vmul.f32 1.442695, %v3800_v31  ;;  %v3803_v23 = vsub.f32 0.0, %v3653_v55 }
 0x10d   :  { %v7392_v18 = vmul.f32 0.70710677, %v7380_v42  ;;  %v7394_v21 = vpop.eup %5659  ;;  %v5148_v0 = vadd.f32 1.0, %v4848_v27  ;;  %v1702_v8 = vmul.f32 0.3275911, %v1552_v3  ;;  %v3652_v17 = vmul.f32 %v1552_v3, %v1552_v3  ;;  %v6195_v60 = vld [vmem:[%s11233_s2 + $0xb0] sm:$0xff] }
 0x10e   :  { %v1555_v26 = vand.u32 2147483647, %v7385_v16  ;;  %v3201_v52 = vmul.f32 %v7349_v41, %v3051_v50  ;;  %v2300_v6 = vmul.f32 1.0614054, %v7394_v21  ;;  %v5001_v54 = vmul.f32 0.5, %v7278_v37  ;;  %v11240_v55 = vld [vmem:[#allocation6_spill] sm:$0xff] }
 0x10f   :  { %v1554_v62 = vand.u32 2147483647, %v7392_v18  ;;  %v5298_v48 = vmul.f32 %v5148_v0, %v4998_v32  ;;  %v1852_v35 = vadd.f32 1.0, %v1702_v8  ;;  %v3972_v44 = vmul.f32 1.442695, %v3803_v23  ;;  %v114_v2 = vld [vmem:[%s11233_s2 + $0x298] sm:$0xff] }
 0x110   :  { %v1705_v25 = vmul.f32 0.3275911, %v1555_v26  ;;  %v3351_v22 = vadd.f32 0.2548296, %v3201_v52  ;;  %v2450_v61 = vadd.f32 -1.4531521, %v2300_v6  ;;  %v3655_v49 = vmul.f32 %v1555_v26, %v1555_v26 }
 0x111   :  { %v1704_v38 = vmul.f32 0.3275911, %v1554_v62  ;;  %5449 = vst.msk [vmem:[%s11234_s3 + $0x70] sm:$0xff] %vm5434_vm2, %v5298_v48  ;;  %5665 = vrcp.f32 %v1852_v35  ;;  %vm4551_vm1 = vcmp.ge.f32.partialorder %v7282_v9, 0.0  ;;  %v3802_v24 = vsub.f32 0.0, %v3652_v17 }
 0x112   :  { %v1855_v46 = vadd.f32 1.0, %v1705_v25  ;;  %v7406_v63 = vpop.eup %5661  ;;  %v3501_v4 = vmul.f32 %v7349_v41, %v3351_v22  ;;  %v2600_v19 = vmul.f32 %v7394_v21, %v2450_v61  ;;  %5667 = vpow2.f32 %v3966_v36  ;;  %v112_v41 = vld [vmem:[%s11233_s2 + $0x288] sm:$0xff] }
 0x113   :  { %v1854_v30 = vadd.f32 1.0, %v1704_v38  ;;  %v5664_v29 = vpop.eup %5663  ;;  %v2303_v40 = vmul.f32 1.0614054, %v7406_v63  ;;  %v7413_v37 = vmul.f32 0.5, %v7320_v45  ;;  %v3654_v28 = vmul.f32 %v1554_v62, %v1554_v62  ;;  %v6194_v45 = vld [vmem:[%s11233_s2 + $0xb8] sm:$0xff] }
 0x114   :  { %v4251_v47 = vmul.f32 %v5664_v29, %v3501_v4  ;;  %v2750_v10 = vadd.f32 1.4214138, %v2600_v19  ;;  %5669 = vrcp.f32 %v1855_v46  ;;  %v205_v43 = vmul.f32 %v6194_v45, %v6710_v20 }
 0x115   :  { %v2453_v15 = vadd.f32 -1.4531521, %v2303_v40  ;;  %5671 = vrcp.f32 %v1854_v30  ;;  %v3970_v7 = vmul.f32 1.442695, %v3802_v24  ;;  %v204_v39 = vmul.f32 %v6195_v60, %v6710_v20 }
 0x116   :  { %v4401_v31 = vsub.f32 1.0, %v4251_v47  ;;  %v2900_v5 = vmul.f32 %v7394_v21, %v2750_v10  ;;  %5673 = vpow2.f32 %v3972_v44  ;;  %v414_v51 = vmul.f32 %v11240_v55, %v112_v41 }
 0x117   :  { %v2603_v58 = vmul.f32 %v7406_v63, %v2453_v15  ;;  %v1106_v27 = vadd.f32 %v680_v11, %v205_v43  ;;  %v413_v50 = vmul.f32 %v11240_v55, %v111_v56  ;;  %v3805_v32 = vsub.f32 0.0, %v3655_v49 }
 0x118   :  { %v4701_v59 = vsub.f32 0.0, %v4401_v31  ;;  %v3050_v3 = vadd.f32 -0.28449672, %v2900_v5  ;;  %v3804_v0 = vsub.f32 0.0, %v3654_v28  ;;  %v1105_v8 = vadd.f32 %v678_v57, %v204_v39  ;;  %795 = vrot.lane.b32.xlu1 %v414_v51, %s6337_s25  ;;  %v6197_v57 = vld [vmem:[%s11233_s2 + $0xc0] sm:$0xff] }
 0x119   :  { %v2753_v36 = vadd.f32 1.4214138, %v2603_v58  ;;  %v7441_v6 = vadd.f32 %v6742_v1, %v1106_v27  ;;  %793 = vrot.lane.b32.xlu0 %v413_v50, %s6337_s25  ;;  %v416_v23 = vmul.f32 %v11240_v55, %v114_v2  ;;  %v7449_v17 = vmul.f32 0.5, %v7334_v53  ;;  %v684_v2 = vpop.permute.xlu1 %683  ;;  %v682_v50 = vpop.permute.xlu0 %681 }
 0x11a   :  { %v4851_v26 = vsel %vm4551_vm1, %v4401_v31, %v4701_v59  ;;  %v3200_v52 = vmul.f32 %v7394_v21, %v3050_v3  ;;  %v7452_v9 = vadd.f32 %v6742_v1, %v1105_v8  ;;  %5675 = vpow2.f32 %v3970_v7 }
 0x11b   :  { %v7445_v62 = vpop.eup %5665  ;;  %v5151_v48 = vadd.f32 1.0, %v4851_v26  ;;  %v2903_v35 = vmul.f32 %v7406_v63, %v2753_v36  ;;  %v7456_v61 = vmul.f32 0.70710677, %v7441_v6  ;;  %vm4550_vm3 = vcmp.ge.f32.partialorder %v7328_v13, 0.0 }
 0x11c   :  { %v3350_v25 = vadd.f32 0.2548296, %v3200_v52  ;;  %v2302_v22 = vmul.f32 1.0614054, %v7445_v62  ;;  %v5668_v38 = vpop.eup %5667  ;;  %v3976_v19 = vmul.f32 1.442695, %v3805_v32  ;;  %799 = vrot.lane.b32.xlu1 %v416_v23, %s6337_s25  ;;  %v206_v58 = vmul.f32 %v6197_v57, %v6710_v20 }
 0x11d   :  { %v5301_v46 = vmul.f32 %v5151_v48, %v5001_v54  ;;  %v3053_v4 = vadd.f32 -0.28449672, %v2903_v35  ;;  %v7460_v44 = vmul.f32 0.70710677, %v7452_v9  ;;  %v3974_v40 = vmul.f32 1.442695, %v3804_v0 }
 0x11e   :  { %v7463_v53 = vpop.eup %5669  ;;  %v3500_v30 = vmul.f32 %v7394_v21, %v3350_v25  ;;  %v2452_v29 = vadd.f32 -1.4531521, %v2302_v22  ;;  %v1557_v24 = vand.u32 2147483647, %v7456_v61  ;;  %v6196_v21 = vld [vmem:[%s11233_s2 + $0xc8] sm:$0xff]  ;;  %5677 = vpow2.f32 %v3976_v19 }
 0x11f   :  { %v7467_v47 = vpop.eup %5671  ;;  %5452 = vst.msk [vmem:[%s11234_s3 + $0x88] sm:$0xff] %vm5434_vm2, %v5301_v46  ;;  %v3203_v54 = vmul.f32 %v7406_v63, %v3053_v4  ;;  %v2305_v10 = vmul.f32 1.0614054, %v7463_v53  ;;  %v1556_v41 = vand.u32 2147483647, %v7460_v44  ;;  %v207_v15 = vmul.f32 %v6196_v21, %v6710_v20 }
 0x120   :  { %v5674_v49 = vpop.eup %5673  ;;  %v4250_v28 = vmul.f32 %v5668_v38, %v3500_v30  ;;  %v2602_v11 = vmul.f32 %v7445_v62, %v2452_v29  ;;  %v2304_v56 = vmul.f32 1.0614054, %v7467_v47  ;;  %v1707_v31 = vmul.f32 0.3275911, %v1557_v24 }
 0x121   :  { %v3353_v5 = vadd.f32 0.2548296, %v3203_v54  ;;  %v2455_v45 = vadd.f32 -1.4531521, %v2305_v10  ;;  %v1706_v43 = vmul.f32 0.3275911, %v1556_v41  ;;  %v1108_v52 = vadd.f32 %v684_v2, %v207_v15 }
 0x122   :  { %v4400_v7 = vsub.f32 1.0, %v4250_v28  ;;  %v2752_v60 = vadd.f32 1.4214138, %v2602_v11  ;;  %v2454_v39 = vadd.f32 -1.4531521, %v2304_v56  ;;  %v1857_v51 = vadd.f32 1.0, %v1707_v31 }
 0x123   :  { %v3503_v59 = vmul.f32 %v7406_v63, %v3353_v5  ;;  %v2605_v3 = vmul.f32 %v7463_v53, %v2455_v45  ;;  %v1856_v27 = vadd.f32 1.0, %v1706_v43  ;;  %v1107_v25 = vadd.f32 %v682_v50, %v206_v58 }
 0x124   :  { %v4700_v36 = vsub.f32 0.0, %v4400_v7  ;;  %v2902_v32 = vmul.f32 %v7445_v62, %v2752_v60  ;;  %v2604_v0 = vmul.f32 %v7467_v47, %v2454_v39  ;;  %5679 = vrcp.f32 %v1857_v51  ;;  %v5676_v23 = vpop.eup %5675 }
 0x125   :  { %v4253_v8 = vmul.f32 %v5674_v49, %v3503_v59  ;;  %v2755_v26 = vadd.f32 1.4214138, %v2605_v3  ;;  %5681 = vrcp.f32 %v1856_v27  ;;  %vm4553_vm4 = vcmp.ge.f32.partialorder %v7347_v34, 0.0 }
 0x126   :  { %v4850_v48 = vsel %vm4550_vm3, %v4400_v7, %v4700_v36  ;;  %v3052_v63 = vadd.f32 -0.28449672, %v2902_v32  ;;  %v2754_v35 = vadd.f32 1.4214138, %v2604_v0  ;;  %5683 = vpow2.f32 %v3974_v40 }
 0x127   :  { %v5150_v22 = vadd.f32 1.0, %v4850_v48  ;;  %v4403_v38 = vsub.f32 1.0, %v4253_v8  ;;  %v2905_v46 = vmul.f32 %v7463_v53, %v2755_v26  ;;  %v3657_v30 = vmul.f32 %v1557_v24, %v1557_v24 }
 0x128   :  { %v3202_v4 = vmul.f32 %v7445_v62, %v3052_v63  ;;  %v2904_v19 = vmul.f32 %v7467_v47, %v2754_v35  ;;  %v7498_v10 = vadd.f32 %v6742_v1, %v1108_v52  ;;  %v5002_v15 = vmul.f32 0.5, %v7368_v12  ;;  %v5678_v5 = vpop.eup %5677 }
 0x129   :  { %v5300_v29 = vmul.f32 %v5150_v22, %v7413_v37  ;;  %v4703_v54 = vsub.f32 0.0, %v4403_v38  ;;  %v3055_v13 = vadd.f32 -0.28449672, %v2905_v46  ;;  %v7502_v40 = vadd.f32 %v6742_v1, %v1107_v25 }
 0x12a   :  { %v3352_v21 = vadd.f32 0.2548296, %v3202_v4  ;;  %v3054_v49 = vadd.f32 -0.28449672, %v2904_v19  ;;  %vm4552_vm5 = vcmp.ge.f32.partialorder %v7373_v14, 0.0  ;;  %v3656_v24 = vmul.f32 %v1556_v41, %v1556_v41 }
 0x12b   :  { %5451 = vst.msk [vmem:[%s11234_s3 + $0x80] sm:$0xff] %vm5434_vm2, %v5300_v29  ;;  %v4853_v34 = vsel %vm4553_vm4, %v4403_v38, %v4703_v54  ;;  %v3205_v37 = vmul.f32 %v7463_v53, %v3055_v13  ;;  %v7511_v28 = vmul.f32 0.70710677, %v7498_v10  ;;  %v7515_v56 = vmul.f32 0.5, %v7376_v33 }
 0x12c   :  { %v5153_v11 = vadd.f32 1.0, %v4853_v34  ;;  %v3502_v12 = vmul.f32 %v7445_v62, %v3352_v21  ;;  %v3204_v31 = vmul.f32 %v7467_v47, %v3054_v49  ;;  %v7519_v43 = vmul.f32 0.5, %v7380_v42  ;;  %v113_v21 = vld [vmem:[%s11233_s2 + $0x290] sm:$0xff] }
 0x12d   :  { %v3355_v45 = vadd.f32 0.2548296, %v3205_v37  ;;  %v3807_v57 = vsub.f32 0.0, %v3657_v30  ;;  %v1559_v58 = vand.u32 2147483647, %v7511_v28  ;;  %vm4555_vm6 = vcmp.ge.f32.partialorder %v7385_v16, 0.0 }
 0x12e   :  { %v7522_v41 = vpop.eup %5679  ;;  %v5303_v7 = vmul.f32 %v5153_v11, %v7449_v17  ;;  %v4252_v60 = vmul.f32 %v5676_v23, %v3502_v12  ;;  %v3354_v62 = vadd.f32 0.2548296, %v3204_v31  ;;  %v7527_v33 = vmul.f32 0.70710677, %v7502_v40  ;;  %v688_v31 = vpop.permute.xlu1 %687 }
 0x12f   :  { %v7529_v39 = vpop.eup %5681  ;;  %v3505_v51 = vmul.f32 %v7463_v53, %v3355_v45  ;;  %vm4554_vm7 = vcmp.ge.f32.partialorder %v7392_v18, 0.0  ;;  %v2307_v42 = vmul.f32 1.0614054, %v7522_v41  ;;  %v3806_v2 = vsub.f32 0.0, %v3656_v24  ;;  %v6198_v18 = vld [vmem:[%s11233_s2 + $0xd8] sm:$0xff] }
 0x130   :  { %v1709_v59 = vmul.f32 0.3275911, %v1559_v58  ;;  %5454 = vst.msk [vmem:[%s11234_s3 + $0x98] sm:$0xff] %vm5434_vm2, %v5303_v7  ;;  %v4402_v17 = vsub.f32 1.0, %v4252_v60  ;;  %v3504_v3 = vmul.f32 %v7467_v47, %v3354_v62  ;;  %v2306_v27 = vmul.f32 1.0614054, %v7529_v39  ;;  %v5684_v36 = vpop.eup %5683 }
 0x131   :  { %v1558_v50 = vand.u32 2147483647, %v7527_v33  ;;  %v4255_v53 = vmul.f32 %v5678_v5, %v3505_v51  ;;  %v2457_v32 = vadd.f32 -1.4531521, %v2307_v42  ;;  %v3980_v0 = vmul.f32 1.442695, %v3807_v57 }
 0x132   :  { %v1859_v8 = vadd.f32 1.0, %v1709_v59  ;;  %v4702_v26 = vsub.f32 0.0, %v4402_v17  ;;  %v4254_v52 = vmul.f32 %v5684_v36, %v3504_v3  ;;  %v2456_v23 = vadd.f32 -1.4531521, %v2306_v27  ;;  %v116_v5 = vld [vmem:[%s11233_s2 + $0x2a8] sm:$0xff]  ;;  %v115_v7 = vld [vmem:[%s11233_s2 + $0x2a0] sm:$0xff] }
 0x133   :  { %v1708_v48 = vmul.f32 0.3275911, %v1558_v50  ;;  %v4405_v63 = vsub.f32 1.0, %v4255_v53  ;;  %v2607_v35 = vmul.f32 %v7522_v41, %v2457_v32  ;;  %v3978_v25 = vmul.f32 1.442695, %v3806_v2  ;;  %v6199_v42 = vld [vmem:[%s11233_s2 + $0xd0] sm:$0xff] }
 0x134   :  { %5685 = vrcp.f32 %v1859_v8  ;;  %v4852_v47 = vsel %vm4552_vm5, %v4402_v17, %v4702_v26  ;;  %v4404_v22 = vsub.f32 1.0, %v4254_v52  ;;  %v2606_v38 = vmul.f32 %v7529_v39, %v2456_v23 }
 0x135   :  { %v1858_v46 = vadd.f32 1.0, %v1708_v48  ;;  %v5152_v4 = vadd.f32 1.0, %v4852_v47  ;;  %v4705_v19 = vsub.f32 0.0, %v4405_v63  ;;  %v2757_v30 = vadd.f32 1.4214138, %v2607_v35 }
 0x136   :  { %5687 = vpow2.f32 %v3980_v0  ;;  %v4704_v29 = vsub.f32 0.0, %v4404_v22  ;;  %v2756_v54 = vadd.f32 1.4214138, %v2606_v38  ;;  %v3659_v13 = vmul.f32 %v1559_v58, %v1559_v58  ;;  %v686_v58 = vpop.permute.xlu0 %685 }
 0x137   :  { %5689 = vrcp.f32 %v1858_v46  ;;  %v5302_v49 = vmul.f32 %v5152_v4, %v5002_v15  ;;  %v4855_v14 = vsel %vm4555_vm6, %v4405_v63, %v4705_v19  ;;  %v2907_v34 = vmul.f32 %v7522_v41, %v2757_v30 }
 0x138   :  { %5691 = vpow2.f32 %v3978_v25  ;;  %v5155_v37 = vadd.f32 1.0, %v4855_v14  ;;  %v4854_v24 = vsel %vm4554_vm7, %v4404_v22, %v4704_v29  ;;  %v2906_v11 = vmul.f32 %v7529_v39, %v2756_v54 }
 0x139   :  { %v3658_v12 = vmul.f32 %v1558_v50, %v1558_v50  ;;  %5453 = vst.msk [vmem:[%s11234_s3 + $0x90] sm:$0xff] %vm5434_vm2, %v5302_v49  ;;  %v5154_v16 = vadd.f32 1.0, %v4854_v24  ;;  %v3057_v15 = vadd.f32 -0.28449672, %v2907_v34  ;;  %v415_v45 = vmul.f32 %v11240_v55, %v113_v21  ;;  %v6200_v49 = vld [vmem:[%s11233_s2 + $0xe8] sm:$0xff] }
 0x13a   :  { %v209_v57 = vmul.f32 %v6198_v18, %v6710_v20  ;;  %v5305_v60 = vmul.f32 %v5155_v37, %v7515_v56  ;;  %v3056_v62 = vadd.f32 -0.28449672, %v2906_v11  ;;  %v3809_v51 = vsub.f32 0.0, %v3659_v13  ;;  %v118_v56 = vld [vmem:[%s11233_s2 + $0x2b8] sm:$0xff]  ;;  %v692_v11 = vpop.permute.xlu1 %691  ;;  %v6201_v18 = vld [vmem:[%s11233_s2 + $0xe0] sm:$0xff] }
 0x13b   :  { %v208_v2 = vmul.f32 %v6199_v42, %v6710_v20  ;;  %v5304_v59 = vmul.f32 %v5154_v16, %v7519_v43  ;;  %v3207_v17 = vmul.f32 %v7522_v41, %v3057_v15  ;;  %797 = vrot.lane.b32.xlu0 %v415_v45, %s6337_s25  ;;  %v418_v27 = vmul.f32 %v11240_v55, %v116_v5 }
 0x13c   :  { %v1110_v3 = vadd.f32 %v688_v31, %v209_v57  ;;  %5456 = vst.msk [vmem:[%s11234_s3 + $0xa8] sm:$0xff] %vm5434_vm2, %v5305_v60  ;;  %v3206_v50 = vmul.f32 %v7529_v39, %v3056_v62  ;;  %v3808_v36 = vsub.f32 0.0, %v3658_v12  ;;  %v417_v53 = vmul.f32 %v11240_v55, %v115_v7 }
 0x13d   :  { %v1109_v43 = vadd.f32 %v686_v58, %v208_v2  ;;  %5455 = vst.msk [vmem:[%s11234_s3 + $0xa0] sm:$0xff] %vm5434_vm2, %v5304_v59  ;;  %v3357_v0 = vadd.f32 0.2548296, %v3207_v17  ;;  %803 = vrot.lane.b32.xlu1 %v418_v27, %s6337_s25  ;;  %v420_v48 = vmul.f32 %v11240_v55, %v118_v56  ;;  %v5007_v25 = vmul.f32 0.5, %v7441_v6  ;;  %v690_v2 = vpop.permute.xlu0 %689  ;;  %v117_v27 = vld [vmem:[%s11233_s2 + $0x2b0] sm:$0xff] }
 0x13e   :  { %v7587_v32 = vpop.eup %5685  ;;  %v7594_v8 = vadd.f32 %v6742_v1, %v1110_v3  ;;  %v3356_v26 = vadd.f32 0.2548296, %v3206_v50  ;;  %v3984_v47 = vmul.f32 1.442695, %v3809_v51  ;;  %v3982_v19 = vmul.f32 1.442695, %v3808_v36 }
 0x13f   :  { %v2309_v52 = vmul.f32 1.0614054, %v7587_v32  ;;  %v7599_v23 = vadd.f32 %v6742_v1, %v1109_v43  ;;  %v3507_v35 = vmul.f32 %v7522_v41, %v3357_v0  ;;  %801 = vrot.lane.b32.xlu0 %v417_v53, %s6337_s25  ;;  %vm4557_vm8 = vcmp.ge.f32.partialorder %v7456_v61, 0.0  ;;  %v120_v0 = vld [vmem:[%s11233_s2 + $0x2c8] sm:$0xff] }
 0x140   :  { %v5688_v63 = vpop.eup %5687  ;;  %v7605_v22 = vmul.f32 0.70710677, %v7594_v8  ;;  %v3506_v46 = vmul.f32 %v7529_v39, %v3356_v26  ;;  %v211_v14 = vmul.f32 %v6200_v49, %v6710_v20  ;;  %5693 = vpow2.f32 %v3984_v47 }
 0x141   :  { %v7608_v38 = vpop.eup %5689  ;;  %v2459_v4 = vadd.f32 -1.4531521, %v2309_v52  ;;  %v7612_v30 = vmul.f32 0.70710677, %v7599_v23  ;;  %v4257_v54 = vmul.f32 %v5688_v63, %v3507_v35  ;;  %807 = vrot.lane.b32.xlu1 %v420_v48, %s6337_s25  ;;  %5695 = vpow2.f32 %v3982_v19 }
 0x142   :  { %v5692_v29 = vpop.eup %5691  ;;  %v2308_v6 = vmul.f32 1.0614054, %v7608_v38  ;;  %v1561_v41 = vand.u32 2147483647, %v7605_v22  ;;  %v210_v57 = vmul.f32 %v6201_v18, %v6710_v20  ;;  %v1112_v62 = vadd.f32 %v692_v11, %v211_v14 }
 0x143   :  { %v4256_v13 = vmul.f32 %v5692_v29, %v3506_v46  ;;  %v2609_v21 = vmul.f32 %v7587_v32, %v2459_v4  ;;  %v1560_v39 = vand.u32 2147483647, %v7612_v30  ;;  %v4407_v34 = vsub.f32 1.0, %v4257_v54  ;;  %v696_v46 = vpop.permute.xlu1 %695  ;;  %v6202_v29 = vld [vmem:[%s11233_s2 + $0xf8] sm:$0xff] }
 0x144   :  { %v2458_v37 = vadd.f32 -1.4531521, %v2308_v6  ;;  %v1711_v24 = vmul.f32 0.3275911, %v1561_v41  ;;  %vm4556_vm9 = vcmp.ge.f32.partialorder %v7460_v44, 0.0  ;;  %v5006_v56 = vmul.f32 0.5, %v7452_v9 }
 0x145   :  { %v4406_v12 = vsub.f32 1.0, %v4256_v13  ;;  %v2759_v31 = vadd.f32 1.4214138, %v2609_v21  ;;  %v1710_v5 = vmul.f32 0.3275911, %v1560_v39  ;;  %v4707_v16 = vsub.f32 0.0, %v4407_v34 }
 0x146   :  { %v2608_v15 = vmul.f32 %v7608_v38, %v2458_v37  ;;  %v1861_v45 = vadd.f32 1.0, %v1711_v24  ;;  %v7640_v44 = vadd.f32 %v6742_v1, %v1112_v62  ;;  %v1111_v53 = vadd.f32 %v690_v2, %v210_v57  ;;  %v6203_v6 = vld [vmem:[%s11233_s2 + $0xf0] sm:$0xff] }
 0x147   :  { %v4706_v58 = vsub.f32 0.0, %v4406_v12  ;;  %v2909_v7 = vmul.f32 %v7587_v32, %v2759_v31  ;;  %v1860_v60 = vadd.f32 1.0, %v1710_v5  ;;  %v4857_v51 = vsel %vm4557_vm8, %v4407_v34, %v4707_v16  ;;  %v694_v34 = vpop.permute.xlu0 %693 }
 0x148   :  { %v2758_v42 = vadd.f32 1.4214138, %v2608_v15  ;;  %5697 = vrcp.f32 %v1861_v45  ;;  %v5157_v59 = vadd.f32 1.0, %v4857_v51  ;;  %v3661_v48 = vmul.f32 %v1561_v41, %v1561_v41 }
 0x149   :  { %v4856_v17 = vsel %vm4556_vm9, %v4406_v12, %v4706_v58  ;;  %v3059_v3 = vadd.f32 -0.28449672, %v2909_v7  ;;  %5699 = vrcp.f32 %v1860_v60  ;;  %v419_v63 = vmul.f32 %v11240_v55, %v117_v27 }
 0x14a   :  { %v5156_v50 = vadd.f32 1.0, %v4856_v17  ;;  %v2908_v36 = vmul.f32 %v7608_v38, %v2758_v42  ;;  %v5307_v61 = vmul.f32 %v5157_v59, %v5007_v25  ;;  %v3660_v35 = vmul.f32 %v1560_v39, %v1560_v39  ;;  %v5694_v4 = vpop.eup %5693 }
 0x14b   :  { %v3209_v43 = vmul.f32 %v7587_v32, %v3059_v3  ;;  %v7651_v25 = vmul.f32 0.70710677, %v7640_v44  ;;  %v7654_v47 = vadd.f32 %v6742_v1, %v1111_v53  ;;  %805 = vrot.lane.b32.xlu0 %v419_v63, %s6337_s25  ;;  %v213_v54 = vmul.f32 %v6202_v29, %v6710_v20  ;;  %v5696_v21 = vpop.eup %5695 }
 0x14c   :  { %v5306_v26 = vmul.f32 %v5156_v50, %v5006_v56  ;;  %v3058_v52 = vadd.f32 -0.28449672, %v2908_v36  ;;  %5458 = vst.msk [vmem:[%s11234_s3 + $0xb8] sm:$0xff] %vm5434_vm2, %v5307_v61  ;;  %v212_v41 = vmul.f32 %v6203_v6, %v6710_v20  ;;  %v422_v13 = vmul.f32 %v11240_v55, %v120_v0  ;;  %v119_v36 = vld [vmem:[%s11233_s2 + $0x2c0] sm:$0xff] }
 0x14d   :  { %v3359_v9 = vadd.f32 0.2548296, %v3209_v43  ;;  %v1563_v49 = vand.u32 2147483647, %v7651_v25  ;;  %v7674_v14 = vmul.f32 0.70710677, %v7654_v47  ;;  %v1114_v12 = vadd.f32 %v696_v46, %v213_v54 }
 0x14e   :  { %5457 = vst.msk [vmem:[%s11234_s3 + $0xb0] sm:$0xff] %vm5434_vm2, %v5306_v26  ;;  %v3208_v19 = vmul.f32 %v7608_v38, %v3058_v52  ;;  %v5009_v37 = vmul.f32 0.5, %v7498_v10  ;;  %v3811_v11 = vsub.f32 0.0, %v3661_v48  ;;  %811 = vrot.lane.b32.xlu1 %v422_v13, %s6337_s25  ;;  %v3810_v5 = vsub.f32 0.0, %v3660_v35 }
 0x14f   :  { %v3509_v39 = vmul.f32 %v7587_v32, %v3359_v9  ;;  %v1713_v16 = vmul.f32 0.3275911, %v1563_v49  ;;  %v1562_v15 = vand.u32 2147483647, %v7674_v14  ;;  %vm4559_vm10 = vcmp.ge.f32.partialorder %v7511_v28, 0.0 }
 0x150   :  { %v3358_v24 = vadd.f32 0.2548296, %v3208_v19  ;;  %v5008_v18 = vmul.f32 0.5, %v7502_v40  ;;  %v1113_v57 = vadd.f32 %v694_v34, %v212_v41  ;;  %v7688_v62 = vadd.f32 %v6742_v1, %v1114_v12 }
 0x151   :  { %v4259_v31 = vmul.f32 %v5694_v4, %v3509_v39  ;;  %v1863_v60 = vadd.f32 1.0, %v1713_v16  ;;  %v3988_v42 = vmul.f32 1.442695, %v3811_v11  ;;  %v1712_v59 = vmul.f32 0.3275911, %v1562_v15 }
 0x152   :  { %v7679_v45 = vpop.eup %5697  ;;  %v3508_v32 = vmul.f32 %v7608_v38, %v3358_v24  ;;  %v3986_v38 = vmul.f32 1.442695, %v3810_v5  ;;  %v3663_v56 = vmul.f32 %v1563_v49, %v1563_v49  ;;  %v7698_v53 = vmul.f32 0.70710677, %v7688_v62 }
 0x153   :  { %v7684_v10 = vpop.eup %5699  ;;  %v4409_v58 = vsub.f32 1.0, %v4259_v31  ;;  %v2311_v7 = vmul.f32 1.0614054, %v7679_v45  ;;  %5701 = vrcp.f32 %v1863_v60  ;;  %v1862_v50 = vadd.f32 1.0, %v1712_v59  ;;  %v700_v31 = vpop.permute.xlu1 %699 }
 0x154   :  { %v4258_v51 = vmul.f32 %v5696_v21, %v3508_v32  ;;  %v2310_v2 = vmul.f32 1.0614054, %v7684_v10  ;;  %v7701_v0 = vadd.f32 %v6742_v1, %v1113_v57  ;;  %vm4558_vm11 = vcmp.ge.f32.partialorder %v7527_v33, 0.0  ;;  %v6205_v32 = vld [vmem:[%s11233_s2 + $0x100] sm:$0xff] }
 0x155   :  { %v4709_v17 = vsub.f32 0.0, %v4409_v58  ;;  %v2461_v3 = vadd.f32 -1.4531521, %v2311_v7  ;;  %5703 = vrcp.f32 %v1862_v50  ;;  %v1565_v9 = vand.u32 2147483647, %v7698_v53 }
 0x156   :  { %v4408_v40 = vsub.f32 1.0, %v4258_v51  ;;  %v2460_v27 = vadd.f32 -1.4531521, %v2310_v2  ;;  %v421_v28 = vmul.f32 %v11240_v55, %v119_v36  ;;  %5705 = vpow2.f32 %v3988_v42 }
 0x157   :  { %v4859_v61 = vsel %vm4559_vm10, %v4409_v58, %v4709_v17  ;;  %v2611_v43 = vmul.f32 %v7679_v45, %v2461_v3  ;;  %5707 = vpow2.f32 %v3986_v38  ;;  %v1715_v54 = vmul.f32 0.3275911, %v1565_v9 }
 0x158   :  { %v5159_v26 = vadd.f32 1.0, %v4859_v61  ;;  %v4708_v52 = vsub.f32 0.0, %v4408_v40  ;;  %v2610_v48 = vmul.f32 %v7684_v10, %v2460_v27  ;;  %809 = vrot.lane.b32.xlu0 %v421_v28, %s6337_s25  ;;  %v7714_v33 = vmul.f32 0.5, %v7594_v8  ;;  %v698_v8 = vpop.permute.xlu0 %697 }
 0x159   :  { %v2761_v63 = vadd.f32 1.4214138, %v2611_v43  ;;  %v3813_v41 = vsub.f32 0.0, %v3663_v56  ;;  %v7718_v13 = vmul.f32 0.70710677, %v7701_v0  ;;  %v3662_v49 = vmul.f32 %v1562_v15, %v1562_v15 }
 0x15a   :  { %v5309_v35 = vmul.f32 %v5159_v26, %v5009_v37  ;;  %v4858_v46 = vsel %vm4558_vm11, %v4408_v40, %v4708_v52  ;;  %v2760_v4 = vadd.f32 1.4214138, %v2610_v48  ;;  %v1865_v34 = vadd.f32 1.0, %v1715_v54 }
 0x15b   :  { %v5158_v19 = vadd.f32 1.0, %v4858_v46  ;;  %v2911_v29 = vmul.f32 %v7679_v45, %v2761_v63  ;;  %v7721_v24 = vmul.f32 0.5, %v7599_v23  ;;  %v3665_v11 = vmul.f32 %v1565_v9, %v1565_v9  ;;  %v6204_v23 = vld [vmem:[%s11233_s2 + $0x108] sm:$0xff] }
 0x15c   :  { %5460 = vst.msk [vmem:[%s11234_s3 + $0xc8] sm:$0xff] %vm5434_vm2, %v5309_v35  ;;  %v2910_v6 = vmul.f32 %v7684_v10, %v2760_v4  ;;  %v1564_v12 = vand.u32 2147483647, %v7718_v13  ;;  %5709 = vrcp.f32 %v1865_v34  ;;  %v215_v15 = vmul.f32 %v6204_v23, %v6710_v20 }
 0x15d   :  { %v5308_v21 = vmul.f32 %v5158_v19, %v5008_v18  ;;  %v3061_v39 = vadd.f32 -0.28449672, %v2911_v29  ;;  %v7724_v5 = vpop.eup %5701  ;;  %v214_v18 = vmul.f32 %v6205_v32, %v6710_v20  ;;  %v3992_v7 = vmul.f32 1.442695, %v3813_v41 }
 0x15e   :  { %v3060_v37 = vadd.f32 -0.28449672, %v2910_v6  ;;  %v2313_v58 = vmul.f32 1.0614054, %v7724_v5  ;;  %v1714_v60 = vmul.f32 0.3275911, %v1564_v12  ;;  %v1116_v2 = vadd.f32 %v700_v31, %v215_v15 }
 0x15f   :  { %5459 = vst.msk [vmem:[%s11234_s3 + $0xc0] sm:$0xff] %vm5434_vm2, %v5308_v21  ;;  %v3211_v16 = vmul.f32 %v7679_v45, %v3061_v39  ;;  %v3812_v42 = vsub.f32 0.0, %v3662_v49  ;;  %v1115_v59 = vadd.f32 %v698_v8, %v214_v18  ;;  %v7741_v17 = vpop.eup %5703  ;;  %vm4561_vm12 = vcmp.ge.f32.partialorder %v7605_v22, 0.0 }
 0x160   :  { %v3210_v57 = vmul.f32 %v7684_v10, %v3060_v37  ;;  %v2463_v38 = vadd.f32 -1.4531521, %v2313_v58  ;;  %v3815_v40 = vsub.f32 0.0, %v3665_v11  ;;  %v1864_v27 = vadd.f32 1.0, %v1714_v60  ;;  %v5706_v43 = vpop.eup %5705 }
 0x161   :  { %v3361_v51 = vadd.f32 0.2548296, %v3211_v16  ;;  %vm4560_vm13 = vcmp.ge.f32.partialorder %v7612_v30, 0.0  ;;  %v2312_v50 = vmul.f32 1.0614054, %v7741_v17  ;;  %v3664_v36 = vmul.f32 %v1564_v12, %v1564_v12  ;;  %v5708_v63 = vpop.eup %5707 }
 0x162   :  { %v3360_v3 = vadd.f32 0.2548296, %v3210_v57  ;;  %v7748_v61 = vadd.f32 %v6742_v1, %v1116_v2  ;;  %v2613_v52 = vmul.f32 %v7724_v5, %v2463_v38  ;;  %5711 = vrcp.f32 %v1864_v27 }
 0x163   :  { %v3511_v56 = vmul.f32 %v7679_v45, %v3361_v51  ;;  %v7753_v48 = vadd.f32 %v6742_v1, %v1115_v59  ;;  %5713 = vpow2.f32 %v3992_v7  ;;  %v2462_v45 = vadd.f32 -1.4531521, %v2312_v50 }
 0x164   :  { %v3510_v26 = vmul.f32 %v7684_v10, %v3360_v3  ;;  %v7756_v28 = vmul.f32 0.70710677, %v7748_v61  ;;  %v2763_v46 = vadd.f32 1.4214138, %v2613_v52  ;;  %v3990_v4 = vmul.f32 1.442695, %v3812_v42 }
 0x165   :  { %v4261_v9 = vmul.f32 %v5706_v43, %v3511_v56  ;;  %v7759_v19 = vmul.f32 0.70710677, %v7753_v48  ;;  %v2612_v29 = vmul.f32 %v7741_v17, %v2462_v45  ;;  %v3814_v54 = vsub.f32 0.0, %v3664_v36 }
 0x166   :  { %v4260_v35 = vmul.f32 %v5708_v63, %v3510_v26  ;;  %v1567_v6 = vand.u32 2147483647, %v7756_v28  ;;  %v2913_v21 = vmul.f32 %v7724_v5, %v2763_v46  ;;  %v3996_v39 = vmul.f32 1.442695, %v3815_v40  ;;  %v7765_v34 = vpop.eup %5709  ;;  %v121_v26 = vld [vmem:[%s11233_s2 + $0x2d0] sm:$0xff]  ;;  %v124_v46 = vld [vmem:[%s11233_s2 + $0x2e8] sm:$0xff] }
 0x167   :  { %v4411_v10 = vsub.f32 1.0, %v4261_v9  ;;  %v1566_v49 = vand.u32 2147483647, %v7759_v19  ;;  %v7768_v11 = vmul.f32 0.5, %v7640_v44  ;;  %v2762_v12 = vadd.f32 1.4214138, %v2612_v29 }
 0x168   :  { %v4410_v41 = vsub.f32 1.0, %v4260_v35  ;;  %v1717_v31 = vmul.f32 0.3275911, %v1567_v6  ;;  %v3063_v16 = vadd.f32 -0.28449672, %v2913_v21  ;;  %5715 = vpow2.f32 %v3990_v4 }
 0x169   :  { %v4711_v37 = vsub.f32 0.0, %v4411_v10  ;;  %v2315_v23 = vmul.f32 1.0614054, %v7765_v34  ;;  %v2912_v32 = vmul.f32 %v7741_v17, %v2762_v12  ;;  %v3994_v18 = vmul.f32 1.442695, %v3814_v54  ;;  %v704_v54 = vpop.permute.xlu1 %703  ;;  %v6206_v12 = vld [vmem:[%s11233_s2 + $0x118] sm:$0xff] }
 0x16a   :  { %v4710_v8 = vsub.f32 0.0, %v4410_v41  ;;  %v1867_v57 = vadd.f32 1.0, %v1717_v31  ;;  %v3213_v44 = vmul.f32 %v7724_v5, %v3063_v16  ;;  %v3667_v2 = vmul.f32 %v1567_v6, %v1567_v6  ;;  %v123_v6 = vld [vmem:[%s11233_s2 + $0x2e0] sm:$0xff]  ;;  %v702_v31 = vpop.permute.xlu0 %701 }
 0x16b   :  { %v4861_v15 = vsel %vm4561_vm12, %v4411_v10, %v4711_v37  ;;  %v2465_v60 = vadd.f32 -1.4531521, %v2315_v23  ;;  %v3062_v42 = vadd.f32 -0.28449672, %v2912_v32  ;;  %v1716_v40 = vmul.f32 0.3275911, %v1566_v49 }
 0x16c   :  { %v5161_v58 = vadd.f32 1.0, %v4861_v15  ;;  %v4860_v7 = vsel %vm4560_vm13, %v4410_v41, %v4710_v8  ;;  %5717 = vrcp.f32 %v1867_v57  ;;  %v7777_v59 = vpop.eup %5711  ;;  %v3363_v3 = vadd.f32 0.2548296, %v3213_v44  ;;  %v6207_v23 = vld [vmem:[%s11233_s2 + $0x110] sm:$0xff] }
 0x16d   :  { %v5160_v51 = vadd.f32 1.0, %v4860_v7  ;;  %v2615_v38 = vmul.f32 %v7765_v34, %v2465_v60  ;;  %v5714_v27 = vpop.eup %5713  ;;  %vm4563_vm14 = vcmp.ge.f32.partialorder %v7651_v25, 0.0  ;;  %v3212_v30 = vmul.f32 %v7741_v17, %v3062_v42 }
 0x16e   :  { %v5311_v22 = vmul.f32 %v5161_v58, %v7714_v33  ;;  %v2314_v50 = vmul.f32 1.0614054, %v7777_v59  ;;  %v3513_v33 = vmul.f32 %v7724_v5, %v3363_v3  ;;  %5719 = vpow2.f32 %v3996_v39 }
 0x16f   :  { %v5310_v56 = vmul.f32 %v5160_v51, %v7721_v24  ;;  %v2765_v36 = vadd.f32 1.4214138, %v2615_v38  ;;  %v1866_v43 = vadd.f32 1.0, %v1716_v40  ;;  %v122_v24 = vld [vmem:[%s11233_s2 + $0x2d8] sm:$0xff]  ;;  %v3362_v52 = vadd.f32 0.2548296, %v3212_v30 }
 0x170   :  { %5462 = vst.msk [vmem:[%s11234_s3 + $0xd8] sm:$0xff] %vm5434_vm2, %v5311_v22  ;;  %v7801_v63 = vmul.f32 0.5, %v7654_v47  ;;  %v2464_v5 = vadd.f32 -1.4531521, %v2314_v50  ;;  %5721 = vpow2.f32 %v3994_v18  ;;  %v4263_v9 = vmul.f32 %v5714_v27, %v3513_v33 }
 0x171   :  { %5461 = vst.msk [vmem:[%s11234_s3 + $0xd0] sm:$0xff] %vm5434_vm2, %v5310_v56  ;;  %vm4562_vm15 = vcmp.ge.f32.partialorder %v7674_v14, 0.0  ;;  %v2915_v45 = vmul.f32 %v7765_v34, %v2765_v36  ;;  %v3817_v35 = vsub.f32 0.0, %v3667_v2  ;;  %5723 = vrcp.f32 %v1866_v43 }
 0x172   :  { %v3512_v4 = vmul.f32 %v7741_v17, %v3362_v52  ;;  %v2614_v10 = vmul.f32 %v7777_v59, %v2464_v5  ;;  %v424_v47 = vmul.f32 %v11240_v55, %v122_v24  ;;  %v423_v29 = vmul.f32 %v11240_v55, %v121_v26  ;;  %v5716_v41 = vpop.eup %5715 }
 0x173   :  { %v4413_v21 = vsub.f32 1.0, %v4263_v9  ;;  %v3065_v39 = vadd.f32 -0.28449672, %v2915_v45  ;;  %v3666_v37 = vmul.f32 %v1566_v49, %v1566_v49  ;;  %v217_v17 = vmul.f32 %v6206_v12, %v6710_v20 }
 0x174   :  { %v4262_v8 = vmul.f32 %v5716_v41, %v3512_v4  ;;  %v2764_v16 = vadd.f32 1.4214138, %v2614_v10  ;;  %815 = vrot.lane.b32.xlu1 %v424_v47, %s6337_s25  ;;  %813 = vrot.lane.b32.xlu0 %v423_v29, %s6337_s25  ;;  %v216_v15 = vmul.f32 %v6207_v23, %v6710_v20  ;;  %v426_v49 = vmul.f32 %v11240_v55, %v124_v46  ;;  %v708_v23 = vpop.permute.xlu1 %707 }
 0x175   :  { %v4713_v32 = vsub.f32 0.0, %v4413_v21  ;;  %v3215_v18 = vmul.f32 %v7765_v34, %v3065_v39  ;;  %v1118_v57 = vadd.f32 %v704_v54, %v217_v17  ;;  %v425_v58 = vmul.f32 %v11240_v55, %v123_v6 }
 0x176   :  { %v7828_v7 = vpop.eup %5717  ;;  %v4412_v44 = vsub.f32 1.0, %v4262_v8  ;;  %v2914_v60 = vmul.f32 %v7777_v59, %v2764_v16  ;;  %v4000_v51 = vmul.f32 1.442695, %v3817_v35  ;;  %v1117_v42 = vadd.f32 %v702_v31, %v216_v15 }
 0x177   :  { %v4863_v2 = vsel %vm4563_vm14, %v4413_v21, %v4713_v32  ;;  %v3365_v22 = vadd.f32 0.2548296, %v3215_v18  ;;  %v2317_v3 = vmul.f32 1.0614054, %v7828_v7  ;;  %v7835_v38 = vadd.f32 %v6742_v1, %v1118_v57 }
 0x178   :  { %v5163_v40 = vadd.f32 1.0, %v4863_v2  ;;  %v4712_v27 = vsub.f32 0.0, %v4412_v44  ;;  %v3064_v56 = vadd.f32 -0.28449672, %v2914_v60  ;;  %v7838_v30 = vadd.f32 %v6742_v1, %v1117_v42  ;;  %819 = vrot.lane.b32.xlu1 %v426_v49, %s6337_s25  ;;  %817 = vrot.lane.b32.xlu0 %v425_v58, %s6337_s25  ;;  %v5720_v50 = vpop.eup %5719 }
 0x179   :  { %v3515_v25 = vmul.f32 %v7765_v34, %v3365_v22  ;;  %v2467_v33 = vadd.f32 -1.4531521, %v2317_v3  ;;  %v3816_v36 = vsub.f32 0.0, %v3666_v37  ;;  %v7844_v43 = vmul.f32 0.70710677, %v7835_v38 }
 0x17a   :  { %v5722_v24 = vpop.eup %5721  ;;  %v5313_v26 = vmul.f32 %v5163_v40, %v7768_v11  ;;  %v4862_v52 = vsel %vm4562_vm15, %v4412_v44, %v4712_v27  ;;  %v3214_v5 = vmul.f32 %v7777_v59, %v3064_v56  ;;  %v7851_v9 = vmul.f32 0.70710677, %v7838_v30  ;;  %v706_v27 = vpop.permute.xlu0 %705  ;;  %v125_v56 = vld [vmem:[%s11233_s2 + $0x2f0] sm:$0xff] }
 0x17b   :  { %v7853_v45 = vpop.eup %5723  ;;  %v5162_v35 = vadd.f32 1.0, %v4862_v52  ;;  %v4265_v34 = vmul.f32 %v5720_v50, %v3515_v25  ;;  %v2617_v46 = vmul.f32 %v7828_v7, %v2467_v33  ;;  %v1569_v4 = vand.u32 2147483647, %v7844_v43  ;;  %v6209_v33 = vld [vmem:[%s11233_s2 + $0x120] sm:$0xff] }
 0x17c   :  { %5464 = vst.msk [vmem:[%s11234_s3 + $0xe8] sm:$0xff] %vm5434_vm2, %v5313_v26  ;;  %v3364_v14 = vadd.f32 0.2548296, %v3214_v5  ;;  %5725 = vpow2.f32 %v4000_v51  ;;  %v2316_v11 = vmul.f32 1.0614054, %v7853_v45  ;;  %vm4565_vm0 = vcmp.ge.f32.partialorder %v7698_v53, 0.0 }
 0x17d   :  { %v5312_v10 = vmul.f32 %v5162_v35, %v7801_v63  ;;  %v4415_v47 = vsub.f32 1.0, %v4265_v34  ;;  %v2767_v29 = vadd.f32 1.4214138, %v2617_v46  ;;  %v1719_v54 = vmul.f32 0.3275911, %v1569_v4  ;;  %v6208_v63 = vld [vmem:[%s11233_s2 + $0x128] sm:$0xff] }
 0x17e   :  { %v3514_v6 = vmul.f32 %v7777_v59, %v3364_v14  ;;  %v2466_v41 = vadd.f32 -1.4531521, %v2316_v11  ;;  %v3998_v21 = vmul.f32 1.442695, %v3816_v36  ;;  %v1568_v39 = vand.u32 2147483647, %v7851_v9 }
 0x17f   :  { %5463 = vst.msk [vmem:[%s11234_s3 + $0xe0] sm:$0xff] %vm5434_vm2, %v5312_v10  ;;  %v4715_v37 = vsub.f32 0.0, %v4415_v47  ;;  %v2917_v12 = vmul.f32 %v7828_v7, %v2767_v29  ;;  %v1869_v17 = vadd.f32 1.0, %v1719_v54  ;;  %v219_v31 = vmul.f32 %v6208_v63, %v6710_v20  ;;  %v126_v53 = vld [vmem:[%s11233_s2 + $0x2f8] sm:$0xff]  ;;  %v128_v11 = vld [vmem:[%s11233_s2 + $0x308] sm:$0xff] }
 0x180   :  { %v4264_v59 = vmul.f32 %v5722_v24, %v3514_v6  ;;  %v2616_v8 = vmul.f32 %v7853_v45, %v2466_v41  ;;  %v1718_v16 = vmul.f32 0.3275911, %v1568_v39  ;;  %v5015_v32 = vmul.f32 0.5, %v7688_v62  ;;  %v712_v6 = vpop.permute.xlu1 %711  ;;  %v6210_v41 = vld [vmem:[%s11233_s2 + $0x138] sm:$0xff] }
 0x181   :  { %v4865_v15 = vsel %vm4565_vm0, %v4415_v47, %v4715_v37  ;;  %v3067_v49 = vadd.f32 -0.28449672, %v2917_v12  ;;  %5727 = vrcp.f32 %v1869_v17  ;;  %v1120_v51 = vadd.f32 %v708_v23, %v219_v31 }
 0x182   :  { %v5165_v18 = vadd.f32 1.0, %v4865_v15  ;;  %v4414_v57 = vsub.f32 1.0, %v4264_v59  ;;  %v2766_v58 = vadd.f32 1.4214138, %v2616_v8  ;;  %5729 = vpow2.f32 %v3998_v21 }
 0x183   :  { %v3217_v44 = vmul.f32 %v7828_v7, %v3067_v49  ;;  %v1868_v60 = vadd.f32 1.0, %v1718_v16  ;;  %vm4564_vm1 = vcmp.ge.f32.partialorder %v7718_v13, 0.0  ;;  %v3669_v62 = vmul.f32 %v1569_v4, %v1569_v4 }
 0x184   :  { %v5315_v42 = vmul.f32 %v5165_v18, %v5015_v32  ;;  %v4714_v2 = vsub.f32 0.0, %v4414_v57  ;;  %v2916_v22 = vmul.f32 %v7853_v45, %v2766_v58  ;;  %v7884_v40 = vadd.f32 %v6742_v1, %v1120_v51 }
 0x185   :  { %v3367_v3 = vadd.f32 0.2548296, %v3217_v44  ;;  %5731 = vrcp.f32 %v1868_v60  ;;  %v218_v36 = vmul.f32 %v6209_v33, %v6710_v20  ;;  %v428_v24 = vmul.f32 %v11240_v55, %v126_v53 }
 0x186   :  { %v5726_v50 = vpop.eup %5725  ;;  %5466 = vst.msk [vmem:[%s11234_s3 + $0xf8] sm:$0xff] %vm5434_vm2, %v5315_v42  ;;  %v4864_v13 = vsel %vm4564_vm1, %v4414_v57, %v4714_v2  ;;  %v3066_v25 = vadd.f32 -0.28449672, %v2916_v22  ;;  %v5014_v26 = vmul.f32 0.5, %v7701_v0  ;;  %v7901_v35 = vmul.f32 0.70710677, %v7884_v40 }
 0x187   :  { %v5164_v52 = vadd.f32 1.0, %v4864_v13  ;;  %v3517_v5 = vmul.f32 %v7828_v7, %v3367_v3  ;;  %v5017_v34 = vmul.f32 0.5, %v7748_v61  ;;  %v1119_v4 = vadd.f32 %v706_v27, %v218_v36  ;;  %823 = vrot.lane.b32.xlu1 %v428_v24, %s6337_s25 }
 0x188   :  { %v3216_v46 = vmul.f32 %v7853_v45, %v3066_v25  ;;  %v427_v14 = vmul.f32 %v11240_v55, %v125_v56  ;;  %v3819_v47 = vsub.f32 0.0, %v3669_v62  ;;  %v1571_v7 = vand.u32 2147483647, %v7901_v35 }
 0x189   :  { %v5314_v0 = vmul.f32 %v5164_v52, %v5014_v26  ;;  %v4267_v10 = vmul.f32 %v5726_v50, %v3517_v5  ;;  %v3668_v54 = vmul.f32 %v1568_v39, %v1568_v39  ;;  %v7912_v61 = vadd.f32 %v6742_v1, %v1119_v4  ;;  %v127_v4 = vld [vmem:[%s11233_s2 + $0x300] sm:$0xff] }
 0x18a   :  { %v3366_v29 = vadd.f32 0.2548296, %v3216_v46  ;;  %821 = vrot.lane.b32.xlu0 %v427_v14, %s6337_s25  ;;  %v221_v21 = vmul.f32 %v6210_v41, %v6710_v20  ;;  %vm4567_vm3 = vcmp.ge.f32.partialorder %v7756_v28, 0.0  ;;  %v1721_v12 = vmul.f32 0.3275911, %v1571_v7  ;;  %v6211_v28 = vld [vmem:[%s11233_s2 + $0x130] sm:$0xff] }
 0x18b   :  { %v7919_v37 = vpop.eup %5727  ;;  %5465 = vst.msk [vmem:[%s11234_s3 + $0xf0] sm:$0xff] %vm5434_vm2, %v5314_v0  ;;  %v4417_v39 = vsub.f32 1.0, %v4267_v10  ;;  %v430_v17 = vmul.f32 %v11240_v55, %v128_v11  ;;  %vm4566_vm4 = vcmp.ge.f32.partialorder %v7759_v19, 0.0  ;;  %v7931_v59 = vmul.f32 0.70710677, %v7912_v61  ;;  %v130_v19 = vld [vmem:[%s11233_s2 + $0x318] sm:$0xff] }
 0x18c   :  { %v3516_v63 = vmul.f32 %v7853_v45, %v3366_v29  ;;  %v2319_v31 = vmul.f32 1.0614054, %v7919_v37  ;;  %v5730_v8 = vpop.eup %5729  ;;  %v4004_v23 = vmul.f32 1.442695, %v3819_v47  ;;  %v1871_v15 = vadd.f32 1.0, %v1721_v12  ;;  %v129_v41 = vld [vmem:[%s11233_s2 + $0x310] sm:$0xff] }
 0x18d   :  { %v4717_v16 = vsub.f32 0.0, %v4417_v39  ;;  %v1122_v49 = vadd.f32 %v712_v6, %v221_v21  ;;  %827 = vrot.lane.b32.xlu1 %v430_v17, %s6337_s25  ;;  %v3818_v57 = vsub.f32 0.0, %v3668_v54  ;;  %v1570_v58 = vand.u32 2147483647, %v7931_v59 }
 0x18e   :  { %v4266_v32 = vmul.f32 %v5730_v8, %v3516_v63  ;;  %v2469_v18 = vadd.f32 -1.4531521, %v2319_v31  ;;  %5733 = vrcp.f32 %v1871_v15  ;;  %v3671_v60 = vmul.f32 %v1571_v7, %v1571_v7  ;;  %v716_v63 = vpop.permute.xlu1 %715 }
 0x18f   :  { %v7935_v45 = vpop.eup %5731  ;;  %v4867_v44 = vsel %vm4567_vm3, %v4417_v39, %v4717_v16  ;;  %v7940_v51 = vadd.f32 %v6742_v1, %v1122_v49  ;;  %v5016_v3 = vmul.f32 0.5, %v7753_v48  ;;  %v1720_v62 = vmul.f32 0.3275911, %v1570_v58  ;;  %v710_v48 = vpop.permute.xlu0 %709  ;;  %v6212_v16 = vld [vmem:[%s11233_s2 + $0x148] sm:$0xff] }
 0x190   :  { %v5167_v53 = vadd.f32 1.0, %v4867_v44  ;;  %v4416_v42 = vsub.f32 1.0, %v4266_v32  ;;  %v2619_v2 = vmul.f32 %v7919_v37, %v2469_v18  ;;  %v2318_v22 = vmul.f32 1.0614054, %v7935_v45 }
 0x191   :  { %v7946_v27 = vmul.f32 0.70710677, %v7940_v51  ;;  %v220_v56 = vmul.f32 %v6211_v28, %v6710_v20  ;;  %5735 = vpow2.f32 %v4004_v23  ;;  %v4002_v36 = vmul.f32 1.442695, %v3818_v57 }
 0x192   :  { %v5317_v50 = vmul.f32 %v5167_v53, %v5017_v34  ;;  %v4716_v13 = vsub.f32 0.0, %v4416_v42  ;;  %v2769_v25 = vadd.f32 1.4214138, %v2619_v2  ;;  %v2468_v33 = vadd.f32 -1.4531521, %v2318_v22  ;;  %v6213_v53 = vld [vmem:[%s11233_s2 + $0x140] sm:$0xff] }
 0x193   :  { %v1870_v24 = vadd.f32 1.0, %v1720_v62  ;;  %v1573_v26 = vand.u32 2147483647, %v7946_v27  ;;  %v3821_v46 = vsub.f32 0.0, %v3671_v60  ;;  %v3670_v11 = vmul.f32 %v1570_v58, %v1570_v58  ;;  %v714_v28 = vpop.permute.xlu0 %713 }
 0x194   :  { %5468 = vst.msk [vmem:[%s11234_s3 + $0x108] sm:$0xff] %vm5434_vm2, %v5317_v50  ;;  %v4866_v52 = vsel %vm4566_vm4, %v4416_v42, %v4716_v13  ;;  %v2919_v5 = vmul.f32 %v7919_v37, %v2769_v25  ;;  %v2618_v34 = vmul.f32 %v7935_v45, %v2468_v33  ;;  %v1121_v7 = vadd.f32 %v710_v48, %v220_v56 }
 0x195   :  { %v5166_v14 = vadd.f32 1.0, %v4866_v52  ;;  %5737 = vrcp.f32 %v1870_v24  ;;  %v1723_v0 = vmul.f32 0.3275911, %v1573_v26  ;;  %v429_v6 = vmul.f32 %v11240_v55, %v127_v4 }
 0x196   :  { %v3069_v10 = vadd.f32 -0.28449672, %v2919_v5  ;;  %v2768_v47 = vadd.f32 1.4214138, %v2618_v34  ;;  %5739 = vpow2.f32 %v4002_v36  ;;  %v4008_v12 = vmul.f32 1.442695, %v3821_v46 }
 0x197   :  { %v5316_v29 = vmul.f32 %v5166_v14, %v5016_v3  ;;  %v1873_v54 = vadd.f32 1.0, %v1723_v0  ;;  %v7974_v17 = vadd.f32 %v6742_v1, %v1121_v7  ;;  %v3820_v8 = vsub.f32 0.0, %v3670_v11  ;;  %825 = vrot.lane.b32.xlu0 %v429_v6, %s6337_s25 }
 0x198   :  { %v3219_v21 = vmul.f32 %v7919_v37, %v3069_v10  ;;  %v2918_v39 = vmul.f32 %v7935_v45, %v2768_v47  ;;  %v7976_v31 = vpop.eup %5733  ;;  %v223_v23 = vmul.f32 %v6212_v16, %v6710_v20  ;;  %v432_v15 = vmul.f32 %v11240_v55, %v130_v19 }
 0x199   :  { %5467 = vst.msk [vmem:[%s11234_s3 + $0x100] sm:$0xff] %vm5434_vm2, %v5316_v29  ;;  %5741 = vrcp.f32 %v1873_v54  ;;  %v2321_v18 = vmul.f32 1.0614054, %v7976_v31  ;;  %v431_v57 = vmul.f32 %v11240_v55, %v129_v41  ;;  %v3673_v58 = vmul.f32 %v1573_v26, %v1573_v26 }
 0x19a   :  { %v3369_v49 = vadd.f32 0.2548296, %v3219_v21  ;;  %v3068_v32 = vadd.f32 -0.28449672, %v2918_v39  ;;  %v7991_v44 = vmul.f32 0.70710677, %v7974_v17  ;;  %v1124_v60 = vadd.f32 %v716_v63, %v223_v23  ;;  %831 = vrot.lane.b32.xlu1 %v432_v15, %s6337_s25 }
 0x19b   :  { %v222_v42 = vmul.f32 %v6213_v53, %v6710_v20  ;;  %v5019_v22 = vmul.f32 0.5, %v7835_v38  ;;  %v2471_v62 = vadd.f32 -1.4531521, %v2321_v18  ;;  %v5736_v56 = vpop.eup %5735  ;;  %vm4569_vm5 = vcmp.ge.f32.partialorder %v7844_v43, 0.0  ;;  %829 = vrot.lane.b32.xlu0 %v431_v57, %s6337_s25 }
 0x19c   :  { %v3519_v2 = vmul.f32 %v7919_v37, %v3369_v49  ;;  %v3218_v3 = vmul.f32 %v7935_v45, %v3068_v32  ;;  %v4006_v50 = vmul.f32 1.442695, %v3820_v8  ;;  %v1572_v13 = vand.u32 2147483647, %v7991_v44 }
 0x19d   :  { %v8004_v25 = vadd.f32 %v6742_v1, %v1124_v60  ;;  %v2621_v37 = vmul.f32 %v7976_v31, %v2471_v62  ;;  %5743 = vpow2.f32 %v4008_v12  ;;  %vm4568_vm6 = vcmp.ge.f32.partialorder %v7851_v9, 0.0 }
 0x19e   :  { %v4269_v33 = vmul.f32 %v5736_v56, %v3519_v2  ;;  %v3368_v36 = vadd.f32 0.2548296, %v3218_v3  ;;  %v3823_v24 = vsub.f32 0.0, %v3673_v58  ;;  %v1722_v26 = vmul.f32 0.3275911, %v1572_v13 }
 0x19f   :  { %v8008_v38 = vpop.eup %5737  ;;  %v8012_v48 = vmul.f32 0.70710677, %v8004_v25  ;;  %v1123_v52 = vadd.f32 %v714_v28, %v222_v42  ;;  %v2771_v46 = vadd.f32 1.4214138, %v2621_v37  ;;  %v5018_v11 = vmul.f32 0.5, %v7838_v30 }
 0x1a0   :  { %v4419_v5 = vsub.f32 1.0, %v4269_v33  ;;  %v3518_v34 = vmul.f32 %v7935_v45, %v3368_v36  ;;  %v2320_v4 = vmul.f32 1.0614054, %v8008_v38  ;;  %v5740_v14 = vpop.eup %5739  ;;  %5745 = vpow2.f32 %v4006_v50 }
 0x1a1   :  { %v1872_v0 = vadd.f32 1.0, %v1722_v26  ;;  %v1575_v10 = vand.u32 2147483647, %v8012_v48  ;;  %v2921_v19 = vmul.f32 %v7976_v31, %v2771_v46  ;;  %v4012_v6 = vmul.f32 1.442695, %v3823_v24  ;;  %v718_v46 = vpop.permute.xlu0 %717 }
 0x1a2   :  { %v4719_v47 = vsub.f32 0.0, %v4419_v5  ;;  %v4268_v7 = vmul.f32 %v5740_v14, %v3518_v34  ;;  %v2470_v29 = vadd.f32 -1.4531521, %v2320_v4  ;;  %v8022_v41 = vadd.f32 %v6742_v1, %v1123_v52  ;;  %v720_v52 = vpop.permute.xlu1 %719  ;;  %v6215_v4 = vld [vmem:[%s11233_s2 + $0x150] sm:$0xff] }
 0x1a3   :  { %v8019_v54 = vpop.eup %5741  ;;  %5747 = vrcp.f32 %v1872_v0  ;;  %v1725_v45 = vmul.f32 0.3275911, %v1575_v10  ;;  %v3071_v39 = vadd.f32 -0.28449672, %v2921_v19  ;;  %v3672_v16 = vmul.f32 %v1572_v13, %v1572_v13  ;;  %v132_v13 = vld [vmem:[%s11233_s2 + $0x328] sm:$0xff] }
 0x1a4   :  { %v4869_v30 = vsel %vm4569_vm5, %v4419_v5, %v4719_v47  ;;  %v4418_v21 = vsub.f32 1.0, %v4268_v7  ;;  %v2620_v12 = vmul.f32 %v8008_v38, %v2470_v29  ;;  %v2323_v8 = vmul.f32 1.0614054, %v8019_v54 }
 0x1a5   :  { %v5169_v63 = vadd.f32 1.0, %v4869_v30  ;;  %v1875_v23 = vadd.f32 1.0, %v1725_v45  ;;  %v3221_v49 = vmul.f32 %v7976_v31, %v3071_v39  ;;  %v3675_v18 = vmul.f32 %v1575_v10, %v1575_v10  ;;  %v131_v30 = vld [vmem:[%s11233_s2 + $0x320] sm:$0xff] }
 0x1a6   :  { %v4718_v15 = vsub.f32 0.0, %v4418_v21  ;;  %v2770_v32 = vadd.f32 1.4214138, %v2620_v12  ;;  %v2473_v58 = vadd.f32 -1.4531521, %v2323_v8  ;;  %v8035_v2 = vmul.f32 0.5, %v7884_v40 }
 0x1a7   :  { %v5319_v57 = vmul.f32 %v5169_v63, %v5019_v22  ;;  %5749 = vrcp.f32 %v1875_v23  ;;  %v8030_v43 = vmul.f32 0.70710677, %v8022_v41  ;;  %v5744_v60 = vpop.eup %5743  ;;  %v3371_v42 = vadd.f32 0.2548296, %v3221_v49 }
 0x1a8   :  { %v4868_v53 = vsel %vm4568_vm6, %v4418_v21, %v4718_v15  ;;  %v2920_v3 = vmul.f32 %v8008_v38, %v2770_v32  ;;  %vm4571_vm7 = vcmp.ge.f32.partialorder %v7901_v35, 0.0  ;;  %v2623_v62 = vmul.f32 %v8019_v54, %v2473_v58 }
 0x1a9   :  { %5470 = vst.msk [vmem:[%s11234_s3 + $0x118] sm:$0xff] %vm5434_vm2, %v5319_v57  ;;  %v5168_v22 = vadd.f32 1.0, %v4868_v53  ;;  %v3822_v28 = vsub.f32 0.0, %v3672_v16  ;;  %v1574_v9 = vand.u32 2147483647, %v8030_v43  ;;  %v3521_v56 = vmul.f32 %v7976_v31, %v3371_v42  ;;  %v6214_v31 = vld [vmem:[%s11233_s2 + $0x158] sm:$0xff] }
 0x1aa   :  { %v3070_v50 = vadd.f32 -0.28449672, %v2920_v3  ;;  %v8047_v40 = vmul.f32 0.5, %v7912_v61  ;;  %5751 = vpow2.f32 %v4012_v6  ;;  %v5746_v33 = vpop.eup %5745  ;;  %v2773_v37 = vadd.f32 1.4214138, %v2623_v62 }
 0x1ab   :  { %v5318_v36 = vmul.f32 %v5168_v22, %v5018_v11  ;;  %v3825_v24 = vsub.f32 0.0, %v3675_v18  ;;  %v1724_v26 = vmul.f32 0.3275911, %v1574_v9  ;;  %v4271_v5 = vmul.f32 %v5744_v60, %v3521_v56 }
 0x1ac   :  { %v3220_v34 = vmul.f32 %v8008_v38, %v3070_v50  ;;  %v225_v61 = vmul.f32 %v6214_v31, %v6710_v20  ;;  %v224_v14 = vmul.f32 %v6215_v4, %v6710_v20  ;;  %v2923_v0 = vmul.f32 %v8019_v54, %v2773_v37 }
 0x1ad   :  { %v8061_v11 = vpop.eup %5747  ;;  %5469 = vst.msk [vmem:[%s11234_s3 + $0x110] sm:$0xff] %vm5434_vm2, %v5318_v36  ;;  %v4010_v10 = vmul.f32 1.442695, %v3822_v28  ;;  %v1874_v47 = vadd.f32 1.0, %v1724_v26  ;;  %v434_v7 = vmul.f32 %v11240_v55, %v132_v13  ;;  %v4421_v19 = vsub.f32 1.0, %v4271_v5 }
 0x1ae   :  { %v3370_v29 = vadd.f32 0.2548296, %v3220_v34  ;;  %v2322_v6 = vmul.f32 1.0614054, %v8061_v11  ;;  %v1126_v45 = vadd.f32 %v720_v52, %v225_v61  ;;  %v3073_v21 = vadd.f32 -0.28449672, %v2923_v0 }
 0x1af   :  { %v4016_v39 = vmul.f32 1.442695, %v3825_v24  ;;  %5753 = vrcp.f32 %v1874_v47  ;;  %v1125_v12 = vadd.f32 %v718_v46, %v224_v14  ;;  %835 = vrot.lane.b32.xlu1 %v434_v7, %s6337_s25  ;;  %v4721_v63 = vsub.f32 0.0, %v4421_v19 }
 0x1b0   :  { %v3520_v8 = vmul.f32 %v8008_v38, %v3370_v29  ;;  %v2472_v16 = vadd.f32 -1.4531521, %v2322_v6  ;;  %v8076_v23 = vadd.f32 %v6742_v1, %v1126_v45  ;;  %v3223_v49 = vmul.f32 %v8019_v54, %v3073_v21  ;;  %v6216_v6 = vld [vmem:[%s11233_s2 + $0x168] sm:$0xff] }
 0x1b1   :  { %v8078_v15 = vpop.eup %5749  ;;  %v3674_v32 = vmul.f32 %v1574_v9, %v1574_v9  ;;  %v8082_v18 = vadd.f32 %v6742_v1, %v1125_v12  ;;  %v433_v57 = vmul.f32 %v11240_v55, %v131_v30  ;;  %v4871_v58 = vsel %vm4571_vm7, %v4421_v19, %v4721_v63  ;;  %v724_v12 = vpop.permute.xlu1 %723 }
 0x1b2   :  { %v4270_v60 = vmul.f32 %v5746_v33, %v3520_v8  ;;  %v2622_v38 = vmul.f32 %v8061_v11, %v2472_v16  ;;  %v2325_v53 = vmul.f32 1.0614054, %v8078_v15  ;;  %v5171_v42 = vadd.f32 1.0, %v4871_v58 }
 0x1b3   :  { %vm4570_vm8 = vcmp.ge.f32.partialorder %v7931_v59, 0.0  ;;  %v3373_v3 = vadd.f32 0.2548296, %v3223_v49  ;;  %v8091_v22 = vmul.f32 0.70710677, %v8076_v23  ;;  %833 = vrot.lane.b32.xlu0 %v433_v57, %s6337_s25  ;;  %vm4573_vm9 = vcmp.ge.f32.partialorder %v7946_v27, 0.0 }
 0x1b4   :  { %v5752_v62 = vpop.eup %5751  ;;  %v4420_v28 = vsub.f32 1.0, %v4270_v60  ;;  %v2772_v35 = vadd.f32 1.4214138, %v2622_v38  ;;  %5755 = vpow2.f32 %v4010_v10  ;;  %v2475_v9 = vadd.f32 -1.4531521, %v2325_v53  ;;  %v722_v60 = vpop.permute.xlu0 %721  ;;  %v134_v38 = vld [vmem:[%s11233_s2 + $0x338] sm:$0xff] }
 0x1b5   :  { %v5321_v56 = vmul.f32 %v5171_v42, %v8035_v2  ;;  %v3523_v50 = vmul.f32 %v8019_v54, %v3373_v3  ;;  %v3824_v13 = vsub.f32 0.0, %v3674_v32  ;;  %v1577_v33 = vand.u32 2147483647, %v8091_v22  ;;  %v6217_v27 = vld [vmem:[%s11233_s2 + $0x160] sm:$0xff] }
 0x1b6   :  { %v4720_v36 = vsub.f32 0.0, %v4420_v28  ;;  %v2922_v37 = vmul.f32 %v8061_v11, %v2772_v35  ;;  %v2625_v24 = vmul.f32 %v8078_v15, %v2475_v9  ;;  %v8101_v26 = vmul.f32 0.70710677, %v8082_v18 }
 0x1b7   :  { %5472 = vst.msk [vmem:[%s11234_s3 + $0x128] sm:$0xff] %vm5434_vm2, %v5321_v56  ;;  %v4273_v52 = vmul.f32 %v5752_v62, %v3523_v50  ;;  %v5023_v2 = vmul.f32 0.5, %v7940_v51  ;;  %5757 = vpow2.f32 %v4016_v39  ;;  %v1727_v54 = vmul.f32 0.3275911, %v1577_v33 }
 0x1b8   :  { %v4870_v5 = vsel %vm4570_vm8, %v4420_v28, %v4720_v36  ;;  %v3072_v34 = vadd.f32 -0.28449672, %v2922_v37  ;;  %v2775_v31 = vadd.f32 1.4214138, %v2625_v24  ;;  %v1576_v61 = vand.u32 2147483647, %v8101_v26 }
 0x1b9   :  { %v8111_v46 = vpop.eup %5753  ;;  %v5170_v4 = vadd.f32 1.0, %v4870_v5  ;;  %v4423_v14 = vsub.f32 1.0, %v4273_v52  ;;  %v4014_v0 = vmul.f32 1.442695, %v3824_v13  ;;  %v1877_v10 = vadd.f32 1.0, %v1727_v54 }
 0x1ba   :  { %v3222_v47 = vmul.f32 %v8061_v11, %v3072_v34  ;;  %v2925_v7 = vmul.f32 %v8078_v15, %v2775_v31  ;;  %v2324_v51 = vmul.f32 1.0614054, %v8111_v46  ;;  %v1726_v19 = vmul.f32 0.3275911, %v1576_v61 }
 0x1bb   :  { %v5320_v59 = vmul.f32 %v5170_v4, %v8047_v40  ;;  %v4723_v29 = vsub.f32 0.0, %v4423_v14  ;;  %5759 = vrcp.f32 %v1877_v10  ;;  %v227_v45 = vmul.f32 %v6216_v6, %v6710_v20 }
 0x1bc   :  { %v3372_v30 = vadd.f32 0.2548296, %v3222_v47  ;;  %v3075_v21 = vadd.f32 -0.28449672, %v2925_v7  ;;  %v2474_v39 = vadd.f32 -1.4531521, %v2324_v51  ;;  %5761 = vpow2.f32 %v4014_v0 }
 0x1bd   :  { %5471 = vst.msk [vmem:[%s11234_s3 + $0x120] sm:$0xff] %vm5434_vm2, %v5320_v59  ;;  %v4873_v40 = vsel %vm4573_vm9, %v4423_v14, %v4723_v29  ;;  %v3677_v63 = vmul.f32 %v1577_v33, %v1577_v33  ;;  %v1876_v8 = vadd.f32 1.0, %v1726_v19  ;;  %v1128_v53 = vadd.f32 %v724_v12, %v227_v45 }
 0x1be   :  { %v5756_v16 = vpop.eup %5755  ;;  %v5173_v49 = vadd.f32 1.0, %v4873_v40  ;;  %v3522_v32 = vmul.f32 %v8061_v11, %v3372_v30  ;;  %v3225_v57 = vmul.f32 %v8078_v15, %v3075_v21  ;;  %v2624_v58 = vmul.f32 %v8111_v46, %v2474_v39  ;;  %v133_v11 = vld [vmem:[%s11233_s2 + $0x330] sm:$0xff] }
 0x1bf   :  { %5763 = vrcp.f32 %v1876_v8  ;;  %v226_v42 = vmul.f32 %v6217_v27, %v6710_v20  ;;  %v3827_v56 = vsub.f32 0.0, %v3677_v63  ;;  %v8141_v50 = vadd.f32 %v6742_v1, %v1128_v53  ;;  %v6218_v8 = vld [vmem:[%s11233_s2 + $0x178] sm:$0xff] }
 0x1c0   :  { %v5323_v3 = vmul.f32 %v5173_v49, %v5023_v2  ;;  %v4272_v62 = vmul.f32 %v5756_v16, %v3522_v32  ;;  %v3375_v28 = vadd.f32 0.2548296, %v3225_v57  ;;  %v2774_v35 = vadd.f32 1.4214138, %v2624_v58  ;;  %v728_v58 = vpop.permute.xlu1 %727 }
 0x1c1   :  { %v5758_v9 = vpop.eup %5757  ;;  %v1127_v13 = vadd.f32 %v722_v60, %v226_v42  ;;  %v436_v33 = vmul.f32 %v11240_v55, %v134_v38  ;;  %v435_v52 = vmul.f32 %v11240_v55, %v133_v11  ;;  %vm4572_vm10 = vcmp.ge.f32.partialorder %v7991_v44, 0.0 }
 0x1c2   :  { %5474 = vst.msk [vmem:[%s11234_s3 + $0x138] sm:$0xff] %vm5434_vm2, %v5323_v3  ;;  %v4422_v36 = vsub.f32 1.0, %v4272_v62  ;;  %v3525_v37 = vmul.f32 %v8078_v15, %v3375_v28  ;;  %v2924_v24 = vmul.f32 %v8111_v46, %v2774_v35  ;;  %v5022_v2 = vmul.f32 0.5, %v7974_v17  ;;  %v136_v3 = vld [vmem:[%s11233_s2 + $0x348] sm:$0xff] }
 0x1c3   :  { %v8154_v54 = vmul.f32 0.70710677, %v8141_v50  ;;  %v8157_v5 = vadd.f32 %v6742_v1, %v1127_v13  ;;  %839 = vrot.lane.b32.xlu1 %v436_v33, %s6337_s25  ;;  %v3676_v15 = vmul.f32 %v1576_v61, %v1576_v61  ;;  %837 = vrot.lane.b32.xlu0 %v435_v52, %s6337_s25  ;;  %v4020_v0 = vmul.f32 1.442695, %v3827_v56  ;;  %v135_v56 = vld [vmem:[%s11233_s2 + $0x340] sm:$0xff] }
 0x1c4   :  { %v4722_v34 = vsub.f32 0.0, %v4422_v36  ;;  %v4275_v31 = vmul.f32 %v5758_v9, %v3525_v37  ;;  %v3074_v4 = vadd.f32 -0.28449672, %v2924_v24  ;;  %vm4575_vm11 = vcmp.ge.f32.partialorder %v8012_v48, 0.0  ;;  %v6219_v9 = vld [vmem:[%s11233_s2 + $0x170] sm:$0xff] }
 0x1c5   :  { %v8161_v14 = vpop.eup %5759  ;;  %v1579_v44 = vand.u32 2147483647, %v8154_v54  ;;  %v8165_v17 = vmul.f32 0.70710677, %v8157_v5  ;;  %v3826_v21 = vsub.f32 0.0, %v3676_v15  ;;  %v229_v16 = vmul.f32 %v6218_v8, %v6710_v20 }
 0x1c6   :  { %v4872_v10 = vsel %vm4572_vm10, %v4422_v36, %v4722_v34  ;;  %v4425_v47 = vsub.f32 1.0, %v4275_v31  ;;  %v3224_v7 = vmul.f32 %v8111_v46, %v3074_v4  ;;  %v2327_v51 = vmul.f32 1.0614054, %v8161_v14  ;;  %v5762_v19 = vpop.eup %5761 }
 0x1c7   :  { %v5172_v59 = vadd.f32 1.0, %v4872_v10  ;;  %v1729_v61 = vmul.f32 0.3275911, %v1579_v44  ;;  %v1578_v29 = vand.u32 2147483647, %v8165_v17  ;;  %v5025_v60 = vmul.f32 0.5, %v8004_v25 }
 0x1c8   :  { %v4725_v6 = vsub.f32 0.0, %v4425_v47  ;;  %v3374_v45 = vadd.f32 0.2548296, %v3224_v7  ;;  %v2477_v30 = vadd.f32 -1.4531521, %v2327_v51  ;;  %v1130_v35 = vadd.f32 %v728_v58, %v229_v16 }
 0x1c9   :  { %v8171_v39 = vpop.eup %5763  ;;  %v5322_v12 = vmul.f32 %v5172_v59, %v5022_v2  ;;  %v1879_v40 = vadd.f32 1.0, %v1729_v61  ;;  %v1728_v63 = vmul.f32 0.3275911, %v1578_v29  ;;  %v4018_v28 = vmul.f32 1.442695, %v3826_v21 }
 0x1ca   :  { %v4875_v49 = vsel %vm4575_vm11, %v4425_v47, %v4725_v6  ;;  %v3524_v48 = vmul.f32 %v8111_v46, %v3374_v45  ;;  %v2627_v32 = vmul.f32 %v8161_v14, %v2477_v30  ;;  %v2326_v57 = vmul.f32 1.0614054, %v8171_v39  ;;  %v726_v46 = vpop.permute.xlu0 %725 }
 0x1cb   :  { %5473 = vst.msk [vmem:[%s11234_s3 + $0x130] sm:$0xff] %vm5434_vm2, %v5322_v12  ;;  %v5175_v38 = vadd.f32 1.0, %v4875_v49  ;;  %5765 = vrcp.f32 %v1879_v40  ;;  %v1878_v53 = vadd.f32 1.0, %v1728_v63  ;;  %v228_v25 = vmul.f32 %v6219_v9, %v6710_v20 }
 0x1cc   :  { %v4274_v27 = vmul.f32 %v5762_v19, %v3524_v48  ;;  %v2777_v42 = vadd.f32 1.4214138, %v2627_v32  ;;  %5767 = vpow2.f32 %v4020_v0  ;;  %v2476_v11 = vadd.f32 -1.4531521, %v2326_v57 }
 0x1cd   :  { %v5325_v62 = vmul.f32 %v5175_v38, %v5025_v60  ;;  %5769 = vrcp.f32 %v1878_v53  ;;  %vm4574_vm12 = vcmp.ge.f32.partialorder %v8030_v43, 0.0  ;;  %v8203_v37 = vadd.f32 %v6742_v1, %v1130_v35  ;;  %v732_v43 = vpop.permute.xlu1 %731 }
 0x1ce   :  { %v4424_v13 = vsub.f32 1.0, %v4274_v27  ;;  %v2927_v33 = vmul.f32 %v8161_v14, %v2777_v42  ;;  %v2626_v36 = vmul.f32 %v8171_v39, %v2476_v11  ;;  %v1129_v24 = vadd.f32 %v726_v46, %v228_v25 }
 0x1cf   :  { %5476 = vst.msk [vmem:[%s11234_s3 + $0x148] sm:$0xff] %vm5434_vm2, %v5325_v62  ;;  %v438_v52 = vmul.f32 %v11240_v55, %v136_v3  ;;  %v437_v4 = vmul.f32 %v11240_v55, %v135_v56  ;;  %5771 = vpow2.f32 %v4018_v28  ;;  %v3679_v15 = vmul.f32 %v1579_v44, %v1579_v44  ;;  %v6220_v44 = vld [vmem:[%s11233_s2 + $0x188] sm:$0xff] }
 0x1d0   :  { %v4724_v2 = vsub.f32 0.0, %v4424_v13  ;;  %v3077_v34 = vadd.f32 -0.28449672, %v2927_v33  ;;  %v2776_v31 = vadd.f32 1.4214138, %v2626_v36  ;;  %v8211_v10 = vadd.f32 %v6742_v1, %v1129_v24 }
 0x1d1   :  { %v8208_v0 = vmul.f32 0.70710677, %v8203_v37  ;;  %843 = vrot.lane.b32.xlu1 %v438_v52, %s6337_s25  ;;  %841 = vrot.lane.b32.xlu0 %v437_v4, %s6337_s25  ;;  %v231_v19 = vmul.f32 %v6220_v44, %v6710_v20  ;;  %v5024_v59 = vmul.f32 0.5, %v8022_v41  ;;  %v3678_v6 = vmul.f32 %v1578_v29, %v1578_v29  ;;  %v730_v44 = vpop.permute.xlu0 %729 }
 0x1d2   :  { %v4874_v47 = vsel %vm4574_vm12, %v4424_v13, %v4724_v2  ;;  %v3227_v7 = vmul.f32 %v8161_v14, %v3077_v34  ;;  %v2926_v51 = vmul.f32 %v8171_v39, %v2776_v31  ;;  %v8224_v12 = vmul.f32 0.70710677, %v8211_v10 }
 0x1d3   :  { %v5174_v61 = vadd.f32 1.0, %v4874_v47  ;;  %v1581_v45 = vand.u32 2147483647, %v8208_v0  ;;  %v1132_v40 = vadd.f32 %v732_v43, %v231_v19  ;;  %v5027_v16 = vmul.f32 0.5, %v8076_v23  ;;  %v138_v43 = vld [vmem:[%s11233_s2 + $0x358] sm:$0xff] }
 0x1d4   :  { %v3377_v30 = vadd.f32 0.2548296, %v3227_v7  ;;  %v3076_v21 = vadd.f32 -0.28449672, %v2926_v51  ;;  %v3829_v49 = vsub.f32 0.0, %v3679_v15  ;;  %v8238_v60 = vmul.f32 0.5, %v8082_v18 }
 0x1d5   :  { %v8226_v63 = vpop.eup %5765  ;;  %v5324_v8 = vmul.f32 %v5174_v61, %v5024_v59  ;;  %v1731_v48 = vmul.f32 0.3275911, %v1581_v45  ;;  %v1580_v58 = vand.u32 2147483647, %v8224_v12  ;;  %v3828_v23 = vsub.f32 0.0, %v3678_v6 }
 0x1d6   :  { %v5768_v32 = vpop.eup %5767  ;;  %v3527_v41 = vmul.f32 %v8161_v14, %v3377_v30  ;;  %v3226_v29 = vmul.f32 %v8171_v39, %v3076_v21  ;;  %v2329_v57 = vmul.f32 1.0614054, %v8226_v63  ;;  %v8241_v53 = vadd.f32 %v6742_v1, %v1132_v40 }
 0x1d7   :  { %5475 = vst.msk [vmem:[%s11234_s3 + $0x140] sm:$0xff] %vm5434_vm2, %v5324_v8  ;;  %v1881_v38 = vadd.f32 1.0, %v1731_v48  ;;  %v8243_v14 = vpop.eup %5769  ;;  %v1730_v46 = vmul.f32 0.3275911, %v1580_v58  ;;  %vm4577_vm13 = vcmp.ge.f32.partialorder %v8091_v22, 0.0  ;;  %vm4576_vm14 = vcmp.ge.f32.partialorder %v8101_v26, 0.0 }
 0x1d8   :  { %v4277_v27 = vmul.f32 %v5768_v32, %v3527_v41  ;;  %v3376_v42 = vadd.f32 0.2548296, %v3226_v29  ;;  %v2479_v11 = vadd.f32 -1.4531521, %v2329_v57  ;;  %v4024_v3 = vmul.f32 1.442695, %v3829_v49 }
 0x1d9   :  { %v2328_v62 = vmul.f32 1.0614054, %v8243_v14  ;;  %5773 = vrcp.f32 %v1881_v38  ;;  %v1880_v9 = vadd.f32 1.0, %v1730_v46  ;;  %v5772_v25 = vpop.eup %5771  ;;  %v4022_v13 = vmul.f32 1.442695, %v3828_v23  ;;  %v6221_v22 = vld [vmem:[%s11233_s2 + $0x180] sm:$0xff] }
 0x1da   :  { %v4427_v28 = vsub.f32 1.0, %v4277_v27  ;;  %v3526_v18 = vmul.f32 %v8171_v39, %v3376_v42  ;;  %v2629_v35 = vmul.f32 %v8226_v63, %v2479_v11  ;;  %v8250_v33 = vmul.f32 0.70710677, %v8241_v53  ;;  %v736_v42 = vpop.permute.xlu1 %735 }
 0x1db   :  { %v2478_v56 = vadd.f32 -1.4531521, %v2328_v62  ;;  %5775 = vrcp.f32 %v1880_v9  ;;  %v3681_v15 = vmul.f32 %v1581_v45, %v1581_v45  ;;  %v3680_v61 = vmul.f32 %v1580_v58, %v1580_v58  ;;  %v137_v45 = vld [vmem:[%s11233_s2 + $0x350] sm:$0xff] }
 0x1dc   :  { %v4727_v36 = vsub.f32 0.0, %v4427_v28  ;;  %v4276_v24 = vmul.f32 %v5772_v25, %v3526_v18  ;;  %v2779_v52 = vadd.f32 1.4214138, %v2629_v35  ;;  %5777 = vpow2.f32 %v4024_v3 }
 0x1dd   :  { %v2628_v2 = vmul.f32 %v8243_v14, %v2478_v56  ;;  %v1583_v39 = vand.u32 2147483647, %v8250_v33  ;;  %5779 = vpow2.f32 %v4022_v13  ;;  %v230_v6 = vmul.f32 %v6221_v22, %v6710_v20 }
 0x1de   :  { %v4877_v34 = vsel %vm4577_vm13, %v4427_v28, %v4727_v36  ;;  %v4426_v31 = vsub.f32 1.0, %v4276_v24  ;;  %v2929_v4 = vmul.f32 %v8226_v63, %v2779_v52  ;;  %v440_v8 = vmul.f32 %v11240_v55, %v138_v43 }
 0x1df   :  { %v5177_v47 = vadd.f32 1.0, %v4877_v34  ;;  %v2778_v7 = vadd.f32 1.4214138, %v2628_v2  ;;  %v1733_v51 = vmul.f32 0.3275911, %v1583_v39  ;;  %v3831_v32 = vsub.f32 0.0, %v3681_v15 }
 0x1e0   :  { %v4726_v19 = vsub.f32 0.0, %v4426_v31  ;;  %v3079_v59 = vadd.f32 -0.28449672, %v2929_v4  ;;  %v1131_v41 = vadd.f32 %v730_v44, %v230_v6  ;;  %847 = vrot.lane.b32.xlu1 %v440_v8, %s6337_s25  ;;  %v439_v58 = vmul.f32 %v11240_v55, %v137_v45 }
 0x1e1   :  { %v5327_v30 = vmul.f32 %v5177_v47, %v5027_v16  ;;  %v2928_v21 = vmul.f32 %v8243_v14, %v2778_v7  ;;  %v1883_v40 = vadd.f32 1.0, %v1733_v51  ;;  %v8282_v23 = vmul.f32 0.5, %v8141_v50  ;;  %v6222_v50 = vld [vmem:[%s11233_s2 + $0x198] sm:$0xff] }
 0x1e2   :  { %v4876_v49 = vsel %vm4576_vm14, %v4426_v31, %v4726_v19  ;;  %v3229_v48 = vmul.f32 %v8226_v63, %v3079_v59  ;;  %v8286_v27 = vadd.f32 %v6742_v1, %v1131_v41  ;;  %vm4579_vm15 = vcmp.ge.f32.partialorder %v8154_v54, 0.0  ;;  %845 = vrot.lane.b32.xlu0 %v439_v58, %s6337_s25 }
 0x1e3   :  { %v8273_v29 = vpop.eup %5773  ;;  %5478 = vst.msk [vmem:[%s11234_s3 + $0x158] sm:$0xff] %vm5434_vm2, %v5327_v30  ;;  %v5176_v16 = vadd.f32 1.0, %v4876_v49  ;;  %v3078_v57 = vadd.f32 -0.28449672, %v2928_v21  ;;  %5781 = vrcp.f32 %v1883_v40  ;;  %v3830_v3 = vsub.f32 0.0, %v3680_v61  ;;  %v734_v30 = vpop.permute.xlu0 %733 }
 0x1e4   :  { %v3379_v26 = vadd.f32 0.2548296, %v3229_v48  ;;  %v2331_v38 = vmul.f32 1.0614054, %v8273_v29  ;;  %v233_v62 = vmul.f32 %v6222_v50, %v6710_v20  ;;  %v4028_v9 = vmul.f32 1.442695, %v3831_v32 }
 0x1e5   :  { %v5326_v11 = vmul.f32 %v5176_v16, %v8238_v60  ;;  %v3228_v46 = vmul.f32 %v8243_v14, %v3078_v57  ;;  %v8296_v28 = vpop.eup %5775  ;;  %v8300_v60 = vmul.f32 0.70710677, %v8286_v27  ;;  %v5028_v13 = vmul.f32 0.5, %v8157_v5 }
 0x1e6   :  { %v3529_v18 = vmul.f32 %v8226_v63, %v3379_v26  ;;  %v2481_v35 = vadd.f32 -1.4531521, %v2331_v38  ;;  %v5778_v25 = vpop.eup %5777  ;;  %v2330_v36 = vmul.f32 1.0614054, %v8296_v28  ;;  %v1134_v24 = vadd.f32 %v736_v42, %v233_v62  ;;  %v140_v38 = vld [vmem:[%s11233_s2 + $0x368] sm:$0xff] }
 0x1e7   :  { %5477 = vst.msk [vmem:[%s11234_s3 + $0x150] sm:$0xff] %vm5434_vm2, %v5326_v11  ;;  %v3378_v56 = vadd.f32 0.2548296, %v3228_v46  ;;  %vm4578_vm0 = vcmp.ge.f32.partialorder %v8165_v17, 0.0  ;;  %v3683_v2 = vmul.f32 %v1583_v39, %v1583_v39  ;;  %v1582_v34 = vand.u32 2147483647, %v8300_v60  ;;  %v5780_v31 = vpop.eup %5779 }
 0x1e8   :  { %v4279_v52 = vmul.f32 %v5778_v25, %v3529_v18  ;;  %v2631_v63 = vmul.f32 %v8273_v29, %v2481_v35  ;;  %v2480_v15 = vadd.f32 -1.4531521, %v2330_v36  ;;  %v4026_v43 = vmul.f32 1.442695, %v3830_v3  ;;  %v6223_v39 = vld [vmem:[%s11233_s2 + $0x190] sm:$0xff]  ;;  %v139_v36 = vld [vmem:[%s11233_s2 + $0x360] sm:$0xff] }
 0x1e9   :  { %v3528_v4 = vmul.f32 %v8243_v14, %v3378_v56  ;;  %v8313_v47 = vadd.f32 %v6742_v1, %v1134_v24  ;;  %5783 = vpow2.f32 %v4028_v9  ;;  %v1732_v51 = vmul.f32 0.3275911, %v1582_v34 }
 0x1ea   :  { %v4429_v5 = vsub.f32 1.0, %v4279_v52  ;;  %v2781_v7 = vadd.f32 1.4214138, %v2631_v63  ;;  %v2630_v19 = vmul.f32 %v8296_v28, %v2480_v15  ;;  %v232_v14 = vmul.f32 %v6223_v39, %v6710_v20 }
 0x1eb   :  { %v4278_v44 = vmul.f32 %v5780_v31, %v3528_v4  ;;  %v8317_v59 = vmul.f32 0.70710677, %v8313_v47  ;;  %v3833_v6 = vsub.f32 0.0, %v3683_v2  ;;  %v1882_v45 = vadd.f32 1.0, %v1732_v51 }
 0x1ec   :  { %v4729_v61 = vsub.f32 0.0, %v4429_v5  ;;  %v2931_v22 = vmul.f32 %v8273_v29, %v2781_v7  ;;  %v2780_v8 = vadd.f32 1.4214138, %v2630_v19  ;;  %5785 = vpow2.f32 %v4026_v43  ;;  %v740_v43 = vpop.permute.xlu1 %739  ;;  %v6224_v7 = vld [vmem:[%s11233_s2 + $0x1a8] sm:$0xff] }
 0x1ed   :  { %v8324_v21 = vpop.eup %5781  ;;  %v4428_v40 = vsub.f32 1.0, %v4278_v44  ;;  %v1585_v49 = vand.u32 2147483647, %v8317_v59  ;;  %5787 = vrcp.f32 %v1882_v45  ;;  %v1133_v26 = vadd.f32 %v734_v30, %v232_v14  ;;  %v6225_v30 = vld [vmem:[%s11233_s2 + $0x1a0] sm:$0xff] }
 0x1ee   :  { %v4879_v48 = vsel %vm4579_vm15, %v4429_v5, %v4729_v61  ;;  %v3081_v32 = vadd.f32 -0.28449672, %v2931_v22  ;;  %v2333_v41 = vmul.f32 1.0614054, %v8324_v21  ;;  %v2930_v58 = vmul.f32 %v8296_v28, %v2780_v8 }
 0x1ef   :  { %v5179_v16 = vadd.f32 1.0, %v4879_v48  ;;  %v4728_v57 = vsub.f32 0.0, %v4428_v40  ;;  %v4032_v46 = vmul.f32 1.442695, %v3833_v6  ;;  %v1735_v3 = vmul.f32 0.3275911, %v1585_v49 }
 0x1f0   :  { %v3231_v42 = vmul.f32 %v8273_v29, %v3081_v32  ;;  %v2483_v11 = vadd.f32 -1.4531521, %v2333_v41  ;;  %v3080_v62 = vadd.f32 -0.28449672, %v2930_v58  ;;  %v3682_v18 = vmul.f32 %v1582_v34, %v1582_v34  ;;  %v738_v32 = vpop.permute.xlu0 %737 }
 0x1f1   :  { %v5329_v54 = vmul.f32 %v5179_v16, %v8282_v23  ;;  %v4878_v50 = vsel %vm4578_vm0, %v4428_v40, %v4728_v57  ;;  %v1885_v56 = vadd.f32 1.0, %v1735_v3  ;;  %v5031_v23 = vmul.f32 0.5, %v8203_v37 }
 0x1f2   :  { %v5178_v35 = vadd.f32 1.0, %v4878_v50  ;;  %v3381_v9 = vadd.f32 0.2548296, %v3231_v42  ;;  %v2633_v25 = vmul.f32 %v8324_v21, %v2483_v11  ;;  %v3230_v17 = vmul.f32 %v8296_v28, %v3080_v62 }
 0x1f3   :  { %5480 = vst.msk [vmem:[%s11234_s3 + $0x168] sm:$0xff] %vm5434_vm2, %v5329_v54  ;;  %v8349_v24 = vadd.f32 %v6742_v1, %v1133_v26  ;;  %v442_v52 = vmul.f32 %v11240_v55, %v140_v38  ;;  %v5784_v63 = vpop.eup %5783  ;;  %5789 = vrcp.f32 %v1885_v56  ;;  %v441_v37 = vmul.f32 %v11240_v55, %v139_v36 }
 0x1f4   :  { %v5328_v2 = vmul.f32 %v5178_v35, %v5028_v13  ;;  %v3531_v34 = vmul.f32 %v8273_v29, %v3381_v9  ;;  %v2783_v31 = vadd.f32 1.4214138, %v2633_v25  ;;  %v3380_v4 = vadd.f32 0.2548296, %v3230_v17 }
 0x1f5   :  { %5791 = vpow2.f32 %v4032_v46  ;;  %v8354_v15 = vmul.f32 0.70710677, %v8349_v24  ;;  %851 = vrot.lane.b32.xlu1 %v442_v52, %s6337_s25  ;;  %v3832_v5 = vsub.f32 0.0, %v3682_v18  ;;  %v235_v51 = vmul.f32 %v6224_v7, %v6710_v20  ;;  %849 = vrot.lane.b32.xlu0 %v441_v37, %s6337_s25 }
 0x1f6   :  { %5479 = vst.msk [vmem:[%s11234_s3 + $0x160] sm:$0xff] %vm5434_vm2, %v5328_v2  ;;  %v4281_v13 = vmul.f32 %v5784_v63, %v3531_v34  ;;  %v2933_v29 = vmul.f32 %v8324_v21, %v2783_v31  ;;  %v5786_v44 = vpop.eup %5785  ;;  %vm4581_vm1 = vcmp.ge.f32.partialorder %v8208_v0, 0.0  ;;  %v3530_v19 = vmul.f32 %v8296_v28, %v3380_v4  ;;  %v142_v63 = vld [vmem:[%s11233_s2 + $0x378] sm:$0xff] }
 0x1f7   :  { %v3685_v39 = vmul.f32 %v1585_v49, %v1585_v49  ;;  %v1584_v14 = vand.u32 2147483647, %v8354_v15  ;;  %v8371_v61 = vpop.eup %5787  ;;  %v1136_v45 = vadd.f32 %v740_v43, %v235_v51  ;;  %v234_v40 = vmul.f32 %v6225_v30, %v6710_v20  ;;  %v141_v43 = vld [vmem:[%s11233_s2 + $0x370] sm:$0xff] }
 0x1f8   :  { %v4431_v22 = vsub.f32 1.0, %v4281_v13  ;;  %v3083_v6 = vadd.f32 -0.28449672, %v2933_v29  ;;  %v4280_v8 = vmul.f32 %v5786_v44, %v3530_v19  ;;  %v5030_v48 = vmul.f32 0.5, %v8211_v10 }
 0x1f9   :  { %v2332_v28 = vmul.f32 1.0614054, %v8371_v61  ;;  %v1734_v49 = vmul.f32 0.3275911, %v1584_v14  ;;  %v4030_v57 = vmul.f32 1.442695, %v3832_v5  ;;  %v8381_v58 = vadd.f32 %v6742_v1, %v1136_v45 }
 0x1fa   :  { %v4731_v41 = vsub.f32 0.0, %v4431_v22  ;;  %v3233_v16 = vmul.f32 %v8324_v21, %v3083_v6  ;;  %v4430_v26 = vsub.f32 1.0, %v4280_v8  ;;  %v3835_v42 = vsub.f32 0.0, %v3685_v39 }
 0x1fb   :  { %v2482_v38 = vadd.f32 -1.4531521, %v2332_v28  ;;  %v1884_v11 = vadd.f32 1.0, %v1734_v49  ;;  %v8386_v10 = vmul.f32 0.70710677, %v8381_v58  ;;  %v1135_v54 = vadd.f32 %v738_v32, %v234_v40  ;;  %v744_v40 = vpop.permute.xlu1 %743  ;;  %v742_v49 = vpop.permute.xlu0 %741 }
 0x1fc   :  { %v4881_v46 = vsel %vm4581_vm1, %v4431_v22, %v4731_v41  ;;  %v3383_v3 = vadd.f32 0.2548296, %v3233_v16  ;;  %v4730_v62 = vsub.f32 0.0, %v4430_v26  ;;  %vm4580_vm3 = vcmp.ge.f32.partialorder %v8224_v12, 0.0 }
 0x1fd   :  { %v5181_v50 = vadd.f32 1.0, %v4881_v46  ;;  %v2632_v18 = vmul.f32 %v8371_v61, %v2482_v38  ;;  %5793 = vrcp.f32 %v1884_v11  ;;  %v8389_v35 = vpop.eup %5789  ;;  %v1587_v0 = vand.u32 2147483647, %v8386_v10 }
 0x1fe   :  { %v3533_v9 = vmul.f32 %v8324_v21, %v3383_v3  ;;  %5795 = vpow2.f32 %v4030_v57  ;;  %v4880_v36 = vsel %vm4580_vm3, %v4430_v26, %v4730_v62  ;;  %v2335_v52 = vmul.f32 1.0614054, %v8389_v35 }
 0x1ff   :  { %v5792_v25 = vpop.eup %5791  ;;  %v5331_v56 = vmul.f32 %v5181_v50, %v5031_v23  ;;  %v2782_v17 = vadd.f32 1.4214138, %v2632_v18  ;;  %v5180_v2 = vadd.f32 1.0, %v4880_v36  ;;  %v3684_v31 = vmul.f32 %v1584_v14, %v1584_v14 }
 0x200   :  { %v4283_v34 = vmul.f32 %v5792_v25, %v3533_v9  ;;  %v1737_v4 = vmul.f32 0.3275911, %v1587_v0  ;;  %v2485_v21 = vadd.f32 -1.4531521, %v2335_v52  ;;  %v4036_v23 = vmul.f32 1.442695, %v3835_v42 }
 0x201   :  { %5482 = vst.msk [vmem:[%s11234_s3 + $0x178] sm:$0xff] %vm5434_vm2, %v5331_v56  ;;  %v2932_v12 = vmul.f32 %v8371_v61, %v2782_v17  ;;  %v8404_v37 = vadd.f32 %v6742_v1, %v1135_v54  ;;  %v5330_v13 = vmul.f32 %v5180_v2, %v5030_v48  ;;  %v444_v7 = vmul.f32 %v11240_v55, %v142_v63  ;;  %v6226_v48 = vld [vmem:[%s11233_s2 + $0x1b8] sm:$0xff]  ;;  %v144_v42 = vld [vmem:[%s11233_s2 + $0x388] sm:$0xff] }
 0x202   :  { %v4433_v29 = vsub.f32 1.0, %v4283_v34  ;;  %v1887_v5 = vadd.f32 1.0, %v1737_v4  ;;  %v2635_v44 = vmul.f32 %v8389_v35, %v2485_v21  ;;  %v3834_v14 = vsub.f32 0.0, %v3684_v31 }
 0x203   :  { %v3082_v51 = vadd.f32 -0.28449672, %v2932_v12  ;;  %v8412_v19 = vmul.f32 0.70710677, %v8404_v37  ;;  %5481 = vst.msk [vmem:[%s11234_s3 + $0x170] sm:$0xff] %vm5434_vm2, %v5330_v13  ;;  %855 = vrot.lane.b32.xlu1 %v444_v7, %s6337_s25  ;;  %v443_v22 = vmul.f32 %v11240_v55, %v141_v43  ;;  %vm4583_vm4 = vcmp.ge.f32.partialorder %v8250_v33, 0.0 }
 0x204   :  { %v4733_v39 = vsub.f32 0.0, %v4433_v29  ;;  %5797 = vrcp.f32 %v1887_v5  ;;  %v2785_v45 = vadd.f32 1.4214138, %v2635_v44  ;;  %v237_v28 = vmul.f32 %v6226_v48, %v6710_v20  ;;  %v6227_v33 = vld [vmem:[%s11233_s2 + $0x1b0] sm:$0xff] }
 0x205   :  { %v3232_v6 = vmul.f32 %v8371_v61, %v3082_v51  ;;  %v1586_v30 = vand.u32 2147483647, %v8412_v19  ;;  %5799 = vpow2.f32 %v4036_v23  ;;  %853 = vrot.lane.b32.xlu0 %v443_v22, %s6337_s25  ;;  %v236_v32 = vmul.f32 %v6227_v33, %v6710_v20 }
 0x206   :  { %v4883_v8 = vsel %vm4583_vm4, %v4433_v29, %v4733_v39  ;;  %v5033_v16 = vmul.f32 0.5, %v8241_v53  ;;  %v2935_v38 = vmul.f32 %v8389_v35, %v2785_v45  ;;  %v4034_v3 = vmul.f32 1.442695, %v3834_v14 }
 0x207   :  { %v8432_v41 = vpop.eup %5793  ;;  %v5183_v57 = vadd.f32 1.0, %v4883_v8  ;;  %v3382_v26 = vadd.f32 0.2548296, %v3232_v6  ;;  %v1736_v54 = vmul.f32 0.3275911, %v1586_v30  ;;  %v1138_v50 = vadd.f32 %v744_v40, %v237_v28 }
 0x208   :  { %v5796_v11 = vpop.eup %5795  ;;  %v2334_v46 = vmul.f32 1.0614054, %v8432_v41  ;;  %v3085_v9 = vadd.f32 -0.28449672, %v2935_v38  ;;  %v1137_v25 = vadd.f32 %v742_v49, %v236_v32  ;;  %v3687_v56 = vmul.f32 %v1587_v0, %v1587_v0 }
 0x209   :  { %v5333_v62 = vmul.f32 %v5183_v57, %v5033_v16  ;;  %v3532_v18 = vmul.f32 %v8371_v61, %v3382_v26  ;;  %v1886_v36 = vadd.f32 1.0, %v1736_v54  ;;  %v8442_v17 = vadd.f32 %v6742_v1, %v1138_v50 }
 0x20a   :  { %v2484_v53 = vadd.f32 -1.4531521, %v2334_v46  ;;  %v3235_v63 = vmul.f32 %v8389_v35, %v3085_v9  ;;  %v8450_v2 = vadd.f32 %v6742_v1, %v1137_v25  ;;  %v446_v61 = vmul.f32 %v11240_v55, %v144_v42 }
 0x20b   :  { %5484 = vst.msk [vmem:[%s11234_s3 + $0x188] sm:$0xff] %vm5434_vm2, %v5333_v62  ;;  %v4282_v52 = vmul.f32 %v5796_v11, %v3532_v18  ;;  %v5032_v34 = vmul.f32 0.5, %v8286_v27  ;;  %5801 = vrcp.f32 %v1886_v36  ;;  %v8456_v31 = vmul.f32 0.70710677, %v8442_v17 }
 0x20c   :  { %v2634_v0 = vmul.f32 %v8432_v41, %v2484_v53  ;;  %vm4582_vm5 = vcmp.ge.f32.partialorder %v8300_v60, 0.0  ;;  %v3385_v12 = vadd.f32 0.2548296, %v3235_v63  ;;  %v8460_v21 = vmul.f32 0.70710677, %v8450_v2  ;;  %859 = vrot.lane.b32.xlu1 %v446_v61, %s6337_s25  ;;  %v748_v53 = vpop.permute.xlu1 %747  ;;  %v6228_v61 = vld [vmem:[%s11233_s2 + $0x1c8] sm:$0xff] }
 0x20d   :  { %v4432_v4 = vsub.f32 1.0, %v4282_v52  ;;  %5803 = vpow2.f32 %v4034_v3  ;;  %v3837_v27 = vsub.f32 0.0, %v3687_v56  ;;  %v1589_v13 = vand.u32 2147483647, %v8456_v31  ;;  %v746_v56 = vpop.permute.xlu0 %745 }
 0x20e   :  { %v8463_v23 = vpop.eup %5797  ;;  %v2784_v43 = vadd.f32 1.4214138, %v2634_v0  ;;  %v3535_v5 = vmul.f32 %v8389_v35, %v3385_v12  ;;  %v1588_v51 = vand.u32 2147483647, %v8460_v21  ;;  %v5035_v39 = vmul.f32 0.5, %v8313_v47 }
 0x20f   :  { %v4732_v29 = vsub.f32 0.0, %v4432_v4  ;;  %v2337_v7 = vmul.f32 1.0614054, %v8463_v23  ;;  %v5800_v44 = vpop.eup %5799  ;;  %v3686_v22 = vmul.f32 %v1586_v30, %v1586_v30  ;;  %v1739_v6 = vmul.f32 0.3275911, %v1589_v13  ;;  %v143_v30 = vld [vmem:[%s11233_s2 + $0x380] sm:$0xff] }
 0x210   :  { %v2934_v14 = vmul.f32 %v8432_v41, %v2784_v43  ;;  %v4285_v40 = vmul.f32 %v5800_v44, %v3535_v5  ;;  %v1738_v48 = vmul.f32 0.3275911, %v1588_v51  ;;  %v4040_v35 = vmul.f32 1.442695, %v3837_v27 }
 0x211   :  { %v4882_v45 = vsel %vm4582_vm5, %v4432_v4, %v4732_v29  ;;  %v2487_v8 = vadd.f32 -1.4531521, %v2337_v7  ;;  %v1889_v33 = vadd.f32 1.0, %v1739_v6  ;;  %vm4585_vm6 = vcmp.ge.f32.partialorder %v8317_v59, 0.0  ;;  %v145_v4 = vld [vmem:[%s11233_s2 + $0x390] sm:$0xff] }
 0x212   :  { %v5182_v28 = vadd.f32 1.0, %v4882_v45  ;;  %v3084_v49 = vadd.f32 -0.28449672, %v2934_v14  ;;  %v4435_v32 = vsub.f32 1.0, %v4285_v40  ;;  %v1888_v47 = vadd.f32 1.0, %v1738_v48 }
 0x213   :  { %v2637_v16 = vmul.f32 %v8463_v23, %v2487_v8  ;;  %v8480_v26 = vmul.f32 0.5, %v8349_v24  ;;  %5805 = vrcp.f32 %v1889_v33  ;;  %v3836_v11 = vsub.f32 0.0, %v3686_v22  ;;  %v146_v24 = vld [vmem:[%s11233_s2 + $0x398] sm:$0xff] }
 0x214   :  { %v5332_v57 = vmul.f32 %v5182_v28, %v5032_v34  ;;  %v3234_v60 = vmul.f32 %v8432_v41, %v3084_v49  ;;  %v4735_v38 = vsub.f32 0.0, %v4435_v32  ;;  %5807 = vrcp.f32 %v1888_v47  ;;  %v6229_v34 = vld [vmem:[%s11233_s2 + $0x1c0] sm:$0xff] }
 0x215   :  { %v2787_v42 = vadd.f32 1.4214138, %v2637_v16  ;;  %v8482_v46 = vpop.eup %5801  ;;  %5809 = vpow2.f32 %v4040_v35  ;;  %v3689_v54 = vmul.f32 %v1589_v13, %v1589_v13  ;;  %v445_v50 = vmul.f32 %v11240_v55, %v143_v30 }
 0x216   :  { %5483 = vst.msk [vmem:[%s11234_s3 + $0x180] sm:$0xff] %vm5434_vm2, %v5332_v57  ;;  %v3384_v3 = vadd.f32 0.2548296, %v3234_v60  ;;  %v4885_v62 = vsel %vm4585_vm6, %v4435_v32, %v4735_v38  ;;  %v2336_v9 = vmul.f32 1.0614054, %v8482_v46  ;;  %v3688_v25 = vmul.f32 %v1588_v51, %v1588_v51  ;;  %v148_v51 = vld [vmem:[%s11233_s2 + $0x3a8] sm:$0xff] }
 0x217   :  { %v2937_v18 = vmul.f32 %v8463_v23, %v2787_v42  ;;  %v5804_v36 = vpop.eup %5803  ;;  %v5185_v52 = vadd.f32 1.0, %v4885_v62  ;;  %857 = vrot.lane.b32.xlu0 %v445_v50, %s6337_s25  ;;  %v239_v59 = vmul.f32 %v6228_v61, %v6710_v20  ;;  %v238_v0 = vmul.f32 %v6229_v34, %v6710_v20 }
 0x218   :  { %v3534_v63 = vmul.f32 %v8432_v41, %v3384_v3  ;;  %v2486_v41 = vadd.f32 -1.4531521, %v2336_v9  ;;  %v4038_v43 = vmul.f32 1.442695, %v3836_v11  ;;  %v448_v27 = vmul.f32 %v11240_v55, %v146_v24 }
 0x219   :  { %v3087_v12 = vadd.f32 -0.28449672, %v2937_v18  ;;  %v5335_v13 = vmul.f32 %v5185_v52, %v5035_v39  ;;  %v1140_v5 = vadd.f32 %v748_v53, %v239_v59  ;;  %v1139_v7 = vadd.f32 %v746_v56, %v238_v0  ;;  %v6230_v56 = vld [vmem:[%s11233_s2 + $0x1d8] sm:$0xff]  ;;  %v752_v59 = vpop.permute.xlu1 %751 }
 0x21a   :  { %v4284_v29 = vmul.f32 %v5804_v36, %v3534_v63  ;;  %v2636_v14 = vmul.f32 %v8482_v46, %v2486_v41  ;;  %v3839_v22 = vsub.f32 0.0, %v3689_v54  ;;  %863 = vrot.lane.b32.xlu1 %v448_v27, %s6337_s25  ;;  %v447_v6 = vmul.f32 %v11240_v55, %v145_v4 }
 0x21b   :  { %v3237_v44 = vmul.f32 %v8463_v23, %v3087_v12  ;;  %5486 = vst.msk [vmem:[%s11234_s3 + $0x198] sm:$0xff] %vm5434_vm2, %v5335_v13  ;;  %v3838_v45 = vsub.f32 0.0, %v3688_v25  ;;  %v8522_v40 = vadd.f32 %v6742_v1, %v1140_v5  ;;  %v8525_v8 = vadd.f32 %v6742_v1, %v1139_v7 }
 0x21c   :  { %v4434_v39 = vsub.f32 1.0, %v4284_v29  ;;  %vm4584_vm7 = vcmp.ge.f32.partialorder %v8354_v15, 0.0  ;;  %v2786_v28 = vadd.f32 1.4214138, %v2636_v14  ;;  %861 = vrot.lane.b32.xlu0 %v447_v6, %s6337_s25  ;;  %v450_v49 = vmul.f32 %v11240_v55, %v148_v51  ;;  %v750_v14 = vpop.permute.xlu0 %749 }
 0x21d   :  { %v3387_v48 = vadd.f32 0.2548296, %v3237_v44  ;;  %v8530_v35 = vpop.eup %5805  ;;  %vm4587_vm8 = vcmp.ge.f32.partialorder %v8386_v10, 0.0  ;;  %5811 = vpow2.f32 %v4038_v43  ;;  %v8534_v32 = vmul.f32 0.70710677, %v8522_v40 }
 0x21e   :  { %v4734_v33 = vsub.f32 0.0, %v4434_v39  ;;  %v8537_v16 = vmul.f32 0.70710677, %v8525_v8  ;;  %v8539_v47 = vpop.eup %5807  ;;  %v2936_v57 = vmul.f32 %v8482_v46, %v2786_v28  ;;  %v2339_v60 = vmul.f32 1.0614054, %v8530_v35  ;;  %867 = vrot.lane.b32.xlu1 %v450_v49, %s6337_s25  ;;  %v147_v28 = vld [vmem:[%s11233_s2 + $0x3a0] sm:$0xff] }
 0x21f   :  { %v3537_v30 = vmul.f32 %v8463_v23, %v3387_v48  ;;  %v4044_v38 = vmul.f32 1.442695, %v3839_v22  ;;  %v5810_v42 = vpop.eup %5809  ;;  %v2338_v3 = vmul.f32 1.0614054, %v8539_v47  ;;  %v4042_v54 = vmul.f32 1.442695, %v3838_v45 }
 0x220   :  { %v4884_v11 = vsel %vm4584_vm7, %v4434_v39, %v4734_v33  ;;  %v1591_v50 = vand.u32 2147483647, %v8534_v32  ;;  %v3086_v18 = vadd.f32 -0.28449672, %v2936_v57  ;;  %v2489_v23 = vadd.f32 -1.4531521, %v2339_v60 }
 0x221   :  { %v5184_v24 = vadd.f32 1.0, %v4884_v11  ;;  %v4287_v62 = vmul.f32 %v5810_v42, %v3537_v30  ;;  %v2488_v9 = vadd.f32 -1.4531521, %v2338_v3  ;;  %v1590_v53 = vand.u32 2147483647, %v8537_v16 }
 0x222   :  { %v1741_v25 = vmul.f32 0.3275911, %v1591_v50  ;;  %v241_v15 = vmul.f32 %v6230_v56, %v6710_v20  ;;  %v3236_v63 = vmul.f32 %v8482_v46, %v3086_v18  ;;  %v2639_v61 = vmul.f32 %v8530_v35, %v2489_v23  ;;  %v6232_v56 = vld [vmem:[%s11233_s2 + $0x1e8] sm:$0xff] }
 0x223   :  { %v5334_v36 = vmul.f32 %v5184_v24, %v8480_v26  ;;  %v4437_v52 = vsub.f32 1.0, %v4287_v62  ;;  %5813 = vpow2.f32 %v4044_v38  ;;  %v2638_v34 = vmul.f32 %v8539_v47, %v2488_v9  ;;  %v6231_v26 = vld [vmem:[%s11233_s2 + $0x1d0] sm:$0xff] }
 0x224   :  { %v1891_v0 = vadd.f32 1.0, %v1741_v25  ;;  %v1740_v4 = vmul.f32 0.3275911, %v1590_v53  ;;  %v3386_v41 = vadd.f32 0.2548296, %v3236_v63  ;;  %v240_v27 = vmul.f32 %v6231_v26, %v6710_v20 }
 0x225   :  { %5485 = vst.msk [vmem:[%s11234_s3 + $0x190] sm:$0xff] %vm5434_vm2, %v5334_v36  ;;  %v4737_v12 = vsub.f32 0.0, %v4437_v52  ;;  %v2789_v43 = vadd.f32 1.4214138, %v2639_v61  ;;  %v2788_v13 = vadd.f32 1.4214138, %v2638_v34  ;;  %v1142_v5 = vadd.f32 %v752_v59, %v241_v15 }
 0x226   :  { %5815 = vrcp.f32 %v1891_v0  ;;  %v1890_v29 = vadd.f32 1.0, %v1740_v4  ;;  %v3536_v51 = vmul.f32 %v8482_v46, %v3386_v41  ;;  %v5037_v6 = vmul.f32 0.5, %v8381_v58 }
 0x227   :  { %v4887_v7 = vsel %vm4587_vm8, %v4437_v52, %v4737_v12  ;;  %v2939_v44 = vmul.f32 %v8530_v35, %v2789_v43  ;;  %5817 = vpow2.f32 %v4042_v54  ;;  %v5812_v22 = vpop.eup %5811  ;;  %v2938_v45 = vmul.f32 %v8539_v47, %v2788_v13  ;;  %v756_v52 = vpop.permute.xlu1 %755 }
 0x228   :  { %v5187_v39 = vadd.f32 1.0, %v4887_v7  ;;  %v3691_v48 = vmul.f32 %v1591_v50, %v1591_v50  ;;  %v4286_v49 = vmul.f32 %v5812_v22, %v3536_v51  ;;  %5819 = vrcp.f32 %v1890_v29 }
 0x229   :  { %v3089_v10 = vadd.f32 -0.28449672, %v2939_v44  ;;  %v3088_v46 = vadd.f32 -0.28449672, %v2938_v45  ;;  %v8576_v30 = vadd.f32 %v6742_v1, %v1142_v5  ;;  %v1141_v57 = vadd.f32 %v750_v14, %v240_v27 }
 0x22a   :  { %v5337_v33 = vmul.f32 %v5187_v39, %v5037_v6  ;;  %v4436_v60 = vsub.f32 1.0, %v4286_v49  ;;  %v5036_v58 = vmul.f32 0.5, %v8404_v37  ;;  %v449_v42 = vmul.f32 %v11240_v55, %v147_v28 }
 0x22b   :  { %v3239_v38 = vmul.f32 %v8530_v35, %v3089_v10  ;;  %v3238_v11 = vmul.f32 %v8539_v47, %v3088_v46  ;;  %v3841_v3 = vsub.f32 0.0, %v3691_v48  ;;  %v8587_v54 = vmul.f32 0.70710677, %v8576_v30 }
 0x22c   :  { %5488 = vst.msk [vmem:[%s11234_s3 + $0x1a8] sm:$0xff] %vm5434_vm2, %v5337_v33  ;;  %v8590_v50 = vadd.f32 %v6742_v1, %v1141_v57  ;;  %vm4586_vm9 = vcmp.ge.f32.partialorder %v8412_v19, 0.0  ;;  %v4736_v37 = vsub.f32 0.0, %v4436_v60  ;;  %v3690_v62 = vmul.f32 %v1590_v53, %v1590_v53  ;;  %865 = vrot.lane.b32.xlu0 %v449_v42, %s6337_s25  ;;  %v754_v42 = vpop.permute.xlu0 %753 }
 0x22d   :  { %v3389_v24 = vadd.f32 0.2548296, %v3239_v38  ;;  %v5814_v18 = vpop.eup %5813  ;;  %v5039_v23 = vmul.f32 0.5, %v8442_v17  ;;  %v3388_v9 = vadd.f32 0.2548296, %v3238_v11  ;;  %v243_v15 = vmul.f32 %v6232_v56, %v6710_v20 }
 0x22e   :  { %v1593_v25 = vand.u32 2147483647, %v8587_v54  ;;  %v4886_v36 = vsel %vm4586_vm9, %v4436_v60, %v4736_v37  ;;  %vm4589_vm10 = vcmp.ge.f32.partialorder %v8456_v31, 0.0  ;;  %v8603_v53 = vmul.f32 0.70710677, %v8590_v50  ;;  %v150_v31 = vld [vmem:[%s11233_s2 + $0x3b8] sm:$0xff] }
 0x22f   :  { %v3539_v19 = vmul.f32 %v8530_v35, %v3389_v24  ;;  %v5186_v17 = vadd.f32 1.0, %v4886_v36  ;;  %v3538_v61 = vmul.f32 %v8539_v47, %v3388_v9  ;;  %v4048_v59 = vmul.f32 1.442695, %v3841_v3 }
 0x230   :  { %v8605_v63 = vpop.eup %5815  ;;  %v1743_v34 = vmul.f32 0.3275911, %v1593_v25  ;;  %v3840_v41 = vsub.f32 0.0, %v3690_v62  ;;  %v1592_v35 = vand.u32 2147483647, %v8603_v53  ;;  %v1144_v13 = vadd.f32 %v756_v52, %v243_v15 }
 0x231   :  { %v5818_v0 = vpop.eup %5817  ;;  %v4289_v4 = vmul.f32 %v5814_v18, %v3539_v19  ;;  %v2341_v12 = vmul.f32 1.0614054, %v8605_v63  ;;  %v5336_v43 = vmul.f32 %v5186_v17, %v5036_v58  ;;  %vm4588_vm11 = vcmp.ge.f32.partialorder %v8460_v21, 0.0  ;;  %v149_v21 = vld [vmem:[%s11233_s2 + $0x3b0] sm:$0xff] }
 0x232   :  { %v4288_v26 = vmul.f32 %v5818_v0, %v3538_v61  ;;  %v1893_v27 = vadd.f32 1.0, %v1743_v34  ;;  %v8610_v29 = vpop.eup %5819  ;;  %v1742_v47 = vmul.f32 0.3275911, %v1592_v35  ;;  %v5038_v44 = vmul.f32 0.5, %v8450_v2  ;;  %v6233_v2 = vld [vmem:[%s11233_s2 + $0x1e0] sm:$0xff]  ;;  %v760_v61 = vpop.permute.xlu1 %759 }
 0x233   :  { %v4439_v5 = vsub.f32 1.0, %v4289_v4  ;;  %v2491_v7 = vadd.f32 -1.4531521, %v2341_v12  ;;  %5487 = vst.msk [vmem:[%s11234_s3 + $0x1a0] sm:$0xff] %vm5434_vm2, %v5336_v43  ;;  %v2340_v14 = vmul.f32 1.0614054, %v8610_v29  ;;  %v8621_v49 = vadd.f32 %v6742_v1, %v1144_v13 }
 0x234   :  { %v4438_v51 = vsub.f32 1.0, %v4288_v26  ;;  %5821 = vrcp.f32 %v1893_v27  ;;  %v4046_v39 = vmul.f32 1.442695, %v3840_v41  ;;  %v1892_v45 = vadd.f32 1.0, %v1742_v47  ;;  %v6234_v4 = vld [vmem:[%s11233_s2 + $0x1f8] sm:$0xff] }
 0x235   :  { %v4739_v22 = vsub.f32 0.0, %v4439_v5  ;;  %v2641_v6 = vmul.f32 %v8605_v63, %v2491_v7  ;;  %5823 = vpow2.f32 %v4048_v59  ;;  %v2490_v28 = vadd.f32 -1.4531521, %v2340_v14 }
 0x236   :  { %v4738_v48 = vsub.f32 0.0, %v4438_v51  ;;  %5825 = vrcp.f32 %v1892_v45  ;;  %v242_v46 = vmul.f32 %v6233_v2, %v6710_v20  ;;  %v8633_v38 = vmul.f32 0.70710677, %v8621_v49 }
 0x237   :  { %v4889_v10 = vsel %vm4589_vm10, %v4439_v5, %v4739_v22  ;;  %v2791_v33 = vadd.f32 1.4214138, %v2641_v6  ;;  %v2640_v58 = vmul.f32 %v8610_v29, %v2490_v28  ;;  %v8640_v37 = vmul.f32 0.5, %v8522_v40  ;;  %v152_v40 = vld [vmem:[%s11233_s2 + $0x3c8] sm:$0xff] }
 0x238   :  { %v5189_v57 = vadd.f32 1.0, %v4889_v10  ;;  %v4888_v60 = vsel %vm4588_vm11, %v4438_v51, %v4738_v48  ;;  %5827 = vpow2.f32 %v4046_v39  ;;  %v3693_v18 = vmul.f32 %v1593_v25, %v1593_v25 }
 0x239   :  { %v5188_v11 = vadd.f32 1.0, %v4888_v60  ;;  %v2941_v3 = vmul.f32 %v8605_v63, %v2791_v33  ;;  %v2790_v62 = vadd.f32 1.4214138, %v2640_v58  ;;  %v1595_v9 = vand.u32 2147483647, %v8633_v38 }
 0x23a   :  { %v5339_v24 = vmul.f32 %v5189_v57, %v5039_v23  ;;  %v1143_v36 = vadd.f32 %v754_v42, %v242_v46  ;;  %v452_v19 = vmul.f32 %v11240_v55, %v150_v31  ;;  %v3692_v52 = vmul.f32 %v1592_v35, %v1592_v35 }
 0x23b   :  { %v5338_v56 = vmul.f32 %v5188_v11, %v5038_v44  ;;  %v3091_v15 = vadd.f32 -0.28449672, %v2941_v3  ;;  %v2940_v23 = vmul.f32 %v8610_v29, %v2790_v62  ;;  %v1745_v25 = vmul.f32 0.3275911, %v1595_v9 }
 0x23c   :  { %5490 = vst.msk [vmem:[%s11234_s3 + $0x1b8] sm:$0xff] %vm5434_vm2, %v5339_v24  ;;  %v451_v17 = vmul.f32 %v11240_v55, %v149_v21  ;;  %v8662_v34 = vmul.f32 0.5, %v8525_v8  ;;  %v8665_v0 = vadd.f32 %v6742_v1, %v1143_v36  ;;  %871 = vrot.lane.b32.xlu1 %v452_v19, %s6337_s25  ;;  %v245_v12 = vmul.f32 %v6234_v4, %v6710_v20  ;;  %v6235_v24 = vld [vmem:[%s11233_s2 + $0x1f0] sm:$0xff] }
 0x23d   :  { %5489 = vst.msk [vmem:[%s11234_s3 + $0x1b0] sm:$0xff] %vm5434_vm2, %v5338_v56  ;;  %v3241_v59 = vmul.f32 %v8605_v63, %v3091_v15  ;;  %v3090_v35 = vadd.f32 -0.28449672, %v2940_v23  ;;  %v3843_v43 = vsub.f32 0.0, %v3693_v18  ;;  %v1895_v26 = vadd.f32 1.0, %v1745_v25  ;;  %v758_v56 = vpop.permute.xlu0 %757 }
 0x23e   :  { %v8672_v41 = vpop.eup %5821  ;;  %869 = vrot.lane.b32.xlu0 %v451_v17, %s6337_s25  ;;  %v454_v8 = vmul.f32 %v11240_v55, %v152_v40  ;;  %v8678_v5 = vmul.f32 0.70710677, %v8665_v0  ;;  %v1146_v7 = vadd.f32 %v760_v61, %v245_v12  ;;  %vm4591_vm12 = vcmp.ge.f32.partialorder %v8534_v32, 0.0  ;;  %v151_v32 = vld [vmem:[%s11233_s2 + $0x3c0] sm:$0xff] }
 0x23f   :  { %v3391_v27 = vadd.f32 0.2548296, %v3241_v59  ;;  %v2343_v13 = vmul.f32 1.0614054, %v8672_v41  ;;  %v5824_v47 = vpop.eup %5823  ;;  %v3240_v51 = vmul.f32 %v8610_v29, %v3090_v35  ;;  %v3842_v44 = vsub.f32 0.0, %v3692_v52 }
 0x240   :  { %5829 = vrcp.f32 %v1895_v26  ;;  %v8682_v14 = vpop.eup %5825  ;;  %v8686_v39 = vmul.f32 0.5, %v8576_v30  ;;  %v1594_v45 = vand.u32 2147483647, %v8678_v5  ;;  %875 = vrot.lane.b32.xlu1 %v454_v8, %s6337_s25  ;;  %v4052_v28 = vmul.f32 1.442695, %v3843_v43 }
 0x241   :  { %v3541_v22 = vmul.f32 %v8605_v63, %v3391_v27  ;;  %v2493_v6 = vadd.f32 -1.4531521, %v2343_v13  ;;  %v3390_v48 = vadd.f32 0.2548296, %v3240_v51  ;;  %v2342_v10 = vmul.f32 1.0614054, %v8682_v14 }
 0x242   :  { %v8692_v33 = vadd.f32 %v6742_v1, %v1146_v7  ;;  %v5828_v2 = vpop.eup %5827  ;;  %vm4590_vm13 = vcmp.ge.f32.partialorder %v8537_v16, 0.0  ;;  %v3695_v57 = vmul.f32 %v1595_v9, %v1595_v9  ;;  %v1744_v30 = vmul.f32 0.3275911, %v1594_v45 }
 0x243   :  { %v4291_v46 = vmul.f32 %v5824_v47, %v3541_v22  ;;  %v2643_v63 = vmul.f32 %v8672_v41, %v2493_v6  ;;  %v3540_v60 = vmul.f32 %v8610_v29, %v3390_v48  ;;  %v2492_v58 = vadd.f32 -1.4531521, %v2342_v10 }
 0x244   :  { %v4050_v42 = vmul.f32 1.442695, %v3842_v44  ;;  %v8698_v31 = vmul.f32 0.70710677, %v8692_v33  ;;  %v1894_v21 = vadd.f32 1.0, %v1744_v30  ;;  %v244_v62 = vmul.f32 %v6235_v24, %v6710_v20  ;;  %v6236_v30 = vld [vmem:[%s11233_s2 + $0x208] sm:$0xff] }
 0x245   :  { %v4441_v11 = vsub.f32 1.0, %v4291_v46  ;;  %v2793_v3 = vadd.f32 1.4214138, %v2643_v63  ;;  %v4290_v18 = vmul.f32 %v5828_v2, %v3540_v60  ;;  %5831 = vpow2.f32 %v4052_v28 }
 0x246   :  { %v2642_v9 = vmul.f32 %v8682_v14, %v2492_v58  ;;  %v1597_v29 = vand.u32 2147483647, %v8698_v31  ;;  %v3845_v19 = vsub.f32 0.0, %v3695_v57  ;;  %5833 = vrcp.f32 %v1894_v21 }
 0x247   :  { %v4741_v15 = vsub.f32 0.0, %v4441_v11  ;;  %v2943_v36 = vmul.f32 %v8672_v41, %v2793_v3  ;;  %v4440_v40 = vsub.f32 1.0, %v4290_v18  ;;  %5835 = vpow2.f32 %v4050_v42 }
 0x248   :  { %v2792_v23 = vadd.f32 1.4214138, %v2642_v9  ;;  %v1747_v52 = vmul.f32 0.3275911, %v1597_v29  ;;  %v3694_v61 = vmul.f32 %v1594_v45, %v1594_v45  ;;  %v1145_v59 = vadd.f32 %v758_v56, %v244_v62 }
 0x249   :  { %v4891_v25 = vsel %vm4591_vm12, %v4441_v11, %v4741_v15  ;;  %v3093_v17 = vadd.f32 -0.28449672, %v2943_v36  ;;  %v4740_v35 = vsub.f32 0.0, %v4440_v40  ;;  %v4056_v13 = vmul.f32 1.442695, %v3845_v19 }
 0x24a   :  { %v8709_v4 = vpop.eup %5829  ;;  %v5191_v12 = vadd.f32 1.0, %v4891_v25  ;;  %v2942_v43 = vmul.f32 %v8682_v14, %v2792_v23  ;;  %v1897_v26 = vadd.f32 1.0, %v1747_v52  ;;  %v8715_v7 = vadd.f32 %v6742_v1, %v1145_v59  ;;  %v6237_v25 = vld [vmem:[%s11233_s2 + $0x200] sm:$0xff] }
 0x24b   :  { %v3243_v8 = vmul.f32 %v8672_v41, %v3093_v17  ;;  %v2345_v27 = vmul.f32 1.0614054, %v8709_v4  ;;  %v4890_v51 = vsel %vm4590_vm13, %v4440_v40, %v4740_v35  ;;  %v3844_v48 = vsub.f32 0.0, %v3694_v61  ;;  %v762_v35 = vpop.permute.xlu0 %761 }
 0x24c   :  { %v5341_v47 = vmul.f32 %v5191_v12, %v8640_v37  ;;  %v3092_v44 = vadd.f32 -0.28449672, %v2942_v43  ;;  %5837 = vrcp.f32 %v1897_v26  ;;  %v5190_v22 = vadd.f32 1.0, %v4890_v51  ;;  %v764_v37 = vpop.permute.xlu1 %763 }
 0x24d   :  { %v3393_v6 = vadd.f32 0.2548296, %v3243_v8  ;;  %v2495_v45 = vadd.f32 -1.4531521, %v2345_v27  ;;  %v3697_v10 = vmul.f32 %v1597_v29, %v1597_v29  ;;  %v8729_v2 = vmul.f32 0.70710677, %v8715_v7 }
 0x24e   :  { %5492 = vst.msk [vmem:[%s11234_s3 + $0x1c8] sm:$0xff] %vm5434_vm2, %v5341_v47  ;;  %v3242_v28 = vmul.f32 %v8682_v14, %v3092_v44  ;;  %v453_v16 = vmul.f32 %v11240_v55, %v151_v32  ;;  %v5340_v46 = vmul.f32 %v5190_v22, %v8662_v34  ;;  %v247_v60 = vmul.f32 %v6236_v30, %v6710_v20 }
 0x24f   :  { %v3543_v63 = vmul.f32 %v8672_v41, %v3393_v6  ;;  %v2645_v57 = vmul.f32 %v8709_v4, %v2495_v45  ;;  %v5832_v58 = vpop.eup %5831  ;;  %vm4593_vm14 = vcmp.ge.f32.partialorder %v8587_v54, 0.0  ;;  %v5042_v11 = vmul.f32 0.5, %v8590_v50  ;;  %v154_v45 = vld [vmem:[%s11233_s2 + $0x3d8] sm:$0xff] }
 0x250   :  { %v3392_v42 = vadd.f32 0.2548296, %v3242_v28  ;;  %v1596_v3 = vand.u32 2147483647, %v8729_v2  ;;  %873 = vrot.lane.b32.xlu0 %v453_v16, %s6337_s25  ;;  %v8743_v34 = vpop.eup %5833  ;;  %5491 = vst.msk [vmem:[%s11234_s3 + $0x1c0] sm:$0xff] %vm5434_vm2, %v5340_v46  ;;  %vm4592_vm15 = vcmp.ge.f32.partialorder %v8603_v53, 0.0  ;;  %5839 = vpow2.f32 %v4056_v13 }
 0x251   :  { %v4293_v41 = vmul.f32 %v5832_v58, %v3543_v63  ;;  %v2795_v21 = vadd.f32 1.4214138, %v2645_v57  ;;  %v1148_v24 = vadd.f32 %v764_v37, %v247_v60  ;;  %v5836_v62 = vpop.eup %5835  ;;  %v2344_v18 = vmul.f32 1.0614054, %v8743_v34 }
 0x252   :  { %v3542_v50 = vmul.f32 %v8682_v14, %v3392_v42  ;;  %v3847_v9 = vsub.f32 0.0, %v3697_v10  ;;  %v1746_v29 = vmul.f32 0.3275911, %v1596_v3  ;;  %v4054_v36 = vmul.f32 1.442695, %v3844_v48 }
 0x253   :  { %v4443_v56 = vsub.f32 1.0, %v4293_v41  ;;  %v2945_v15 = vmul.f32 %v8709_v4, %v2795_v21  ;;  %v8754_v19 = vadd.f32 %v6742_v1, %v1148_v24  ;;  %v2494_v23 = vadd.f32 -1.4531521, %v2344_v18 }
 0x254   :  { %v4292_v40 = vmul.f32 %v5836_v62, %v3542_v50  ;;  %v1896_v52 = vadd.f32 1.0, %v1746_v29  ;;  %v246_v14 = vmul.f32 %v6237_v25, %v6710_v20  ;;  %v8761_v59 = vmul.f32 0.5, %v8621_v49 }
 0x255   :  { %v4743_v17 = vsub.f32 0.0, %v4443_v56  ;;  %v3095_v61 = vadd.f32 -0.28449672, %v2945_v15  ;;  %v8764_v12 = vmul.f32 0.70710677, %v8754_v19  ;;  %v2644_v8 = vmul.f32 %v8743_v34, %v2494_v23  ;;  %v6238_v15 = vld [vmem:[%s11233_s2 + $0x218] sm:$0xff] }
 0x256   :  { %v8766_v43 = vpop.eup %5837  ;;  %v4442_v26 = vsub.f32 1.0, %v4292_v40  ;;  %v4060_v27 = vmul.f32 1.442695, %v3847_v9  ;;  %5841 = vrcp.f32 %v1896_v52  ;;  %v1147_v6 = vadd.f32 %v762_v35, %v246_v14  ;;  %v768_v9 = vpop.permute.xlu1 %767 }
 0x257   :  { %v4893_v13 = vsel %vm4593_vm14, %v4443_v56, %v4743_v17  ;;  %v3245_v32 = vmul.f32 %v8709_v4, %v3095_v61  ;;  %v2347_v47 = vmul.f32 1.0614054, %v8766_v43  ;;  %v1599_v49 = vand.u32 2147483647, %v8764_v12 }
 0x258   :  { %v5193_v51 = vadd.f32 1.0, %v4893_v13  ;;  %v4742_v44 = vsub.f32 0.0, %v4442_v26  ;;  %v2794_v22 = vadd.f32 1.4214138, %v2644_v8  ;;  %5843 = vpow2.f32 %v4054_v36 }
 0x259   :  { %v3395_v48 = vadd.f32 0.2548296, %v3245_v32  ;;  %v2497_v28 = vadd.f32 -1.4531521, %v2347_v47  ;;  %v1749_v10 = vmul.f32 0.3275911, %v1599_v49  ;;  %v3696_v46 = vmul.f32 %v1596_v3, %v1596_v3 }
 0x25a   :  { %v5343_v54 = vmul.f32 %v5193_v51, %v8686_v39  ;;  %v4892_v16 = vsel %vm4592_vm15, %v4442_v26, %v4742_v44  ;;  %v2944_v37 = vmul.f32 %v8743_v34, %v2794_v22  ;;  %v5840_v63 = vpop.eup %5839  ;;  %5845 = vpow2.f32 %v4060_v27  ;;  %v153_v3 = vld [vmem:[%s11233_s2 + $0x3d0] sm:$0xff] }
 0x25b   :  { %v5192_v57 = vadd.f32 1.0, %v4892_v16  ;;  %v3545_v30 = vmul.f32 %v8709_v4, %v3395_v48  ;;  %v2647_v60 = vmul.f32 %v8766_v43, %v2497_v28  ;;  %v1899_v58 = vadd.f32 1.0, %v1749_v10  ;;  %v766_v10 = vpop.permute.xlu0 %765 }
 0x25c   :  { %5494 = vst.msk [vmem:[%s11234_s3 + $0x1d8] sm:$0xff] %vm5434_vm2, %v5343_v54  ;;  %v3094_v42 = vadd.f32 -0.28449672, %v2944_v37  ;;  %v8788_v53 = vadd.f32 %v6742_v1, %v1147_v6  ;;  %v456_v39 = vmul.f32 %v11240_v55, %v154_v45  ;;  %v3846_v62 = vsub.f32 0.0, %v3696_v46  ;;  %v6239_v6 = vld [vmem:[%s11233_s2 + $0x210] sm:$0xff] }
 0x25d   :  { %v5342_v4 = vmul.f32 %v5192_v57, %v5042_v11  ;;  %v4295_v41 = vmul.f32 %v5840_v63, %v3545_v30  ;;  %v2797_v21 = vadd.f32 1.4214138, %v2647_v60  ;;  %5847 = vrcp.f32 %v1899_v58  ;;  %v156_v58 = vld [vmem:[%s11233_s2 + $0x3e8] sm:$0xff] }
 0x25e   :  { %v3244_v24 = vmul.f32 %v8743_v34, %v3094_v42  ;;  %v3699_v50 = vmul.f32 %v1599_v49, %v1599_v49  ;;  %v8796_v18 = vmul.f32 0.70710677, %v8788_v53  ;;  %879 = vrot.lane.b32.xlu1 %v456_v39, %s6337_s25  ;;  %v455_v56 = vmul.f32 %v11240_v55, %v153_v3 }
 0x25f   :  { %5493 = vst.msk [vmem:[%s11234_s3 + $0x1d0] sm:$0xff] %vm5434_vm2, %v5342_v4  ;;  %v4445_v29 = vsub.f32 1.0, %v4295_v41  ;;  %v2947_v11 = vmul.f32 %v8766_v43, %v2797_v21  ;;  %v249_v36 = vmul.f32 %v6238_v15, %v6710_v20  ;;  %vm4595_vm0 = vcmp.ge.f32.partialorder %v8633_v38, 0.0  ;;  %v155_v15 = vld [vmem:[%s11233_s2 + $0x3e0] sm:$0xff] }
 0x260   :  { %v8809_v40 = vpop.eup %5841  ;;  %v3394_v23 = vadd.f32 0.2548296, %v3244_v24  ;;  %v5044_v52 = vmul.f32 0.5, %v8665_v0  ;;  %v1598_v25 = vand.u32 2147483647, %v8796_v18  ;;  %877 = vrot.lane.b32.xlu0 %v455_v56, %s6337_s25  ;;  %v3849_v27 = vsub.f32 0.0, %v3699_v50 }
 0x261   :  { %v4745_v14 = vsub.f32 0.0, %v4445_v29  ;;  %v3097_v17 = vadd.f32 -0.28449672, %v2947_v11  ;;  %v2346_v61 = vmul.f32 1.0614054, %v8809_v40  ;;  %v1150_v35 = vadd.f32 %v768_v9, %v249_v36 }
 0x262   :  { %v3544_v26 = vmul.f32 %v8743_v34, %v3394_v23  ;;  %v4058_v8 = vmul.f32 1.442695, %v3846_v62  ;;  %v1748_v13 = vmul.f32 0.3275911, %v1598_v25  ;;  %v5844_v32 = vpop.eup %5843  ;;  %v248_v34 = vmul.f32 %v6239_v6, %v6710_v20 }
 0x263   :  { %v4895_v47 = vsel %vm4595_vm0, %v4445_v29, %v4745_v14  ;;  %v3247_v38 = vmul.f32 %v8766_v43, %v3097_v17  ;;  %v2496_v49 = vadd.f32 -1.4531521, %v2346_v61  ;;  %v8819_v0 = vadd.f32 %v6742_v1, %v1150_v35 }
 0x264   :  { %v5195_v51 = vadd.f32 1.0, %v4895_v47  ;;  %v4294_v44 = vmul.f32 %v5844_v32, %v3544_v26  ;;  %v1898_v22 = vadd.f32 1.0, %v1748_v13  ;;  %vm4594_vm1 = vcmp.ge.f32.partialorder %v8678_v5, 0.0  ;;  %v5846_v54 = vpop.eup %5845 }
 0x265   :  { %v3397_v45 = vadd.f32 0.2548296, %v3247_v38  ;;  %v2646_v48 = vmul.f32 %v8809_v40, %v2496_v49  ;;  %v8828_v28 = vmul.f32 0.70710677, %v8819_v0  ;;  %v5047_v46 = vmul.f32 0.5, %v8692_v33 }
 0x266   :  { %v5345_v16 = vmul.f32 %v5195_v51, %v8761_v59  ;;  %v4444_v37 = vsub.f32 1.0, %v4294_v44  ;;  %5849 = vrcp.f32 %v1898_v22  ;;  %v4064_v42 = vmul.f32 1.442695, %v3849_v27 }
 0x267   :  { %v8832_v63 = vpop.eup %5847  ;;  %v3547_v57 = vmul.f32 %v8766_v43, %v3397_v45  ;;  %v2796_v30 = vadd.f32 1.4214138, %v2646_v48  ;;  %5851 = vpow2.f32 %v4058_v8  ;;  %v1601_v60 = vand.u32 2147483647, %v8828_v28  ;;  %v770_v45 = vpop.permute.xlu0 %769  ;;  %v158_v48 = vld [vmem:[%s11233_s2 + $0x3f8] sm:$0xff] }
 0x268   :  { %5496 = vst.msk [vmem:[%s11234_s3 + $0x1e8] sm:$0xff] %vm5434_vm2, %v5345_v16  ;;  %v4744_v59 = vsub.f32 0.0, %v4444_v37  ;;  %v2349_v33 = vmul.f32 1.0614054, %v8832_v63  ;;  %v1149_v39 = vadd.f32 %v766_v10, %v248_v34  ;;  %v3698_v4 = vmul.f32 %v1598_v25, %v1598_v25 }
 0x269   :  { %v4297_v3 = vmul.f32 %v5846_v54, %v3547_v57  ;;  %v2946_v43 = vmul.f32 %v8809_v40, %v2796_v30  ;;  %v1751_v41 = vmul.f32 0.3275911, %v1601_v60  ;;  %v458_v50 = vmul.f32 %v11240_v55, %v156_v58 }
 0x26a   :  { %v4894_v21 = vsel %vm4594_vm1, %v4444_v37, %v4744_v59  ;;  %v2499_v24 = vadd.f32 -1.4531521, %v2349_v33  ;;  %v8848_v62 = vadd.f32 %v6742_v1, %v1149_v39  ;;  %vm4597_vm3 = vcmp.ge.f32.partialorder %v8698_v31, 0.0  ;;  %v6241_v37 = vld [vmem:[%s11233_s2 + $0x220] sm:$0xff]  ;;  %v157_v59 = vld [vmem:[%s11233_s2 + $0x3f0] sm:$0xff] }
 0x26b   :  { %v5194_v9 = vadd.f32 1.0, %v4894_v21  ;;  %v4447_v29 = vsub.f32 1.0, %v4297_v3  ;;  %v3096_v11 = vadd.f32 -0.28449672, %v2946_v43  ;;  %v1901_v56 = vadd.f32 1.0, %v1751_v41  ;;  %883 = vrot.lane.b32.xlu1 %v458_v50, %s6337_s25 }
 0x26c   :  { %v8856_v36 = vmul.f32 0.5, %v8715_v7  ;;  %v2649_v5 = vmul.f32 %v8832_v63, %v2499_v24  ;;  %v8860_v23 = vmul.f32 0.70710677, %v8848_v62  ;;  %v457_v31 = vmul.f32 %v11240_v55, %v155_v15  ;;  %v772_v7 = vpop.permute.xlu1 %771 }
 0x26d   :  { %v5344_v25 = vmul.f32 %v5194_v9, %v5044_v52  ;;  %v4747_v14 = vsub.f32 0.0, %v4447_v29  ;;  %v3246_v17 = vmul.f32 %v8809_v40, %v3096_v11  ;;  %5853 = vrcp.f32 %v1901_v56  ;;  %v6240_v52 = vld [vmem:[%s11233_s2 + $0x228] sm:$0xff] }
 0x26e   :  { %v2799_v61 = vadd.f32 1.4214138, %v2649_v5  ;;  %5855 = vpow2.f32 %v4064_v42  ;;  %v1600_v35 = vand.u32 2147483647, %v8860_v23  ;;  %v3848_v27 = vsub.f32 0.0, %v3698_v4  ;;  %881 = vrot.lane.b32.xlu0 %v457_v31, %s6337_s25 }
 0x26f   :  { %5495 = vst.msk [vmem:[%s11234_s3 + $0x1e0] sm:$0xff] %vm5434_vm2, %v5344_v25  ;;  %v4897_v26 = vsel %vm4597_vm3, %v4447_v29, %v4747_v14  ;;  %v3396_v8 = vadd.f32 0.2548296, %v3246_v17  ;;  %v251_v13 = vmul.f32 %v6240_v52, %v6710_v20  ;;  %vm4596_vm4 = vcmp.ge.f32.partialorder %v8729_v2, 0.0 }
 0x270   :  { %v8874_v32 = vpop.eup %5849  ;;  %v5197_v47 = vadd.f32 1.0, %v4897_v26  ;;  %v2949_v38 = vmul.f32 %v8832_v63, %v2799_v61  ;;  %v1750_v49 = vmul.f32 0.3275911, %v1600_v35  ;;  %v3701_v6 = vmul.f32 %v1601_v60, %v1601_v60 }
 0x271   :  { %v5852_v51 = vpop.eup %5851  ;;  %v3546_v44 = vmul.f32 %v8809_v40, %v3396_v8  ;;  %v2348_v22 = vmul.f32 1.0614054, %v8874_v32  ;;  %v1152_v34 = vadd.f32 %v772_v7, %v251_v13  ;;  %v250_v57 = vmul.f32 %v6241_v37, %v6710_v20  ;;  %v776_v37 = vpop.permute.xlu1 %775 }
 0x272   :  { %v5347_v10 = vmul.f32 %v5197_v47, %v5047_v46  ;;  %v3099_v54 = vadd.f32 -0.28449672, %v2949_v38  ;;  %v1900_v16 = vadd.f32 1.0, %v1750_v49  ;;  %v4062_v58 = vmul.f32 1.442695, %v3848_v27 }
 0x273   :  { %v4296_v30 = vmul.f32 %v5852_v51, %v3546_v44  ;;  %v2498_v40 = vadd.f32 -1.4531521, %v2348_v22  ;;  %v8889_v60 = vadd.f32 %v6742_v1, %v1152_v34  ;;  %v1151_v33 = vadd.f32 %v770_v45, %v250_v57 }
 0x274   :  { %5498 = vst.msk [vmem:[%s11234_s3 + $0x1f8] sm:$0xff] %vm5434_vm2, %v5347_v10  ;;  %v3249_v46 = vmul.f32 %v8832_v63, %v3099_v54  ;;  %5857 = vrcp.f32 %v1900_v16  ;;  %v460_v42 = vmul.f32 %v11240_v55, %v158_v48  ;;  %v3851_v43 = vsub.f32 0.0, %v3701_v6  ;;  %v160_v48 = vld [vmem:[%s11233_s2 + $0x408] sm:$0xff] }
 0x275   :  { %v4446_v39 = vsub.f32 1.0, %v4296_v30  ;;  %v2648_v3 = vmul.f32 %v8874_v32, %v2498_v40  ;;  %v8902_v4 = vmul.f32 0.70710677, %v8889_v60  ;;  %v8905_v21 = vmul.f32 0.5, %v8754_v19  ;;  %v6242_v40 = vld [vmem:[%s11233_s2 + $0x238] sm:$0xff] }
 0x276   :  { %v3399_v41 = vadd.f32 0.2548296, %v3249_v46  ;;  %v8908_v24 = vadd.f32 %v6742_v1, %v1151_v33  ;;  %887 = vrot.lane.b32.xlu1 %v460_v42, %s6337_s25  ;;  %v459_v50 = vmul.f32 %v11240_v55, %v157_v59  ;;  %v3700_v56 = vmul.f32 %v1600_v35, %v1600_v35 }
 0x277   :  { %v8912_v9 = vpop.eup %5853  ;;  %v4746_v29 = vsub.f32 0.0, %v4446_v39  ;;  %v2798_v11 = vadd.f32 1.4214138, %v2648_v3  ;;  %v1603_v15 = vand.u32 2147483647, %v8902_v4  ;;  %5859 = vpow2.f32 %v4062_v58 }
 0x278   :  { %v5856_v5 = vpop.eup %5855  ;;  %v3549_v25 = vmul.f32 %v8832_v63, %v3399_v41  ;;  %v2351_v19 = vmul.f32 1.0614054, %v8912_v9  ;;  %v8918_v14 = vmul.f32 0.70710677, %v8908_v24  ;;  %885 = vrot.lane.b32.xlu0 %v459_v50, %s6337_s25  ;;  %v4068_v31 = vmul.f32 1.442695, %v3851_v43 }
 0x279   :  { %v4896_v17 = vsel %vm4596_vm4, %v4446_v39, %v4746_v29  ;;  %v2948_v61 = vmul.f32 %v8874_v32, %v2798_v11  ;;  %v1753_v35 = vmul.f32 0.3275911, %v1603_v15  ;;  %vm4599_vm5 = vcmp.ge.f32.partialorder %v8764_v12, 0.0  ;;  %v774_v39 = vpop.permute.xlu0 %773  ;;  %v159_v12 = vld [vmem:[%s11233_s2 + $0x400] sm:$0xff]  ;;  %v6243_v50 = vld [vmem:[%s11233_s2 + $0x230] sm:$0xff] }
 0x27a   :  { %v5196_v7 = vadd.f32 1.0, %v4896_v17  ;;  %v4299_v26 = vmul.f32 %v5856_v5, %v3549_v25  ;;  %v2501_v8 = vadd.f32 -1.4531521, %v2351_v19  ;;  %v1602_v63 = vand.u32 2147483647, %v8918_v14 }
 0x27b   :  { %v3098_v27 = vadd.f32 -0.28449672, %v2948_v61  ;;  %v3850_v52 = vsub.f32 0.0, %v3700_v56  ;;  %v1903_v13 = vadd.f32 1.0, %v1753_v35  ;;  %v8930_v44 = vmul.f32 0.5, %v8788_v53 }
 0x27c   :  { %v5346_v47 = vmul.f32 %v5196_v7, %v8856_v36  ;;  %v4449_v38 = vsub.f32 1.0, %v4299_v26  ;;  %v2651_v2 = vmul.f32 %v8912_v9, %v2501_v8  ;;  %v1752_v49 = vmul.f32 0.3275911, %v1602_v63 }
 0x27d   :  { %v3248_v51 = vmul.f32 %v8874_v32, %v3098_v27  ;;  %5861 = vrcp.f32 %v1903_v13  ;;  %v3703_v22 = vmul.f32 %v1603_v15, %v1603_v15  ;;  %v4066_v54 = vmul.f32 1.442695, %v3850_v52 }
 0x27e   :  { %v8932_v6 = vpop.eup %5857  ;;  %5497 = vst.msk [vmem:[%s11234_s3 + $0x1f0] sm:$0xff] %vm5434_vm2, %v5346_v47  ;;  %v4749_v34 = vsub.f32 0.0, %v4449_v38  ;;  %v2801_v36 = vadd.f32 1.4214138, %v2651_v2  ;;  %5863 = vpow2.f32 %v4068_v31  ;;  %v1902_v45 = vadd.f32 1.0, %v1752_v49 }
 0x27f   :  { %v3398_v10 = vadd.f32 0.2548296, %v3248_v51  ;;  %v2350_v53 = vmul.f32 1.0614054, %v8932_v6  ;;  %v3702_v16 = vmul.f32 %v1602_v63, %v1602_v63  ;;  %v253_v58 = vmul.f32 %v6242_v40, %v6710_v20 }
 0x280   :  { %v4899_v57 = vsel %vm4599_vm5, %v4449_v38, %v4749_v34  ;;  %v2951_v30 = vmul.f32 %v8912_v9, %v2801_v36  ;;  %5865 = vrcp.f32 %v1902_v45  ;;  %v3853_v42 = vsub.f32 0.0, %v3703_v22  ;;  %v6244_v36 = vld [vmem:[%s11233_s2 + $0x248] sm:$0xff] }
 0x281   :  { %v5199_v59 = vadd.f32 1.0, %v4899_v57  ;;  %v3548_v46 = vmul.f32 %v8874_v32, %v3398_v10  ;;  %v2500_v33 = vadd.f32 -1.4531521, %v2350_v53  ;;  %v5860_v3 = vpop.eup %5859  ;;  %v1154_v41 = vadd.f32 %v776_v37, %v253_v58 }
 0x282   :  { %v3101_v43 = vadd.f32 -0.28449672, %v2951_v30  ;;  %v252_v29 = vmul.f32 %v6243_v50, %v6710_v20  ;;  %v462_v11 = vmul.f32 %v11240_v55, %v160_v48  ;;  %v3852_v5 = vsub.f32 0.0, %v3702_v16  ;;  %v780_v16 = vpop.permute.xlu1 %779  ;;  %v6245_v30 = vld [vmem:[%s11233_s2 + $0x240] sm:$0xff] }
 0x283   :  { %v5349_v32 = vmul.f32 %v5199_v59, %v8905_v21  ;;  %v4298_v56 = vmul.f32 %v5860_v3, %v3548_v46  ;;  %v2650_v15 = vmul.f32 %v8932_v6, %v2500_v33  ;;  %v8962_v19 = vadd.f32 %v6742_v1, %v1154_v41 }
 0x284   :  { %v3251_v25 = vmul.f32 %v8912_v9, %v3101_v43  ;;  %v1153_v17 = vadd.f32 %v774_v39, %v252_v29  ;;  %891 = vrot.lane.b32.xlu1 %v462_v11, %s6337_s25  ;;  %v461_v61 = vmul.f32 %v11240_v55, %v159_v12  ;;  %vm4598_vm6 = vcmp.ge.f32.partialorder %v8796_v18, 0.0 }
 0x285   :  { %5500 = vst.msk [vmem:[%s11234_s3 + $0x208] sm:$0xff] %vm5434_vm2, %v5349_v32  ;;  %v4448_v21 = vsub.f32 1.0, %v4298_v56  ;;  %v8972_v31 = vmul.f32 0.5, %v8819_v0  ;;  %v2800_v35 = vadd.f32 1.4214138, %v2650_v15  ;;  %5867 = vpow2.f32 %v4066_v54 }
 0x286   :  { %v3401_v7 = vadd.f32 0.2548296, %v3251_v25  ;;  %v8975_v26 = vmul.f32 0.70710677, %v8962_v19  ;;  %v8978_v8 = vadd.f32 %v6742_v1, %v1153_v17  ;;  %889 = vrot.lane.b32.xlu0 %v461_v61, %s6337_s25  ;;  %vm4601_vm7 = vcmp.ge.f32.partialorder %v8828_v28, 0.0 }
 0x287   :  { %v8981_v63 = vpop.eup %5861  ;;  %v4748_v27 = vsub.f32 0.0, %v4448_v21  ;;  %v2950_v52 = vmul.f32 %v8932_v6, %v2800_v35  ;;  %v4072_v0 = vmul.f32 1.442695, %v3853_v42  ;;  %v4070_v2 = vmul.f32 1.442695, %v3852_v5  ;;  %v778_v42 = vpop.permute.xlu0 %777 }
 0x288   :  { %v5864_v13 = vpop.eup %5863  ;;  %v3551_v47 = vmul.f32 %v8912_v9, %v3401_v7  ;;  %v2353_v38 = vmul.f32 1.0614054, %v8981_v63  ;;  %v1605_v49 = vand.u32 2147483647, %v8975_v26  ;;  %v8991_v34 = vmul.f32 0.70710677, %v8978_v8 }
 0x289   :  { %v4898_v51 = vsel %vm4598_vm6, %v4448_v21, %v4748_v27  ;;  %v3100_v22 = vadd.f32 -0.28449672, %v2950_v52  ;;  %v255_v45 = vmul.f32 %v6244_v36, %v6710_v20  ;;  %v254_v40 = vmul.f32 %v6245_v30, %v6710_v20  ;;  %v161_v30 = vld [vmem:[%s11233_s2 + $0x410] sm:$0xff] }
 0x28a   :  { %v8997_v48 = vpop.eup %5865  ;;  %v5198_v9 = vadd.f32 1.0, %v4898_v51  ;;  %v4301_v10 = vmul.f32 %v5864_v13, %v3551_v47  ;;  %v2503_v53 = vadd.f32 -1.4531521, %v2353_v38  ;;  %v1755_v54 = vmul.f32 0.3275911, %v1605_v49  ;;  %v162_v13 = vld [vmem:[%s11233_s2 + $0x418] sm:$0xff] }
 0x28b   :  { %v3250_v18 = vmul.f32 %v8932_v6, %v3100_v22  ;;  %v2352_v37 = vmul.f32 1.0614054, %v8997_v48  ;;  %v1604_v57 = vand.u32 2147483647, %v8991_v34  ;;  %v3705_v3 = vmul.f32 %v1605_v49, %v1605_v49 }
 0x28c   :  { %v5348_v58 = vmul.f32 %v5198_v9, %v8930_v44  ;;  %v4451_v59 = vsub.f32 1.0, %v4301_v10  ;;  %v2653_v46 = vmul.f32 %v8981_v63, %v2503_v53  ;;  %v1905_v33 = vadd.f32 1.0, %v1755_v54 }
 0x28d   :  { %v3400_v39 = vadd.f32 0.2548296, %v3250_v18  ;;  %v2502_v12 = vadd.f32 -1.4531521, %v2352_v37  ;;  %v1156_v43 = vadd.f32 %v780_v16, %v255_v45  ;;  %v1754_v29 = vmul.f32 0.3275911, %v1604_v57 }
 0x28e   :  { %5499 = vst.msk [vmem:[%s11234_s3 + $0x200] sm:$0xff] %vm5434_vm2, %v5348_v58  ;;  %v4751_v41 = vsub.f32 0.0, %v4451_v59  ;;  %v2803_v50 = vadd.f32 1.4214138, %v2653_v46  ;;  %5869 = vrcp.f32 %v1905_v33  ;;  %v1155_v32 = vadd.f32 %v778_v42, %v254_v40 }
 0x28f   :  { %v3550_v44 = vmul.f32 %v8932_v6, %v3400_v39  ;;  %5871 = vpow2.f32 %v4072_v0  ;;  %v2652_v11 = vmul.f32 %v8997_v48, %v2502_v12  ;;  %v5868_v56 = vpop.eup %5867  ;;  %v5050_v5 = vmul.f32 0.5, %v8848_v62 }
 0x290   :  { %v4901_v15 = vsel %vm4601_vm7, %v4451_v59, %v4751_v41  ;;  %v2953_v25 = vmul.f32 %v8981_v63, %v2803_v50  ;;  %v1904_v17 = vadd.f32 1.0, %v1754_v29  ;;  %5873 = vpow2.f32 %v4070_v2 }
 0x291   :  { %v5201_v61 = vadd.f32 1.0, %v4901_v15  ;;  %v4300_v21 = vmul.f32 %v5868_v56, %v3550_v44  ;;  %v2802_v35 = vadd.f32 1.4214138, %v2652_v11  ;;  %v3855_v27 = vsub.f32 0.0, %v3705_v3  ;;  %v784_v56 = vpop.permute.xlu1 %783  ;;  %v164_v15 = vld [vmem:[%s11233_s2 + $0x428] sm:$0xff] }
 0x292   :  { %v3103_v7 = vadd.f32 -0.28449672, %v2953_v25  ;;  %5875 = vrcp.f32 %v1904_v17  ;;  %v9019_v6 = vadd.f32 %v6742_v1, %v1156_v43  ;;  %v9024_v62 = vadd.f32 %v6742_v1, %v1155_v32 }
 0x293   :  { %v5351_v52 = vmul.f32 %v5201_v61, %v8972_v31  ;;  %v4450_v0 = vsub.f32 1.0, %v4300_v21  ;;  %v2952_v28 = vmul.f32 %v8997_v48, %v2802_v35  ;;  %vm4600_vm8 = vcmp.ge.f32.partialorder %v8860_v23, 0.0  ;;  %v6246_v61 = vld [vmem:[%s11233_s2 + $0x258] sm:$0xff] }
 0x294   :  { %v3253_v47 = vmul.f32 %v8981_v63, %v3103_v7  ;;  %v9032_v38 = vmul.f32 0.5, %v8889_v60  ;;  %v9035_v2 = vmul.f32 0.70710677, %v9019_v6  ;;  %v9042_v51 = vmul.f32 0.5, %v8908_v24 }
 0x295   :  { %5502 = vst.msk [vmem:[%s11234_s3 + $0x218] sm:$0xff] %vm5434_vm2, %v5351_v52  ;;  %v4750_v31 = vsub.f32 0.0, %v4450_v0  ;;  %v3102_v49 = vadd.f32 -0.28449672, %v2952_v28  ;;  %v9045_v23 = vmul.f32 0.70710677, %v9024_v62  ;;  %v3704_v36 = vmul.f32 %v1604_v57, %v1604_v57  ;;  %v782_v52 = vpop.permute.xlu0 %781 }
 0x296   :  { %v3403_v22 = vadd.f32 0.2548296, %v3253_v47  ;;  %v1607_v60 = vand.u32 2147483647, %v9035_v2  ;;  %v464_v45 = vmul.f32 %v11240_v55, %v162_v13  ;;  %vm4603_vm9 = vcmp.ge.f32.partialorder %v8902_v4, 0.0  ;;  %v163_v13 = vld [vmem:[%s11233_s2 + $0x420] sm:$0xff] }
 0x297   :  { %v4900_v9 = vsel %vm4600_vm8, %v4450_v0, %v4750_v31  ;;  %v3252_v10 = vmul.f32 %v8997_v48, %v3102_v49  ;;  %v4076_v53 = vmul.f32 1.442695, %v3855_v27  ;;  %v1606_v54 = vand.u32 2147483647, %v9045_v23  ;;  %v6247_v0 = vld [vmem:[%s11233_s2 + $0x250] sm:$0xff]  ;;  %v6248_v4 = vld [vmem:[%s11233_s2 + $0x268] sm:$0xff] }
 0x298   :  { %v9052_v16 = vpop.eup %5869  ;;  %v5200_v24 = vadd.f32 1.0, %v4900_v9  ;;  %v3553_v18 = vmul.f32 %v8981_v63, %v3403_v22  ;;  %v9056_v37 = vmul.f32 0.5, %v8962_v19  ;;  %v1757_v57 = vmul.f32 0.3275911, %v1607_v60  ;;  %895 = vrot.lane.b32.xlu1 %v464_v45, %s6337_s25 }
 0x299   :  { %v5872_v40 = vpop.eup %5871  ;;  %v3402_v58 = vadd.f32 0.2548296, %v3252_v10  ;;  %v2355_v59 = vmul.f32 1.0614054, %v9052_v16  ;;  %v1756_v46 = vmul.f32 0.3275911, %v1606_v54  ;;  %5877 = vpow2.f32 %v4076_v53 }
 0x29a   :  { %v5350_v33 = vmul.f32 %v5200_v24, %v5050_v5  ;;  %v4303_v42 = vmul.f32 %v5872_v40, %v3553_v18  ;;  %vm4602_vm10 = vcmp.ge.f32.partialorder %v8918_v14, 0.0  ;;  %v3854_v63 = vsub.f32 0.0, %v3704_v36  ;;  %v5874_v19 = vpop.eup %5873 }
 0x29b   :  { %v1907_v39 = vadd.f32 1.0, %v1757_v57  ;;  %v3552_v12 = vmul.f32 %v8997_v48, %v3402_v58  ;;  %v2505_v3 = vadd.f32 -1.4531521, %v2355_v59  ;;  %v1906_v43 = vadd.f32 1.0, %v1756_v46  ;;  %v788_v58 = vpop.permute.xlu1 %787 }
 0x29c   :  { %v9065_v41 = vpop.eup %5875  ;;  %5501 = vst.msk [vmem:[%s11234_s3 + $0x210] sm:$0xff] %vm5434_vm2, %v5350_v33  ;;  %v4453_v50 = vsub.f32 1.0, %v4303_v42  ;;  %v3707_v29 = vmul.f32 %v1607_v60, %v1607_v60  ;;  %v463_v44 = vmul.f32 %v11240_v55, %v161_v30  ;;  %v4074_v25 = vmul.f32 1.442695, %v3854_v63 }
 0x29d   :  { %5879 = vrcp.f32 %v1907_v39  ;;  %v4302_v11 = vmul.f32 %v5874_v19, %v3552_v12  ;;  %v2655_v32 = vmul.f32 %v9052_v16, %v2505_v3  ;;  %v2354_v48 = vmul.f32 1.0614054, %v9065_v41 }
 0x29e   :  { %5881 = vrcp.f32 %v1906_v43  ;;  %v4753_v5 = vsub.f32 0.0, %v4453_v50  ;;  %v3706_v17 = vmul.f32 %v1606_v54, %v1606_v54  ;;  %893 = vrot.lane.b32.xlu0 %v463_v44, %s6337_s25  ;;  %v257_v21 = vmul.f32 %v6246_v61, %v6710_v20 }
 0x29f   :  { %v4452_v35 = vsub.f32 1.0, %v4302_v11  ;;  %v2805_v7 = vadd.f32 1.4214138, %v2655_v32  ;;  %v2504_v27 = vadd.f32 -1.4531521, %v2354_v48  ;;  %v256_v28 = vmul.f32 %v6247_v0, %v6710_v20 }
 0x2a0   :  { %v4903_v47 = vsel %vm4603_vm9, %v4453_v50, %v4753_v5  ;;  %v3857_v31 = vsub.f32 0.0, %v3707_v29  ;;  %v1158_v49 = vadd.f32 %v784_v56, %v257_v21  ;;  %v466_v22 = vmul.f32 %v11240_v55, %v164_v15 }
 0x2a1   :  { %v5203_v36 = vadd.f32 1.0, %v4903_v47  ;;  %v4752_v60 = vsub.f32 0.0, %v4452_v35  ;;  %v2955_v45 = vmul.f32 %v9052_v16, %v2805_v7  ;;  %v2654_v9 = vmul.f32 %v9065_v41, %v2504_v27 }
 0x2a2   :  { %v9095_v10 = vadd.f32 %v6742_v1, %v1158_v49  ;;  %v1157_v53 = vadd.f32 %v782_v52, %v256_v28  ;;  %899 = vrot.lane.b32.xlu1 %v466_v22, %s6337_s25  ;;  %v465_v54 = vmul.f32 %v11240_v55, %v163_v13  ;;  %v259_v24 = vmul.f32 %v6248_v4, %v6710_v20 }
 0x2a3   :  { %v5353_v18 = vmul.f32 %v5203_v36, %v9032_v38  ;;  %v4902_v57 = vsel %vm4602_vm10, %v4452_v35, %v4752_v60  ;;  %v3105_v30 = vadd.f32 -0.28449672, %v2955_v45  ;;  %v2804_v40 = vadd.f32 1.4214138, %v2654_v9  ;;  %v5878_v42 = vpop.eup %5877  ;;  %v6249_v45 = vld [vmem:[%s11233_s2 + $0x260] sm:$0xff] }
 0x2a4   :  { %v5202_v59 = vadd.f32 1.0, %v4902_v57  ;;  %5883 = vpow2.f32 %v4074_v25  ;;  %v9107_v46 = vmul.f32 0.70710677, %v9095_v10  ;;  %v9110_v33 = vadd.f32 %v6742_v1, %v1157_v53  ;;  %897 = vrot.lane.b32.xlu0 %v465_v54, %s6337_s25  ;;  %v786_v57 = vpop.permute.xlu0 %785 }
 0x2a5   :  { %5504 = vst.msk [vmem:[%s11234_s3 + $0x228] sm:$0xff] %vm5434_vm2, %v5353_v18  ;;  %v3255_v14 = vmul.f32 %v9052_v16, %v3105_v30  ;;  %v2954_v38 = vmul.f32 %v9065_v41, %v2804_v40  ;;  %v4080_v63 = vmul.f32 1.442695, %v3857_v31  ;;  %v3856_v39 = vsub.f32 0.0, %v3706_v17 }
 0x2a6   :  { %v5352_v12 = vmul.f32 %v5202_v59, %v9042_v51  ;;  %v1609_v3 = vand.u32 2147483647, %v9107_v46  ;;  %v9124_v43 = vmul.f32 0.70710677, %v9110_v33  ;;  %v1160_v50 = vadd.f32 %v788_v58, %v259_v24 }
 0x2a7   :  { %v9119_v19 = vpop.eup %5879  ;;  %v3405_v44 = vadd.f32 0.2548296, %v3255_v14  ;;  %v3104_v11 = vadd.f32 -0.28449672, %v2954_v38  ;;  %v4078_v17 = vmul.f32 1.442695, %v3856_v39  ;;  %5885 = vpow2.f32 %v4080_v63 }
 0x2a8   :  { %v9126_v29 = vpop.eup %5881  ;;  %v2357_v32 = vmul.f32 1.0614054, %v9119_v19  ;;  %5503 = vst.msk [vmem:[%s11234_s3 + $0x220] sm:$0xff] %vm5434_vm2, %v5352_v12  ;;  %v1759_v51 = vmul.f32 0.3275911, %v1609_v3  ;;  %v9138_v7 = vadd.f32 %v6742_v1, %v1160_v50  ;;  %vm4605_vm11 = vcmp.ge.f32.partialorder %v8975_v26, 0.0 }
 0x2a9   :  { %v2356_v48 = vmul.f32 1.0614054, %v9126_v29  ;;  %v1608_v56 = vand.u32 2147483647, %v9124_v43  ;;  %v3555_v15 = vmul.f32 %v9052_v16, %v3405_v44  ;;  %v3254_v5 = vmul.f32 %v9065_v41, %v3104_v11 }
 0x2aa   :  { %v2507_v25 = vadd.f32 -1.4531521, %v2357_v32  ;;  %v1909_v21 = vadd.f32 1.0, %v1759_v51  ;;  %v3709_v36 = vmul.f32 %v1609_v3, %v1609_v3  ;;  %v9145_v60 = vmul.f32 0.70710677, %v9138_v7 }
 0x2ab   :  { %v2506_v61 = vadd.f32 -1.4531521, %v2356_v48  ;;  %v1758_v35 = vmul.f32 0.3275911, %v1608_v56  ;;  %v4305_v27 = vmul.f32 %v5878_v42, %v3555_v15  ;;  %v3404_v52 = vadd.f32 0.2548296, %v3254_v5 }
 0x2ac   :  { %v2657_v0 = vmul.f32 %v9119_v19, %v2507_v25  ;;  %5887 = vrcp.f32 %v1909_v21  ;;  %v258_v9 = vmul.f32 %v6249_v45, %v6710_v20  ;;  %vm4604_vm12 = vcmp.ge.f32.partialorder %v8991_v34, 0.0  ;;  %v166_v42 = vld [vmem:[%s11233_s2 + $0x438] sm:$0xff] }
 0x2ad   :  { %v2656_v28 = vmul.f32 %v9126_v29, %v2506_v61  ;;  %v1908_v16 = vadd.f32 1.0, %v1758_v35  ;;  %v4455_v13 = vsub.f32 1.0, %v4305_v27  ;;  %v3554_v47 = vmul.f32 %v9065_v41, %v3404_v52  ;;  %v792_v27 = vpop.permute.xlu1 %791 }
 0x2ae   :  { %v2807_v31 = vadd.f32 1.4214138, %v2657_v0  ;;  %5889 = vpow2.f32 %v4078_v17  ;;  %v5884_v49 = vpop.eup %5883  ;;  %v5054_v41 = vmul.f32 0.5, %v8978_v8  ;;  %v1611_v18 = vand.u32 2147483647, %v9145_v60 }
 0x2af   :  { %v2806_v22 = vadd.f32 1.4214138, %v2656_v28  ;;  %v4755_v53 = vsub.f32 0.0, %v4455_v13  ;;  %v4304_v54 = vmul.f32 %v5884_v49, %v3554_v47  ;;  %5891 = vrcp.f32 %v1908_v16  ;;  %v6250_v16 = vld [vmem:[%s11233_s2 + $0x278] sm:$0xff] }
 0x2b0   :  { %v2957_v4 = vmul.f32 %v9119_v19, %v2807_v31  ;;  %v9159_v59 = vmul.f32 0.5, %v9019_v6  ;;  %v9165_v8 = vmul.f32 0.5, %v9024_v62  ;;  %v1761_v63 = vmul.f32 0.3275911, %v1611_v18  ;;  %v165_v6 = vld [vmem:[%s11233_s2 + $0x430] sm:$0xff] }
 0x2b1   :  { %v2956_v24 = vmul.f32 %v9126_v29, %v2806_v22  ;;  %v4905_v30 = vsel %vm4605_vm11, %v4455_v13, %v4755_v53  ;;  %v4454_v40 = vsub.f32 1.0, %v4304_v54  ;;  %v3859_v26 = vsub.f32 0.0, %v3709_v36  ;;  %v5886_v48 = vpop.eup %5885 }
 0x2b2   :  { %v3107_v58 = vadd.f32 -0.28449672, %v2957_v4  ;;  %v5205_v14 = vadd.f32 1.0, %v4905_v30  ;;  %v1159_v3 = vadd.f32 %v786_v57, %v258_v9  ;;  %v1911_v11 = vadd.f32 1.0, %v1761_v63 }
 0x2b3   :  { %v3106_v38 = vadd.f32 -0.28449672, %v2956_v24  ;;  %v4754_v39 = vsub.f32 0.0, %v4454_v40  ;;  %v468_v32 = vmul.f32 %v11240_v55, %v166_v42  ;;  %v3708_v15 = vmul.f32 %v1608_v56, %v1608_v56 }
 0x2b4   :  { %v3257_v12 = vmul.f32 %v9119_v19, %v3107_v58  ;;  %v5355_v50 = vmul.f32 %v5205_v14, %v9056_v37  ;;  %v9177_v5 = vadd.f32 %v6742_v1, %v1159_v3  ;;  %5893 = vrcp.f32 %v1911_v11 }
 0x2b5   :  { %v3256_v44 = vmul.f32 %v9126_v29, %v3106_v38  ;;  %v4904_v62 = vsel %vm4604_vm12, %v4454_v40, %v4754_v39  ;;  %903 = vrot.lane.b32.xlu1 %v468_v32, %s6337_s25  ;;  %v467_v34 = vmul.f32 %v11240_v55, %v165_v6  ;;  %vm4607_vm13 = vcmp.ge.f32.partialorder %v9035_v2, 0.0 }
 0x2b6   :  { %v3407_v51 = vadd.f32 0.2548296, %v3257_v12  ;;  %v9179_v25 = vpop.eup %5887  ;;  %5506 = vst.msk [vmem:[%s11234_s3 + $0x238] sm:$0xff] %vm5434_vm2, %v5355_v50  ;;  %v5204_v37 = vadd.f32 1.0, %v4904_v62  ;;  %v9191_v35 = vmul.f32 0.70710677, %v9177_v5  ;;  %v3711_v45 = vmul.f32 %v1611_v18, %v1611_v18 }
 0x2b7   :  { %v3406_v17 = vadd.f32 0.2548296, %v3256_v44  ;;  %v2359_v21 = vmul.f32 1.0614054, %v9179_v25  ;;  %v4084_v28 = vmul.f32 1.442695, %v3859_v26  ;;  %901 = vrot.lane.b32.xlu0 %v467_v34, %s6337_s25 }
 0x2b8   :  { %v5890_v61 = vpop.eup %5889  ;;  %v3557_v56 = vmul.f32 %v9119_v19, %v3407_v51  ;;  %v5354_v52 = vmul.f32 %v5204_v37, %v5054_v41  ;;  %v261_v19 = vmul.f32 %v6250_v16, %v6710_v20  ;;  %v3858_v49 = vsub.f32 0.0, %v3708_v15  ;;  %v6251_v26 = vld [vmem:[%s11233_s2 + $0x270] sm:$0xff]  ;;  %v790_v51 = vpop.permute.xlu0 %789  ;;  %v168_v34 = vld [vmem:[%s11233_s2 + $0x448] sm:$0xff] }
 0x2b9   :  { %v3556_v0 = vmul.f32 %v9126_v29, %v3406_v17  ;;  %v9199_v13 = vpop.eup %5891  ;;  %v2509_v31 = vadd.f32 -1.4531521, %v2359_v21  ;;  %v1610_v22 = vand.u32 2147483647, %v9191_v35  ;;  %vm4606_vm14 = vcmp.ge.f32.partialorder %v9045_v23, 0.0  ;;  %v167_v23 = vld [vmem:[%s11233_s2 + $0x440] sm:$0xff] }
 0x2ba   :  { %v4307_v47 = vmul.f32 %v5886_v48, %v3557_v56  ;;  %5505 = vst.msk [vmem:[%s11234_s3 + $0x230] sm:$0xff] %vm5434_vm2, %v5354_v52  ;;  %v2358_v36 = vmul.f32 1.0614054, %v9199_v13  ;;  %v1162_v9 = vadd.f32 %v792_v27, %v261_v19  ;;  %5895 = vpow2.f32 %v4084_v28 }
 0x2bb   :  { %v4306_v29 = vmul.f32 %v5890_v61, %v3556_v0  ;;  %v2659_v54 = vmul.f32 %v9179_v25, %v2509_v31  ;;  %v1760_v4 = vmul.f32 0.3275911, %v1610_v22  ;;  %v4082_v58 = vmul.f32 1.442695, %v3858_v49 }
 0x2bc   :  { %v4457_v53 = vsub.f32 1.0, %v4307_v47  ;;  %v2508_v24 = vadd.f32 -1.4531521, %v2358_v36  ;;  %v9210_v57 = vadd.f32 %v6742_v1, %v1162_v9  ;;  %v3861_v38 = vsub.f32 0.0, %v3711_v45  ;;  %v796_v36 = vpop.permute.xlu1 %795 }
 0x2bd   :  { %v4456_v41 = vsub.f32 1.0, %v4306_v29  ;;  %v2809_v40 = vadd.f32 1.4214138, %v2659_v54  ;;  %v1910_v42 = vadd.f32 1.0, %v1760_v4  ;;  %v260_v3 = vmul.f32 %v6251_v26, %v6710_v20  ;;  %v6253_v54 = vld [vmem:[%s11233_s2 + $0x280] sm:$0xff] }
 0x2be   :  { %v4757_v30 = vsub.f32 0.0, %v4457_v53  ;;  %v2658_v18 = vmul.f32 %v9199_v13, %v2508_v24  ;;  %v9214_v63 = vmul.f32 0.70710677, %v9210_v57  ;;  %v9223_v6 = vpop.eup %5893  ;;  %v4088_v27 = vmul.f32 1.442695, %v3861_v38  ;;  %v794_v24 = vpop.permute.xlu0 %793 }
 0x2bf   :  { %v4756_v14 = vsub.f32 0.0, %v4456_v41  ;;  %v2959_v12 = vmul.f32 %v9179_v25, %v2809_v40  ;;  %5897 = vrcp.f32 %v1910_v42  ;;  %v2361_v62 = vmul.f32 1.0614054, %v9223_v6 }
 0x2c0   :  { %v4907_v39 = vsel %vm4607_vm13, %v4457_v53, %v4757_v30  ;;  %v2808_v11 = vadd.f32 1.4214138, %v2658_v18  ;;  %v1613_v32 = vand.u32 2147483647, %v9214_v63  ;;  %5899 = vpow2.f32 %v4082_v58  ;;  %v6252_v53 = vld [vmem:[%s11233_s2 + $0x288] sm:$0xff] }
 0x2c1   :  { %v5207_v50 = vadd.f32 1.0, %v4907_v39  ;;  %v4906_v44 = vsel %vm4606_vm14, %v4456_v41, %v4756_v14  ;;  %v3109_v48 = vadd.f32 -0.28449672, %v2959_v12  ;;  %v2511_v21 = vadd.f32 -1.4531521, %v2361_v62 }
 0x2c2   :  { %v5206_v2 = vadd.f32 1.0, %v4906_v44  ;;  %v2958_v37 = vmul.f32 %v9199_v13, %v2808_v11  ;;  %v1763_v17 = vmul.f32 0.3275911, %v1613_v32  ;;  %v3710_v52 = vmul.f32 %v1610_v22, %v1610_v22 }
 0x2c3   :  { %v5357_v15 = vmul.f32 %v5207_v50, %v9159_v59  ;;  %v3259_v56 = vmul.f32 %v9179_v25, %v3109_v48  ;;  %v1161_v28 = vadd.f32 %v790_v51, %v260_v3  ;;  %v470_v19 = vmul.f32 %v11240_v55, %v168_v34 }
 0x2c4   :  { %v5356_v61 = vmul.f32 %v5206_v2, %v9165_v8  ;;  %v3108_v59 = vadd.f32 -0.28449672, %v2958_v37  ;;  %v1913_v0 = vadd.f32 1.0, %v1763_v17  ;;  %v2661_v8 = vmul.f32 %v9223_v6, %v2511_v21  ;;  %v5896_v31 = vpop.eup %5895 }
 0x2c5   :  { %5508 = vst.msk [vmem:[%s11234_s3 + $0x248] sm:$0xff] %vm5434_vm2, %v5357_v15  ;;  %v3409_v16 = vadd.f32 0.2548296, %v3259_v56  ;;  %v469_v47 = vmul.f32 %v11240_v55, %v167_v23  ;;  %v5059_v49 = vmul.f32 0.5, %v9095_v10  ;;  %v9253_v22 = vadd.f32 %v6742_v1, %v1161_v28  ;;  %907 = vrot.lane.b32.xlu1 %v470_v19, %s6337_s25 }
 0x2c6   :  { %5507 = vst.msk [vmem:[%s11234_s3 + $0x240] sm:$0xff] %vm5434_vm2, %v5356_v61  ;;  %v3258_v29 = vmul.f32 %v9199_v13, %v3108_v59  ;;  %5901 = vrcp.f32 %v1913_v0  ;;  %v2811_v9 = vadd.f32 1.4214138, %v2661_v8  ;;  %v263_v10 = vmul.f32 %v6252_v53, %v6710_v20 }
 0x2c7   :  { %v3559_v45 = vmul.f32 %v9179_v25, %v3409_v16  ;;  %905 = vrot.lane.b32.xlu0 %v469_v47, %s6337_s25  ;;  %v262_v4 = vmul.f32 %v6253_v54, %v6710_v20  ;;  %vm4609_vm15 = vcmp.ge.f32.partialorder %v9107_v46, 0.0  ;;  %5903 = vpow2.f32 %v4088_v27 }
 0x2c8   :  { %v3408_v25 = vadd.f32 0.2548296, %v3258_v29  ;;  %v9268_v41 = vmul.f32 0.70710677, %v9253_v22  ;;  %vm4608_vm0 = vcmp.ge.f32.partialorder %v9124_v43, 0.0  ;;  %v2961_v58 = vmul.f32 %v9223_v6, %v2811_v9 }
 0x2c9   :  { %v9270_v30 = vpop.eup %5897  ;;  %v4309_v40 = vmul.f32 %v5896_v31, %v3559_v45  ;;  %v3860_v42 = vsub.f32 0.0, %v3710_v52  ;;  %v1164_v14 = vadd.f32 %v796_v36, %v263_v10  ;;  %v3713_v39 = vmul.f32 %v1613_v32, %v1613_v32 }
 0x2ca   :  { %v3558_v18 = vmul.f32 %v9199_v13, %v3408_v25  ;;  %v2360_v38 = vmul.f32 1.0614054, %v9270_v30  ;;  %v1612_v12 = vand.u32 2147483647, %v9268_v41  ;;  %v5900_v26 = vpop.eup %5899  ;;  %v3111_v50 = vadd.f32 -0.28449672, %v2961_v58 }
 0x2cb   :  { %v4459_v3 = vsub.f32 1.0, %v4309_v40  ;;  %v9278_v44 = vadd.f32 %v6742_v1, %v1164_v14  ;;  %v1163_v11 = vadd.f32 %v794_v24, %v262_v4  ;;  %v5058_v48 = vmul.f32 0.5, %v9110_v33 }
 0x2cc   :  { %v4308_v2 = vmul.f32 %v5900_v26, %v3558_v18  ;;  %v2510_v62 = vadd.f32 -1.4531521, %v2360_v38  ;;  %v1762_v51 = vmul.f32 0.3275911, %v1612_v12  ;;  %v3261_v13 = vmul.f32 %v9223_v6, %v3111_v50  ;;  %v169_v18 = vld [vmem:[%s11233_s2 + $0x450] sm:$0xff] }
 0x2cd   :  { %v4759_v15 = vsub.f32 0.0, %v4459_v3  ;;  %v4086_v37 = vmul.f32 1.442695, %v3860_v42  ;;  %v9283_v32 = vmul.f32 0.70710677, %v9278_v44  ;;  %v3863_v23 = vsub.f32 0.0, %v3713_v39 }
 0x2ce   :  { %v4458_v17 = vsub.f32 1.0, %v4308_v2  ;;  %v2660_v34 = vmul.f32 %v9270_v30, %v2510_v62  ;;  %v1912_v61 = vadd.f32 1.0, %v1762_v51  ;;  %v3411_v21 = vadd.f32 0.2548296, %v3261_v13 }
 0x2cf   :  { %v4909_v56 = vsel %vm4609_vm15, %v4459_v3, %v4759_v15  ;;  %v1615_v33 = vand.u32 2147483647, %v9283_v32  ;;  %v9290_v27 = vadd.f32 %v6742_v1, %v1163_v11  ;;  %v3712_v36 = vmul.f32 %v1612_v12, %v1612_v12  ;;  %v800_v11 = vpop.permute.xlu1 %799 }
 0x2d0   :  { %v9292_v59 = vpop.eup %5901  ;;  %v5209_v52 = vadd.f32 1.0, %v4909_v56  ;;  %v4758_v0 = vsub.f32 0.0, %v4458_v17  ;;  %v2810_v28 = vadd.f32 1.4214138, %v2660_v34  ;;  %5905 = vrcp.f32 %v1912_v61  ;;  %v798_v34 = vpop.permute.xlu0 %797 }
 0x2d1   :  { %v3561_v16 = vmul.f32 %v9223_v6, %v3411_v21  ;;  %5907 = vpow2.f32 %v4086_v37  ;;  %v2363_v8 = vmul.f32 1.0614054, %v9292_v59  ;;  %v1765_v19 = vmul.f32 0.3275911, %v1615_v33  ;;  %v5904_v46 = vpop.eup %5903  ;;  %v170_v6 = vld [vmem:[%s11233_s2 + $0x458] sm:$0xff] }
 0x2d2   :  { %v5359_v47 = vmul.f32 %v5209_v52, %v5059_v49  ;;  %v4908_v31 = vsel %vm4608_vm0, %v4458_v17, %v4758_v0  ;;  %v2960_v29 = vmul.f32 %v9270_v30, %v2810_v28  ;;  %v4092_v10 = vmul.f32 1.442695, %v3863_v23  ;;  %v171_v0 = vld [vmem:[%s11233_s2 + $0x460] sm:$0xff] }
 0x2d3   :  { %v5208_v45 = vadd.f32 1.0, %v4908_v31  ;;  %v4311_v9 = vmul.f32 %v5904_v46, %v3561_v16  ;;  %v2513_v53 = vadd.f32 -1.4531521, %v2363_v8  ;;  %vm4611_vm1 = vcmp.ge.f32.partialorder %v9145_v60, 0.0 }
 0x2d4   :  { %5510 = vst.msk [vmem:[%s11234_s3 + $0x258] sm:$0xff] %vm5434_vm2, %v5359_v47  ;;  %v3110_v43 = vadd.f32 -0.28449672, %v2960_v29  ;;  %v1915_v49 = vadd.f32 1.0, %v1765_v19  ;;  %v9308_v54 = vmul.f32 0.70710677, %v9290_v27  ;;  %v472_v12 = vmul.f32 %v11240_v55, %v170_v6 }
 0x2d5   :  { %v5358_v4 = vmul.f32 %v5208_v45, %v5058_v48  ;;  %v4461_v25 = vsub.f32 1.0, %v4311_v9  ;;  %v5061_v24 = vmul.f32 0.5, %v9138_v7  ;;  %v2663_v40 = vmul.f32 %v9292_v59, %v2513_v53 }
 0x2d6   :  { %v3260_v58 = vmul.f32 %v9270_v30, %v3110_v43  ;;  %v3862_v42 = vsub.f32 0.0, %v3712_v36  ;;  %5909 = vrcp.f32 %v1915_v49  ;;  %v1614_v14 = vand.u32 2147483647, %v9308_v54  ;;  %911 = vrot.lane.b32.xlu1 %v472_v12, %s6337_s25 }
 0x2d7   :  { %5509 = vst.msk [vmem:[%s11234_s3 + $0x250] sm:$0xff] %vm5434_vm2, %v5358_v4  ;;  %v4761_v38 = vsub.f32 0.0, %v4461_v25  ;;  %v9322_v7 = vmul.f32 0.5, %v9177_v5  ;;  %v2813_v39 = vadd.f32 1.4214138, %v2663_v40  ;;  %5911 = vpow2.f32 %v4092_v10  ;;  %v6254_v5 = vld [vmem:[%s11233_s2 + $0x298] sm:$0xff] }
 0x2d8   :  { %v3410_v26 = vadd.f32 0.2548296, %v3260_v58  ;;  %v3715_v3 = vmul.f32 %v1615_v33, %v1615_v33  ;;  %v1764_v50 = vmul.f32 0.3275911, %v1614_v14  ;;  %v471_v62 = vmul.f32 %v11240_v55, %v169_v18  ;;  %v6255_v33 = vld [vmem:[%s11233_s2 + $0x290] sm:$0xff] }
 0x2d9   :  { %v4911_v2 = vsel %vm4611_vm1, %v4461_v25, %v4761_v38  ;;  %v2963_v48 = vmul.f32 %v9292_v59, %v2813_v39  ;;  %v265_v51 = vmul.f32 %v6254_v5, %v6710_v20  ;;  %v4090_v17 = vmul.f32 1.442695, %v3862_v42 }
 0x2da   :  { %v9334_v15 = vpop.eup %5905  ;;  %v5211_v13 = vadd.f32 1.0, %v4911_v2  ;;  %v3560_v37 = vmul.f32 %v9270_v30, %v3410_v26  ;;  %v1914_v60 = vadd.f32 1.0, %v1764_v50  ;;  %909 = vrot.lane.b32.xlu0 %v471_v62, %s6337_s25  ;;  %v264_v52 = vmul.f32 %v6255_v33, %v6710_v20  ;;  %v172_v30 = vld [vmem:[%s11233_s2 + $0x468] sm:$0xff] }
 0x2db   :  { %v5908_v23 = vpop.eup %5907  ;;  %v3113_v61 = vadd.f32 -0.28449672, %v2963_v48  ;;  %v2362_v56 = vmul.f32 1.0614054, %v9334_v15  ;;  %v1166_v21 = vadd.f32 %v800_v11, %v265_v51  ;;  %v3865_v8 = vsub.f32 0.0, %v3715_v3 }
 0x2dc   :  { %v5361_v28 = vmul.f32 %v5211_v13, %v5061_v24  ;;  %v4310_v16 = vmul.f32 %v5908_v23, %v3560_v37  ;;  %5913 = vrcp.f32 %v1914_v60  ;;  %v1165_v31 = vadd.f32 %v798_v34, %v264_v52  ;;  %v6257_v52 = vld [vmem:[%s11233_s2 + $0x2a0] sm:$0xff] }
 0x2dd   :  { %v3263_v19 = vmul.f32 %v9292_v59, %v3113_v61  ;;  %v2512_v46 = vadd.f32 -1.4531521, %v2362_v56  ;;  %v9351_v47 = vadd.f32 %v6742_v1, %v1166_v21  ;;  %v3714_v36 = vmul.f32 %v1614_v14, %v1614_v14  ;;  %v804_v56 = vpop.permute.xlu1 %803 }
 0x2de   :  { %5512 = vst.msk [vmem:[%s11234_s3 + $0x268] sm:$0xff] %vm5434_vm2, %v5361_v28  ;;  %v4460_v29 = vsub.f32 1.0, %v4310_v16  ;;  %v474_v45 = vmul.f32 %v11240_v55, %v172_v30  ;;  %v473_v9 = vmul.f32 %v11240_v55, %v171_v0  ;;  %vm4610_vm3 = vcmp.ge.f32.partialorder %v9191_v35, 0.0 }
 0x2df   :  { %v3413_v53 = vadd.f32 0.2548296, %v3263_v19  ;;  %v2662_v10 = vmul.f32 %v9334_v15, %v2512_v46  ;;  %v9362_v6 = vmul.f32 0.70710677, %v9351_v47  ;;  %v5063_v4 = vmul.f32 0.5, %v9210_v57  ;;  %v802_v19 = vpop.permute.xlu0 %801 }
 0x2e0   :  { %v9364_v43 = vpop.eup %5909  ;;  %v4760_v49 = vsub.f32 0.0, %v4460_v29  ;;  %v4096_v25 = vmul.f32 1.442695, %v3865_v8  ;;  %v9368_v24 = vadd.f32 %v6742_v1, %v1165_v31  ;;  %915 = vrot.lane.b32.xlu1 %v474_v45, %s6337_s25  ;;  %913 = vrot.lane.b32.xlu0 %v473_v9, %s6337_s25  ;;  %5915 = vpow2.f32 %v4090_v17  ;;  %v6256_v17 = vld [vmem:[%s11233_s2 + $0x2a8] sm:$0xff] }
 0x2e1   :  { %v3563_v40 = vmul.f32 %v9292_v59, %v3413_v53  ;;  %v2812_v58 = vadd.f32 1.4214138, %v2662_v10  ;;  %v2365_v42 = vmul.f32 1.0614054, %v9364_v43  ;;  %v1617_v14 = vand.u32 2147483647, %v9362_v6  ;;  %v5912_v18 = vpop.eup %5911 }
 0x2e2   :  { %v4910_v38 = vsel %vm4610_vm3, %v4460_v29, %v4760_v49  ;;  %v3864_v57 = vsub.f32 0.0, %v3714_v36  ;;  %v9378_v39 = vmul.f32 0.70710677, %v9368_v24  ;;  %vm4613_vm4 = vcmp.ge.f32.partialorder %v9214_v63, 0.0  ;;  %v174_v36 = vld [vmem:[%s11233_s2 + $0x478] sm:$0xff]  ;;  %v173_v53 = vld [vmem:[%s11233_s2 + $0x470] sm:$0xff] }
 0x2e3   :  { %v5210_v12 = vadd.f32 1.0, %v4910_v38  ;;  %v4313_v26 = vmul.f32 %v5912_v18, %v3563_v40  ;;  %v2962_v3 = vmul.f32 %v9334_v15, %v2812_v58  ;;  %v2515_v50 = vadd.f32 -1.4531521, %v2365_v42 }
 0x2e4   :  { %5917 = vpow2.f32 %v4096_v25  ;;  %v1767_v59 = vmul.f32 0.3275911, %v1617_v14  ;;  %v1616_v11 = vand.u32 2147483647, %v9378_v39  ;;  %v4094_v51 = vmul.f32 1.442695, %v3864_v57 }
 0x2e5   :  { %v5360_v2 = vmul.f32 %v5210_v12, %v9322_v7  ;;  %v4463_v35 = vsub.f32 1.0, %v4313_v26  ;;  %v3112_v48 = vadd.f32 -0.28449672, %v2962_v3  ;;  %v2665_v62 = vmul.f32 %v9364_v43, %v2515_v50 }
 0x2e6   :  { %v9385_v5 = vpop.eup %5913  ;;  %v1917_v13 = vadd.f32 1.0, %v1767_v59  ;;  %v1766_v37 = vmul.f32 0.3275911, %v1616_v11  ;;  %v267_v60 = vmul.f32 %v6256_v17, %v6710_v20  ;;  %v3717_v21 = vmul.f32 %v1617_v14, %v1617_v14  ;;  %v808_v17 = vpop.permute.xlu1 %807 }
 0x2e7   :  { %5511 = vst.msk [vmem:[%s11234_s3 + $0x260] sm:$0xff] %vm5434_vm2, %v5360_v2  ;;  %v4763_v7 = vsub.f32 0.0, %v4463_v35  ;;  %v3262_v34 = vmul.f32 %v9334_v15, %v3112_v48  ;;  %v2815_v23 = vadd.f32 1.4214138, %v2665_v62  ;;  %v2364_v61 = vmul.f32 1.0614054, %v9385_v5 }
 0x2e8   :  { %5919 = vrcp.f32 %v1917_v13  ;;  %v1916_v33 = vadd.f32 1.0, %v1766_v37  ;;  %v266_v30 = vmul.f32 %v6257_v52, %v6710_v20  ;;  %v5062_v31 = vmul.f32 0.5, %v9253_v22 }
 0x2e9   :  { %v4913_v0 = vsel %vm4613_vm4, %v4463_v35, %v4763_v7  ;;  %v3412_v28 = vadd.f32 0.2548296, %v3262_v34  ;;  %v2965_v16 = vmul.f32 %v9364_v43, %v2815_v23  ;;  %v2514_v8 = vadd.f32 -1.4531521, %v2364_v61  ;;  %v6258_v35 = vld [vmem:[%s11233_s2 + $0x2b8] sm:$0xff] }
 0x2ea   :  { %v5213_v46 = vadd.f32 1.0, %v4913_v0  ;;  %5921 = vpow2.f32 %v4094_v51  ;;  %v1168_v29 = vadd.f32 %v804_v56, %v267_v60  ;;  %v5916_v10 = vpop.eup %5915  ;;  %v3867_v25 = vsub.f32 0.0, %v3717_v21 }
 0x2eb   :  { %v3562_v45 = vmul.f32 %v9334_v15, %v3412_v28  ;;  %v3115_v9 = vadd.f32 -0.28449672, %v2965_v16  ;;  %v2664_v63 = vmul.f32 %v9385_v5, %v2514_v8  ;;  %5923 = vrcp.f32 %v1916_v33 }
 0x2ec   :  { %v5363_v49 = vmul.f32 %v5213_v46, %v5063_v4  ;;  %v9414_v22 = vadd.f32 %v6742_v1, %v1168_v29  ;;  %v1167_v40 = vadd.f32 %v802_v19, %v266_v30  ;;  %v476_v15 = vmul.f32 %v11240_v55, %v174_v36 }
 0x2ed   :  { %v4312_v58 = vmul.f32 %v5916_v10, %v3562_v45  ;;  %v3265_v42 = vmul.f32 %v9364_v43, %v3115_v9  ;;  %v2814_v14 = vadd.f32 1.4214138, %v2664_v63  ;;  %v3716_v38 = vmul.f32 %v1616_v11, %v1616_v11 }
 0x2ee   :  { %v5918_v18 = vpop.eup %5917  ;;  %5514 = vst.msk [vmem:[%s11234_s3 + $0x278] sm:$0xff] %vm5434_vm2, %v5363_v49  ;;  %v9423_v4 = vmul.f32 0.70710677, %v9414_v22  ;;  %v9426_v57 = vadd.f32 %v6742_v1, %v1167_v40  ;;  %v475_v12 = vmul.f32 %v11240_v55, %v173_v53  ;;  %vm4612_vm5 = vcmp.ge.f32.partialorder %v9268_v41, 0.0  ;;  %919 = vrot.lane.b32.xlu1 %v476_v15, %s6337_s25  ;;  %v806_v15 = vpop.permute.xlu0 %805 }
 0x2ef   :  { %v4462_v26 = vsub.f32 1.0, %v4312_v58  ;;  %v3415_v3 = vadd.f32 0.2548296, %v3265_v42  ;;  %v2964_v50 = vmul.f32 %v9385_v5, %v2814_v14  ;;  %v5065_v59 = vmul.f32 0.5, %v9278_v44 }
 0x2f0   :  { %v1619_v11 = vand.u32 2147483647, %v9423_v4  ;;  %v9435_v2 = vmul.f32 0.70710677, %v9426_v57  ;;  %917 = vrot.lane.b32.xlu0 %v475_v12, %s6337_s25  ;;  %v269_v48 = vmul.f32 %v6258_v35, %v6710_v20  ;;  %v4100_v37 = vmul.f32 1.442695, %v3867_v25 }
 0x2f1   :  { %v4762_v62 = vsub.f32 0.0, %v4462_v26  ;;  %v3565_v51 = vmul.f32 %v9364_v43, %v3415_v3  ;;  %v3114_v13 = vadd.f32 -0.28449672, %v2964_v50  ;;  %vm4615_vm6 = vcmp.ge.f32.partialorder %v9283_v32, 0.0  ;;  %v6259_v32 = vld [vmem:[%s11233_s2 + $0x2b0] sm:$0xff]  ;;  %v176_v3 = vld [vmem:[%s11233_s2 + $0x488] sm:$0xff] }
 0x2f2   :  { %v9443_v44 = vpop.eup %5919  ;;  %v3866_v60 = vsub.f32 0.0, %v3716_v38  ;;  %v1769_v7 = vmul.f32 0.3275911, %v1619_v11  ;;  %v1618_v34 = vand.u32 2147483647, %v9435_v2  ;;  %v1170_v0 = vadd.f32 %v808_v17, %v269_v48 }
 0x2f3   :  { %v4912_v23 = vsel %vm4612_vm5, %v4462_v26, %v4762_v62  ;;  %v4315_v61 = vmul.f32 %v5918_v18, %v3565_v51  ;;  %v3264_v56 = vmul.f32 %v9385_v5, %v3114_v13  ;;  %v2367_v21 = vmul.f32 1.0614054, %v9443_v44 }
 0x2f4   :  { %v5922_v43 = vpop.eup %5921  ;;  %v5212_v33 = vadd.f32 1.0, %v4912_v23  ;;  %v1919_v52 = vadd.f32 1.0, %v1769_v7  ;;  %v1768_v30 = vmul.f32 0.3275911, %v1618_v34  ;;  %v5064_v19 = vmul.f32 0.5, %v9290_v27 }
 0x2f5   :  { %v9451_v28 = vpop.eup %5923  ;;  %v4465_v16 = vsub.f32 1.0, %v4315_v61  ;;  %v3414_v8 = vadd.f32 0.2548296, %v3264_v56  ;;  %v2517_v46 = vadd.f32 -1.4531521, %v2367_v21  ;;  %vm4614_vm7 = vcmp.ge.f32.partialorder %v9308_v54, 0.0 }
 0x2f6   :  { %v5362_v29 = vmul.f32 %v5212_v33, %v5062_v31  ;;  %v2366_v41 = vmul.f32 1.0614054, %v9451_v28  ;;  %5925 = vrcp.f32 %v1919_v52  ;;  %v3719_v36 = vmul.f32 %v1619_v11, %v1619_v11 }
 0x2f7   :  { %v4765_v45 = vsub.f32 0.0, %v4465_v16  ;;  %v3564_v9 = vmul.f32 %v9385_v5, %v3414_v8  ;;  %v2667_v63 = vmul.f32 %v9443_v44, %v2517_v46  ;;  %v1918_v53 = vadd.f32 1.0, %v1768_v30 }
 0x2f8   :  { %5513 = vst.msk [vmem:[%s11234_s3 + $0x270] sm:$0xff] %vm5434_vm2, %v5362_v29  ;;  %5927 = vpow2.f32 %v4100_v37  ;;  %v2516_v27 = vadd.f32 -1.4531521, %v2366_v41  ;;  %v4098_v31 = vmul.f32 1.442695, %v3866_v60  ;;  %v9463_v10 = vadd.f32 %v6742_v1, %v1170_v0  ;;  %v6260_v29 = vld [vmem:[%s11233_s2 + $0x2c8] sm:$0xff] }
 0x2f9   :  { %v4915_v49 = vsel %vm4615_vm6, %v4465_v16, %v4765_v45  ;;  %v4314_v25 = vmul.f32 %v5922_v43, %v3564_v9  ;;  %v2817_v40 = vadd.f32 1.4214138, %v2667_v63  ;;  %5929 = vrcp.f32 %v1918_v53 }
 0x2fa   :  { %v5215_v5 = vadd.f32 1.0, %v4915_v49  ;;  %v2666_v58 = vmul.f32 %v9451_v28, %v2516_v27  ;;  %v3869_v42 = vsub.f32 0.0, %v3719_v36  ;;  %v9469_v14 = vmul.f32 0.70710677, %v9463_v10  ;;  %v812_v27 = vpop.permute.xlu1 %811 }
 0x2fb   :  { %v4464_v18 = vsub.f32 1.0, %v4314_v25  ;;  %v2967_v38 = vmul.f32 %v9443_v44, %v2817_v40  ;;  %v9473_v12 = vmul.f32 0.5, %v9351_v47  ;;  %v268_v26 = vmul.f32 %v6259_v32, %v6710_v20  ;;  %v175_v47 = vld [vmem:[%s11233_s2 + $0x480] sm:$0xff] }
 0x2fc   :  { %v5365_v50 = vmul.f32 %v5215_v5, %v5065_v59  ;;  %v2816_v11 = vadd.f32 1.4214138, %v2666_v58  ;;  %v3718_v35 = vmul.f32 %v1618_v34, %v1618_v34  ;;  %v1621_v48 = vand.u32 2147483647, %v9469_v14  ;;  %v810_v5 = vpop.permute.xlu0 %809 }
 0x2fd   :  { %v4764_v62 = vsub.f32 0.0, %v4464_v18  ;;  %v3117_v51 = vadd.f32 -0.28449672, %v2967_v38  ;;  %5931 = vpow2.f32 %v4098_v31  ;;  %v1169_v13 = vadd.f32 %v806_v15, %v268_v26 }
 0x2fe   :  { %5516 = vst.msk [vmem:[%s11234_s3 + $0x288] sm:$0xff] %vm5434_vm2, %v5365_v50  ;;  %v2966_v37 = vmul.f32 %v9451_v28, %v2816_v11  ;;  %v4104_v59 = vmul.f32 1.442695, %v3869_v42  ;;  %v1771_v17 = vmul.f32 0.3275911, %v1621_v48  ;;  %v478_v60 = vmul.f32 %v11240_v55, %v176_v3 }
 0x2ff   :  { %v4914_v7 = vsel %vm4614_vm7, %v4464_v18, %v4764_v62  ;;  %v3267_v34 = vmul.f32 %v9443_v44, %v3117_v51  ;;  %v9496_v23 = vadd.f32 %v6742_v1, %v1169_v13  ;;  %v477_v61 = vmul.f32 %v11240_v55, %v175_v47  ;;  %v6261_v18 = vld [vmem:[%s11233_s2 + $0x2c0] sm:$0xff] }
 0x300   :  { %v9499_v56 = vpop.eup %5925  ;;  %v5214_v21 = vadd.f32 1.0, %v4914_v7  ;;  %v3116_v43 = vadd.f32 -0.28449672, %v2966_v37  ;;  %v3868_v33 = vsub.f32 0.0, %v3718_v35  ;;  %v1921_v52 = vadd.f32 1.0, %v1771_v17  ;;  %923 = vrot.lane.b32.xlu1 %v478_v60, %s6337_s25 }
 0x301   :  { %v3417_v30 = vadd.f32 0.2548296, %v3267_v34  ;;  %v2369_v0 = vmul.f32 1.0614054, %v9499_v56  ;;  %v9504_v54 = vmul.f32 0.70710677, %v9496_v23  ;;  %921 = vrot.lane.b32.xlu0 %v477_v61, %s6337_s25  ;;  %v271_v41 = vmul.f32 %v6260_v29, %v6710_v20 }
 0x302   :  { %v5928_v16 = vpop.eup %5927  ;;  %v5364_v8 = vmul.f32 %v5214_v21, %v5064_v19  ;;  %v3266_v46 = vmul.f32 %v9451_v28, %v3116_v43  ;;  %5933 = vrcp.f32 %v1921_v52  ;;  %v3721_v63 = vmul.f32 %v1621_v48, %v1621_v48 }
 0x303   :  { %v9512_v36 = vpop.eup %5929  ;;  %v3567_v45 = vmul.f32 %v9443_v44, %v3417_v30  ;;  %v2519_v9 = vadd.f32 -1.4531521, %v2369_v0  ;;  %v1620_v53 = vand.u32 2147483647, %v9504_v54  ;;  %vm4617_vm8 = vcmp.ge.f32.partialorder %v9362_v6, 0.0 }
 0x304   :  { %5515 = vst.msk [vmem:[%s11234_s3 + $0x280] sm:$0xff] %vm5434_vm2, %v5364_v8  ;;  %v3416_v19 = vadd.f32 0.2548296, %v3266_v46  ;;  %5935 = vpow2.f32 %v4104_v59  ;;  %v2368_v31 = vmul.f32 1.0614054, %v9512_v36  ;;  %vm4616_vm9 = vcmp.ge.f32.partialorder %v9378_v39, 0.0 }
 0x305   :  { %v4317_v49 = vmul.f32 %v5928_v16, %v3567_v45  ;;  %v2669_v44 = vmul.f32 %v9499_v56, %v2519_v9  ;;  %v4102_v25 = vmul.f32 1.442695, %v3868_v33  ;;  %v1770_v40 = vmul.f32 0.3275911, %v1620_v53 }
 0x306   :  { %v3566_v58 = vmul.f32 %v9451_v28, %v3416_v19  ;;  %v2518_v42 = vadd.f32 -1.4531521, %v2368_v31  ;;  %v1172_v15 = vadd.f32 %v812_v27, %v271_v41  ;;  %v270_v38 = vmul.f32 %v6261_v18, %v6710_v20 }
 0x307   :  { %v5932_v32 = vpop.eup %5931  ;;  %v4467_v26 = vsub.f32 1.0, %v4317_v49  ;;  %v2819_v3 = vadd.f32 1.4214138, %v2669_v44  ;;  %v3871_v50 = vsub.f32 0.0, %v3721_v63  ;;  %v1920_v11 = vadd.f32 1.0, %v1770_v40 }
 0x308   :  { %v4316_v35 = vmul.f32 %v5932_v32, %v3566_v58  ;;  %v2668_v48 = vmul.f32 %v9512_v36, %v2518_v42  ;;  %v9531_v47 = vadd.f32 %v6742_v1, %v1172_v15  ;;  %v1171_v28 = vadd.f32 %v810_v5, %v270_v38 }
 0x309   :  { %v4767_v62 = vsub.f32 0.0, %v4467_v26  ;;  %v2969_v51 = vmul.f32 %v9499_v56, %v2819_v3  ;;  %5937 = vrcp.f32 %v1920_v11  ;;  %v3720_v13 = vmul.f32 %v1620_v53, %v1620_v53  ;;  %v177_v11 = vld [vmem:[%s11233_s2 + $0x490] sm:$0xff] }
 0x30a   :  { %v4466_v37 = vsub.f32 1.0, %v4316_v35  ;;  %v2818_v59 = vadd.f32 1.4214138, %v2668_v48  ;;  %5939 = vpow2.f32 %v4102_v25  ;;  %v9535_v17 = vmul.f32 0.70710677, %v9531_v47 }
 0x30b   :  { %v4917_v60 = vsel %vm4617_vm8, %v4467_v26, %v4767_v62  ;;  %v3119_v7 = vadd.f32 -0.28449672, %v2969_v51  ;;  %v4108_v34 = vmul.f32 1.442695, %v3871_v50  ;;  %v9540_v61 = vadd.f32 %v6742_v1, %v1171_v28  ;;  %v180_v51 = vld [vmem:[%s11233_s2 + $0x4a8] sm:$0xff] }
 0x30c   :  { %v9542_v21 = vpop.eup %5933  ;;  %v5217_v43 = vadd.f32 1.0, %v4917_v60  ;;  %v4766_v33 = vsub.f32 0.0, %v4466_v37  ;;  %v2968_v52 = vmul.f32 %v9512_v36, %v2818_v59  ;;  %v1623_v30 = vand.u32 2147483647, %v9535_v17  ;;  %v6262_v60 = vld [vmem:[%s11233_s2 + $0x2d8] sm:$0xff] }
 0x30d   :  { %v3269_v0 = vmul.f32 %v9499_v56, %v3119_v7  ;;  %v2371_v16 = vmul.f32 1.0614054, %v9542_v21  ;;  %v3870_v8 = vsub.f32 0.0, %v3720_v13  ;;  %v9549_v6 = vmul.f32 0.70710677, %v9540_v61 }
 0x30e   :  { %v5936_v46 = vpop.eup %5935  ;;  %v5367_v29 = vmul.f32 %v5217_v43, %v9473_v12  ;;  %v4916_v41 = vsel %vm4616_vm9, %v4466_v37, %v4766_v33  ;;  %v3118_v45 = vadd.f32 -0.28449672, %v2968_v52  ;;  %v1773_v9 = vmul.f32 0.3275911, %v1623_v30 }
 0x30f   :  { %v5066_v63 = vmul.f32 0.5, %v9368_v24  ;;  %v5216_v53 = vadd.f32 1.0, %v4916_v41  ;;  %v3419_v27 = vadd.f32 0.2548296, %v3269_v0  ;;  %v2521_v19 = vadd.f32 -1.4531521, %v2371_v16 }
 0x310   :  { %5518 = vst.msk [vmem:[%s11234_s3 + $0x298] sm:$0xff] %vm5434_vm2, %v5367_v29  ;;  %v9560_v31 = vmul.f32 0.5, %v9414_v22  ;;  %v3268_v12 = vmul.f32 %v9512_v36, %v3118_v45  ;;  %v1923_v49 = vadd.f32 1.0, %v1773_v9  ;;  %v1622_v39 = vand.u32 2147483647, %v9549_v6  ;;  %v178_v22 = vld [vmem:[%s11233_s2 + $0x498] sm:$0xff] }
 0x311   :  { %v5366_v44 = vmul.f32 %v5216_v53, %v5066_v63  ;;  %v3569_v25 = vmul.f32 %v9499_v56, %v3419_v27  ;;  %v2671_v24 = vmul.f32 %v9542_v21, %v2521_v19  ;;  %v4106_v40 = vmul.f32 1.442695, %v3870_v8  ;;  %v179_v16 = vld [vmem:[%s11233_s2 + $0x4a0] sm:$0xff] }
 0x312   :  { %vm4619_vm10 = vcmp.ge.f32.partialorder %v9423_v4, 0.0  ;;  %v3418_v5 = vadd.f32 0.2548296, %v3268_v12  ;;  %5941 = vrcp.f32 %v1923_v49  ;;  %v1772_v58 = vmul.f32 0.3275911, %v1622_v39 }
 0x313   :  { %v9570_v42 = vpop.eup %5937  ;;  %5517 = vst.msk [vmem:[%s11234_s3 + $0x290] sm:$0xff] %vm5434_vm2, %v5366_v44  ;;  %v4319_v56 = vmul.f32 %v5936_v46, %v3569_v25  ;;  %v5068_v15 = vmul.f32 0.5, %v9426_v57  ;;  %v2821_v18 = vadd.f32 1.4214138, %v2671_v24  ;;  %5943 = vpow2.f32 %v4108_v34  ;;  %v814_v34 = vpop.permute.xlu0 %813 }
 0x314   :  { %v5940_v38 = vpop.eup %5939  ;;  %v3568_v32 = vmul.f32 %v9512_v36, %v3418_v5  ;;  %v2370_v26 = vmul.f32 1.0614054, %v9570_v42  ;;  %v3723_v3 = vmul.f32 %v1623_v30, %v1623_v30  ;;  %v1922_v50 = vadd.f32 1.0, %v1772_v58  ;;  %v816_v36 = vpop.permute.xlu1 %815  ;;  %v6263_v30 = vld [vmem:[%s11233_s2 + $0x2d0] sm:$0xff] }
 0x315   :  { %v4469_v35 = vsub.f32 1.0, %v4319_v56  ;;  %v2971_v48 = vmul.f32 %v9542_v21, %v2821_v18  ;;  %5945 = vpow2.f32 %v4106_v40  ;;  %v480_v28 = vmul.f32 %v11240_v55, %v178_v22 }
 0x316   :  { %v4318_v57 = vmul.f32 %v5940_v38, %v3568_v32  ;;  %vm4618_vm11 = vcmp.ge.f32.partialorder %v9435_v2, 0.0  ;;  %v2520_v62 = vadd.f32 -1.4531521, %v2370_v26  ;;  %5947 = vrcp.f32 %v1922_v50 }
 0x317   :  { %v4769_v13 = vsub.f32 0.0, %v4469_v35  ;;  %v3121_v37 = vadd.f32 -0.28449672, %v2971_v48  ;;  %927 = vrot.lane.b32.xlu1 %v480_v28, %s6337_s25  ;;  %v479_v59 = vmul.f32 %v11240_v55, %v177_v11  ;;  %v273_v7 = vmul.f32 %v6262_v60, %v6710_v20 }
 0x318   :  { %v4468_v43 = vsub.f32 1.0, %v4318_v57  ;;  %v2670_v33 = vmul.f32 %v9570_v42, %v2520_v62  ;;  %v3873_v52 = vsub.f32 0.0, %v3723_v3  ;;  %v272_v0 = vmul.f32 %v6263_v30, %v6710_v20 }
 0x319   :  { %v4919_v8 = vsel %vm4619_vm10, %v4469_v35, %v4769_v13  ;;  %v3271_v46 = vmul.f32 %v9542_v21, %v3121_v37  ;;  %925 = vrot.lane.b32.xlu0 %v479_v59, %s6337_s25  ;;  %v1174_v29 = vadd.f32 %v816_v36, %v273_v7  ;;  %v482_v41 = vmul.f32 %v11240_v55, %v180_v51  ;;  %v6264_v51 = vld [vmem:[%s11233_s2 + $0x2e8] sm:$0xff] }
 0x31a   :  { %v5219_v45 = vadd.f32 1.0, %v4919_v8  ;;  %v4768_v9 = vsub.f32 0.0, %v4468_v43  ;;  %v2820_v63 = vadd.f32 1.4214138, %v2670_v33  ;;  %v1173_v53 = vadd.f32 %v814_v34, %v272_v0  ;;  %v820_v34 = vpop.permute.xlu1 %819 }
 0x31b   :  { %v3421_v27 = vadd.f32 0.2548296, %v3271_v46  ;;  %v3722_v19 = vmul.f32 %v1622_v39, %v1622_v39  ;;  %v9608_v12 = vadd.f32 %v6742_v1, %v1174_v29  ;;  %931 = vrot.lane.b32.xlu1 %v482_v41, %s6337_s25  ;;  %v481_v4 = vmul.f32 %v11240_v55, %v179_v16 }
 0x31c   :  { %v9612_v49 = vpop.eup %5941  ;;  %v5369_v44 = vmul.f32 %v5219_v45, %v9560_v31  ;;  %v4918_v25 = vsel %vm4618_vm11, %v4468_v43, %v4768_v9  ;;  %v2970_v24 = vmul.f32 %v9570_v42, %v2820_v63  ;;  %v9619_v40 = vadd.f32 %v6742_v1, %v1173_v53  ;;  %v818_v63 = vpop.permute.xlu0 %817 }
 0x31d   :  { %v5944_v39 = vpop.eup %5943  ;;  %v5218_v5 = vadd.f32 1.0, %v4918_v25  ;;  %v3571_v58 = vmul.f32 %v9542_v21, %v3421_v27  ;;  %v2373_v22 = vmul.f32 1.0614054, %v9612_v49  ;;  %v9624_v55 = vmul.f32 0.70710677, %v9608_v12  ;;  %929 = vrot.lane.b32.xlu0 %v481_v4, %s6337_s25  ;;  %v6265_v27 = vld [vmem:[%s11233_s2 + $0x2e0] sm:$0xff] }
 0x31e   :  { %5520 = vst.msk [vmem:[%s11234_s3 + $0x2a8] sm:$0xff] %vm5434_vm2, %v5369_v44  ;;  %v5071_v2 = vmul.f32 0.5, %v9463_v10  ;;  %v3120_v31 = vadd.f32 -0.28449672, %v2970_v24  ;;  %v9633_v56 = vmul.f32 0.70710677, %v9619_v40  ;;  %v275_v13 = vmul.f32 %v6264_v51, %v6710_v20  ;;  %v824_v24 = vpop.permute.xlu1 %823 }
 0x31f   :  { %v5946_v18 = vpop.eup %5945  ;;  %v5368_v21 = vmul.f32 %v5218_v5, %v5068_v15  ;;  %v4321_v38 = vmul.f32 %v5944_v39, %v3571_v58  ;;  %v2523_v32 = vadd.f32 -1.4531521, %v2373_v22  ;;  %v1625_v26 = vand.u32 2147483647, %v9624_v55  ;;  %v6266_v22 = vld [vmem:[%s11233_s2 + $0x2f8] sm:$0xff] }
 0x320   :  { %v9636_v3 = vpop.eup %5947  ;;  %v3270_v50 = vmul.f32 %v9570_v42, %v3120_v31  ;;  %v4112_v11 = vmul.f32 1.442695, %v3873_v52  ;;  %v3872_v35 = vsub.f32 0.0, %v3722_v19  ;;  %v1624_v48 = vand.u32 2147483647, %v9633_v56 }
 0x321   :  { %5519 = vst.msk [vmem:[%s11234_s3 + $0x2a0] sm:$0xff] %vm5434_vm2, %v5368_v21  ;;  %v4471_v10 = vsub.f32 1.0, %v4321_v38  ;;  %v2673_v15 = vmul.f32 %v9612_v49, %v2523_v32  ;;  %v2372_v28 = vmul.f32 1.0614054, %v9636_v3  ;;  %v1775_v57 = vmul.f32 0.3275911, %v1625_v26 }
 0x322   :  { %vm4621_vm12 = vcmp.ge.f32.partialorder %v9469_v14, 0.0  ;;  %v3420_v62 = vadd.f32 0.2548296, %v3270_v50  ;;  %v1774_v36 = vmul.f32 0.3275911, %v1624_v48  ;;  %vm4620_vm13 = vcmp.ge.f32.partialorder %v9504_v54, 0.0 }
 0x323   :  { %v4771_v37 = vsub.f32 0.0, %v4471_v10  ;;  %v2823_v59 = vadd.f32 1.4214138, %v2673_v15  ;;  %v2522_v60 = vadd.f32 -1.4531521, %v2372_v28  ;;  %v1925_v7 = vadd.f32 1.0, %v1775_v57 }
 0x324   :  { %v3570_v43 = vmul.f32 %v9570_v42, %v3420_v62  ;;  %5949 = vpow2.f32 %v4112_v11  ;;  %v4110_v33 = vmul.f32 1.442695, %v3872_v35  ;;  %v1924_v14 = vadd.f32 1.0, %v1774_v36 }
 0x325   :  { %v4921_v52 = vsel %vm4621_vm12, %v4471_v10, %v4771_v37  ;;  %v2973_v30 = vmul.f32 %v9612_v49, %v2823_v59  ;;  %v2672_v0 = vmul.f32 %v9636_v3, %v2522_v60  ;;  %5951 = vrcp.f32 %v1925_v7 }
 0x326   :  { %v5221_v16 = vadd.f32 1.0, %v4921_v52  ;;  %v4320_v8 = vmul.f32 %v5946_v18, %v3570_v43  ;;  %v3725_v46 = vmul.f32 %v1625_v26, %v1625_v26  ;;  %5953 = vrcp.f32 %v1924_v14 }
 0x327   :  { %v5070_v29 = vmul.f32 0.5, %v9496_v23  ;;  %v3123_v41 = vadd.f32 -0.28449672, %v2973_v30  ;;  %v2822_v45 = vadd.f32 1.4214138, %v2672_v0  ;;  %v1176_v9 = vadd.f32 %v820_v34, %v275_v13 }
 0x328   :  { %v5371_v42 = vmul.f32 %v5221_v16, %v5071_v2  ;;  %v4470_v53 = vsub.f32 1.0, %v4320_v8  ;;  %5955 = vpow2.f32 %v4110_v33  ;;  %v274_v19 = vmul.f32 %v6265_v27, %v6710_v20 }
 0x329   :  { %v3273_v4 = vmul.f32 %v9612_v49, %v3123_v41  ;;  %v2972_v44 = vmul.f32 %v9636_v3, %v2822_v45  ;;  %v3724_v25 = vmul.f32 %v1624_v48, %v1624_v48  ;;  %v9663_v23 = vadd.f32 %v6742_v1, %v1176_v9 }
 0x32a   :  { %5522 = vst.msk [vmem:[%s11234_s3 + $0x2b8] sm:$0xff] %vm5434_vm2, %v5371_v42  ;;  %v4770_v39 = vsub.f32 0.0, %v4470_v53  ;;  %v3875_v5 = vsub.f32 0.0, %v3725_v46  ;;  %v1175_v58 = vadd.f32 %v818_v63, %v274_v19  ;;  %v277_v2 = vmul.f32 %v6266_v22, %v6710_v20 }
 0x32b   :  { %v3423_v31 = vadd.f32 0.2548296, %v3273_v4  ;;  %v3122_v18 = vadd.f32 -0.28449672, %v2972_v44  ;;  %v9674_v21 = vmul.f32 0.70710677, %v9663_v23 }
 0x32c   :  { %v4920_v38 = vsel %vm4620_vm13, %v4470_v53, %v4770_v39  ;;  %v5073_v32 = vmul.f32 0.5, %v9531_v47  ;;  %v9680_v26 = vadd.f32 %v6742_v1, %v1175_v58  ;;  %v1178_v50 = vadd.f32 %v824_v24, %v277_v2  ;;  %v822_v58 = vpop.permute.xlu0 %821 }
 0x32d   :  { %v5220_v11 = vadd.f32 1.0, %v4920_v38  ;;  %v3573_v35 = vmul.f32 %v9612_v49, %v3423_v31  ;;  %v3272_v48 = vmul.f32 %v9636_v3, %v3122_v18  ;;  %v1627_v10 = vand.u32 2147483647, %v9674_v21  ;;  %v828_v18 = vpop.permute.xlu1 %827 }
 0x32e   :  { %v5950_v15 = vpop.eup %5949  ;;  %vm4623_vm14 = vcmp.ge.f32.partialorder %v9535_v17, 0.0  ;;  %v4116_v28 = vmul.f32 1.442695, %v3875_v5  ;;  %v3874_v57 = vsub.f32 0.0, %v3724_v25  ;;  %v9687_v54 = vmul.f32 0.70710677, %v9680_v26 }
 0x32f   :  { %v9689_v47 = vpop.eup %5951  ;;  %v5370_v62 = vmul.f32 %v5220_v11, %v5070_v29  ;;  %v4323_v36 = vmul.f32 %v5950_v15, %v3573_v35  ;;  %v3422_v51 = vadd.f32 0.2548296, %v3272_v48  ;;  %v1777_v13 = vmul.f32 0.3275911, %v1627_v10  ;;  %v6268_v25 = vld [vmem:[%s11233_s2 + $0x308] sm:$0xff] }
 0x330   :  { %v9691_v37 = vpop.eup %5953  ;;  %vm4622_vm15 = vcmp.ge.f32.partialorder %v9549_v6, 0.0  ;;  %v2375_v49 = vmul.f32 1.0614054, %v9689_v47  ;;  %v1626_v59 = vand.u32 2147483647, %v9687_v54  ;;  %v9697_v60 = vadd.f32 %v6742_v1, %v1178_v50 }
 0x331   :  { %5521 = vst.msk [vmem:[%s11234_s3 + $0x2b0] sm:$0xff] %vm5434_vm2, %v5370_v62  ;;  %v4473_v7 = vsub.f32 1.0, %v4323_v36  ;;  %v3572_v34 = vmul.f32 %v9636_v3, %v3422_v51  ;;  %v2374_v43 = vmul.f32 1.0614054, %v9691_v37  ;;  %v1927_v33 = vadd.f32 1.0, %v1777_v13  ;;  %v6267_v3 = vld [vmem:[%s11233_s2 + $0x2f0] sm:$0xff] }
 0x332   :  { %v5956_v14 = vpop.eup %5955  ;;  %v2525_v52 = vadd.f32 -1.4531521, %v2375_v49  ;;  %5957 = vpow2.f32 %v4116_v28  ;;  %v4114_v30 = vmul.f32 1.442695, %v3874_v57  ;;  %v1776_v0 = vmul.f32 0.3275911, %v1626_v59 }
 0x333   :  { %v4773_v16 = vsub.f32 0.0, %v4473_v7  ;;  %v4322_v8 = vmul.f32 %v5956_v14, %v3572_v34  ;;  %v2524_v46 = vadd.f32 -1.4531521, %v2374_v43  ;;  %5959 = vrcp.f32 %v1927_v33 }
 0x334   :  { %v2675_v29 = vmul.f32 %v9689_v47, %v2525_v52  ;;  %v3727_v41 = vmul.f32 %v1627_v10, %v1627_v10  ;;  %v1926_v45 = vadd.f32 1.0, %v1776_v0  ;;  %v276_v9 = vmul.f32 %v6267_v3, %v6710_v20  ;;  %v6269_v3 = vld [vmem:[%s11233_s2 + $0x300] sm:$0xff] }
 0x335   :  { %v4923_v63 = vsel %vm4623_vm14, %v4473_v7, %v4773_v16  ;;  %v4472_v42 = vsub.f32 1.0, %v4322_v8  ;;  %v2674_v53 = vmul.f32 %v9691_v37, %v2524_v46  ;;  %v9714_v27 = vmul.f32 0.70710677, %v9697_v60 }
 0x336   :  { %v5223_v19 = vadd.f32 1.0, %v4923_v63  ;;  %v2825_v4 = vadd.f32 1.4214138, %v2675_v29  ;;  %v3726_v44 = vmul.f32 %v1626_v59, %v1626_v59  ;;  %v279_v24 = vmul.f32 %v6268_v25, %v6710_v20 }
 0x337   :  { %v4772_v39 = vsub.f32 0.0, %v4472_v42  ;;  %v2824_v5 = vadd.f32 1.4214138, %v2674_v53  ;;  %5961 = vrcp.f32 %v1926_v45  ;;  %v1629_v17 = vand.u32 2147483647, %v9714_v27 }
 0x338   :  { %v5373_v22 = vmul.f32 %v5223_v19, %v5073_v32  ;;  %v2975_v2 = vmul.f32 %v9689_v47, %v2825_v4  ;;  %5963 = vpow2.f32 %v4114_v30  ;;  %v3877_v31 = vsub.f32 0.0, %v3727_v41  ;;  %v826_v4 = vpop.permute.xlu0 %825 }
 0x339   :  { %v4922_v38 = vsel %vm4622_vm15, %v4472_v42, %v4772_v39  ;;  %v5072_v50 = vmul.f32 0.5, %v9540_v61  ;;  %v2974_v11 = vmul.f32 %v9691_v37, %v2824_v5  ;;  %v1779_v35 = vmul.f32 0.3275911, %v1629_v17 }
 0x33a   :  { %5524 = vst.msk [vmem:[%s11234_s3 + $0x2c8] sm:$0xff] %vm5434_vm2, %v5373_v22  ;;  %v5222_v48 = vadd.f32 1.0, %v4922_v38  ;;  %v3125_v32 = vadd.f32 -0.28449672, %v2975_v2  ;;  %v9731_v10 = vmul.f32 0.5, %v9608_v12  ;;  %v1177_v15 = vadd.f32 %v822_v58, %v276_v9 }
 0x33b   :  { %v3124_v28 = vadd.f32 -0.28449672, %v2974_v11  ;;  %v3876_v57 = vsub.f32 0.0, %v3726_v44  ;;  %v1929_v6 = vadd.f32 1.0, %v1779_v35  ;;  %v1180_v62 = vadd.f32 %v828_v18, %v279_v24 }
 0x33c   :  { %v5958_v36 = vpop.eup %5957  ;;  %v5372_v61 = vmul.f32 %v5222_v48, %v5072_v50  ;;  %v3275_v51 = vmul.f32 %v9689_v47, %v3125_v32  ;;  %v4120_v13 = vmul.f32 1.442695, %v3877_v31  ;;  %v9735_v49 = vadd.f32 %v6742_v1, %v1177_v15 }
 0x33d   :  { %v9737_v59 = vpop.eup %5959  ;;  %v3274_v7 = vmul.f32 %v9691_v37, %v3124_v28  ;;  %v9741_v12 = vmul.f32 0.5, %v9619_v40  ;;  %5965 = vrcp.f32 %v1929_v6  ;;  %v9744_v34 = vadd.f32 %v6742_v1, %v1180_v62 }
 0x33e   :  { %5523 = vst.msk [vmem:[%s11234_s3 + $0x2c0] sm:$0xff] %vm5434_vm2, %v5372_v61  ;;  %v3425_v43 = vadd.f32 0.2548296, %v3275_v51  ;;  %v2377_v33 = vmul.f32 1.0614054, %v9737_v59  ;;  %vm4625_vm0 = vcmp.ge.f32.partialorder %v9624_v55, 0.0  ;;  %5967 = vpow2.f32 %v4120_v13 }
 0x33f   :  { %v9752_v14 = vmul.f32 0.70710677, %v9735_v49  ;;  %v3424_v52 = vadd.f32 0.2548296, %v3274_v7  ;;  %v4118_v40 = vmul.f32 1.442695, %v3876_v57  ;;  %v3729_v41 = vmul.f32 %v1629_v17, %v1629_v17 }
 0x340   :  { %v9756_v30 = vmul.f32 0.70710677, %v9744_v34  ;;  %v3575_v0 = vmul.f32 %v9689_v47, %v3425_v43  ;;  %v2527_v16 = vadd.f32 -1.4531521, %v2377_v33  ;;  %v278_v9 = vmul.f32 %v6269_v3, %v6710_v20 }
 0x341   :  { %v1628_v8 = vand.u32 2147483647, %v9752_v14  ;;  %v9760_v46 = vpop.eup %5961  ;;  %v3574_v29 = vmul.f32 %v9691_v37, %v3424_v52  ;;  %5969 = vpow2.f32 %v4118_v40  ;;  %v3879_v22 = vsub.f32 0.0, %v3729_v41  ;;  %v832_v41 = vpop.permute.xlu1 %831 }
 0x342   :  { %v1631_v45 = vand.u32 2147483647, %v9756_v30  ;;  %v5964_v63 = vpop.eup %5963  ;;  %v4325_v42 = vmul.f32 %v5958_v36, %v3575_v0  ;;  %v2677_v47 = vmul.f32 %v9737_v59, %v2527_v16  ;;  %v2376_v53 = vmul.f32 1.0614054, %v9760_v46 }
 0x343   :  { %v1778_v19 = vmul.f32 0.3275911, %v1628_v8  ;;  %v4324_v44 = vmul.f32 %v5964_v63, %v3574_v29  ;;  %v3728_v37 = vmul.f32 %v1628_v8, %v1628_v8  ;;  %v1179_v31 = vadd.f32 %v826_v4, %v278_v9 }
 0x344   :  { %v1781_v25 = vmul.f32 0.3275911, %v1631_v45  ;;  %v4475_v24 = vsub.f32 1.0, %v4325_v42  ;;  %v2827_v39 = vadd.f32 1.4214138, %v2677_v47  ;;  %vm4624_vm1 = vcmp.ge.f32.partialorder %v9633_v56, 0.0 }
 0x345   :  { %v2526_v5 = vadd.f32 -1.4531521, %v2376_v53  ;;  %v1928_v17 = vadd.f32 1.0, %v1778_v19  ;;  %v4474_v58 = vsub.f32 1.0, %v4324_v44  ;;  %v3878_v48 = vsub.f32 0.0, %v3728_v37 }
 0x346   :  { %v1931_v2 = vadd.f32 1.0, %v1781_v25  ;;  %v4775_v18 = vsub.f32 0.0, %v4475_v24  ;;  %v2977_v38 = vmul.f32 %v9737_v59, %v2827_v39  ;;  %v4124_v36 = vmul.f32 1.442695, %v3879_v22 }
 0x347   :  { %v2676_v50 = vmul.f32 %v9760_v46, %v2526_v5  ;;  %5971 = vrcp.f32 %v1928_v17  ;;  %v9772_v11 = vpop.eup %5965  ;;  %v4774_v35 = vsub.f32 0.0, %v4474_v58  ;;  %v9779_v61 = vadd.f32 %v6742_v1, %v1179_v31  ;;  %v6271_v17 = vld [vmem:[%s11233_s2 + $0x310] sm:$0xff] }
 0x348   :  { %5973 = vrcp.f32 %v1931_v2  ;;  %v4925_v32 = vsel %vm4625_vm0, %v4475_v24, %v4775_v18  ;;  %v3127_v15 = vadd.f32 -0.28449672, %v2977_v38  ;;  %v2379_v57 = vmul.f32 1.0614054, %v9772_v11  ;;  %v5968_v51 = vpop.eup %5967  ;;  %v830_v38 = vpop.permute.xlu0 %829 }
 0x349   :  { %v2826_v28 = vadd.f32 1.4214138, %v2676_v50  ;;  %v5225_v6 = vadd.f32 1.0, %v4925_v32  ;;  %v4924_v62 = vsel %vm4624_vm1, %v4474_v58, %v4774_v35  ;;  %v4122_v33 = vmul.f32 1.442695, %v3878_v48 }
 0x34a   :  { %v5224_v13 = vadd.f32 1.0, %v4924_v62  ;;  %v3277_v56 = vmul.f32 %v9737_v59, %v3127_v15  ;;  %v2529_v43 = vadd.f32 -1.4531521, %v2379_v57  ;;  %v3731_v52 = vmul.f32 %v1631_v45, %v1631_v45 }
 0x34b   :  { %v2976_v7 = vmul.f32 %v9760_v46, %v2826_v28  ;;  %v5375_v55 = vmul.f32 %v5225_v6, %v9731_v10  ;;  %v9785_v40 = vmul.f32 0.70710677, %v9779_v61  ;;  %v5970_v3 = vpop.eup %5969  ;;  %vm4627_vm3 = vcmp.ge.f32.partialorder %v9674_v21, 0.0 }
 0x34c   :  { %v5374_v0 = vmul.f32 %v5224_v13, %v9741_v12  ;;  %v3427_v16 = vadd.f32 0.2548296, %v3277_v56  ;;  %v2679_v29 = vmul.f32 %v9772_v11, %v2529_v43  ;;  %v5077_v10 = vmul.f32 0.5, %v9663_v23  ;;  %v6270_v12 = vld [vmem:[%s11233_s2 + $0x318] sm:$0xff] }
 0x34d   :  { %v3126_v8 = vadd.f32 -0.28449672, %v2976_v7  ;;  %5526 = vst.msk [vmem:[%s11234_s3 + $0x2d8] sm:$0xff] %vm5434_vm2, %v5375_v55  ;;  %v1630_v45 = vand.u32 2147483647, %v9785_v40  ;;  %v281_v9 = vmul.f32 %v6270_v12, %v6710_v20  ;;  %v9807_v47 = vmul.f32 0.5, %v9680_v26  ;;  %v836_v55 = vpop.permute.xlu1 %835 }
 0x34e   :  { %5525 = vst.msk [vmem:[%s11234_s3 + $0x2d0] sm:$0xff] %vm5434_vm2, %v5374_v0  ;;  %v3577_v63 = vmul.f32 %v9737_v59, %v3427_v16  ;;  %v2829_v23 = vadd.f32 1.4214138, %v2679_v29  ;;  %5975 = vpow2.f32 %v4124_v36  ;;  %v3881_v53 = vsub.f32 0.0, %v3731_v52  ;;  %v6272_v36 = vld [vmem:[%s11233_s2 + $0x328] sm:$0xff] }
 0x34f   :  { %v3276_v42 = vmul.f32 %v9760_v46, %v3126_v8  ;;  %v1780_v19 = vmul.f32 0.3275911, %v1630_v45  ;;  %v1182_v4 = vadd.f32 %v832_v41, %v281_v9  ;;  %5977 = vpow2.f32 %v4122_v33 }
 0x350   :  { %v4327_v37 = vmul.f32 %v5968_v51, %v3577_v63  ;;  %v2979_v24 = vmul.f32 %v9772_v11, %v2829_v23  ;;  %vm4626_vm4 = vcmp.ge.f32.partialorder %v9687_v54, 0.0  ;;  %v280_v58 = vmul.f32 %v6271_v17, %v6710_v20 }
 0x351   :  { %v9809_v44 = vpop.eup %5971  ;;  %v3426_v25 = vadd.f32 0.2548296, %v3276_v42  ;;  %v1930_v26 = vadd.f32 1.0, %v1780_v19  ;;  %v9817_v5 = vadd.f32 %v6742_v1, %v1182_v4  ;;  %v4128_v35 = vmul.f32 1.442695, %v3881_v53 }
 0x352   :  { %v9812_v39 = vpop.eup %5973  ;;  %v2378_v59 = vmul.f32 1.0614054, %v9809_v44  ;;  %v4477_v22 = vsub.f32 1.0, %v4327_v37  ;;  %v3129_v31 = vadd.f32 -0.28449672, %v2979_v24  ;;  %v283_v51 = vmul.f32 %v6272_v36, %v6710_v20 }
 0x353   :  { %v3576_v2 = vmul.f32 %v9760_v46, %v3426_v25  ;;  %v2381_v18 = vmul.f32 1.0614054, %v9812_v39  ;;  %5979 = vrcp.f32 %v1930_v26  ;;  %v9826_v48 = vmul.f32 0.70710677, %v9817_v5 }
 0x354   :  { %v2528_v50 = vadd.f32 -1.4531521, %v2378_v59  ;;  %v4777_v32 = vsub.f32 0.0, %v4477_v22  ;;  %v3279_v28 = vmul.f32 %v9772_v11, %v3129_v31  ;;  %v1181_v46 = vadd.f32 %v830_v38, %v280_v58 }
 0x355   :  { %v4326_v15 = vmul.f32 %v5970_v3, %v3576_v2  ;;  %v2531_v57 = vadd.f32 -1.4531521, %v2381_v18  ;;  %v1633_v62 = vand.u32 2147483647, %v9826_v48  ;;  %5981 = vpow2.f32 %v4128_v35 }
 0x356   :  { %v2678_v6 = vmul.f32 %v9809_v44, %v2528_v50  ;;  %v4927_v13 = vsel %vm4627_vm3, %v4477_v22, %v4777_v32  ;;  %v3429_v7 = vadd.f32 0.2548296, %v3279_v28  ;;  %v3730_v41 = vmul.f32 %v1630_v45, %v1630_v45 }
 0x357   :  { %v4476_v56 = vsub.f32 1.0, %v4326_v15  ;;  %v2681_v43 = vmul.f32 %v9812_v39, %v2531_v57  ;;  %v5227_v33 = vadd.f32 1.0, %v4927_v13  ;;  %v1783_v0 = vmul.f32 0.3275911, %v1633_v62 }
 0x358   :  { %v2828_v52 = vadd.f32 1.4214138, %v2678_v6  ;;  %v3579_v8 = vmul.f32 %v9772_v11, %v3429_v7  ;;  %v5976_v3 = vpop.eup %5975  ;;  %v1184_v63 = vadd.f32 %v836_v55, %v283_v51  ;;  %v9844_v4 = vadd.f32 %v6742_v1, %v1181_v46 }
 0x359   :  { %v4776_v16 = vsub.f32 0.0, %v4476_v56  ;;  %v2831_v29 = vadd.f32 1.4214138, %v2681_v43  ;;  %v5377_v12 = vmul.f32 %v5227_v33, %v5077_v10  ;;  %v1933_v21 = vadd.f32 1.0, %v1783_v0  ;;  %v5978_v42 = vpop.eup %5977 }
 0x35a   :  { %v2978_v9 = vmul.f32 %v9809_v44, %v2828_v52  ;;  %v4329_v53 = vmul.f32 %v5976_v3, %v3579_v8  ;;  %vm4629_vm5 = vcmp.ge.f32.partialorder %v9714_v27, 0.0  ;;  %v5079_v54 = vmul.f32 0.5, %v9697_v60 }
 0x35b   :  { %v4926_v23 = vsel %vm4626_vm4, %v4476_v56, %v4776_v16  ;;  %v2981_v19 = vmul.f32 %v9812_v39, %v2831_v29  ;;  %5528 = vst.msk [vmem:[%s11234_s3 + $0x2e8] sm:$0xff] %vm5434_vm2, %v5377_v12  ;;  %5983 = vrcp.f32 %v1933_v21  ;;  %v9853_v25 = vmul.f32 0.70710677, %v9844_v4  ;;  %v6273_v16 = vld [vmem:[%s11233_s2 + $0x320] sm:$0xff] }
 0x35c   :  { %v5226_v11 = vadd.f32 1.0, %v4926_v23  ;;  %v3128_v10 = vadd.f32 -0.28449672, %v2978_v9  ;;  %v4479_v45 = vsub.f32 1.0, %v4329_v53  ;;  %v3880_v17 = vsub.f32 0.0, %v3730_v41  ;;  %v840_v9 = vpop.permute.xlu1 %839  ;;  %v6274_v23 = vld [vmem:[%s11233_s2 + $0x338] sm:$0xff] }
 0x35d   :  { %v3131_v37 = vadd.f32 -0.28449672, %v2981_v19  ;;  %v9855_v24 = vpop.eup %5979  ;;  %v9860_v58 = vadd.f32 %v6742_v1, %v1184_v63  ;;  %v1632_v60 = vand.u32 2147483647, %v9853_v25  ;;  %v3733_v38 = vmul.f32 %v1633_v62, %v1633_v62 }
 0x35e   :  { %v5376_v59 = vmul.f32 %v5226_v11, %v9807_v47  ;;  %v3278_v26 = vmul.f32 %v9809_v44, %v3128_v10  ;;  %v4779_v22 = vsub.f32 0.0, %v4479_v45  ;;  %v2380_v31 = vmul.f32 1.0614054, %v9855_v24 }
 0x35f   :  { %v3281_v2 = vmul.f32 %v9812_v39, %v3131_v37  ;;  %v5078_v47 = vmul.f32 0.5, %v9735_v49  ;;  %v9871_v50 = vmul.f32 0.70710677, %v9860_v58  ;;  %v1782_v28 = vmul.f32 0.3275911, %v1632_v60  ;;  %v5982_v57 = vpop.eup %5981 }
 0x360   :  { %5527 = vst.msk [vmem:[%s11234_s3 + $0x2e0] sm:$0xff] %vm5434_vm2, %v5376_v59  ;;  %v3428_v18 = vadd.f32 0.2548296, %v3278_v26  ;;  %v4929_v35 = vsel %vm4629_vm5, %v4479_v45, %v4779_v22  ;;  %v2530_v15 = vadd.f32 -1.4531521, %v2380_v31  ;;  %vm4628_vm6 = vcmp.ge.f32.partialorder %v9752_v14, 0.0 }
 0x361   :  { %v3431_v32 = vadd.f32 0.2548296, %v3281_v2  ;;  %v5229_v6 = vadd.f32 1.0, %v4929_v35  ;;  %v4126_v36 = vmul.f32 1.442695, %v3880_v17  ;;  %v1932_v13 = vadd.f32 1.0, %v1782_v28 }
 0x362   :  { %v3578_v46 = vmul.f32 %v9809_v44, %v3428_v18  ;;  %v1635_v51 = vand.u32 2147483647, %v9871_v50  ;;  %v2680_v62 = vmul.f32 %v9855_v24, %v2530_v15  ;;  %v3883_v7 = vsub.f32 0.0, %v3733_v38  ;;  %v834_v44 = vpop.permute.xlu0 %833 }
 0x363   :  { %v3581_v49 = vmul.f32 %v9812_v39, %v3431_v32  ;;  %v5379_v56 = vmul.f32 %v5229_v6, %v5079_v54  ;;  %vm4631_vm7 = vcmp.ge.f32.partialorder %v9756_v30, 0.0  ;;  %5985 = vrcp.f32 %v1932_v13 }
 0x364   :  { %v4328_v27 = vmul.f32 %v5978_v42, %v3578_v46  ;;  %v1785_v43 = vmul.f32 0.3275911, %v1635_v51  ;;  %v2830_v33 = vadd.f32 1.4214138, %v2680_v62  ;;  %5987 = vpow2.f32 %v4126_v36 }
 0x365   :  { %v4331_v55 = vmul.f32 %v5982_v57, %v3581_v49  ;;  %v9881_v52 = vpop.eup %5983  ;;  %5530 = vst.msk [vmem:[%s11234_s3 + $0x2f8] sm:$0xff] %vm5434_vm2, %v5379_v56  ;;  %v282_v8 = vmul.f32 %v6273_v16, %v6710_v20  ;;  %v5081_v41 = vmul.f32 0.5, %v9744_v34  ;;  %v4132_v63 = vmul.f32 1.442695, %v3883_v7  ;;  %v6275_v57 = vld [vmem:[%s11233_s2 + $0x330] sm:$0xff] }
 0x366   :  { %v4478_v39 = vsub.f32 1.0, %v4328_v27  ;;  %v1935_v0 = vadd.f32 1.0, %v1785_v43  ;;  %v2980_v3 = vmul.f32 %v9855_v24, %v2830_v33  ;;  %v2383_v12 = vmul.f32 1.0614054, %v9881_v52  ;;  %v838_v32 = vpop.permute.xlu0 %837 }
 0x367   :  { %v4481_v29 = vsub.f32 1.0, %v4331_v55  ;;  %v1183_v42 = vadd.f32 %v834_v44, %v282_v8  ;;  %v285_v53 = vmul.f32 %v6274_v23, %v6710_v20  ;;  %v3732_v45 = vmul.f32 %v1632_v60, %v1632_v60 }
 0x368   :  { %v4778_v21 = vsub.f32 0.0, %v4478_v39  ;;  %v3130_v11 = vadd.f32 -0.28449672, %v2980_v3  ;;  %v2533_v10 = vadd.f32 -1.4531521, %v2383_v12  ;;  %5989 = vrcp.f32 %v1935_v0 }
 0x369   :  { %v4781_v19 = vsub.f32 0.0, %v4481_v29  ;;  %v9901_v54 = vadd.f32 %v6742_v1, %v1183_v42  ;;  %v1186_v37 = vadd.f32 %v840_v9, %v285_v53  ;;  %5991 = vpow2.f32 %v4132_v63 }
 0x36a   :  { %v4928_v34 = vsel %vm4628_vm6, %v4478_v39, %v4778_v21  ;;  %v3280_v17 = vmul.f32 %v9855_v24, %v3130_v11  ;;  %v2683_v22 = vmul.f32 %v9881_v52, %v2533_v10  ;;  %v3735_v31 = vmul.f32 %v1635_v51, %v1635_v51 }
 0x36b   :  { %v5228_v59 = vadd.f32 1.0, %v4928_v34  ;;  %v4931_v26 = vsel %vm4631_vm7, %v4481_v29, %v4781_v19  ;;  %v9908_v18 = vmul.f32 0.70710677, %v9901_v54  ;;  %v9911_v35 = vadd.f32 %v6742_v1, %v1186_v37 }
 0x36c   :  { %v5231_v2 = vadd.f32 1.0, %v4931_v26  ;;  %v3430_v60 = vadd.f32 0.2548296, %v3280_v17  ;;  %v2833_v38 = vadd.f32 1.4214138, %v2683_v22  ;;  %v3882_v30 = vsub.f32 0.0, %v3732_v45 }
 0x36d   :  { %v5378_v14 = vmul.f32 %v5228_v59, %v5078_v47  ;;  %v1634_v28 = vand.u32 2147483647, %v9908_v18  ;;  %v284_v6 = vmul.f32 %v6275_v57, %v6710_v20  ;;  %v9918_v46 = vpop.eup %5985  ;;  %v9927_v51 = vmul.f32 0.70710677, %v9911_v35 }
 0x36e   :  { %v5381_v15 = vmul.f32 %v5231_v2, %v5081_v41  ;;  %v3580_v47 = vmul.f32 %v9855_v24, %v3430_v60  ;;  %v2983_v36 = vmul.f32 %v9881_v52, %v2833_v38  ;;  %v5988_v49 = vpop.eup %5987  ;;  %v2382_v62 = vmul.f32 1.0614054, %v9918_v46  ;;  %v844_v38 = vpop.permute.xlu1 %843 }
 0x36f   :  { %5529 = vst.msk [vmem:[%s11234_s3 + $0x2f0] sm:$0xff] %vm5434_vm2, %v5378_v14  ;;  %v1784_v13 = vmul.f32 0.3275911, %v1634_v28  ;;  %v1185_v56 = vadd.f32 %v838_v32, %v284_v6  ;;  %v3885_v43 = vsub.f32 0.0, %v3735_v31  ;;  %v1637_v24 = vand.u32 2147483647, %v9927_v51 }
 0x370   :  { %5532 = vst.msk [vmem:[%s11234_s3 + $0x308] sm:$0xff] %vm5434_vm2, %v5381_v15  ;;  %v4330_v27 = vmul.f32 %v5988_v49, %v3580_v47  ;;  %v3133_v7 = vadd.f32 -0.28449672, %v2983_v36  ;;  %v2532_v55 = vadd.f32 -1.4531521, %v2382_v62  ;;  %v5080_v8 = vmul.f32 0.5, %v9779_v61 }
 0x371   :  { %v4130_v33 = vmul.f32 1.442695, %v3882_v30  ;;  %v1934_v44 = vadd.f32 1.0, %v1784_v13  ;;  %v9936_v39 = vadd.f32 %v6742_v1, %v1185_v56  ;;  %v1787_v41 = vmul.f32 0.3275911, %v1637_v24  ;;  %v6276_v30 = vld [vmem:[%s11233_s2 + $0x348] sm:$0xff] }
 0x372   :  { %v9938_v0 = vpop.eup %5989  ;;  %v4480_v16 = vsub.f32 1.0, %v4330_v27  ;;  %v3283_v29 = vmul.f32 %v9881_v52, %v3133_v7  ;;  %vm4630_vm8 = vcmp.ge.f32.partialorder %v9785_v40, 0.0  ;;  %v2682_v3 = vmul.f32 %v9918_v46, %v2532_v55 }
 0x373   :  { %v2385_v12 = vmul.f32 1.0614054, %v9938_v0  ;;  %5993 = vrcp.f32 %v1934_v44  ;;  %v4136_v63 = vmul.f32 1.442695, %v3885_v43  ;;  %v1937_v42 = vadd.f32 1.0, %v1787_v41  ;;  %v5992_v23 = vpop.eup %5991 }
 0x374   :  { %v4780_v9 = vsub.f32 0.0, %v4480_v16  ;;  %v3433_v21 = vadd.f32 0.2548296, %v3283_v29  ;;  %vm4633_vm9 = vcmp.ge.f32.partialorder %v9826_v48, 0.0  ;;  %v2832_v53 = vadd.f32 1.4214138, %v2682_v3 }
 0x375   :  { %5995 = vpow2.f32 %v4130_v33  ;;  %v2535_v61 = vadd.f32 -1.4531521, %v2385_v12  ;;  %v9947_v19 = vmul.f32 0.70710677, %v9936_v39  ;;  %v3734_v10 = vmul.f32 %v1634_v28, %v1634_v28 }
 0x376   :  { %v4930_v11 = vsel %vm4630_vm8, %v4480_v16, %v4780_v9  ;;  %v3583_v40 = vmul.f32 %v9881_v52, %v3433_v21  ;;  %5997 = vrcp.f32 %v1937_v42  ;;  %v2982_v45 = vmul.f32 %v9918_v46, %v2832_v53  ;;  %v842_v52 = vpop.permute.xlu0 %841 }
 0x377   :  { %v5230_v34 = vadd.f32 1.0, %v4930_v11  ;;  %v2685_v37 = vmul.f32 %v9938_v0, %v2535_v61  ;;  %v1636_v59 = vand.u32 2147483647, %v9947_v19  ;;  %v5083_v17 = vmul.f32 0.5, %v9817_v5  ;;  %v6277_v5 = vld [vmem:[%s11233_s2 + $0x340] sm:$0xff] }
 0x378   :  { %v4333_v26 = vmul.f32 %v5992_v23, %v3583_v40  ;;  %5999 = vpow2.f32 %v4136_v63  ;;  %v3737_v22 = vmul.f32 %v1637_v24, %v1637_v24  ;;  %v3132_v31 = vadd.f32 -0.28449672, %v2982_v45 }
 0x379   :  { %v5380_v2 = vmul.f32 %v5230_v34, %v5080_v8  ;;  %v2835_v14 = vadd.f32 1.4214138, %v2685_v37  ;;  %v1786_v60 = vmul.f32 0.3275911, %v1636_v59  ;;  %v3884_v15 = vsub.f32 0.0, %v3734_v10 }
 0x37a   :  { %v4483_v32 = vsub.f32 1.0, %v4333_v26  ;;  %v287_v28 = vmul.f32 %v6276_v30, %v6710_v20  ;;  %v286_v57 = vmul.f32 %v6277_v5, %v6710_v20  ;;  %v3282_v6 = vmul.f32 %v9918_v46, %v3132_v31  ;;  %v6278_v26 = vld [vmem:[%s11233_s2 + $0x358] sm:$0xff]  ;;  %v848_v31 = vpop.permute.xlu1 %847 }
 0x37b   :  { %5531 = vst.msk [vmem:[%s11234_s3 + $0x300] sm:$0xff] %vm5434_vm2, %v5380_v2  ;;  %v9968_v47 = vmul.f32 0.5, %v9844_v4  ;;  %v2985_v36 = vmul.f32 %v9938_v0, %v2835_v14  ;;  %v1936_v49 = vadd.f32 1.0, %v1786_v60  ;;  %v3887_v13 = vsub.f32 0.0, %v3737_v22 }
 0x37c   :  { %v4783_v62 = vsub.f32 0.0, %v4483_v32  ;;  %v1188_v56 = vadd.f32 %v844_v38, %v287_v28  ;;  %v1187_v27 = vadd.f32 %v842_v52, %v286_v57  ;;  %v3432_v43 = vadd.f32 0.2548296, %v3282_v6 }
 0x37d   :  { %v9971_v7 = vpop.eup %5993  ;;  %v3135_v24 = vadd.f32 -0.28449672, %v2985_v36  ;;  %v9974_v55 = vmul.f32 0.5, %v9860_v58  ;;  %6001 = vrcp.f32 %v1936_v49  ;;  %vm4632_vm10 = vcmp.ge.f32.partialorder %v9853_v25, 0.0 }
 0x37e   :  { %v4933_v33 = vsel %vm4633_vm9, %v4483_v32, %v4783_v62  ;;  %v2384_v4 = vmul.f32 1.0614054, %v9971_v7  ;;  %v4134_v44 = vmul.f32 1.442695, %v3884_v15  ;;  %v9981_v16 = vadd.f32 %v6742_v1, %v1188_v56 }
 0x37f   :  { %v5996_v8 = vpop.eup %5995  ;;  %v5233_v29 = vadd.f32 1.0, %v4933_v33  ;;  %v3582_v41 = vmul.f32 %v9918_v46, %v3432_v43  ;;  %v3285_v3 = vmul.f32 %v9938_v0, %v3135_v24  ;;  %v9986_v58 = vadd.f32 %v6742_v1, %v1187_v27 }
 0x380   :  { %v9988_v12 = vpop.eup %5997  ;;  %v2534_v48 = vadd.f32 -1.4531521, %v2384_v4  ;;  %v4140_v9 = vmul.f32 1.442695, %v3887_v13  ;;  %v9991_v21 = vmul.f32 0.70710677, %v9981_v16  ;;  %v3736_v11 = vmul.f32 %v1636_v59, %v1636_v59 }
 0x381   :  { %v5383_v63 = vmul.f32 %v5233_v29, %v5083_v17  ;;  %v4332_v42 = vmul.f32 %v5996_v8, %v3582_v41  ;;  %v3435_v23 = vadd.f32 0.2548296, %v3285_v3  ;;  %v2387_v53 = vmul.f32 1.0614054, %v9988_v12 }
 0x382   :  { %v6000_v61 = vpop.eup %5999  ;;  %vm4635_vm11 = vcmp.ge.f32.partialorder %v9871_v50, 0.0  ;;  %v2684_v46 = vmul.f32 %v9971_v7, %v2534_v48  ;;  %v1639_v40 = vand.u32 2147483647, %v9991_v21  ;;  %v9998_v10 = vmul.f32 0.70710677, %v9986_v58 }
 0x383   :  { %5534 = vst.msk [vmem:[%s11234_s3 + $0x318] sm:$0xff] %vm5434_vm2, %v5383_v63  ;;  %v4482_v34 = vsub.f32 1.0, %v4332_v42  ;;  %v3585_v45 = vmul.f32 %v9938_v0, %v3435_v23  ;;  %v2537_v37 = vadd.f32 -1.4531521, %v2387_v53  ;;  %v289_v59 = vmul.f32 %v6278_v26, %v6710_v20  ;;  %v846_v63 = vpop.permute.xlu0 %845 }
 0x384   :  { %v2834_v17 = vadd.f32 1.4214138, %v2684_v46  ;;  %6003 = vpow2.f32 %v4134_v44  ;;  %v1789_v22 = vmul.f32 0.3275911, %v1639_v40  ;;  %v1638_v2 = vand.u32 2147483647, %v9998_v10 }
 0x385   :  { %v4782_v14 = vsub.f32 0.0, %v4482_v34  ;;  %v4335_v60 = vmul.f32 %v6000_v61, %v3585_v45  ;;  %v2687_v38 = vmul.f32 %v9988_v12, %v2537_v37  ;;  %6005 = vpow2.f32 %v4140_v9  ;;  %v6279_v46 = vld [vmem:[%s11233_s2 + $0x350] sm:$0xff] }
 0x386   :  { %v2984_v0 = vmul.f32 %v9971_v7, %v2834_v17  ;;  %v3886_v52 = vsub.f32 0.0, %v3736_v11  ;;  %v1939_v32 = vadd.f32 1.0, %v1789_v22  ;;  %v1788_v15 = vmul.f32 0.3275911, %v1638_v2 }
 0x387   :  { %v10012_v30 = vpop.eup %6001  ;;  %v4932_v28 = vsel %vm4632_vm10, %v4482_v34, %v4782_v14  ;;  %v4485_v5 = vsub.f32 1.0, %v4335_v60  ;;  %v2837_v57 = vadd.f32 1.4214138, %v2687_v38  ;;  %v1190_v6 = vadd.f32 %v848_v31, %v289_v59 }
 0x388   :  { %v5232_v36 = vadd.f32 1.0, %v4932_v28  ;;  %v3134_v49 = vadd.f32 -0.28449672, %v2984_v0  ;;  %v2386_v62 = vmul.f32 1.0614054, %v10012_v30  ;;  %6007 = vrcp.f32 %v1939_v32  ;;  %v852_v28 = vpop.permute.xlu1 %851 }
 0x389   :  { %v4785_v13 = vsub.f32 0.0, %v4485_v5  ;;  %v2987_v56 = vmul.f32 %v9988_v12, %v2837_v57  ;;  %v3739_v27 = vmul.f32 %v1639_v40, %v1639_v40  ;;  %v1938_v43 = vadd.f32 1.0, %v1788_v15 }
 0x38a   :  { %v5382_v24 = vmul.f32 %v5232_v36, %v9968_v47  ;;  %v3284_v33 = vmul.f32 %v9971_v7, %v3134_v49  ;;  %v10021_v25 = vmul.f32 0.5, %v9901_v54  ;;  %v2536_v4 = vadd.f32 -1.4531521, %v2386_v62 }
 0x38b   :  { %v4935_v44 = vsel %vm4635_vm11, %v4485_v5, %v4785_v13  ;;  %v3137_v8 = vadd.f32 -0.28449672, %v2987_v56  ;;  %v4138_v29 = vmul.f32 1.442695, %v3886_v52  ;;  %v10026_v41 = vadd.f32 %v6742_v1, %v1190_v6  ;;  %v6281_v13 = vld [vmem:[%s11233_s2 + $0x360] sm:$0xff] }
 0x38c   :  { %5533 = vst.msk [vmem:[%s11234_s3 + $0x310] sm:$0xff] %vm5434_vm2, %v5382_v24  ;;  %v5235_v47 = vadd.f32 1.0, %v4935_v44  ;;  %v3434_v3 = vadd.f32 0.2548296, %v3284_v33  ;;  %v2686_v48 = vmul.f32 %v10012_v30, %v2536_v4  ;;  %6009 = vrcp.f32 %v1938_v43 }
 0x38d   :  { %vm4634_vm12 = vcmp.ge.f32.partialorder %v9908_v18, 0.0  ;;  %v3287_v50 = vmul.f32 %v9988_v12, %v3137_v8  ;;  %v3889_v54 = vsub.f32 0.0, %v3739_v27  ;;  %v10036_v9 = vmul.f32 0.70710677, %v10026_v41 }
 0x38e   :  { %v6004_v42 = vpop.eup %6003  ;;  %v5385_v23 = vmul.f32 %v5235_v47, %v9974_v55  ;;  %v3584_v53 = vmul.f32 %v9971_v7, %v3434_v3  ;;  %v2836_v61 = vadd.f32 1.4214138, %v2686_v48  ;;  %v288_v11 = vmul.f32 %v6279_v46, %v6710_v20 }
 0x38f   :  { %v6006_v40 = vpop.eup %6005  ;;  %v3437_v34 = vadd.f32 0.2548296, %v3287_v50  ;;  %6011 = vpow2.f32 %v4138_v29  ;;  %v3738_v45 = vmul.f32 %v1638_v2, %v1638_v2  ;;  %v1641_v37 = vand.u32 2147483647, %v10036_v9 }
 0x390   :  { %5536 = vst.msk [vmem:[%s11234_s3 + $0x328] sm:$0xff] %vm5434_vm2, %v5385_v23  ;;  %v4334_v55 = vmul.f32 %v6004_v42, %v3584_v53  ;;  %v5087_v7 = vmul.f32 0.5, %v9911_v35  ;;  %v2986_v26 = vmul.f32 %v10012_v30, %v2836_v61  ;;  %v1189_v59 = vadd.f32 %v846_v63, %v288_v11  ;;  %v6280_v35 = vld [vmem:[%s11233_s2 + $0x368] sm:$0xff] }
 0x391   :  { %v3587_v17 = vmul.f32 %v9988_v12, %v3437_v34  ;;  %vm4637_vm13 = vcmp.ge.f32.partialorder %v9927_v51, 0.0  ;;  %v4144_v22 = vmul.f32 1.442695, %v3889_v54  ;;  %v1791_v31 = vmul.f32 0.3275911, %v1641_v37  ;;  %v850_v54 = vpop.permute.xlu0 %849 }
 0x392   :  { %v10053_v2 = vpop.eup %6007  ;;  %v4484_v14 = vsub.f32 1.0, %v4334_v55  ;;  %v3136_v60 = vadd.f32 -0.28449672, %v2986_v26  ;;  %v10056_v38 = vadd.f32 %v6742_v1, %v1189_v59  ;;  %v291_v0 = vmul.f32 %v6280_v35, %v6710_v20 }
 0x393   :  { %v4337_v52 = vmul.f32 %v6006_v40, %v3587_v17  ;;  %v2389_v12 = vmul.f32 1.0614054, %v10053_v2  ;;  %v3888_v32 = vsub.f32 0.0, %v3738_v45  ;;  %v1941_v15 = vadd.f32 1.0, %v1791_v31 }
 0x394   :  { %v4784_v5 = vsub.f32 0.0, %v4484_v14  ;;  %v3286_v57 = vmul.f32 %v10012_v30, %v3136_v60  ;;  %v3741_v6 = vmul.f32 %v1641_v37, %v1641_v37  ;;  %v10065_v36 = vmul.f32 0.70710677, %v10056_v38 }
 0x395   :  { %v4487_v49 = vsub.f32 1.0, %v4337_v52  ;;  %v2539_v62 = vadd.f32 -1.4531521, %v2389_v12  ;;  %6013 = vrcp.f32 %v1941_v15  ;;  %v290_v56 = vmul.f32 %v6281_v13, %v6710_v20 }
 0x396   :  { %v10071_v27 = vpop.eup %6009  ;;  %v4934_v43 = vsel %vm4634_vm12, %v4484_v14, %v4784_v5  ;;  %v3436_v24 = vadd.f32 0.2548296, %v3286_v57  ;;  %v1640_v33 = vand.u32 2147483647, %v10065_v36  ;;  %v1192_v4 = vadd.f32 %v852_v28, %v291_v0 }
 0x397   :  { %v5234_v44 = vadd.f32 1.0, %v4934_v43  ;;  %v4787_v8 = vsub.f32 0.0, %v4487_v49  ;;  %v2689_v29 = vmul.f32 %v10053_v2, %v2539_v62  ;;  %v2388_v47 = vmul.f32 1.0614054, %v10071_v27  ;;  %v856_v62 = vpop.permute.xlu1 %855 }
 0x398   :  { %v3586_v3 = vmul.f32 %v10012_v30, %v3436_v24  ;;  %6015 = vpow2.f32 %v4144_v22  ;;  %v4142_v48 = vmul.f32 1.442695, %v3888_v32  ;;  %v1790_v50 = vmul.f32 0.3275911, %v1640_v33 }
 0x399   :  { %v6012_v63 = vpop.eup %6011  ;;  %v5384_v18 = vmul.f32 %v5234_v44, %v10021_v25  ;;  %v4937_v42 = vsel %vm4637_vm13, %v4487_v49, %v4787_v8  ;;  %v2839_v23 = vadd.f32 1.4214138, %v2689_v29  ;;  %v2538_v53 = vadd.f32 -1.4531521, %v2388_v47 }
 0x39a   :  { %v5237_v61 = vadd.f32 1.0, %v4937_v42  ;;  %v4336_v46 = vmul.f32 %v6012_v63, %v3586_v3  ;;  %v3891_v11 = vsub.f32 0.0, %v3741_v6  ;;  %v1940_v40 = vadd.f32 1.0, %v1790_v50 }
 0x39b   :  { %5535 = vst.msk [vmem:[%s11234_s3 + $0x320] sm:$0xff] %vm5434_vm2, %v5384_v18  ;;  %v2989_v30 = vmul.f32 %v10053_v2, %v2839_v23  ;;  %v2688_v34 = vmul.f32 %v10071_v27, %v2538_v53  ;;  %v10089_v25 = vadd.f32 %v6742_v1, %v1192_v4  ;;  %v1191_v51 = vadd.f32 %v850_v54, %v290_v56 }
 0x39c   :  { %v5387_v45 = vmul.f32 %v5237_v61, %v5087_v7  ;;  %v4486_v37 = vsub.f32 1.0, %v4336_v46  ;;  %vm4636_vm14 = vcmp.ge.f32.partialorder %v9947_v19, 0.0  ;;  %6017 = vrcp.f32 %v1940_v40  ;;  %v854_v40 = vpop.permute.xlu0 %853 }
 0x39d   :  { %v3139_v55 = vadd.f32 -0.28449672, %v2989_v30  ;;  %v2838_v26 = vadd.f32 1.4214138, %v2688_v34  ;;  %v10093_v59 = vmul.f32 0.70710677, %v10089_v25  ;;  %v10096_v17 = vadd.f32 %v6742_v1, %v1191_v51 }
 0x39e   :  { %5538 = vst.msk [vmem:[%s11234_s3 + $0x338] sm:$0xff] %vm5434_vm2, %v5387_v45  ;;  %v4786_v22 = vsub.f32 0.0, %v4486_v37  ;;  %v5086_v7 = vmul.f32 0.5, %v9936_v39  ;;  %6019 = vpow2.f32 %v4142_v48  ;;  %v4148_v31 = vmul.f32 1.442695, %v3891_v11  ;;  %v6282_v39 = vld [vmem:[%s11233_s2 + $0x378] sm:$0xff] }
 0x39f   :  { %v10103_v14 = vpop.eup %6013  ;;  %v3289_v60 = vmul.f32 %v10053_v2, %v3139_v55  ;;  %v2988_v35 = vmul.f32 %v10071_v27, %v2838_v26  ;;  %v3740_v0 = vmul.f32 %v1640_v33, %v1640_v33  ;;  %v1643_v52 = vand.u32 2147483647, %v10093_v59  ;;  %v6283_v45 = vld [vmem:[%s11233_s2 + $0x370] sm:$0xff] }
 0x3a0   :  { %v4936_v12 = vsel %vm4636_vm14, %v4486_v37, %v4786_v22  ;;  %v2391_v32 = vmul.f32 1.0614054, %v10103_v14  ;;  %v10112_v15 = vmul.f32 0.70710677, %v10096_v17  ;;  %v293_v28 = vmul.f32 %v6282_v39, %v6710_v20 }
 0x3a1   :  { %v5236_v5 = vadd.f32 1.0, %v4936_v12  ;;  %v3439_v57 = vadd.f32 0.2548296, %v3289_v60  ;;  %v5089_v6 = vmul.f32 0.5, %v9981_v16  ;;  %v3138_v49 = vadd.f32 -0.28449672, %v2988_v35 }
 0x3a2   :  { %v6016_v13 = vpop.eup %6015  ;;  %v2541_v19 = vadd.f32 -1.4531521, %v2391_v32  ;;  %v1793_v56 = vmul.f32 0.3275911, %v1643_v52  ;;  %v1642_v43 = vand.u32 2147483647, %v10112_v15  ;;  %v1194_v3 = vadd.f32 %v856_v62, %v293_v28 }
 0x3a3   :  { %v5386_v24 = vmul.f32 %v5236_v5, %v5086_v7  ;;  %v3589_v33 = vmul.f32 %v10053_v2, %v3439_v57  ;;  %v3288_v4 = vmul.f32 %v10071_v27, %v3138_v49  ;;  %v3890_v44 = vsub.f32 0.0, %v3740_v0  ;;  %v6284_v49 = vld [vmem:[%s11233_s2 + $0x388] sm:$0xff] }
 0x3a4   :  { %v2691_v8 = vmul.f32 %v10103_v14, %v2541_v19  ;;  %v1943_v29 = vadd.f32 1.0, %v1793_v56  ;;  %v1792_v47 = vmul.f32 0.3275911, %v1642_v43  ;;  %vm4639_vm15 = vcmp.ge.f32.partialorder %v9991_v21, 0.0 }
 0x3a5   :  { %5537 = vst.msk [vmem:[%s11234_s3 + $0x330] sm:$0xff] %vm5434_vm2, %v5386_v24  ;;  %v4339_v16 = vmul.f32 %v6016_v13, %v3589_v33  ;;  %v3438_v48 = vadd.f32 0.2548296, %v3288_v4  ;;  %v5088_v50 = vmul.f32 0.5, %v9986_v58  ;;  %vm4638_vm0 = vcmp.ge.f32.partialorder %v9998_v10, 0.0 }
 0x3a6   :  { %v10129_v2 = vpop.eup %6017  ;;  %v2841_v54 = vadd.f32 1.4214138, %v2691_v8  ;;  %6021 = vrcp.f32 %v1943_v29  ;;  %v3743_v63 = vmul.f32 %v1643_v52, %v1643_v52  ;;  %v1942_v18 = vadd.f32 1.0, %v1792_v47 }
 0x3a7   :  { %v4489_v42 = vsub.f32 1.0, %v4339_v16  ;;  %v3588_v23 = vmul.f32 %v10071_v27, %v3438_v48  ;;  %6023 = vpow2.f32 %v4148_v31  ;;  %v2390_v53 = vmul.f32 1.0614054, %v10129_v2 }
 0x3a8   :  { %v6020_v61 = vpop.eup %6019  ;;  %v2991_v46 = vmul.f32 %v10103_v14, %v2841_v54  ;;  %v4146_v11 = vmul.f32 1.442695, %v3890_v44  ;;  %6025 = vrcp.f32 %v1942_v18  ;;  %v10136_v58 = vadd.f32 %v6742_v1, %v1194_v3 }
 0x3a9   :  { %v4789_v30 = vsub.f32 0.0, %v4489_v42  ;;  %v4338_v34 = vmul.f32 %v6020_v61, %v3588_v23  ;;  %v2540_v51 = vadd.f32 -1.4531521, %v2390_v53  ;;  %v292_v27 = vmul.f32 %v6283_v45, %v6710_v20 }
 0x3aa   :  { %v3141_v37 = vadd.f32 -0.28449672, %v2991_v46  ;;  %v10143_v55 = vmul.f32 0.5, %v10026_v41  ;;  %v3893_v26 = vsub.f32 0.0, %v3743_v63  ;;  %v10146_v22 = vmul.f32 0.70710677, %v10136_v58 }
 0x3ab   :  { %v4939_v7 = vsel %vm4639_vm15, %v4489_v42, %v4789_v30  ;;  %v4488_v31 = vsub.f32 1.0, %v4338_v34  ;;  %v2690_v60 = vmul.f32 %v10129_v2, %v2540_v51  ;;  %v1193_v35 = vadd.f32 %v854_v40, %v292_v27  ;;  %v6285_v27 = vld [vmem:[%s11233_s2 + $0x380] sm:$0xff] }
 0x3ac   :  { %v5239_v0 = vadd.f32 1.0, %v4939_v7  ;;  %v3291_v52 = vmul.f32 %v10103_v14, %v3141_v37  ;;  %v3742_v12 = vmul.f32 %v1642_v43, %v1642_v43  ;;  %v1645_v32 = vand.u32 2147483647, %v10146_v22 }
 0x3ad   :  { %v4788_v39 = vsub.f32 0.0, %v4488_v31  ;;  %v2840_v41 = vadd.f32 1.4214138, %v2690_v60  ;;  %6027 = vpow2.f32 %v4146_v11  ;;  %v10154_v28 = vadd.f32 %v6742_v1, %v1193_v35  ;;  %v858_v60 = vpop.permute.xlu0 %857 }
 0x3ae   :  { %v5389_v5 = vmul.f32 %v5239_v0, %v5089_v6  ;;  %v3441_v57 = vadd.f32 0.2548296, %v3291_v52  ;;  %v1795_v21 = vmul.f32 0.3275911, %v1645_v32  ;;  %v295_v62 = vmul.f32 %v6284_v49, %v6710_v20  ;;  %v860_v6 = vpop.permute.xlu1 %859 }
 0x3af   :  { %v4938_v13 = vsel %vm4638_vm0, %v4488_v31, %v4788_v39  ;;  %vm4641_vm1 = vcmp.ge.f32.partialorder %v10036_v9, 0.0  ;;  %v2990_v19 = vmul.f32 %v10129_v2, %v2840_v41  ;;  %v4152_v56 = vmul.f32 1.442695, %v3893_v26 }
 0x3b0   :  { %v10165_v43 = vmul.f32 0.70710677, %v10154_v28  ;;  %v10167_v24 = vpop.eup %6021  ;;  %5540 = vst.msk [vmem:[%s11234_s3 + $0x348] sm:$0xff] %vm5434_vm2, %v5389_v5  ;;  %v5238_v33 = vadd.f32 1.0, %v4938_v13  ;;  %v3591_v10 = vmul.f32 %v10103_v14, %v3441_v57  ;;  %v3892_v4 = vsub.f32 0.0, %v3742_v12 }
 0x3b1   :  { %v1945_v44 = vadd.f32 1.0, %v1795_v21  ;;  %v6024_v8 = vpop.eup %6023  ;;  %v3140_v29 = vadd.f32 -0.28449672, %v2990_v19  ;;  %v2393_v47 = vmul.f32 1.0614054, %v10167_v24  ;;  %v1196_v63 = vadd.f32 %v860_v6, %v295_v62 }
 0x3b2   :  { %v1644_v3 = vand.u32 2147483647, %v10165_v43  ;;  %v10176_v16 = vpop.eup %6025  ;;  %v5388_v48 = vmul.f32 %v5238_v33, %v5088_v50  ;;  %v4341_v54 = vmul.f32 %v6024_v8, %v3591_v10  ;;  %v10185_v61 = vmul.f32 0.5, %v10056_v38 }
 0x3b3   :  { %6029 = vrcp.f32 %v1945_v44  ;;  %v3290_v18 = vmul.f32 %v10129_v2, %v3140_v29  ;;  %v2543_v42 = vadd.f32 -1.4531521, %v2393_v47  ;;  %v2392_v23 = vmul.f32 1.0614054, %v10176_v16 }
 0x3b4   :  { %v1794_v14 = vmul.f32 0.3275911, %v1644_v3  ;;  %5539 = vst.msk [vmem:[%s11234_s3 + $0x340] sm:$0xff] %vm5434_vm2, %v5388_v48  ;;  %v4491_v53 = vsub.f32 1.0, %v4341_v54  ;;  %6031 = vpow2.f32 %v4152_v56  ;;  %v4150_v50 = vmul.f32 1.442695, %v3892_v4 }
 0x3b5   :  { %v3440_v46 = vadd.f32 0.2548296, %v3290_v18  ;;  %v2693_v11 = vmul.f32 %v10167_v24, %v2543_v42  ;;  %v2542_v40 = vadd.f32 -1.4531521, %v2392_v23  ;;  %v3745_v51 = vmul.f32 %v1645_v32, %v1645_v32  ;;  %v6286_v23 = vld [vmem:[%s11233_s2 + $0x398] sm:$0xff] }
 0x3b6   :  { %v1944_v30 = vadd.f32 1.0, %v1794_v14  ;;  %v4791_v34 = vsub.f32 0.0, %v4491_v53  ;;  %v10189_v45 = vadd.f32 %v6742_v1, %v1196_v63  ;;  %v294_v37 = vmul.f32 %v6285_v27, %v6710_v20 }
 0x3b7   :  { %v6028_v38 = vpop.eup %6027  ;;  %v3590_v26 = vmul.f32 %v10129_v2, %v3440_v46  ;;  %v2843_v7 = vadd.f32 1.4214138, %v2693_v11  ;;  %v2692_v31 = vmul.f32 %v10176_v16, %v2542_v40  ;;  %vm4640_vm3 = vcmp.ge.f32.partialorder %v10065_v36, 0.0  ;;  %v864_v40 = vpop.permute.xlu1 %863 }
 0x3b8   :  { %6033 = vrcp.f32 %v1944_v30  ;;  %v4941_v35 = vsel %vm4641_vm1, %v4491_v53, %v4791_v34  ;;  %v10201_v0 = vmul.f32 0.70710677, %v10189_v45  ;;  %v3895_v2 = vsub.f32 0.0, %v3745_v51 }
 0x3b9   :  { %6035 = vpow2.f32 %v4150_v50  ;;  %v5241_v52 = vadd.f32 1.0, %v4941_v35  ;;  %v4340_v12 = vmul.f32 %v6028_v38, %v3590_v26  ;;  %v2993_v32 = vmul.f32 %v10167_v24, %v2843_v7 }
 0x3ba   :  { %v2842_v39 = vadd.f32 1.4214138, %v2692_v31  ;;  %v3744_v41 = vmul.f32 %v1644_v3, %v1644_v3  ;;  %v1647_v5 = vand.u32 2147483647, %v10201_v0  ;;  %v1195_v57 = vadd.f32 %v858_v60, %v294_v37  ;;  %v862_v31 = vpop.permute.xlu0 %861 }
 0x3bb   :  { %v5391_v21 = vmul.f32 %v5241_v52, %v10143_v55  ;;  %v4490_v9 = vsub.f32 1.0, %v4340_v12  ;;  %v3143_v49 = vadd.f32 -0.28449672, %v2993_v32  ;;  %v10210_v19 = vmul.f32 0.5, %v10089_v25 }
 0x3bc   :  { %v2992_v62 = vmul.f32 %v10176_v16, %v2842_v39  ;;  %v10213_v56 = vmul.f32 0.5, %v10096_v17  ;;  %v1797_v6 = vmul.f32 0.3275911, %v1647_v5  ;;  %v10216_v33 = vadd.f32 %v6742_v1, %v1195_v57 }
 0x3bd   :  { %v10207_v13 = vpop.eup %6029  ;;  %5542 = vst.msk [vmem:[%s11234_s3 + $0x358] sm:$0xff] %vm5434_vm2, %v5391_v21  ;;  %v4790_v55 = vsub.f32 0.0, %v4490_v9  ;;  %v3293_v10 = vmul.f32 %v10167_v24, %v3143_v49  ;;  %v4156_v8 = vmul.f32 1.442695, %v3895_v2  ;;  %v3894_v29 = vsub.f32 0.0, %v3744_v41 }
 0x3be   :  { %v3142_v4 = vadd.f32 -0.28449672, %v2992_v62  ;;  %v2395_v44 = vmul.f32 1.0614054, %v10207_v13  ;;  %v6032_v25 = vpop.eup %6031  ;;  %v1947_v17 = vadd.f32 1.0, %v1797_v6  ;;  %vm4643_vm4 = vcmp.ge.f32.partialorder %v10093_v59, 0.0 }
 0x3bf   :  { %v10225_v47 = vmul.f32 0.70710677, %v10216_v33  ;;  %v4940_v3 = vsel %vm4640_vm3, %v4490_v9, %v4790_v55  ;;  %v3443_v48 = vadd.f32 0.2548296, %v3293_v10  ;;  %v297_v14 = vmul.f32 %v6286_v23, %v6710_v20 }
 0x3c0   :  { %v3292_v54 = vmul.f32 %v10176_v16, %v3142_v4  ;;  %v2545_v63 = vadd.f32 -1.4531521, %v2395_v44  ;;  %v5240_v18 = vadd.f32 1.0, %v4940_v3  ;;  %6037 = vrcp.f32 %v1947_v17 }
 0x3c1   :  { %v1646_v42 = vand.u32 2147483647, %v10225_v47  ;;  %v3593_v36 = vmul.f32 %v10167_v24, %v3443_v48  ;;  %v3747_v11 = vmul.f32 %v1647_v5, %v1647_v5  ;;  %6039 = vpow2.f32 %v4156_v8 }
 0x3c2   :  { %v10236_v53 = vpop.eup %6033  ;;  %v3442_v50 = vadd.f32 0.2548296, %v3292_v54  ;;  %v2695_v46 = vmul.f32 %v10207_v13, %v2545_v63  ;;  %v5390_v34 = vmul.f32 %v5240_v18, %v10185_v61  ;;  %v4154_v7 = vmul.f32 1.442695, %v3894_v29  ;;  %v6287_v61 = vld [vmem:[%s11233_s2 + $0x390] sm:$0xff] }
 0x3c3   :  { %v6036_v30 = vpop.eup %6035  ;;  %v2394_v51 = vmul.f32 1.0614054, %v10236_v53  ;;  %v1796_v27 = vmul.f32 0.3275911, %v1646_v42  ;;  %v4343_v37 = vmul.f32 %v6032_v25, %v3593_v36  ;;  %v1198_v35 = vadd.f32 %v864_v40, %v297_v14 }
 0x3c4   :  { %v3592_v38 = vmul.f32 %v10176_v16, %v3442_v50  ;;  %v2845_v26 = vadd.f32 1.4214138, %v2695_v46  ;;  %5541 = vst.msk [vmem:[%s11234_s3 + $0x350] sm:$0xff] %vm5434_vm2, %v5390_v34  ;;  %v296_v52 = vmul.f32 %v6287_v61, %v6710_v20  ;;  %v3897_v39 = vsub.f32 0.0, %v3747_v11 }
 0x3c5   :  { %v2544_v24 = vadd.f32 -1.4531521, %v2394_v51  ;;  %v1946_v60 = vadd.f32 1.0, %v1796_v27  ;;  %v4493_v12 = vsub.f32 1.0, %v4343_v37  ;;  %v10254_v41 = vadd.f32 %v6742_v1, %v1198_v35 }
 0x3c6   :  { %v4342_v32 = vmul.f32 %v6036_v30, %v3592_v38  ;;  %v2995_v16 = vmul.f32 %v10207_v13, %v2845_v26  ;;  %v1197_v5 = vadd.f32 %v862_v31, %v296_v52  ;;  %vm4642_vm5 = vcmp.ge.f32.partialorder %v10112_v15, 0.0 }
 0x3c7   :  { %v2694_v2 = vmul.f32 %v10236_v53, %v2544_v24  ;;  %6041 = vrcp.f32 %v1946_v60  ;;  %v4793_v57 = vsub.f32 0.0, %v4493_v12  ;;  %v10258_v62 = vmul.f32 0.70710677, %v10254_v41  ;;  %v868_v24 = vpop.permute.xlu1 %867 }
 0x3c8   :  { %v4492_v21 = vsub.f32 1.0, %v4342_v32  ;;  %v3145_v9 = vadd.f32 -0.28449672, %v2995_v16  ;;  %6043 = vpow2.f32 %v4154_v7  ;;  %v10261_v6 = vadd.f32 %v6742_v1, %v1197_v5 }
 0x3c9   :  { %v2844_v49 = vadd.f32 1.4214138, %v2694_v2  ;;  %v4943_v55 = vsel %vm4643_vm4, %v4493_v12, %v4793_v57  ;;  %v4160_v44 = vmul.f32 1.442695, %v3897_v39  ;;  %v3746_v29 = vmul.f32 %v1646_v42, %v1646_v42  ;;  %v6288_v12 = vld [vmem:[%s11233_s2 + $0x3a8] sm:$0xff] }
 0x3ca   :  { %v4792_v10 = vsub.f32 0.0, %v4492_v21  ;;  %v3295_v4 = vmul.f32 %v10207_v13, %v3145_v9  ;;  %v10266_v25 = vpop.eup %6037  ;;  %v5243_v8 = vadd.f32 1.0, %v4943_v55  ;;  %v1649_v17 = vand.u32 2147483647, %v10258_v62  ;;  %v6289_v55 = vld [vmem:[%s11233_s2 + $0x3a0] sm:$0xff] }
 0x3cb   :  { %v2994_v15 = vmul.f32 %v10236_v53, %v2844_v49  ;;  %v2397_v54 = vmul.f32 1.0614054, %v10266_v25  ;;  %v10272_v63 = vmul.f32 0.70710677, %v10261_v6  ;;  %v6040_v59 = vpop.eup %6039  ;;  %v3896_v30 = vsub.f32 0.0, %v3746_v29 }
 0x3cc   :  { %v4942_v3 = vsel %vm4642_vm5, %v4492_v21, %v4792_v10  ;;  %v3445_v48 = vadd.f32 0.2548296, %v3295_v4  ;;  %v5393_v18 = vmul.f32 %v5243_v8, %v10210_v19  ;;  %v1799_v36 = vmul.f32 0.3275911, %v1649_v17 }
 0x3cd   :  { %v5242_v23 = vadd.f32 1.0, %v4942_v3  ;;  %v3144_v14 = vadd.f32 -0.28449672, %v2994_v15  ;;  %v2547_v46 = vadd.f32 -1.4531521, %v2397_v54  ;;  %6045 = vpow2.f32 %v4160_v44 }
 0x3ce   :  { %v3595_v50 = vmul.f32 %v10207_v13, %v3445_v48  ;;  %v1648_v42 = vand.u32 2147483647, %v10272_v63  ;;  %5544 = vst.msk [vmem:[%s11234_s3 + $0x368] sm:$0xff] %vm5434_vm2, %v5393_v18  ;;  %v1949_v34 = vadd.f32 1.0, %v1799_v36  ;;  %v5095_v37 = vmul.f32 0.5, %v10136_v58 }
 0x3cf   :  { %v5392_v11 = vmul.f32 %v5242_v23, %v10213_v56  ;;  %v3294_v40 = vmul.f32 %v10236_v53, %v3144_v14  ;;  %v2697_v51 = vmul.f32 %v10266_v25, %v2547_v46  ;;  %v4158_v61 = vmul.f32 1.442695, %v3896_v30 }
 0x3d0   :  { %v4345_v19 = vmul.f32 %v6040_v59, %v3595_v50  ;;  %v1798_v27 = vmul.f32 0.3275911, %v1648_v42  ;;  %6047 = vrcp.f32 %v1949_v34  ;;  %v3749_v52 = vmul.f32 %v1649_v17, %v1649_v17 }
 0x3d1   :  { %v10284_v13 = vpop.eup %6041  ;;  %5543 = vst.msk [vmem:[%s11234_s3 + $0x360] sm:$0xff] %vm5434_vm2, %v5392_v11  ;;  %v3444_v38 = vadd.f32 0.2548296, %v3294_v40  ;;  %v2847_v26 = vadd.f32 1.4214138, %v2697_v51  ;;  %v299_v32 = vmul.f32 %v6288_v12, %v6710_v20  ;;  %vm4645_vm6 = vcmp.ge.f32.partialorder %v10146_v22, 0.0  ;;  %v872_v51 = vpop.permute.xlu1 %871 }
 0x3d2   :  { %v4495_v56 = vsub.f32 1.0, %v4345_v19  ;;  %v2396_v7 = vmul.f32 1.0614054, %v10284_v13  ;;  %v1948_v31 = vadd.f32 1.0, %v1798_v27  ;;  %v6044_v60 = vpop.eup %6043  ;;  %v5094_v5 = vmul.f32 0.5, %v10154_v28 }
 0x3d3   :  { %v3594_v35 = vmul.f32 %v10236_v53, %v3444_v38  ;;  %v2997_v16 = vmul.f32 %v10266_v25, %v2847_v26  ;;  %v1200_v57 = vadd.f32 %v868_v24, %v299_v32  ;;  %v866_v53 = vpop.permute.xlu0 %865  ;;  %v298_v10 = vmul.f32 %v6289_v55, %v6710_v20 }
 0x3d4   :  { %v4795_v58 = vsub.f32 0.0, %v4495_v56  ;;  %v2546_v39 = vadd.f32 -1.4531521, %v2396_v7  ;;  %6049 = vrcp.f32 %v1948_v31  ;;  %v3899_v8 = vsub.f32 0.0, %v3749_v52 }
 0x3d5   :  { %v4344_v2 = vmul.f32 %v6044_v60, %v3594_v35  ;;  %v3147_v9 = vadd.f32 -0.28449672, %v2997_v16  ;;  %v10306_v22 = vadd.f32 %v6742_v1, %v1200_v57  ;;  %6051 = vpow2.f32 %v4158_v61 }
 0x3d6   :  { %v4945_v21 = vsel %vm4645_vm6, %v4495_v56, %v4795_v58  ;;  %v2696_v49 = vmul.f32 %v10284_v13, %v2546_v39  ;;  %v1199_v29 = vadd.f32 %v866_v53, %v298_v10  ;;  %v3748_v48 = vmul.f32 %v1648_v42, %v1648_v42 }
 0x3d7   :  { %v5245_v4 = vadd.f32 1.0, %v4945_v21  ;;  %v4494_v44 = vsub.f32 1.0, %v4344_v2  ;;  %v3297_v28 = vmul.f32 %v10266_v25, %v3147_v9  ;;  %v10310_v54 = vmul.f32 0.70710677, %v10306_v22  ;;  %v6046_v59 = vpop.eup %6045 }
 0x3d8   :  { %v2846_v15 = vadd.f32 1.4214138, %v2696_v49  ;;  %vm4644_vm7 = vcmp.ge.f32.partialorder %v10165_v43, 0.0  ;;  %v10315_v14 = vadd.f32 %v6742_v1, %v1199_v29  ;;  %v4164_v46 = vmul.f32 1.442695, %v3899_v8  ;;  %v6290_v43 = vld [vmem:[%s11233_s2 + $0x3b8] sm:$0xff] }
 0x3d9   :  { %v5395_v17 = vmul.f32 %v5245_v4, %v5095_v37  ;;  %v4794_v3 = vsub.f32 0.0, %v4494_v44  ;;  %v3447_v18 = vadd.f32 0.2548296, %v3297_v28  ;;  %v1651_v42 = vand.u32 2147483647, %v10310_v54  ;;  %v6291_v4 = vld [vmem:[%s11233_s2 + $0x3b0] sm:$0xff] }
 0x3da   :  { %v2996_v23 = vmul.f32 %v10284_v13, %v2846_v15  ;;  %v10317_v36 = vpop.eup %6047  ;;  %v301_v11 = vmul.f32 %v6290_v43, %v6710_v20  ;;  %v3898_v27 = vsub.f32 0.0, %v3748_v48  ;;  %v10331_v38 = vmul.f32 0.70710677, %v10315_v14  ;;  %v870_v15 = vpop.permute.xlu0 %869 }
 0x3db   :  { %5546 = vst.msk [vmem:[%s11234_s3 + $0x378] sm:$0xff] %vm5434_vm2, %v5395_v17  ;;  %v4944_v50 = vsel %vm4644_vm7, %v4494_v44, %v4794_v3  ;;  %v3597_v30 = vmul.f32 %v10266_v25, %v3447_v18  ;;  %v2399_v19 = vmul.f32 1.0614054, %v10317_v36  ;;  %v1801_v37 = vmul.f32 0.3275911, %v1651_v42 }
 0x3dc   :  { %v5244_v40 = vadd.f32 1.0, %v4944_v50  ;;  %v3146_v34 = vadd.f32 -0.28449672, %v2996_v23  ;;  %v1650_v25 = vand.u32 2147483647, %v10331_v38  ;;  %v1202_v61 = vadd.f32 %v872_v51, %v301_v11 }
 0x3dd   :  { %v4347_v7 = vmul.f32 %v6046_v59, %v3597_v30  ;;  %v2549_v24 = vadd.f32 -1.4531521, %v2399_v19  ;;  %v1951_v35 = vadd.f32 1.0, %v1801_v37  ;;  %v5097_v12 = vmul.f32 0.5, %v10189_v45 }
 0x3de   :  { %v10333_v56 = vpop.eup %6049  ;;  %v5394_v26 = vmul.f32 %v5244_v40, %v5094_v5  ;;  %v3296_v31 = vmul.f32 %v10284_v13, %v3146_v34  ;;  %vm4647_vm8 = vcmp.ge.f32.partialorder %v10201_v0, 0.0  ;;  %v1800_v39 = vmul.f32 0.3275911, %v1650_v25 }
 0x3df   :  { %v2398_v60 = vmul.f32 1.0614054, %v10333_v56  ;;  %v4497_v52 = vsub.f32 1.0, %v4347_v7  ;;  %v2699_v58 = vmul.f32 %v10317_v36, %v2549_v24  ;;  %6053 = vrcp.f32 %v1951_v35  ;;  %v6052_v2 = vpop.eup %6051 }
 0x3e0   :  { %5545 = vst.msk [vmem:[%s11234_s3 + $0x370] sm:$0xff] %vm5434_vm2, %v5394_v26  ;;  %v3446_v32 = vadd.f32 0.2548296, %v3296_v31  ;;  %v4162_v21 = vmul.f32 1.442695, %v3898_v27  ;;  %6055 = vpow2.f32 %v4164_v46  ;;  %v1950_v49 = vadd.f32 1.0, %v1800_v39 }
 0x3e1   :  { %v2548_v16 = vadd.f32 -1.4531521, %v2398_v60  ;;  %v4797_v5 = vsub.f32 0.0, %v4497_v52  ;;  %v2849_v53 = vadd.f32 1.4214138, %v2699_v58  ;;  %v10348_v45 = vadd.f32 %v6742_v1, %v1202_v61 }
 0x3e2   :  { %v3596_v57 = vmul.f32 %v10284_v13, %v3446_v32  ;;  %v300_v44 = vmul.f32 %v6291_v4, %v6710_v20  ;;  %6057 = vrcp.f32 %v1950_v49  ;;  %v3751_v3 = vmul.f32 %v1651_v42, %v1651_v42  ;;  %v6293_v32 = vld [vmem:[%s11233_s2 + $0x3c0] sm:$0xff] }
 0x3e3   :  { %v2698_v9 = vmul.f32 %v10333_v56, %v2548_v16  ;;  %v4947_v55 = vsel %vm4647_vm8, %v4497_v52, %v4797_v5  ;;  %v2999_v0 = vmul.f32 %v10317_v36, %v2849_v53  ;;  %v10356_v28 = vmul.f32 0.70710677, %v10348_v45  ;;  %v874_v5 = vpop.permute.xlu0 %873 }
 0x3e4   :  { %v4346_v10 = vmul.f32 %v6052_v2, %v3596_v57  ;;  %v5247_v13 = vadd.f32 1.0, %v4947_v55  ;;  %6059 = vpow2.f32 %v4162_v21  ;;  %v5096_v59 = vmul.f32 0.5, %v10216_v33 }
 0x3e5   :  { %v2848_v8 = vadd.f32 1.4214138, %v2698_v9  ;;  %v3149_v17 = vadd.f32 -0.28449672, %v2999_v0  ;;  %v1653_v23 = vand.u32 2147483647, %v10356_v28  ;;  %v3750_v43 = vmul.f32 %v1650_v25, %v1650_v25  ;;  %v876_v25 = vpop.permute.xlu1 %875 }
 0x3e6   :  { %v4496_v29 = vsub.f32 1.0, %v4346_v10  ;;  %v5397_v48 = vmul.f32 %v5247_v13, %v5097_v12  ;;  %v1201_v11 = vadd.f32 %v870_v15, %v300_v44  ;;  %vm4646_vm9 = vcmp.ge.f32.partialorder %v10225_v47, 0.0  ;;  %v6292_v47 = vld [vmem:[%s11233_s2 + $0x3c8] sm:$0xff] }
 0x3e7   :  { %v2998_v18 = vmul.f32 %v10333_v56, %v2848_v8  ;;  %v3299_v46 = vmul.f32 %v10317_v36, %v3149_v17  ;;  %v10368_v42 = vmul.f32 0.5, %v10254_v41  ;;  %v1803_v40 = vmul.f32 0.3275911, %v1653_v23 }
 0x3e8   :  { %v4796_v50 = vsub.f32 0.0, %v4496_v29  ;;  %5548 = vst.msk [vmem:[%s11234_s3 + $0x388] sm:$0xff] %vm5434_vm2, %v5397_v48  ;;  %v3901_v19 = vsub.f32 0.0, %v3751_v3  ;;  %v10371_v51 = vadd.f32 %v6742_v1, %v1201_v11  ;;  %vm4649_vm10 = vcmp.ge.f32.partialorder %v10258_v62, 0.0 }
 0x3e9   :  { %v3148_v33 = vadd.f32 -0.28449672, %v2998_v18  ;;  %v3449_v34 = vadd.f32 0.2548296, %v3299_v46  ;;  %v10373_v27 = vpop.eup %6053  ;;  %v1953_v7 = vadd.f32 1.0, %v1803_v40  ;;  %v303_v41 = vmul.f32 %v6292_v47, %v6710_v20 }
 0x3ea   :  { %v4946_v30 = vsel %vm4646_vm9, %v4496_v29, %v4796_v50  ;;  %v2401_v24 = vmul.f32 1.0614054, %v10373_v27  ;;  %v3900_v60 = vsub.f32 0.0, %v3750_v43  ;;  %v10384_v35 = vmul.f32 0.70710677, %v10371_v51  ;;  %v6056_v61 = vpop.eup %6055 }
 0x3eb   :  { %v5246_v37 = vadd.f32 1.0, %v4946_v30  ;;  %v3298_v26 = vmul.f32 %v10333_v56, %v3148_v33  ;;  %v3599_v31 = vmul.f32 %v10317_v36, %v3449_v34  ;;  %6061 = vrcp.f32 %v1953_v7 }
 0x3ec   :  { %v302_v58 = vmul.f32 %v6293_v32, %v6710_v20  ;;  %vm4648_vm11 = vcmp.ge.f32.partialorder %v10272_v63, 0.0  ;;  %v5098_v36 = vmul.f32 0.5, %v10261_v6  ;;  %v2551_v39 = vadd.f32 -1.4531521, %v2401_v24  ;;  %v10393_v57 = vpop.eup %6057  ;;  %v880_v63 = vpop.permute.xlu1 %879 }
 0x3ed   :  { %v5396_v52 = vmul.f32 %v5246_v37, %v5096_v59  ;;  %v3448_v12 = vadd.f32 0.2548296, %v3298_v26  ;;  %v4349_v16 = vmul.f32 %v6056_v61, %v3599_v31  ;;  %v1652_v2 = vand.u32 2147483647, %v10384_v35  ;;  %v6294_v61 = vld [vmem:[%s11233_s2 + $0x3d8] sm:$0xff] }
 0x3ee   :  { %v4168_v21 = vmul.f32 1.442695, %v3901_v19  ;;  %v3753_v9 = vmul.f32 %v1653_v23, %v1653_v23  ;;  %v1204_v49 = vadd.f32 %v876_v25, %v303_v41  ;;  %v6060_v55 = vpop.eup %6059  ;;  %v2701_v6 = vmul.f32 %v10373_v27, %v2551_v39 }
 0x3ef   :  { %5547 = vst.msk [vmem:[%s11234_s3 + $0x380] sm:$0xff] %vm5434_vm2, %v5396_v52  ;;  %v3598_v53 = vmul.f32 %v10333_v56, %v3448_v12  ;;  %v4499_v10 = vsub.f32 1.0, %v4349_v16  ;;  %v2400_v0 = vmul.f32 1.0614054, %v10393_v57  ;;  %v1802_v4 = vmul.f32 0.3275911, %v1652_v2 }
 0x3f0   :  { %v4166_v13 = vmul.f32 1.442695, %v3900_v60  ;;  %v10403_v8 = vadd.f32 %v6742_v1, %v1204_v49  ;;  %v1203_v15 = vadd.f32 %v874_v5, %v302_v58  ;;  %v2851_v17 = vadd.f32 1.4214138, %v2701_v6 }
 0x3f1   :  { %v4348_v44 = vmul.f32 %v6060_v55, %v3598_v53  ;;  %v4799_v29 = vsub.f32 0.0, %v4499_v10  ;;  %v2550_v3 = vadd.f32 -1.4531521, %v2400_v0  ;;  %v1952_v56 = vadd.f32 1.0, %v1802_v4 }
 0x3f2   :  { %6063 = vpow2.f32 %v4168_v21  ;;  %v3903_v59 = vsub.f32 0.0, %v3753_v9  ;;  %v10406_v18 = vmul.f32 0.70710677, %v10403_v8  ;;  %v3001_v50 = vmul.f32 %v10373_v27, %v2851_v17 }
 0x3f3   :  { %v4498_v48 = vsub.f32 1.0, %v4348_v44  ;;  %v4949_v23 = vsel %vm4649_vm10, %v4499_v10, %v4799_v29  ;;  %v2700_v46 = vmul.f32 %v10393_v57, %v2550_v3  ;;  %6065 = vrcp.f32 %v1952_v56 }
 0x3f4   :  { %v5249_v43 = vadd.f32 1.0, %v4949_v23  ;;  %v1655_v33 = vand.u32 2147483647, %v10406_v18  ;;  %v10414_v40 = vadd.f32 %v6742_v1, %v1203_v15  ;;  %v3151_v30 = vadd.f32 -0.28449672, %v3001_v50  ;;  %v878_v50 = vpop.permute.xlu0 %877 }
 0x3f5   :  { %v4798_v11 = vsub.f32 0.0, %v4498_v48  ;;  %v10417_v34 = vmul.f32 0.5, %v10306_v22  ;;  %v2850_v19 = vadd.f32 1.4214138, %v2700_v46  ;;  %6067 = vpow2.f32 %v4166_v13  ;;  %v10419_v62 = vpop.eup %6061 }
 0x3f6   :  { %v5399_v37 = vmul.f32 %v5249_v43, %v10368_v42  ;;  %v3752_v7 = vmul.f32 %v1652_v2, %v1652_v2  ;;  %v1805_v47 = vmul.f32 0.3275911, %v1655_v33  ;;  %v3301_v31 = vmul.f32 %v10373_v27, %v3151_v30 }
 0x3f7   :  { %v4948_v26 = vsel %vm4648_vm11, %v4498_v48, %v4798_v11  ;;  %v3000_v24 = vmul.f32 %v10393_v57, %v2850_v19  ;;  %v2403_v60 = vmul.f32 1.0614054, %v10419_v62  ;;  %v4172_v22 = vmul.f32 1.442695, %v3903_v59 }
 0x3f8   :  { %v5248_v41 = vadd.f32 1.0, %v4948_v26  ;;  %5550 = vst.msk [vmem:[%s11234_s3 + $0x398] sm:$0xff] %vm5434_vm2, %v5399_v37  ;;  %v1955_v25 = vadd.f32 1.0, %v1805_v47  ;;  %v10432_v42 = vmul.f32 0.70710677, %v10414_v40  ;;  %v305_v52 = vmul.f32 %v6294_v61, %v6710_v20 }
 0x3f9   :  { %v3451_v32 = vadd.f32 0.2548296, %v3301_v31  ;;  %v3150_v58 = vadd.f32 -0.28449672, %v3000_v24  ;;  %v2553_v16 = vadd.f32 -1.4531521, %v2403_v60  ;;  %v3755_v55 = vmul.f32 %v1655_v33, %v1655_v33 }
 0x3fa   :  { %v5398_v12 = vmul.f32 %v5248_v41, %v5098_v36  ;;  %vm4651_vm12 = vcmp.ge.f32.partialorder %v10310_v54, 0.0  ;;  %v3902_v39 = vsub.f32 0.0, %v3752_v7  ;;  %6069 = vrcp.f32 %v1955_v25 }
 0x3fb   :  { %v1654_v2 = vand.u32 2147483647, %v10432_v42  ;;  %v3601_v5 = vmul.f32 %v10373_v27, %v3451_v32  ;;  %v3300_v53 = vmul.f32 %v10393_v57, %v3150_v58  ;;  %v2703_v36 = vmul.f32 %v10419_v62, %v2553_v16 }
 0x3fc   :  { %5549 = vst.msk [vmem:[%s11234_s3 + $0x390] sm:$0xff] %vm5434_vm2, %v5398_v12  ;;  %v1206_v21 = vadd.f32 %v880_v63, %v305_v52  ;;  %v6064_v9 = vpop.eup %6063  ;;  %v10448_v49 = vmul.f32 0.5, %v10315_v14  ;;  %6071 = vpow2.f32 %v4172_v22  ;;  %vm4650_vm13 = vcmp.ge.f32.partialorder %v10331_v38, 0.0  ;;  %v6295_v14 = vld [vmem:[%s11233_s2 + $0x3d0] sm:$0xff] }
 0x3fd   :  { %v1804_v10 = vmul.f32 0.3275911, %v1654_v2  ;;  %v10450_v6 = vpop.eup %6065  ;;  %v4351_v0 = vmul.f32 %v6064_v9, %v3601_v5  ;;  %v3450_v4 = vadd.f32 0.2548296, %v3300_v53  ;;  %v2853_v44 = vadd.f32 1.4214138, %v2703_v36 }
 0x3fe   :  { %v10453_v13 = vadd.f32 %v6742_v1, %v1206_v21  ;;  %v2402_v27 = vmul.f32 1.0614054, %v10450_v6  ;;  %v4170_v15 = vmul.f32 1.442695, %v3902_v39  ;;  %v304_v17 = vmul.f32 %v6295_v14, %v6710_v20 }
 0x3ff   :  { %v1954_v29 = vadd.f32 1.0, %v1804_v10  ;;  %v6068_v3 = vpop.eup %6067  ;;  %v4501_v56 = vsub.f32 1.0, %v4351_v0  ;;  %v3600_v48 = vmul.f32 %v10393_v57, %v3450_v4  ;;  %v3003_v59 = vmul.f32 %v10419_v62, %v2853_v44  ;;  %v884_v0 = vpop.permute.xlu1 %883 }
 0x400   :  { %v10464_v23 = vmul.f32 0.70710677, %v10453_v13  ;;  %v10467_v46 = vmul.f32 0.5, %v10348_v45  ;;  %v2552_v43 = vadd.f32 -1.4531521, %v2402_v27  ;;  %v3905_v11 = vsub.f32 0.0, %v3755_v55 }
 0x401   :  { %6073 = vrcp.f32 %v1954_v29  ;;  %v4801_v33 = vsub.f32 0.0, %v4501_v56  ;;  %v4350_v30 = vmul.f32 %v6068_v3, %v3600_v48  ;;  %v3153_v19 = vadd.f32 -0.28449672, %v3003_v59  ;;  %v6296_v29 = vld [vmem:[%s11233_s2 + $0x3e8] sm:$0xff] }
 0x402   :  { %v1657_v37 = vand.u32 2147483647, %v10464_v23  ;;  %v2702_v26 = vmul.f32 %v10450_v6, %v2552_v43  ;;  %6075 = vpow2.f32 %v4170_v15  ;;  %v3754_v57 = vmul.f32 %v1654_v2, %v1654_v2  ;;  %v6297_v43 = vld [vmem:[%s11233_s2 + $0x3e0] sm:$0xff] }
 0x403   :  { %v1205_v7 = vadd.f32 %v878_v50, %v304_v17  ;;  %v4951_v47 = vsel %vm4651_vm12, %v4501_v56, %v4801_v33  ;;  %v4500_v41 = vsub.f32 1.0, %v4350_v30  ;;  %v3303_v45 = vmul.f32 %v10419_v62, %v3153_v19  ;;  %v882_v50 = vpop.permute.xlu0 %881 }
 0x404   :  { %v1807_v31 = vmul.f32 0.3275911, %v1657_v37  ;;  %v10474_v24 = vpop.eup %6069  ;;  %v5251_v60 = vadd.f32 1.0, %v4951_v47  ;;  %v2852_v22 = vadd.f32 1.4214138, %v2702_v26  ;;  %v3904_v39 = vsub.f32 0.0, %v3754_v57 }
 0x405   :  { %v4176_v25 = vmul.f32 1.442695, %v3905_v11  ;;  %v10477_v63 = vadd.f32 %v6742_v1, %v1205_v7  ;;  %v4800_v61 = vsub.f32 0.0, %v4500_v41  ;;  %v3453_v52 = vadd.f32 0.2548296, %v3303_v45 }
 0x406   :  { %v2405_v12 = vmul.f32 1.0614054, %v10474_v24  ;;  %v1957_v32 = vadd.f32 1.0, %v1807_v31  ;;  %v6072_v58 = vpop.eup %6071  ;;  %v5401_v54 = vmul.f32 %v5251_v60, %v10417_v34  ;;  %v3002_v16 = vmul.f32 %v10450_v6, %v2852_v22 }
 0x407   :  { %v10483_v2 = vmul.f32 0.70710677, %v10477_v63  ;;  %v4950_v5 = vsel %vm4650_vm13, %v4500_v41, %v4800_v61  ;;  %v3603_v53 = vmul.f32 %v10419_v62, %v3453_v52  ;;  %vm4653_vm14 = vcmp.ge.f32.partialorder %v10356_v28, 0.0 }
 0x408   :  { %v2555_v36 = vadd.f32 -1.4531521, %v2405_v12  ;;  %6077 = vrcp.f32 %v1957_v32  ;;  %5552 = vst.msk [vmem:[%s11234_s3 + $0x3a8] sm:$0xff] %vm5434_vm2, %v5401_v54  ;;  %v5250_v21 = vadd.f32 1.0, %v4950_v5  ;;  %v3152_v34 = vadd.f32 -0.28449672, %v3002_v16 }
 0x409   :  { %v10494_v9 = vmul.f32 0.5, %v10371_v51  ;;  %v4353_v55 = vmul.f32 %v6072_v58, %v3603_v53  ;;  %v3757_v10 = vmul.f32 %v1657_v37, %v1657_v37  ;;  %v1656_v62 = vand.u32 2147483647, %v10483_v2 }
 0x40a   :  { %v2705_v38 = vmul.f32 %v10474_v24, %v2555_v36  ;;  %v5400_v44 = vmul.f32 %v5250_v21, %v10448_v49  ;;  %v3302_v27 = vmul.f32 %v10450_v6, %v3152_v34  ;;  %v4174_v15 = vmul.f32 1.442695, %v3904_v39 }
 0x40b   :  { %v10498_v4 = vpop.eup %6073  ;;  %v307_v51 = vmul.f32 %v6296_v29, %v6710_v20  ;;  %v4503_v14 = vsub.f32 1.0, %v4353_v55  ;;  %6079 = vpow2.f32 %v4176_v25  ;;  %v1806_v48 = vmul.f32 0.3275911, %v1656_v62 }
 0x40c   :  { %v2855_v17 = vadd.f32 1.4214138, %v2705_v38  ;;  %v2404_v3 = vmul.f32 1.0614054, %v10498_v4  ;;  %v6076_v56 = vpop.eup %6075  ;;  %5551 = vst.msk [vmem:[%s11234_s3 + $0x3a0] sm:$0xff] %vm5434_vm2, %v5400_v44  ;;  %v306_v11 = vmul.f32 %v6297_v43, %v6710_v20  ;;  %v3907_v37 = vsub.f32 0.0, %v3757_v10 }
 0x40d   :  { %v3452_v49 = vadd.f32 0.2548296, %v3302_v27  ;;  %v1208_v59 = vadd.f32 %v884_v0, %v307_v51  ;;  %v4803_v33 = vsub.f32 0.0, %v4503_v14  ;;  %vm4652_vm15 = vcmp.ge.f32.partialorder %v10384_v35, 0.0 }
 0x40e   :  { %v3005_v30 = vmul.f32 %v10474_v24, %v2855_v17  ;;  %v2554_v19 = vadd.f32 -1.4531521, %v2404_v3  ;;  %v1956_v57 = vadd.f32 1.0, %v1806_v48  ;;  %v1207_v31 = vadd.f32 %v882_v50, %v306_v11  ;;  %v888_v48 = vpop.permute.xlu1 %887 }
 0x40f   :  { %v3602_v26 = vmul.f32 %v10450_v6, %v3452_v49  ;;  %v10519_v7 = vadd.f32 %v6742_v1, %v1208_v59  ;;  %v4953_v47 = vsel %vm4653_vm14, %v4503_v14, %v4803_v33  ;;  %v4180_v12 = vmul.f32 1.442695, %v3907_v37 }
 0x410   :  { %v3155_v41 = vadd.f32 -0.28449672, %v3005_v30  ;;  %v2704_v45 = vmul.f32 %v10498_v4, %v2554_v19  ;;  %v5253_v60 = vadd.f32 1.0, %v4953_v47  ;;  %6081 = vrcp.f32 %v1956_v57 }
 0x411   :  { %v4352_v22 = vmul.f32 %v6076_v56, %v3602_v26  ;;  %v10525_v25 = vmul.f32 0.70710677, %v10519_v7  ;;  %6083 = vpow2.f32 %v4174_v15  ;;  %v5105_v39 = vmul.f32 0.5, %v10403_v8 }
 0x412   :  { %v10527_v6 = vpop.eup %6077  ;;  %v3305_v61 = vmul.f32 %v10474_v24, %v3155_v41  ;;  %v2854_v52 = vadd.f32 1.4214138, %v2704_v45  ;;  %v5403_v28 = vmul.f32 %v5253_v60, %v10467_v46  ;;  %v10536_v53 = vadd.f32 %v6742_v1, %v1207_v31  ;;  %v886_v41 = vpop.permute.xlu0 %885  ;;  %v6299_v45 = vld [vmem:[%s11233_s2 + $0x3f0] sm:$0xff] }
 0x413   :  { %v4502_v32 = vsub.f32 1.0, %v4352_v22  ;;  %v2407_v58 = vmul.f32 1.0614054, %v10527_v6  ;;  %v1659_v54 = vand.u32 2147483647, %v10525_v25  ;;  %v3756_v21 = vmul.f32 %v1656_v62, %v1656_v62 }
 0x414   :  { %v3455_v16 = vadd.f32 0.2548296, %v3305_v61  ;;  %v3004_v5 = vmul.f32 %v10498_v4, %v2854_v52  ;;  %5554 = vst.msk [vmem:[%s11234_s3 + $0x3b8] sm:$0xff] %vm5434_vm2, %v5403_v28  ;;  %vm4655_vm0 = vcmp.ge.f32.partialorder %v10406_v18, 0.0  ;;  %v10545_v10 = vmul.f32 0.70710677, %v10536_v53 }
 0x415   :  { %v4802_v36 = vsub.f32 0.0, %v4502_v32  ;;  %v2557_v46 = vadd.f32 -1.4531521, %v2407_v58  ;;  %v1809_v34 = vmul.f32 0.3275911, %v1659_v54  ;;  %v6080_v55 = vpop.eup %6079  ;;  %6085 = vpow2.f32 %v4180_v12 }
 0x416   :  { %v3605_v38 = vmul.f32 %v10474_v24, %v3455_v16  ;;  %v3154_v8 = vadd.f32 -0.28449672, %v3004_v5  ;;  %v1658_v51 = vand.u32 2147483647, %v10545_v10  ;;  %v10553_v24 = vmul.f32 0.5, %v10414_v40  ;;  %v6298_v40 = vld [vmem:[%s11233_s2 + $0x3f8] sm:$0xff] }
 0x417   :  { %v4952_v0 = vsel %vm4652_vm15, %v4502_v32, %v4802_v36  ;;  %v2707_v44 = vmul.f32 %v10527_v6, %v2557_v46  ;;  %v1959_v27 = vadd.f32 1.0, %v1809_v34  ;;  %v3906_v17 = vsub.f32 0.0, %v3756_v21  ;;  %v6300_v21 = vld [vmem:[%s11233_s2 + $0x408] sm:$0xff] }
 0x418   :  { %v5252_v15 = vadd.f32 1.0, %v4952_v0  ;;  %v4355_v29 = vmul.f32 %v6080_v55, %v3605_v38  ;;  %v3304_v62 = vmul.f32 %v10498_v4, %v3154_v8  ;;  %v1808_v49 = vmul.f32 0.3275911, %v1658_v51  ;;  %v892_v8 = vpop.permute.xlu1 %891 }
 0x419   :  { %v2857_v14 = vadd.f32 1.4214138, %v2707_v44  ;;  %6087 = vrcp.f32 %v1959_v27  ;;  %vm4654_vm1 = vcmp.ge.f32.partialorder %v10432_v42, 0.0  ;;  %v3759_v43 = vmul.f32 %v1659_v54, %v1659_v54 }
 0x41a   :  { %v5402_v3 = vmul.f32 %v5252_v15, %v10494_v9  ;;  %v4505_v35 = vsub.f32 1.0, %v4355_v29  ;;  %v3454_v56 = vadd.f32 0.2548296, %v3304_v62  ;;  %v10556_v59 = vpop.eup %6081  ;;  %v309_v11 = vmul.f32 %v6298_v40, %v6710_v20 }
 0x41b   :  { %v3007_v50 = vmul.f32 %v10527_v6, %v2857_v14  ;;  %v6084_v33 = vpop.eup %6083  ;;  %v2406_v19 = vmul.f32 1.0614054, %v10556_v59  ;;  %v1958_v37 = vadd.f32 1.0, %v1808_v49  ;;  %v4178_v57 = vmul.f32 1.442695, %v3906_v17 }
 0x41c   :  { %5553 = vst.msk [vmem:[%s11234_s3 + $0x3b0] sm:$0xff] %vm5434_vm2, %v5402_v3  ;;  %v4805_v9 = vsub.f32 0.0, %v4505_v35  ;;  %v3604_v30 = vmul.f32 %v10498_v4, %v3454_v56  ;;  %v1210_v47 = vadd.f32 %v888_v48, %v309_v11  ;;  %v308_v31 = vmul.f32 %v6299_v45, %v6710_v20 }
 0x41d   :  { %v3157_v26 = vadd.f32 -0.28449672, %v3007_v50  ;;  %v2556_v61 = vadd.f32 -1.4531521, %v2406_v19  ;;  %6089 = vrcp.f32 %v1958_v37  ;;  %v3909_v12 = vsub.f32 0.0, %v3759_v43 }
 0x41e   :  { %v4955_v60 = vsel %vm4655_vm0, %v4505_v35, %v4805_v9  ;;  %v4354_v22 = vmul.f32 %v6084_v33, %v3604_v30  ;;  %v10578_v28 = vadd.f32 %v6742_v1, %v1210_v47  ;;  %v5107_v58 = vmul.f32 0.5, %v10453_v13 }
 0x41f   :  { %v5255_v4 = vadd.f32 1.0, %v4955_v60  ;;  %v3307_v52 = vmul.f32 %v10527_v6, %v3157_v26  ;;  %v2706_v54 = vmul.f32 %v10556_v59, %v2556_v61  ;;  %v1209_v16 = vadd.f32 %v886_v41, %v308_v31  ;;  %v6086_v5 = vpop.eup %6085 }
 0x420   :  { %v4504_v32 = vsub.f32 1.0, %v4354_v22  ;;  %v10583_v46 = vmul.f32 0.70710677, %v10578_v28  ;;  %v311_v34 = vmul.f32 %v6300_v21, %v6710_v20  ;;  %6091 = vpow2.f32 %v4178_v57 }
 0x421   :  { %v5405_v36 = vmul.f32 %v5255_v4, %v5105_v39  ;;  %v3457_v18 = vadd.f32 0.2548296, %v3307_v52  ;;  %v2856_v38 = vadd.f32 1.4214138, %v2706_v54  ;;  %v10590_v13 = vadd.f32 %v6742_v1, %v1209_v16 }
 0x422   :  { %v4804_v55 = vsub.f32 0.0, %v4504_v32  ;;  %v4184_v44 = vmul.f32 1.442695, %v3909_v12  ;;  %v3758_v27 = vmul.f32 %v1658_v51, %v1658_v51  ;;  %v1661_v15 = vand.u32 2147483647, %v10583_v46 }
 0x423   :  { %v10592_v0 = vpop.eup %6087  ;;  %5556 = vst.msk [vmem:[%s11234_s3 + $0x3c8] sm:$0xff] %vm5434_vm2, %v5405_v36  ;;  %v3607_v39 = vmul.f32 %v10527_v6, %v3457_v18  ;;  %v3006_v62 = vmul.f32 %v10556_v59, %v2856_v38  ;;  %v10605_v17 = vmul.f32 0.70710677, %v10590_v13  ;;  %v1212_v49 = vadd.f32 %v892_v8, %v311_v34  ;;  %v890_v34 = vpop.permute.xlu0 %889 }
 0x424   :  { %v4954_v29 = vsel %vm4654_vm1, %v4504_v32, %v4804_v55  ;;  %v2409_v14 = vmul.f32 1.0614054, %v10592_v0  ;;  %v1811_v56 = vmul.f32 0.3275911, %v1661_v15  ;;  %v3908_v42 = vsub.f32 0.0, %v3758_v27  ;;  %v6302_v27 = vld [vmem:[%s11233_s2 + $0x418] sm:$0xff] }
 0x425   :  { %v5254_v3 = vadd.f32 1.0, %v4954_v29  ;;  %v4357_v35 = vmul.f32 %v6086_v5, %v3607_v39  ;;  %v3156_v48 = vadd.f32 -0.28449672, %v3006_v62  ;;  %v1660_v51 = vand.u32 2147483647, %v10605_v17 }
 0x426   :  { %v2559_v6 = vadd.f32 -1.4531521, %v2409_v14  ;;  %v1961_v40 = vadd.f32 1.0, %v1811_v56  ;;  %vm4657_vm3 = vcmp.ge.f32.partialorder %v10464_v23, 0.0  ;;  %v10620_v37 = vadd.f32 %v6742_v1, %v1212_v49 }
 0x427   :  { %v5404_v50 = vmul.f32 %v5254_v3, %v10553_v24  ;;  %v4507_v43 = vsub.f32 1.0, %v4357_v35  ;;  %v10609_v11 = vpop.eup %6089  ;;  %v3306_v33 = vmul.f32 %v10556_v59, %v3156_v48  ;;  %v1810_v30 = vmul.f32 0.3275911, %v1660_v51  ;;  %v896_v35 = vpop.permute.xlu1 %895 }
 0x428   :  { %v2709_v9 = vmul.f32 %v10592_v0, %v2559_v6  ;;  %v2408_v24 = vmul.f32 1.0614054, %v10609_v11  ;;  %6093 = vrcp.f32 %v1961_v40  ;;  %v4182_v45 = vmul.f32 1.442695, %v3908_v42  ;;  %v6303_v6 = vld [vmem:[%s11233_s2 + $0x410] sm:$0xff] }
 0x429   :  { %5555 = vst.msk [vmem:[%s11234_s3 + $0x3c0] sm:$0xff] %vm5434_vm2, %v5404_v50  ;;  %v4807_v19 = vsub.f32 0.0, %v4507_v43  ;;  %v3456_v26 = vadd.f32 0.2548296, %v3306_v33  ;;  %6095 = vpow2.f32 %v4184_v44  ;;  %v1960_v23 = vadd.f32 1.0, %v1810_v30 }
 0x42a   :  { %v2859_v57 = vadd.f32 1.4214138, %v2709_v9  ;;  %v2558_v41 = vadd.f32 -1.4531521, %v2408_v24  ;;  %v3761_v31 = vmul.f32 %v1661_v15, %v1661_v15  ;;  %v6092_v60 = vpop.eup %6091  ;;  %vm4656_vm4 = vcmp.ge.f32.partialorder %v10483_v2, 0.0  ;;  %v894_v24 = vpop.permute.xlu0 %893 }
 0x42b   :  { %v4957_v47 = vsel %vm4657_vm3, %v4507_v43, %v4807_v19  ;;  %v3606_v61 = vmul.f32 %v10556_v59, %v3456_v26  ;;  %6097 = vrcp.f32 %v1960_v23  ;;  %v10627_v12 = vmul.f32 0.70710677, %v10620_v37 }
 0x42c   :  { %v5257_v22 = vadd.f32 1.0, %v4957_v47  ;;  %v3009_v4 = vmul.f32 %v10592_v0, %v2859_v57  ;;  %v2708_v52 = vmul.f32 %v10609_v11, %v2558_v41  ;;  %v3760_v5 = vmul.f32 %v1660_v51, %v1660_v51 }
 0x42d   :  { %v4356_v54 = vmul.f32 %v6092_v60, %v3606_v61  ;;  %v5106_v36 = vmul.f32 0.5, %v10477_v63  ;;  %v3911_v21 = vsub.f32 0.0, %v3761_v31  ;;  %v1663_v59 = vand.u32 2147483647, %v10627_v12 }
 0x42e   :  { %v5407_v32 = vmul.f32 %v5257_v22, %v5107_v58  ;;  %v3159_v16 = vadd.f32 -0.28449672, %v3009_v4  ;;  %v2858_v18 = vadd.f32 1.4214138, %v2708_v52  ;;  %6099 = vpow2.f32 %v4182_v45  ;;  %v6301_v58 = vld [vmem:[%s11233_s2 + $0x400] sm:$0xff] }
 0x42f   :  { %v4506_v55 = vsub.f32 1.0, %v4356_v54  ;;  %v310_v63 = vmul.f32 %v6301_v58, %v6710_v20  ;;  %v10641_v8 = vmul.f32 0.5, %v10519_v7  ;;  %v1813_v44 = vmul.f32 0.3275911, %v1663_v59 }
 0x430   :  { %5558 = vst.msk [vmem:[%s11234_s3 + $0x3d8] sm:$0xff] %vm5434_vm2, %v5407_v32  ;;  %v3309_v38 = vmul.f32 %v10592_v0, %v3159_v16  ;;  %v3008_v39 = vmul.f32 %v10609_v11, %v2858_v18  ;;  %v313_v15 = vmul.f32 %v6302_v27, %v6710_v20  ;;  %v3910_v14 = vsub.f32 0.0, %v3760_v5 }
 0x431   :  { %v4806_v29 = vsub.f32 0.0, %v4506_v55  ;;  %v1211_v3 = vadd.f32 %v890_v34, %v310_v63  ;;  %vm4659_vm5 = vcmp.ge.f32.partialorder %v10525_v25, 0.0  ;;  %v4188_v49 = vmul.f32 1.442695, %v3911_v21 }
 0x432   :  { %v3459_v62 = vadd.f32 0.2548296, %v3309_v38  ;;  %v10648_v56 = vpop.eup %6093  ;;  %v3158_v7 = vadd.f32 -0.28449672, %v3008_v39  ;;  %v1963_v48 = vadd.f32 1.0, %v1813_v44  ;;  %v312_v51 = vmul.f32 %v6303_v6, %v6710_v20 }
 0x433   :  { %v6096_v50 = vpop.eup %6095  ;;  %v4956_v43 = vsel %vm4656_vm4, %v4506_v55, %v4806_v29  ;;  %v2411_v40 = vmul.f32 1.0614054, %v10648_v56  ;;  %v10660_v33 = vadd.f32 %v6742_v1, %v1211_v3  ;;  %v1214_v19 = vadd.f32 %v896_v35, %v313_v15 }
 0x434   :  { %v3609_v42 = vmul.f32 %v10592_v0, %v3459_v62  ;;  %v5256_v9 = vadd.f32 1.0, %v4956_v43  ;;  %v3308_v30 = vmul.f32 %v10609_v11, %v3158_v7  ;;  %6101 = vrcp.f32 %v1963_v48 }
 0x435   :  { %v10663_v26 = vpop.eup %6097  ;;  %v2561_v23 = vadd.f32 -1.4531521, %v2411_v40  ;;  %v4186_v47 = vmul.f32 1.442695, %v3910_v14  ;;  %v10666_v2 = vmul.f32 0.70710677, %v10660_v33  ;;  %v3763_v31 = vmul.f32 %v1663_v59, %v1663_v59 }
 0x436   :  { %v4359_v57 = vmul.f32 %v6096_v50, %v3609_v42  ;;  %v5406_v0 = vmul.f32 %v5256_v9, %v5106_v36  ;;  %v3458_v41 = vadd.f32 0.2548296, %v3308_v30  ;;  %v2410_v45 = vmul.f32 1.0614054, %v10663_v26 }
 0x437   :  { %v2711_v22 = vmul.f32 %v10648_v56, %v2561_v23  ;;  %v1662_v61 = vand.u32 2147483647, %v10666_v2  ;;  %v1213_v4 = vadd.f32 %v894_v24, %v312_v51  ;;  %6103 = vpow2.f32 %v4188_v49  ;;  %v900_v23 = vpop.permute.xlu1 %899 }
 0x438   :  { %v4509_v60 = vsub.f32 1.0, %v4359_v57  ;;  %5557 = vst.msk [vmem:[%s11234_s3 + $0x3d0] sm:$0xff] %vm5434_vm2, %v5406_v0  ;;  %v3608_v52 = vmul.f32 %v10609_v11, %v3458_v41  ;;  %v2560_v32 = vadd.f32 -1.4531521, %v2410_v45  ;;  %v10677_v54 = vadd.f32 %v6742_v1, %v1214_v19  ;;  %v6100_v16 = vpop.eup %6099 }
 0x439   :  { %v2861_v36 = vadd.f32 1.4214138, %v2711_v22  ;;  %6105 = vpow2.f32 %v4186_v47  ;;  %v1812_v18 = vmul.f32 0.3275911, %v1662_v61  ;;  %v3913_v34 = vsub.f32 0.0, %v3763_v31 }
 0x43a   :  { %v4809_v5 = vsub.f32 0.0, %v4509_v60  ;;  %v4358_v21 = vmul.f32 %v6100_v16, %v3608_v52  ;;  %v2710_v59 = vmul.f32 %v10663_v26, %v2560_v32  ;;  %v10681_v55 = vmul.f32 0.70710677, %v10677_v54  ;;  %v898_v16 = vpop.permute.xlu0 %897 }
 0x43b   :  { %v3011_v38 = vmul.f32 %v10648_v56, %v2861_v36  ;;  %v1962_v58 = vadd.f32 1.0, %v1812_v18  ;;  %v10687_v63 = vadd.f32 %v6742_v1, %v1213_v4  ;;  %vm4658_vm6 = vcmp.ge.f32.partialorder %v10545_v10, 0.0 }
 0x43c   :  { %v4959_v11 = vsel %vm4659_vm5, %v4509_v60, %v4809_v5  ;;  %v4508_v44 = vsub.f32 1.0, %v4358_v21  ;;  %v2860_v27 = vadd.f32 1.4214138, %v2710_v59  ;;  %v1665_v15 = vand.u32 2147483647, %v10681_v55  ;;  %v6305_v5 = vld [vmem:[%s11233_s2 + $0x420] sm:$0xff] }
 0x43d   :  { %v5259_v39 = vadd.f32 1.0, %v4959_v11  ;;  %v3161_v29 = vadd.f32 -0.28449672, %v3011_v38  ;;  %6107 = vrcp.f32 %v1962_v58  ;;  %v4192_v48 = vmul.f32 1.442695, %v3913_v34  ;;  %v6306_v11 = vld [vmem:[%s11233_s2 + $0x438] sm:$0xff] }
 0x43e   :  { %v10691_v62 = vpop.eup %6101  ;;  %v4808_v14 = vsub.f32 0.0, %v4508_v44  ;;  %v3010_v3 = vmul.f32 %v10663_v26, %v2860_v27  ;;  %v1815_v35 = vmul.f32 0.3275911, %v1665_v15  ;;  %v3762_v6 = vmul.f32 %v1662_v61, %v1662_v61 }
 0x43f   :  { %v5409_v25 = vmul.f32 %v5259_v39, %v10641_v8  ;;  %v3311_v7 = vmul.f32 %v10648_v56, %v3161_v29  ;;  %v2413_v49 = vmul.f32 1.0614054, %v10691_v62  ;;  %v10702_v8 = vmul.f32 0.70710677, %v10687_v63 }
 0x440   :  { %v4958_v10 = vsel %vm4658_vm6, %v4508_v44, %v4808_v14  ;;  %v3160_v51 = vadd.f32 -0.28449672, %v3010_v3  ;;  %v1965_v50 = vadd.f32 1.0, %v1815_v35  ;;  %v5108_v43 = vmul.f32 0.5, %v10536_v53  ;;  %v904_v44 = vpop.permute.xlu1 %903 }
 0x441   :  { %5560 = vst.msk [vmem:[%s11234_s3 + $0x3e8] sm:$0xff] %vm5434_vm2, %v5409_v25  ;;  %v5258_v42 = vadd.f32 1.0, %v4958_v10  ;;  %v3461_v40 = vadd.f32 0.2548296, %v3311_v7  ;;  %v2563_v9 = vadd.f32 -1.4531521, %v2413_v49  ;;  %v6104_v30 = vpop.eup %6103  ;;  %v3765_v52 = vmul.f32 %v1665_v15, %v1665_v15 }
 0x442   :  { %v5111_v19 = vmul.f32 0.5, %v10578_v28  ;;  %v3310_v24 = vmul.f32 %v10663_v26, %v3160_v51  ;;  %6109 = vrcp.f32 %v1965_v50  ;;  %v1664_v57 = vand.u32 2147483647, %v10702_v8 }
 0x443   :  { %v6106_v47 = vpop.eup %6105  ;;  %v5408_v0 = vmul.f32 %v5258_v42, %v5108_v43  ;;  %v3611_v41 = vmul.f32 %v10648_v56, %v3461_v40  ;;  %vm4661_vm7 = vcmp.ge.f32.partialorder %v10583_v46, 0.0  ;;  %v2713_v53 = vmul.f32 %v10691_v62, %v2563_v9  ;;  %v6304_v56 = vld [vmem:[%s11233_s2 + $0x428] sm:$0xff] }
 0x444   :  { %v3460_v45 = vadd.f32 0.2548296, %v3310_v24  ;;  %v5110_v31 = vmul.f32 0.5, %v10590_v13  ;;  %v3912_v60 = vsub.f32 0.0, %v3762_v6  ;;  %v1814_v22 = vmul.f32 0.3275911, %v1664_v57 }
 0x445   :  { %5559 = vst.msk [vmem:[%s11234_s3 + $0x3e0] sm:$0xff] %vm5434_vm2, %v5408_v0  ;;  %v4361_v28 = vmul.f32 %v6104_v30, %v3611_v41  ;;  %vm4660_vm8 = vcmp.ge.f32.partialorder %v10605_v17, 0.0  ;;  %v2863_v61 = vadd.f32 1.4214138, %v2713_v53  ;;  %6111 = vpow2.f32 %v4192_v48 }
 0x446   :  { %v315_v4 = vmul.f32 %v6304_v56, %v6710_v20  ;;  %v3610_v13 = vmul.f32 %v10663_v26, %v3460_v45  ;;  %v1964_v32 = vadd.f32 1.0, %v1814_v22  ;;  %v314_v36 = vmul.f32 %v6305_v5, %v6710_v20 }
 0x447   :  { %v10726_v18 = vpop.eup %6107  ;;  %v4511_v21 = vsub.f32 1.0, %v4361_v28  ;;  %v3013_v59 = vmul.f32 %v10691_v62, %v2863_v61  ;;  %v317_v26 = vmul.f32 %v6306_v11, %v6710_v20  ;;  %v4190_v39 = vmul.f32 1.442695, %v3912_v60 }
 0x448   :  { %v1216_v34 = vadd.f32 %v900_v23, %v315_v4  ;;  %v4360_v38 = vmul.f32 %v6106_v47, %v3610_v13  ;;  %v2412_v58 = vmul.f32 1.0614054, %v10726_v18  ;;  %6113 = vrcp.f32 %v1964_v32 }
 0x449   :  { %v4811_v27 = vsub.f32 0.0, %v4511_v21  ;;  %v3163_v15 = vadd.f32 -0.28449672, %v3013_v59  ;;  %v1215_v25 = vadd.f32 %v898_v16, %v314_v36  ;;  %v10738_v3 = vmul.f32 0.5, %v10620_v37 }
 0x44a   :  { %v10735_v29 = vadd.f32 %v6742_v1, %v1216_v34  ;;  %v4510_v14 = vsub.f32 1.0, %v4360_v38  ;;  %v2562_v35 = vadd.f32 -1.4531521, %v2412_v58  ;;  %v3915_v7 = vsub.f32 0.0, %v3765_v52 }
 0x44b   :  { %v4961_v49 = vsel %vm4661_vm7, %v4511_v21, %v4811_v27  ;;  %v3313_v48 = vmul.f32 %v10691_v62, %v3163_v15  ;;  %v1218_v10 = vadd.f32 %v904_v44, %v317_v26  ;;  %v10750_v37 = vadd.f32 %v6742_v1, %v1215_v25 }
 0x44c   :  { %v10744_v6 = vmul.f32 0.70710677, %v10735_v29  ;;  %v10746_v51 = vpop.eup %6109  ;;  %v5261_v50 = vadd.f32 1.0, %v4961_v49  ;;  %v4810_v43 = vsub.f32 0.0, %v4510_v14  ;;  %v2712_v42 = vmul.f32 %v10726_v18, %v2562_v35 }
 0x44d   :  { %v3463_v40 = vadd.f32 0.2548296, %v3313_v48  ;;  %6115 = vpow2.f32 %v4190_v39  ;;  %v2415_v46 = vmul.f32 1.0614054, %v10746_v51  ;;  %v3764_v47 = vmul.f32 %v1664_v57, %v1664_v57 }
 0x44e   :  { %v1667_v9 = vand.u32 2147483647, %v10744_v6  ;;  %v5411_v30 = vmul.f32 %v5261_v50, %v5111_v19  ;;  %v4960_v24 = vsel %vm4660_vm8, %v4510_v14, %v4810_v43  ;;  %v2862_v23 = vadd.f32 1.4214138, %v2712_v42 }
 0x44f   :  { %v6112_v0 = vpop.eup %6111  ;;  %v5260_v41 = vadd.f32 1.0, %v4960_v24  ;;  %v3613_v53 = vmul.f32 %v10691_v62, %v3463_v40  ;;  %v2565_v45 = vadd.f32 -1.4531521, %v2415_v46  ;;  %v4196_v28 = vmul.f32 1.442695, %v3915_v7  ;;  %v902_v24 = vpop.permute.xlu0 %901 }
 0x450   :  { %v1817_v60 = vmul.f32 0.3275911, %v1667_v9  ;;  %5562 = vst.msk [vmem:[%s11234_s3 + $0x3f8] sm:$0xff] %vm5434_vm2, %v5411_v30  ;;  %v3012_v22 = vmul.f32 %v10726_v18, %v2862_v23  ;;  %v10763_v19 = vmul.f32 0.70710677, %v10750_v37  ;;  %v10766_v17 = vadd.f32 %v6742_v1, %v1218_v10  ;;  %v908_v23 = vpop.permute.xlu1 %907 }
 0x451   :  { %v5410_v57 = vmul.f32 %v5260_v41, %v5110_v31  ;;  %v4363_v61 = vmul.f32 %v6112_v0, %v3613_v53  ;;  %v2715_v62 = vmul.f32 %v10746_v51, %v2565_v45  ;;  %vm4663_vm9 = vcmp.ge.f32.partialorder %v10627_v12, 0.0  ;;  %v6308_v0 = vld [vmem:[%s11233_s2 + $0x448] sm:$0xff] }
 0x452   :  { %v1967_v56 = vadd.f32 1.0, %v1817_v60  ;;  %v10769_v4 = vpop.eup %6113  ;;  %v3162_v13 = vadd.f32 -0.28449672, %v3012_v22  ;;  %v3914_v52 = vsub.f32 0.0, %v3764_v47  ;;  %v1666_v32 = vand.u32 2147483647, %v10763_v19 }
 0x453   :  { %5561 = vst.msk [vmem:[%s11234_s3 + $0x3f0] sm:$0xff] %vm5434_vm2, %v5410_v57  ;;  %v4513_v16 = vsub.f32 1.0, %v4363_v61  ;;  %v2865_v5 = vadd.f32 1.4214138, %v2715_v62  ;;  %v2414_v31 = vmul.f32 1.0614054, %v10769_v4  ;;  %v3767_v44 = vmul.f32 %v1667_v9, %v1667_v9 }
 0x454   :  { %6117 = vrcp.f32 %v1967_v56  ;;  %v3312_v36 = vmul.f32 %v10726_v18, %v3162_v13  ;;  %v10780_v21 = vmul.f32 0.5, %v10660_v33  ;;  %v1816_v59 = vmul.f32 0.3275911, %v1666_v32 }
 0x455   :  { %6119 = vpow2.f32 %v4196_v28  ;;  %v4813_v34 = vsub.f32 0.0, %v4513_v16  ;;  %v3015_v11 = vmul.f32 %v10746_v51, %v2865_v5  ;;  %v2564_v26 = vadd.f32 -1.4531521, %v2414_v31 }
 0x456   :  { %v10784_v38 = vmul.f32 0.70710677, %v10766_v17  ;;  %v3462_v58 = vadd.f32 0.2548296, %v3312_v36  ;;  %v4194_v39 = vmul.f32 1.442695, %v3914_v52  ;;  %v3766_v50 = vmul.f32 %v1666_v32, %v1666_v32 }
 0x457   :  { %v1966_v27 = vadd.f32 1.0, %v1816_v59  ;;  %v6116_v15 = vpop.eup %6115  ;;  %v4963_v25 = vsel %vm4663_vm9, %v4513_v16, %v4813_v34  ;;  %v3165_v14 = vadd.f32 -0.28449672, %v3015_v11  ;;  %v2714_v33 = vmul.f32 %v10769_v4, %v2564_v26 }
 0x458   :  { %v1669_v35 = vand.u32 2147483647, %v10784_v38  ;;  %v5263_v7 = vadd.f32 1.0, %v4963_v25  ;;  %v3612_v49 = vmul.f32 %v10726_v18, %v3462_v58  ;;  %vm4662_vm10 = vcmp.ge.f32.partialorder %v10666_v2, 0.0 }
 0x459   :  { %6121 = vrcp.f32 %v1966_v27  ;;  %v3315_v48 = vmul.f32 %v10746_v51, %v3165_v14  ;;  %v2864_v10 = vadd.f32 1.4214138, %v2714_v33  ;;  %v10795_v40 = vmul.f32 0.5, %v10677_v54  ;;  %v6307_v54 = vld [vmem:[%s11233_s2 + $0x430] sm:$0xff] }
 0x45a   :  { %v1819_v43 = vmul.f32 0.3275911, %v1669_v35  ;;  %v5413_v42 = vmul.f32 %v5263_v7, %v10738_v3  ;;  %v4362_v12 = vmul.f32 %v6116_v15, %v3612_v49  ;;  %6123 = vpow2.f32 %v4194_v39 }
 0x45b   :  { %v3465_v46 = vadd.f32 0.2548296, %v3315_v48  ;;  %v3014_v9 = vmul.f32 %v10769_v4, %v2864_v10  ;;  %v3917_v30 = vsub.f32 0.0, %v3767_v44  ;;  %vm4665_vm11 = vcmp.ge.f32.partialorder %v10681_v55, 0.0 }
 0x45c   :  { %v1969_v18 = vadd.f32 1.0, %v1819_v43  ;;  %5564 = vst.msk [vmem:[%s11234_s3 + $0x408] sm:$0xff] %vm5434_vm2, %v5413_v42  ;;  %v4512_v47 = vsub.f32 1.0, %v4362_v12  ;;  %v316_v3 = vmul.f32 %v6307_v54, %v6710_v20  ;;  %v319_v41 = vmul.f32 %v6308_v0, %v6710_v20 }
 0x45d   :  { %v3615_v45 = vmul.f32 %v10746_v51, %v3465_v46  ;;  %v3164_v60 = vadd.f32 -0.28449672, %v3014_v9  ;;  %v3916_v22 = vsub.f32 0.0, %v3766_v50  ;;  %v10817_v32 = vmul.f32 0.5, %v10687_v63  ;;  %v906_v9 = vpop.permute.xlu0 %905 }
 0x45e   :  { %v10811_v53 = vpop.eup %6117  ;;  %6125 = vrcp.f32 %v1969_v18  ;;  %v4812_v57 = vsub.f32 0.0, %v4512_v47  ;;  %v1217_v62 = vadd.f32 %v902_v24, %v316_v3  ;;  %v1220_v56 = vadd.f32 %v908_v23, %v319_v41 }
 0x45f   :  { %v6120_v28 = vpop.eup %6119  ;;  %v2417_v61 = vmul.f32 1.0614054, %v10811_v53  ;;  %v3314_v52 = vmul.f32 %v10769_v4, %v3164_v60  ;;  %v4200_v16 = vmul.f32 1.442695, %v3917_v30  ;;  %v4198_v26 = vmul.f32 1.442695, %v3916_v22 }
 0x460   :  { %v4365_v13 = vmul.f32 %v6120_v28, %v3615_v45  ;;  %v4962_v5 = vsel %vm4662_vm10, %v4512_v47, %v4812_v57  ;;  %v10822_v31 = vadd.f32 %v6742_v1, %v1217_v62  ;;  %v10825_v36 = vadd.f32 %v6742_v1, %v1220_v56 }
 0x461   :  { %v2567_v51 = vadd.f32 -1.4531521, %v2417_v61  ;;  %v5262_v59 = vadd.f32 1.0, %v4962_v5  ;;  %v3464_v11 = vadd.f32 0.2548296, %v3314_v52  ;;  %vm4664_vm12 = vcmp.ge.f32.partialorder %v10702_v8, 0.0  ;;  %v912_v5 = vpop.permute.xlu1 %911 }
 0x462   :  { %v4515_v34 = vsub.f32 1.0, %v4365_v13  ;;  %v3769_v39 = vmul.f32 %v1669_v35, %v1669_v35  ;;  %v10832_v2 = vmul.f32 0.70710677, %v10822_v31  ;;  %v10835_v44 = vmul.f32 0.70710677, %v10825_v36  ;;  %v6309_v35 = vld [vmem:[%s11233_s2 + $0x440] sm:$0xff] }
 0x463   :  { %v10827_v58 = vpop.eup %6121  ;;  %v2717_v63 = vmul.f32 %v10811_v53, %v2567_v51  ;;  %v5412_v27 = vmul.f32 %v5262_v59, %v10780_v21  ;;  %v3614_v25 = vmul.f32 %v10769_v4, %v3464_v11  ;;  %6127 = vpow2.f32 %v4200_v16 }
 0x464   :  { %v4815_v15 = vsub.f32 0.0, %v4515_v34  ;;  %v2416_v14 = vmul.f32 1.0614054, %v10827_v58  ;;  %v6124_v33 = vpop.eup %6123  ;;  %v1668_v49 = vand.u32 2147483647, %v10832_v2  ;;  %v318_v48 = vmul.f32 %v6309_v35, %v6710_v20 }
 0x465   :  { %v2867_v7 = vadd.f32 1.4214138, %v2717_v63  ;;  %5563 = vst.msk [vmem:[%s11234_s3 + $0x400] sm:$0xff] %vm5434_vm2, %v5412_v27  ;;  %v4364_v21 = vmul.f32 %v6124_v33, %v3614_v25  ;;  %v1671_v50 = vand.u32 2147483647, %v10835_v44  ;;  %v3919_v12 = vsub.f32 0.0, %v3769_v39 }
 0x466   :  { %v4965_v4 = vsel %vm4665_vm11, %v4515_v34, %v4815_v15  ;;  %v2566_v10 = vadd.f32 -1.4531521, %v2416_v14  ;;  %v1818_v46 = vmul.f32 0.3275911, %v1668_v49  ;;  %6129 = vpow2.f32 %v4198_v26  ;;  %v6311_v33 = vld [vmem:[%s11233_s2 + $0x450] sm:$0xff] }
 0x467   :  { %v5265_v43 = vadd.f32 1.0, %v4965_v4  ;;  %v3017_v42 = vmul.f32 %v10811_v53, %v2867_v7  ;;  %v4514_v18 = vsub.f32 1.0, %v4364_v21  ;;  %v1821_v23 = vmul.f32 0.3275911, %v1671_v50  ;;  %v910_v21 = vpop.permute.xlu0 %909 }
 0x468   :  { %v10853_v30 = vpop.eup %6125  ;;  %v2716_v24 = vmul.f32 %v10827_v58, %v2566_v10  ;;  %v1968_v3 = vadd.f32 1.0, %v1818_v46  ;;  %v1219_v60 = vadd.f32 %v906_v9, %v318_v48  ;;  %v4204_v57 = vmul.f32 1.442695, %v3919_v12  ;;  %v6312_v10 = vld [vmem:[%s11233_s2 + $0x468] sm:$0xff]  ;;  %v916_v46 = vpop.permute.xlu1 %915 }
 0x469   :  { %v5415_v55 = vmul.f32 %v5265_v43, %v10795_v40  ;;  %v3167_v47 = vadd.f32 -0.28449672, %v3017_v42  ;;  %v2419_v54 = vmul.f32 1.0614054, %v10853_v30  ;;  %v4814_v0 = vsub.f32 0.0, %v4514_v18 }
 0x46a   :  { %v2866_v41 = vadd.f32 1.4214138, %v2716_v24  ;;  %v1971_v45 = vadd.f32 1.0, %v1821_v23  ;;  %6131 = vrcp.f32 %v1968_v3  ;;  %v3768_v62 = vmul.f32 %v1668_v49, %v1668_v49 }
 0x46b   :  { %5566 = vst.msk [vmem:[%s11234_s3 + $0x418] sm:$0xff] %vm5434_vm2, %v5415_v55  ;;  %v3317_v22 = vmul.f32 %v10811_v53, %v3167_v47  ;;  %v2569_v28 = vadd.f32 -1.4531521, %v2419_v54  ;;  %v4964_v40 = vsel %vm4664_vm12, %v4514_v18, %v4814_v0  ;;  %v3771_v16 = vmul.f32 %v1671_v50, %v1671_v50 }
 0x46c   :  { %v3016_v61 = vmul.f32 %v10827_v58, %v2866_v41  ;;  %6133 = vrcp.f32 %v1971_v45  ;;  %v5264_v56 = vadd.f32 1.0, %v4964_v40  ;;  %v5117_v51 = vmul.f32 0.5, %v10735_v29  ;;  %v6310_v29 = vld [vmem:[%s11233_s2 + $0x458] sm:$0xff] }
 0x46d   :  { %v3467_v13 = vadd.f32 0.2548296, %v3317_v22  ;;  %v2719_v52 = vmul.f32 %v10853_v30, %v2569_v28  ;;  %v10869_v34 = vadd.f32 %v6742_v1, %v1219_v60  ;;  %v6128_v11 = vpop.eup %6127  ;;  %6135 = vpow2.f32 %v4204_v57 }
 0x46e   :  { %v3166_v59 = vadd.f32 -0.28449672, %v3016_v61  ;;  %v5414_v8 = vmul.f32 %v5264_v56, %v10817_v32  ;;  %v3918_v27 = vsub.f32 0.0, %v3768_v62  ;;  %v321_v25 = vmul.f32 %v6310_v29, %v6710_v20 }
 0x46f   :  { %v3617_v26 = vmul.f32 %v10811_v53, %v3467_v13  ;;  %v2869_v63 = vadd.f32 1.4214138, %v2719_v52  ;;  %v10875_v15 = vmul.f32 0.70710677, %v10869_v34  ;;  %v3921_v14 = vsub.f32 0.0, %v3771_v16 }
 0x470   :  { %v3316_v39 = vmul.f32 %v10827_v58, %v3166_v59  ;;  %5565 = vst.msk [vmem:[%s11234_s3 + $0x410] sm:$0xff] %vm5434_vm2, %v5414_v8  ;;  %v320_v7 = vmul.f32 %v6311_v33, %v6710_v20  ;;  %v6130_v49 = vpop.eup %6129  ;;  %v1222_v4 = vadd.f32 %v912_v5, %v321_v25  ;;  %v323_v50 = vmul.f32 %v6312_v10, %v6710_v20 }
 0x471   :  { %v4367_v53 = vmul.f32 %v6128_v11, %v3617_v26  ;;  %v3019_v32 = vmul.f32 %v10853_v30, %v2869_v63  ;;  %v1670_v48 = vand.u32 2147483647, %v10875_v15  ;;  %vm4667_vm13 = vcmp.ge.f32.partialorder %v10744_v6, 0.0 }
 0x472   :  { %v3466_v35 = vadd.f32 0.2548296, %v3316_v39  ;;  %v5116_v42 = vmul.f32 0.5, %v10750_v37  ;;  %v4202_v18 = vmul.f32 1.442695, %v3918_v27  ;;  %v10899_v23 = vadd.f32 %v6742_v1, %v1222_v4 }
 0x473   :  { %v4517_v43 = vsub.f32 1.0, %v4367_v53  ;;  %v3169_v12 = vadd.f32 -0.28449672, %v3019_v32  ;;  %v1820_v24 = vmul.f32 0.3275911, %v1670_v48  ;;  %v1221_v0 = vadd.f32 %v910_v21, %v320_v7 }
 0x474   :  { %v3616_v9 = vmul.f32 %v10827_v58, %v3466_v35  ;;  %v10901_v55 = vpop.eup %6131  ;;  %v4208_v3 = vmul.f32 1.442695, %v3921_v14  ;;  %v1224_v22 = vadd.f32 %v916_v46, %v323_v50  ;;  %v10911_v40 = vmul.f32 0.70710677, %v10899_v23 }
 0x475   :  { %v4817_v47 = vsub.f32 0.0, %v4517_v43  ;;  %v3319_v54 = vmul.f32 %v10853_v30, %v3169_v12  ;;  %v2418_v37 = vmul.f32 1.0614054, %v10901_v55  ;;  %v1970_v60 = vadd.f32 1.0, %v1820_v24 }
 0x476   :  { %v10904_v41 = vpop.eup %6133  ;;  %v4366_v45 = vmul.f32 %v6130_v49, %v3616_v9  ;;  %v3770_v5 = vmul.f32 %v1670_v48, %v1670_v48  ;;  %v1673_v59 = vand.u32 2147483647, %v10911_v40  ;;  %v10917_v26 = vadd.f32 %v6742_v1, %v1221_v0 }
 0x477   :  { %v4967_v58 = vsel %vm4667_vm13, %v4517_v43, %v4817_v47  ;;  %v3469_v28 = vadd.f32 0.2548296, %v3319_v54  ;;  %v2421_v57 = vmul.f32 1.0614054, %v10904_v41  ;;  %v2568_v56 = vadd.f32 -1.4531521, %v2418_v37  ;;  %v6136_v13 = vpop.eup %6135 }
 0x478   :  { %v5267_v61 = vadd.f32 1.0, %v4967_v58  ;;  %v4516_v62 = vsub.f32 1.0, %v4366_v45  ;;  %6137 = vrcp.f32 %v1970_v60  ;;  %vm4666_vm14 = vcmp.ge.f32.partialorder %v10763_v19, 0.0  ;;  %v6313_v60 = vld [vmem:[%s11233_s2 + $0x460] sm:$0xff] }
 0x479   :  { %v3619_v52 = vmul.f32 %v10853_v30, %v3469_v28  ;;  %v2571_v16 = vadd.f32 -1.4531521, %v2421_v57  ;;  %v2718_v8 = vmul.f32 %v10901_v55, %v2568_v56  ;;  %v1823_v27 = vmul.f32 0.3275911, %v1673_v59  ;;  %v914_v57 = vpop.permute.xlu0 %913 }
 0x47a   :  { %v5417_v11 = vmul.f32 %v5267_v61, %v5117_v51  ;;  %v4816_v6 = vsub.f32 0.0, %v4516_v62  ;;  %6139 = vpow2.f32 %v4202_v18  ;;  %v10926_v51 = vadd.f32 %v6742_v1, %v1224_v22 }
 0x47b   :  { %v4369_v63 = vmul.f32 %v6136_v13, %v3619_v52  ;;  %v2721_v39 = vmul.f32 %v10904_v41, %v2571_v16  ;;  %v2868_v29 = vadd.f32 1.4214138, %v2718_v8  ;;  %v1973_v14 = vadd.f32 1.0, %v1823_v27  ;;  %v920_v8 = vpop.permute.xlu1 %919 }
 0x47c   :  { %5568 = vst.msk [vmem:[%s11234_s3 + $0x428] sm:$0xff] %vm5434_vm2, %v5417_v11  ;;  %v4966_v30 = vsel %vm4666_vm14, %v4516_v62, %v4816_v6  ;;  %6141 = vpow2.f32 %v4208_v3  ;;  %v3920_v33 = vsub.f32 0.0, %v3770_v5  ;;  %v10930_v7 = vmul.f32 0.70710677, %v10917_v26 }
 0x47d   :  { %v5266_v25 = vadd.f32 1.0, %v4966_v30  ;;  %v4519_v53 = vsub.f32 1.0, %v4369_v63  ;;  %v2871_v32 = vadd.f32 1.4214138, %v2721_v39  ;;  %v3018_v19 = vmul.f32 %v10901_v55, %v2868_v29 }
 0x47e   :  { %6143 = vrcp.f32 %v1973_v14  ;;  %vm4669_vm15 = vcmp.ge.f32.partialorder %v10784_v38, 0.0  ;;  %v1672_v21 = vand.u32 2147483647, %v10930_v7  ;;  %v3773_v43 = vmul.f32 %v1673_v59, %v1673_v59 }
 0x47f   :  { %v5416_v49 = vmul.f32 %v5266_v25, %v5116_v42  ;;  %v4819_v35 = vsub.f32 0.0, %v4519_v53  ;;  %v3021_v48 = vmul.f32 %v10904_v41, %v2871_v32  ;;  %v3168_v4 = vadd.f32 -0.28449672, %v3018_v19 }
 0x480   :  { %v10940_v12 = vmul.f32 0.70710677, %v10926_v51  ;;  %v5119_v46 = vmul.f32 0.5, %v10766_v17  ;;  %v1822_v18 = vmul.f32 0.3275911, %v1672_v21  ;;  %v322_v17 = vmul.f32 %v6313_v60, %v6710_v20 }
 0x481   :  { %5567 = vst.msk [vmem:[%s11234_s3 + $0x420] sm:$0xff] %vm5434_vm2, %v5416_v49  ;;  %v4969_v10 = vsel %vm4669_vm15, %v4519_v53, %v4819_v35  ;;  %v3171_v50 = vadd.f32 -0.28449672, %v3021_v48  ;;  %v3318_v38 = vmul.f32 %v10901_v55, %v3168_v4  ;;  %v4206_v54 = vmul.f32 1.442695, %v3920_v33 }
 0x482   :  { %v10942_v42 = vpop.eup %6137  ;;  %v5269_v9 = vadd.f32 1.0, %v4969_v10  ;;  %v1675_v3 = vand.u32 2147483647, %v10940_v12  ;;  %v1972_v37 = vadd.f32 1.0, %v1822_v18  ;;  %v3923_v28 = vsub.f32 0.0, %v3773_v43 }
 0x483   :  { %v3321_v24 = vmul.f32 %v10904_v41, %v3171_v50  ;;  %v2420_v47 = vmul.f32 1.0614054, %v10942_v42  ;;  %v3468_v45 = vadd.f32 0.2548296, %v3318_v38  ;;  %v5118_v56 = vmul.f32 0.5, %v10822_v31 }
 0x484   :  { %v5419_v0 = vmul.f32 %v5269_v9, %v5119_v46  ;;  %v6140_v61 = vpop.eup %6139  ;;  %6145 = vrcp.f32 %v1972_v37  ;;  %v1825_v13 = vmul.f32 0.3275911, %v1675_v3  ;;  %vm4668_vm0 = vcmp.ge.f32.partialorder %v10832_v2, 0.0 }
 0x485   :  { %v3471_v22 = vadd.f32 0.2548296, %v3321_v24  ;;  %v2570_v58 = vadd.f32 -1.4531521, %v2420_v47  ;;  %v3618_v62 = vmul.f32 %v10901_v55, %v3468_v45  ;;  %vm4671_vm1 = vcmp.ge.f32.partialorder %v10835_v44, 0.0  ;;  %v6314_v55 = vld [vmem:[%s11233_s2 + $0x478] sm:$0xff] }
 0x486   :  { %5570 = vst.msk [vmem:[%s11234_s3 + $0x438] sm:$0xff] %vm5434_vm2, %v5419_v0  ;;  %v6142_v5 = vpop.eup %6141  ;;  %v1975_v11 = vadd.f32 1.0, %v1825_v13  ;;  %v1223_v6 = vadd.f32 %v914_v57, %v322_v17  ;;  %v325_v31 = vmul.f32 %v6314_v55, %v6710_v20  ;;  %6147 = vpow2.f32 %v4206_v54  ;;  %v918_v55 = vpop.permute.xlu0 %917 }
 0x487   :  { %v3621_v52 = vmul.f32 %v10904_v41, %v3471_v22  ;;  %v2720_v16 = vmul.f32 %v10942_v42, %v2570_v58  ;;  %v4368_v59 = vmul.f32 %v6140_v61, %v3618_v62  ;;  %v4212_v41 = vmul.f32 1.442695, %v3923_v28 }
 0x488   :  { %v10967_v63 = vpop.eup %6143  ;;  %6149 = vrcp.f32 %v1975_v11  ;;  %v10971_v25 = vadd.f32 %v6742_v1, %v1223_v6  ;;  %v5121_v32 = vmul.f32 0.5, %v10825_v36  ;;  %v1226_v19 = vadd.f32 %v920_v8, %v325_v31 }
 0x489   :  { %v4371_v39 = vmul.f32 %v6142_v5, %v3621_v52  ;;  %v2870_v27 = vadd.f32 1.4214138, %v2720_v16  ;;  %v4518_v30 = vsub.f32 1.0, %v4368_v59  ;;  %v2423_v29 = vmul.f32 1.0614054, %v10967_v63  ;;  %v6315_v59 = vld [vmem:[%s11233_s2 + $0x470] sm:$0xff] }
 0x48a   :  { %v3772_v35 = vmul.f32 %v1672_v21, %v1672_v21  ;;  %v10976_v48 = vmul.f32 0.70710677, %v10971_v25  ;;  %6151 = vpow2.f32 %v4212_v41  ;;  %v10979_v50 = vadd.f32 %v6742_v1, %v1226_v19 }
 0x48b   :  { %v4521_v53 = vsub.f32 1.0, %v4371_v39  ;;  %v3020_v14 = vmul.f32 %v10942_v42, %v2870_v27  ;;  %v4818_v33 = vsub.f32 0.0, %v4518_v30  ;;  %v2573_v49 = vadd.f32 -1.4531521, %v2423_v29 }
 0x48c   :  { %v3775_v46 = vmul.f32 %v1675_v3, %v1675_v3  ;;  %v1674_v9 = vand.u32 2147483647, %v10976_v48  ;;  %v10989_v24 = vmul.f32 0.70710677, %v10979_v50  ;;  %v3922_v2 = vsub.f32 0.0, %v3772_v35 }
 0x48d   :  { %v4821_v4 = vsub.f32 0.0, %v4521_v53  ;;  %v3170_v10 = vadd.f32 -0.28449672, %v3020_v14  ;;  %v4968_v43 = vsel %vm4668_vm0, %v4518_v30, %v4818_v33  ;;  %v2723_v36 = vmul.f32 %v10967_v63, %v2573_v49  ;;  %v6316_v33 = vld [vmem:[%s11233_s2 + $0x488] sm:$0xff] }
 0x48e   :  { %v5268_v38 = vadd.f32 1.0, %v4968_v43  ;;  %v10991_v47 = vpop.eup %6145  ;;  %v1824_v45 = vmul.f32 0.3275911, %v1674_v9  ;;  %v1677_v17 = vand.u32 2147483647, %v10989_v24  ;;  %v3925_v58 = vsub.f32 0.0, %v3775_v46 }
 0x48f   :  { %v4971_v21 = vsel %vm4671_vm1, %v4521_v53, %v4821_v4  ;;  %v3320_v18 = vmul.f32 %v10942_v42, %v3170_v10  ;;  %v2873_v0 = vadd.f32 1.4214138, %v2723_v36  ;;  %v2422_v3 = vmul.f32 1.0614054, %v10991_v47 }
 0x490   :  { %v5271_v54 = vadd.f32 1.0, %v4971_v21  ;;  %v5418_v37 = vmul.f32 %v5268_v38, %v5118_v56  ;;  %v1974_v28 = vadd.f32 1.0, %v1824_v45  ;;  %v6148_v57 = vpop.eup %6147  ;;  %v5120_v62 = vmul.f32 0.5, %v10869_v34 }
 0x491   :  { %v3470_v60 = vadd.f32 0.2548296, %v3320_v18  ;;  %v3023_v44 = vmul.f32 %v10967_v63, %v2873_v0  ;;  %v2572_v56 = vadd.f32 -1.4531521, %v2422_v3  ;;  %v1827_v13 = vmul.f32 0.3275911, %v1677_v17 }
 0x492   :  { %v5421_v22 = vmul.f32 %v5271_v54, %v5121_v32  ;;  %5569 = vst.msk [vmem:[%s11234_s3 + $0x430] sm:$0xff] %vm5434_vm2, %v5418_v37  ;;  %v11002_v52 = vpop.eup %6149  ;;  %v4210_v5 = vmul.f32 1.442695, %v3922_v2  ;;  %6153 = vrcp.f32 %v1974_v28  ;;  %vm4670_vm3 = vcmp.ge.f32.partialorder %v10875_v15, 0.0  ;;  %v924_v32 = vpop.permute.xlu1 %923 }
 0x493   :  { %v3620_v61 = vmul.f32 %v10942_v42, %v3470_v60  ;;  %v3173_v16 = vadd.f32 -0.28449672, %v3023_v44  ;;  %v324_v42 = vmul.f32 %v6315_v59, %v6710_v20  ;;  %v2722_v34 = vmul.f32 %v10991_v47, %v2572_v56 }
 0x494   :  { %5572 = vst.msk [vmem:[%s11234_s3 + $0x448] sm:$0xff] %vm5434_vm2, %v5421_v22  ;;  %v2425_v6 = vmul.f32 1.0614054, %v11002_v52  ;;  %v1977_v8 = vadd.f32 1.0, %v1827_v13  ;;  %v11017_v39 = vmul.f32 0.5, %v10899_v23  ;;  %v6152_v41 = vpop.eup %6151  ;;  %v327_v49 = vmul.f32 %v6316_v33, %v6710_v20 }
 0x495   :  { %v4370_v11 = vmul.f32 %v6148_v57, %v3620_v61  ;;  %v3323_v31 = vmul.f32 %v10967_v63, %v3173_v16  ;;  %v4216_v27 = vmul.f32 1.442695, %v3925_v58  ;;  %v2872_v29 = vadd.f32 1.4214138, %v2722_v34 }
 0x496   :  { %v2575_v53 = vadd.f32 -1.4531521, %v2425_v6  ;;  %6155 = vrcp.f32 %v1977_v8  ;;  %v1225_v19 = vadd.f32 %v918_v55, %v324_v42  ;;  %vm4673_vm4 = vcmp.ge.f32.partialorder %v10911_v40, 0.0 }
 0x497   :  { %v4520_v30 = vsub.f32 1.0, %v4370_v11  ;;  %v3473_v14 = vadd.f32 0.2548296, %v3323_v31  ;;  %6157 = vpow2.f32 %v4210_v5  ;;  %v3022_v23 = vmul.f32 %v10991_v47, %v2872_v29 }
 0x498   :  { %v2725_v4 = vmul.f32 %v11002_v52, %v2575_v53  ;;  %v3774_v10 = vmul.f32 %v1674_v9, %v1674_v9  ;;  %v3777_v36 = vmul.f32 %v1677_v17, %v1677_v17  ;;  %v11028_v46 = vadd.f32 %v6742_v1, %v1225_v19  ;;  %v922_v17 = vpop.permute.xlu0 %921 }
 0x499   :  { %v4820_v35 = vsub.f32 0.0, %v4520_v30  ;;  %v3623_v43 = vmul.f32 %v10967_v63, %v3473_v14  ;;  %v1228_v38 = vadd.f32 %v924_v32, %v327_v49  ;;  %v3172_v18 = vadd.f32 -0.28449672, %v3022_v23  ;;  %v6317_v63 = vld [vmem:[%s11233_s2 + $0x480] sm:$0xff] }
 0x49a   :  { %v2875_v54 = vadd.f32 1.4214138, %v2725_v4  ;;  %6159 = vpow2.f32 %v4216_v27  ;;  %v11033_v45 = vmul.f32 0.70710677, %v11028_v46  ;;  %v326_v9 = vmul.f32 %v6317_v63, %v6710_v20 }
 0x49b   :  { %v4970_v21 = vsel %vm4670_vm3, %v4520_v30, %v4820_v35  ;;  %v4373_v2 = vmul.f32 %v6152_v41, %v3623_v43  ;;  %v3322_v37 = vmul.f32 %v10991_v47, %v3172_v18  ;;  %v3924_v15 = vsub.f32 0.0, %v3774_v10 }
 0x49c   :  { %v5270_v0 = vadd.f32 1.0, %v4970_v21  ;;  %v3025_v60 = vmul.f32 %v11002_v52, %v2875_v54  ;;  %v11042_v3 = vadd.f32 %v6742_v1, %v1228_v38  ;;  %v11044_v22 = vpop.eup %6153  ;;  %v3927_v28 = vsub.f32 0.0, %v3777_v36 }
 0x49d   :  { %v4523_v58 = vsub.f32 1.0, %v4373_v2  ;;  %v1676_v57 = vand.u32 2147483647, %v11033_v45  ;;  %v3472_v61 = vadd.f32 0.2548296, %v3322_v37  ;;  %v1227_v42 = vadd.f32 %v922_v17, %v326_v9  ;;  %v928_v37 = vpop.permute.xlu1 %927 }
 0x49e   :  { %v5420_v44 = vmul.f32 %v5270_v0, %v5120_v62  ;;  %v3175_v56 = vadd.f32 -0.28449672, %v3025_v60  ;;  %v2424_v13 = vmul.f32 1.0614054, %v11044_v22  ;;  %v11053_v59 = vmul.f32 0.70710677, %v11042_v3 }
 0x49f   :  { %v4823_v16 = vsub.f32 0.0, %v4523_v58  ;;  %v1826_v5 = vmul.f32 0.3275911, %v1676_v57  ;;  %v3622_v11 = vmul.f32 %v10991_v47, %v3472_v61  ;;  %v4214_v8 = vmul.f32 1.442695, %v3924_v15 }
 0x4a0   :  { %5571 = vst.msk [vmem:[%s11234_s3 + $0x440] sm:$0xff] %vm5434_vm2, %v5420_v44  ;;  %v11055_v62 = vpop.eup %6155  ;;  %v3325_v34 = vmul.f32 %v11002_v52, %v3175_v56  ;;  %v2574_v6 = vadd.f32 -1.4531521, %v2424_v13  ;;  %v4220_v41 = vmul.f32 1.442695, %v3927_v28  ;;  %v11065_v33 = vadd.f32 %v6742_v1, %v1227_v42 }
 0x4a1   :  { %v6158_v55 = vpop.eup %6157  ;;  %v4973_v31 = vsel %vm4673_vm4, %v4523_v58, %v4823_v16  ;;  %v2427_v27 = vmul.f32 1.0614054, %v11055_v62  ;;  %v1976_v30 = vadd.f32 1.0, %v1826_v5  ;;  %v1679_v47 = vand.u32 2147483647, %v11053_v59 }
 0x4a2   :  { %v5273_v29 = vadd.f32 1.0, %v4973_v31  ;;  %v4372_v53 = vmul.f32 %v6158_v55, %v3622_v11  ;;  %v3475_v32 = vadd.f32 0.2548296, %v3325_v34  ;;  %v2724_v14 = vmul.f32 %v11044_v22, %v2574_v6 }
 0x4a3   :  { %v2577_v19 = vadd.f32 -1.4531521, %v2427_v27  ;;  %6161 = vrcp.f32 %v1976_v30  ;;  %vm4672_vm5 = vcmp.ge.f32.partialorder %v10930_v7, 0.0  ;;  %v1829_v43 = vmul.f32 0.3275911, %v1679_v47  ;;  %v6318_v7 = vld [vmem:[%s11233_s2 + $0x498] sm:$0xff]  ;;  %v926_v30 = vpop.permute.xlu0 %925 }
 0x4a4   :  { %v6160_v49 = vpop.eup %6159  ;;  %v5423_v40 = vmul.f32 %v5273_v29, %v11017_v39  ;;  %v4522_v35 = vsub.f32 1.0, %v4372_v53  ;;  %v3625_v23 = vmul.f32 %v11002_v52, %v3475_v32  ;;  %v2874_v4 = vadd.f32 1.4214138, %v2724_v14 }
 0x4a5   :  { %6163 = vpow2.f32 %v4214_v8  ;;  %v2727_v10 = vmul.f32 %v11055_v62, %v2577_v19  ;;  %v3776_v39 = vmul.f32 %v1676_v57, %v1676_v57  ;;  %v1979_v54 = vadd.f32 1.0, %v1829_v43 }
 0x4a6   :  { %5574 = vst.msk [vmem:[%s11234_s3 + $0x458] sm:$0xff] %vm5434_vm2, %v5423_v40  ;;  %v4822_v36 = vsub.f32 0.0, %v4522_v35  ;;  %v4375_v38 = vmul.f32 %v6160_v49, %v3625_v23  ;;  %v3024_v21 = vmul.f32 %v11044_v22, %v2874_v4  ;;  %v11077_v52 = vmul.f32 0.70710677, %v11065_v33 }
 0x4a7   :  { %v2877_v18 = vadd.f32 1.4214138, %v2727_v10  ;;  %v329_v0 = vmul.f32 %v6318_v7, %v6710_v20  ;;  %6165 = vpow2.f32 %v4220_v41  ;;  %v5122_v60 = vmul.f32 0.5, %v10917_v26 }
 0x4a8   :  { %v4972_v2 = vsel %vm4672_vm5, %v4522_v35, %v4822_v36  ;;  %v4525_v63 = vsub.f32 1.0, %v4375_v38  ;;  %v3174_v9 = vadd.f32 -0.28449672, %v3024_v21  ;;  %6167 = vrcp.f32 %v1979_v54  ;;  %v6320_v36 = vld [vmem:[%s11233_s2 + $0x4a8] sm:$0xff] }
 0x4a9   :  { %v5272_v15 = vadd.f32 1.0, %v4972_v2  ;;  %v3027_v17 = vmul.f32 %v11055_v62, %v2877_v18  ;;  %v3926_v28 = vsub.f32 0.0, %v3776_v39  ;;  %v1678_v57 = vand.u32 2147483647, %v11077_v52 }
 0x4aa   :  { %v4825_v44 = vsub.f32 0.0, %v4525_v63  ;;  %v3324_v58 = vmul.f32 %v11044_v22, %v3174_v9  ;;  %vm4675_vm6 = vcmp.ge.f32.partialorder %v10940_v12, 0.0  ;;  %v1230_v13 = vadd.f32 %v928_v37, %v329_v0  ;;  %v6319_v12 = vld [vmem:[%s11233_s2 + $0x490] sm:$0xff] }
 0x4ab   :  { %v5422_v61 = vmul.f32 %v5272_v15, %v5122_v60  ;;  %v3177_v56 = vadd.f32 -0.28449672, %v3027_v17  ;;  %v5125_v5 = vmul.f32 0.5, %v10926_v51  ;;  %v1828_v26 = vmul.f32 0.3275911, %v1678_v57 }
 0x4ac   :  { %v4975_v16 = vsel %vm4675_vm6, %v4525_v63, %v4825_v44  ;;  %v3474_v42 = vadd.f32 0.2548296, %v3324_v58  ;;  %v11097_v8 = vadd.f32 %v6742_v1, %v1230_v13  ;;  %v328_v51 = vmul.f32 %v6319_v12, %v6710_v20 }
 0x4ad   :  { %v11089_v11 = vpop.eup %6161  ;;  %5573 = vst.msk [vmem:[%s11234_s3 + $0x450] sm:$0xff] %vm5434_vm2, %v5422_v61  ;;  %v5275_v34 = vadd.f32 1.0, %v4975_v16  ;;  %v3327_v6 = vmul.f32 %v11055_v62, %v3177_v56  ;;  %v4218_v27 = vmul.f32 1.442695, %v3926_v28  ;;  %v1978_v41 = vadd.f32 1.0, %v1828_v26 }
 0x4ae   :  { %v3624_v55 = vmul.f32 %v11044_v22, %v3474_v42  ;;  %v2426_v31 = vmul.f32 1.0614054, %v11089_v11  ;;  %v3779_v14 = vmul.f32 %v1679_v47, %v1679_v47  ;;  %v11106_v19 = vmul.f32 0.70710677, %v11097_v8 }
 0x4af   :  { %v6164_v29 = vpop.eup %6163  ;;  %v5425_v53 = vmul.f32 %v5275_v34, %v5125_v5  ;;  %v3477_v32 = vadd.f32 0.2548296, %v3327_v6  ;;  %v5124_v40 = vmul.f32 0.5, %v10971_v25  ;;  %6169 = vrcp.f32 %v1978_v41  ;;  %v932_v25 = vpop.permute.xlu1 %931 }
 0x4b0   :  { %v4374_v49 = vmul.f32 %v6164_v29, %v3624_v55  ;;  %v2576_v35 = vadd.f32 -1.4531521, %v2426_v31  ;;  %vm4674_vm7 = vcmp.ge.f32.partialorder %v10976_v48, 0.0  ;;  %v1681_v23 = vand.u32 2147483647, %v11106_v19 }
 0x4b1   :  { %5576 = vst.msk [vmem:[%s11234_s3 + $0x468] sm:$0xff] %vm5434_vm2, %v5425_v53  ;;  %v3627_v22 = vmul.f32 %v11055_v62, %v3477_v32  ;;  %v1229_v47 = vadd.f32 %v926_v30, %v328_v51  ;;  %v6166_v4 = vpop.eup %6165  ;;  %6171 = vpow2.f32 %v4218_v27  ;;  %v331_v38 = vmul.f32 %v6320_v36, %v6710_v20 }
 0x4b2   :  { %v4524_v10 = vsub.f32 1.0, %v4374_v49  ;;  %v2726_v43 = vmul.f32 %v11089_v11, %v2576_v35  ;;  %v11121_v21 = vpop.eup %6167  ;;  %v3929_v18 = vsub.f32 0.0, %v3779_v14  ;;  %v1831_v62 = vmul.f32 0.3275911, %v1681_v23  ;;  %v930_v35 = vpop.permute.xlu0 %929 }
 0x4b3   :  { %v4377_v39 = vmul.f32 %v6166_v4, %v3627_v22  ;;  %v11124_v54 = vadd.f32 %v6742_v1, %v1229_v47  ;;  %v2429_v2 = vmul.f32 1.0614054, %v11121_v21  ;;  %v3778_v63 = vmul.f32 %v1678_v57, %v1678_v57  ;;  %v6321_v47 = vld [vmem:[%s11233_s2 + $0x4a0] sm:$0xff] }
 0x4b4   :  { %v4824_v7 = vsub.f32 0.0, %v4524_v10  ;;  %v2876_v0 = vadd.f32 1.4214138, %v2726_v43  ;;  %v1981_v37 = vadd.f32 1.0, %v1831_v62  ;;  %v1232_v15 = vadd.f32 %v932_v25, %v331_v38 }
 0x4b5   :  { %v4527_v9 = vsub.f32 1.0, %v4377_v39  ;;  %v11128_v60 = vmul.f32 0.70710677, %v11124_v54  ;;  %vm4677_vm8 = vcmp.ge.f32.partialorder %v10989_v24, 0.0  ;;  %v2579_v58 = vadd.f32 -1.4531521, %v2429_v2 }
 0x4b6   :  { %v4974_v17 = vsel %vm4674_vm7, %v4524_v10, %v4824_v7  ;;  %v3026_v44 = vmul.f32 %v11089_v11, %v2876_v0  ;;  %v4224_v56 = vmul.f32 1.442695, %v3929_v18  ;;  %6173 = vrcp.f32 %v1981_v37 }
 0x4b7   :  { %v5274_v28 = vadd.f32 1.0, %v4974_v17  ;;  %v4827_v61 = vsub.f32 0.0, %v4527_v9  ;;  %v5127_v57 = vmul.f32 0.5, %v10979_v50  ;;  %v2729_v16 = vmul.f32 %v11121_v21, %v2579_v58 }
 0x4b8   :  { %v3176_v13 = vadd.f32 -0.28449672, %v3026_v44  ;;  %v1680_v5 = vand.u32 2147483647, %v11128_v60  ;;  %v3928_v48 = vsub.f32 0.0, %v3778_v63  ;;  %v11138_v34 = vadd.f32 %v6742_v1, %v1232_v15 }
 0x4b9   :  { %v5424_v42 = vmul.f32 %v5274_v28, %v5124_v40  ;;  %v4977_v26 = vsel %vm4677_vm8, %v4527_v9, %v4827_v61  ;;  %v11140_v24 = vpop.eup %6169  ;;  %v2879_v51 = vadd.f32 1.4214138, %v2729_v16  ;;  %6175 = vpow2.f32 %v4224_v56 }
 0x4ba   :  { %v5277_v6 = vadd.f32 1.0, %v4977_v26  ;;  %v3326_v12 = vmul.f32 %v11089_v11, %v3176_v13  ;;  %v1830_v55 = vmul.f32 0.3275911, %v1680_v5  ;;  %v2428_v50 = vmul.f32 1.0614054, %v11140_v24 }
 0x4bb   :  { %5575 = vst.msk [vmem:[%s11234_s3 + $0x460] sm:$0xff] %vm5434_vm2, %v5424_v42  ;;  %v3781_v31 = vmul.f32 %v1681_v23, %v1681_v23  ;;  %v11149_v27 = vmul.f32 0.70710677, %v11138_v34  ;;  %v6172_v41 = vpop.eup %6171  ;;  %v3029_v53 = vmul.f32 %v11121_v21, %v2879_v51  ;;  %v4222_v49 = vmul.f32 1.442695, %v3928_v48 }
 0x4bc   :  { %v5427_v30 = vmul.f32 %v5277_v6, %v5127_v57  ;;  %v3476_v29 = vadd.f32 0.2548296, %v3326_v12  ;;  %v1980_v32 = vadd.f32 1.0, %v1830_v55  ;;  %v2578_v14 = vadd.f32 -1.4531521, %v2428_v50 }
 0x4bd   :  { %v1683_v40 = vand.u32 2147483647, %v11149_v27  ;;  %v3179_v23 = vadd.f32 -0.28449672, %v3029_v53  ;;  %v330_v4 = vmul.f32 %v6321_v47, %v6710_v20  ;;  %v3931_v43 = vsub.f32 0.0, %v3781_v31 }
 0x4be   :  { %5578 = vst.msk [vmem:[%s11234_s3 + $0x478] sm:$0xff] %vm5434_vm2, %v5427_v30  ;;  %v3626_v22 = vmul.f32 %v11089_v11, %v3476_v29  ;;  %6177 = vrcp.f32 %v1980_v32  ;;  %v2728_v10 = vmul.f32 %v11140_v24, %v2578_v14  ;;  %v3780_v37 = vmul.f32 %v1680_v5, %v1680_v5 }
 0x4bf   :  { %v1833_v25 = vmul.f32 0.3275911, %v1683_v40  ;;  %v3329_v38 = vmul.f32 %v11121_v21, %v3179_v23  ;;  %v1231_v39 = vadd.f32 %v930_v35, %v330_v4  ;;  %6179 = vpow2.f32 %v4222_v49 }
 0x4c0   :  { %v4376_v36 = vmul.f32 %v6172_v41, %v3626_v22  ;;  %v11164_v18 = vpop.eup %6173  ;;  %v2878_v62 = vadd.f32 1.4214138, %v2728_v10  ;;  %v4228_v9 = vmul.f32 1.442695, %v3931_v43  ;;  %vm4676_vm9 = vcmp.ge.f32.partialorder %v11033_v45, 0.0 }
 0x4c1   :  { %v1983_v11 = vadd.f32 1.0, %v1833_v25  ;;  %v3479_v0 = vadd.f32 0.2548296, %v3329_v38  ;;  %v2431_v2 = vmul.f32 1.0614054, %v11164_v18  ;;  %v11168_v63 = vadd.f32 %v6742_v1, %v1231_v39 }
 0x4c2   :  { %v4526_v7 = vsub.f32 1.0, %v4376_v36  ;;  %v3028_v20 = vmul.f32 %v11140_v24, %v2878_v62  ;;  %v5126_v16 = vmul.f32 0.5, %v11028_v46  ;;  %v3930_v6 = vsub.f32 0.0, %v3780_v37 }
 0x4c3   :  { %6181 = vrcp.f32 %v1983_v11  ;;  %v3629_v17 = vmul.f32 %v11121_v21, %v3479_v0  ;;  %v2581_v44 = vadd.f32 -1.4531521, %v2431_v2  ;;  %v11173_v58 = vmul.f32 0.70710677, %v11168_v63  ;;  %v6176_v28 = vpop.eup %6175 }
 0x4c4   :  { %v4826_v15 = vsub.f32 0.0, %v4526_v7  ;;  %v3178_v61 = vadd.f32 -0.28449672, %v3028_v20  ;;  %6183 = vpow2.f32 %v4228_v9  ;;  %v3783_v50 = vmul.f32 %v1683_v40, %v1683_v40 }
 0x4c5   :  { %v4379_v57 = vmul.f32 %v6176_v28, %v3629_v17  ;;  %v2731_v1 = vmul.f32 %v11164_v18, %v2581_v44  ;;  %v1682_v13 = vand.u32 2147483647, %v11173_v58  ;;  %vm4679_vm10 = vcmp.ge.f32.partialorder %v11053_v59, 0.0 }
 0x4c6   :  { %v4976_v56 = vsel %vm4676_vm9, %v4526_v7, %v4826_v15  ;;  %v3328_v42 = vmul.f32 %v11140_v24, %v3178_v61  ;;  %v5129_v29 = vmul.f32 0.5, %v11042_v3  ;;  %v4226_v40 = vmul.f32 1.442695, %v3930_v6 }
 0x4c7   :  { %v5276_v5 = vadd.f32 1.0, %v4976_v56  ;;  %v4529_v26 = vsub.f32 1.0, %v4379_v57  ;;  %v2881_v48 = vadd.f32 1.4214138, %v2731_v1  ;;  %v1832_v12 = vmul.f32 0.3275911, %v1682_v13 }
 0x4c8   :  { %v11180_v21 = vpop.eup %6177  ;;  %v3478_v51 = vadd.f32 0.2548296, %v3328_v42  ;;  %v3933_v4 = vsub.f32 0.0, %v3783_v50  ;;  %vm4678_vm11 = vcmp.ge.f32.partialorder %v11077_v52, 0.0  ;;  %v3782_v2 = vmul.f32 %v1682_v13, %v1682_v13 }
 0x4c9   :  { %v5426_v45 = vmul.f32 %v5276_v5, %v5126_v16  ;;  %v2430_v55 = vmul.f32 1.0614054, %v11180_v21  ;;  %v4829_v31 = vsub.f32 0.0, %v4529_v26  ;;  %v3031_v41 = vmul.f32 %v11164_v18, %v2881_v48  ;;  %v6180_v46 = vpop.eup %6179 }
 0x4ca   :  { %v1982_v30 = vadd.f32 1.0, %v1832_v12  ;;  %v3628_v53 = vmul.f32 %v11140_v24, %v3478_v51  ;;  %v4232_v11 = vmul.f32 1.442695, %v3933_v4  ;;  %v5128_v37 = vmul.f32 0.5, %v11065_v33 }
 0x4cb   :  { %5577 = vst.msk [vmem:[%s11234_s3 + $0x470] sm:$0xff] %vm5434_vm2, %v5426_v45  ;;  %v2580_v32 = vadd.f32 -1.4531521, %v2430_v55  ;;  %v4979_v14 = vsel %vm4679_vm10, %v4529_v26, %v4829_v31  ;;  %v3181_v49 = vadd.f32 -0.28449672, %v3031_v41  ;;  %v3932_v16 = vsub.f32 0.0, %v3782_v2 }
 0x4cc   :  { %6185 = vrcp.f32 %v1982_v30  ;;  %v5279_v22 = vadd.f32 1.0, %v4979_v14  ;;  %v4378_v23 = vmul.f32 %v6180_v46, %v3628_v53  ;;  %vm4681_vm12 = vcmp.ge.f32.partialorder %v11106_v19, 0.0 }
 0x4cd   :  { %v6182_v35 = vpop.eup %6181  ;;  %v2730_v47 = vmul.f32 %v11180_v21, %v2580_v32  ;;  %v3331_v10 = vmul.f32 %v11164_v18, %v3181_v49  ;;  %6187 = vpow2.f32 %v4226_v40  ;;  %v4230_v12 = vmul.f32 1.442695, %v3932_v16 }
 0x4ce   :  { %v2433_v43 = vmul.f32 1.0614054, %v6182_v35  ;;  %v5429_v25 = vmul.f32 %v5279_v22, %v5129_v29  ;;  %v4528_v59 = vsub.f32 1.0, %v4378_v23  ;;  %v6184_v38 = vpop.eup %6183  ;;  %6189 = vpow2.f32 %v4232_v11 }
 0x4cf   :  { %v2880_v36 = vadd.f32 1.4214138, %v2730_v47  ;;  %v3481_v3 = vadd.f32 0.2548296, %v3331_v10  ;;  %v5131_v45 = vmul.f32 0.5, %v11097_v8  ;;  %6191 = vpow2.f32 %v4230_v12 }
 0x4d0   :  { %v2583_v24 = vadd.f32 -1.4531521, %v2433_v43  ;;  %5580 = vst.msk [vmem:[%s11234_s3 + $0x488] sm:$0xff] %vm5434_vm2, %v5429_v25  ;;  %v4828_v39 = vsub.f32 0.0, %v4528_v59  ;;  %vm4680_vm13 = vcmp.ge.f32.partialorder %v11128_v60, 0.0  ;;  %v5130_v49 = vmul.f32 0.5, %v11124_v54 }
 0x4d1   :  { %v3030_v62 = vmul.f32 %v11180_v21, %v2880_v36  ;;  %v3631_v7 = vmul.f32 %v11164_v18, %v3481_v3  ;;  %vm4683_vm14 = vcmp.ge.f32.partialorder %v11149_v27, 0.0  ;;  %v5133_v60 = vmul.f32 0.5, %v11138_v34 }
 0x4d2   :  { %v2733_v0 = vmul.f32 %v6182_v35, %v2583_v24  ;;  %v4978_v20 = vsel %vm4678_vm11, %v4528_v59, %v4828_v39  ;;  %vm4682_vm15 = vcmp.ge.f32.partialorder %v11173_v58, 0.0 }
 0x4d3   :  { %v3180_v9 = vadd.f32 -0.28449672, %v3030_v62  ;;  %v5278_v15 = vadd.f32 1.0, %v4978_v20  ;;  %v4381_v17 = vmul.f32 %v6184_v38, %v3631_v7  ;;  %v5132_v38 = vmul.f32 0.5, %v11168_v63 }
 0x4d4   :  { %v2883_v44 = vadd.f32 1.4214138, %v2733_v0 }
 0x4d5   :  { %v3330_v28 = vmul.f32 %v11180_v21, %v3180_v9  ;;  %v5428_v56 = vmul.f32 %v5278_v15, %v5128_v37  ;;  %v4531_v57 = vsub.f32 1.0, %v4381_v17 }
 0x4d6   :  { %v6186_v61 = vpop.eup %6185  ;;  %v3033_v1 = vmul.f32 %v6182_v35, %v2883_v44 }
 0x4d7   :  { %v3480_v52 = vadd.f32 0.2548296, %v3330_v28  ;;  %v2432_v5 = vmul.f32 1.0614054, %v6186_v61  ;;  %5579 = vst.msk [vmem:[%s11234_s3 + $0x480] sm:$0xff] %vm5434_vm2, %v5428_v56  ;;  %v4831_v18 = vsub.f32 0.0, %v4531_v57  ;;  %v6188_v26 = vpop.eup %6187 }
 0x4d8   :  { %v3183_v33 = vadd.f32 -0.28449672, %v3033_v1  ;;  %v6190_v53 = vpop.eup %6189 }
 0x4d9   :  { %v3630_v13 = vmul.f32 %v11180_v21, %v3480_v52  ;;  %v2582_v42 = vadd.f32 -1.4531521, %v2432_v5  ;;  %v4981_v48 = vsel %vm4681_vm12, %v4531_v57, %v4831_v18  ;;  %v6192_v59 = vpop.eup %6191 }
 0x4da   :  { %v3333_v6 = vmul.f32 %v6182_v35, %v3183_v33  ;;  %v5281_v51 = vadd.f32 1.0, %v4981_v48 }
 0x4db   :  { %v4380_v55 = vmul.f32 %v6188_v26, %v3630_v13  ;;  %v2732_v50 = vmul.f32 %v6186_v61, %v2582_v42 }
 0x4dc   :  { %v3483_v31 = vadd.f32 0.2548296, %v3333_v6  ;;  %v5431_v41 = vmul.f32 %v5281_v51, %v5131_v45 }
 0x4dd   :  { %v4530_v30 = vsub.f32 1.0, %v4380_v55  ;;  %v2882_v46 = vadd.f32 1.4214138, %v2732_v50 }
 0x4de   :  { %v3633_v29 = vmul.f32 %v6182_v35, %v3483_v31  ;;  %5582 = vst.msk [vmem:[%s11234_s3 + $0x498] sm:$0xff] %vm5434_vm2, %v5431_v41 }
 0x4df   :  { %v4830_v19 = vsub.f32 0.0, %v4530_v30  ;;  %v3032_v21 = vmul.f32 %v6186_v61, %v2882_v46 }
 0x4e0   :  { %v4383_v8 = vmul.f32 %v6190_v53, %v3633_v29 }
 0x4e1   :  { %v4980_v32 = vsel %vm4680_vm13, %v4530_v30, %v4830_v19  ;;  %v3182_v14 = vadd.f32 -0.28449672, %v3032_v21 }
 0x4e2   :  { %v5280_v40 = vadd.f32 1.0, %v4980_v32  ;;  %v4533_v22 = vsub.f32 1.0, %v4383_v8 }
 0x4e3   :  { %v3332_v23 = vmul.f32 %v6186_v61, %v3182_v14 }
 0x4e4   :  { %v5430_v35 = vmul.f32 %v5280_v40, %v5130_v49  ;;  %v4833_v47 = vsub.f32 0.0, %v4533_v22 }
 0x4e5   :  { %v3482_v4 = vadd.f32 0.2548296, %v3332_v23 }
 0x4e6   :  { %5581 = vst.msk [vmem:[%s11234_s3 + $0x490] sm:$0xff] %vm5434_vm2, %v5430_v35  ;;  %v4983_v10 = vsel %vm4683_vm14, %v4533_v22, %v4833_v47 }
 0x4e7   :  { %v5283_v43 = vadd.f32 1.0, %v4983_v10  ;;  %v3632_v25 = vmul.f32 %v6186_v61, %v3482_v4 }
 0x4e9   :  { %v5433_v54 = vmul.f32 %v5283_v43, %v5133_v60  ;;  %v4382_v36 = vmul.f32 %v6192_v59, %v3632_v25 }
 0x4eb   :  { %5584 = vst.msk [vmem:[%s11234_s3 + $0x4a8] sm:$0xff] %vm5434_vm2, %v5433_v54  ;;  %v4532_v27 = vsub.f32 1.0, %v4382_v36 }
 0x4ed   :  { %v4832_v3 = vsub.f32 0.0, %v4532_v27 }
 0x4ef   :  { %v4982_v24 = vsel %vm4682_vm15, %v4532_v27, %v4832_v3 }
 0x4f0   :  { %v5282_v39 = vadd.f32 1.0, %v4982_v24 }
 0x4f2   :  { %v5432_v62 = vmul.f32 %v5282_v39, %v5132_v38 }
 0x4f4   :  { %5583 = vst.msk [vmem:[%s11234_s3 + $0x4a0] sm:$0xff] %vm5434_vm2, %v5432_v62 }
 0x4f5   :  { %5589 = vsyncpa [#allocation4], 1 }

</bundles_post_ra>
